<compile_context>
chip_gen: v7x
topology: tpu7x:2x2x1
jax: 0.10.0
libtpu: 0.0.40
codegen_flags: <defaults>
</compile_context>

<pallas_src>
import functools

import jax
import jax.numpy as jnp
from jax.experimental import pallas as pl
from jax.experimental.pallas import tpu as pltpu


# ----------------------------------------------------------------------------
# Config (FactorVAE configuration)
# ----------------------------------------------------------------------------
CONFIG = {
    "model": {
        "z_dim": 8,
        "img_channels": 4,
        "init_mode": "normal_init",
        "encoder": {
            "num_layers": 3,
            "channels": [16, 32, 16],            # last = 2 * z_dim
            "kernel_sizes": [4, 4, 4],
            "strides": [2, 2, 1],
            "padding": [1, 1, 0],
            "batch_norm": [False, False, False],
        },
        "decoder": {
            "num_layers": 4,
            "channels": [32, 16, 16],
            "kernel_sizes": [1, 4, 4, 4],
            "strides": [1, 1, 2, 2],
            "padding": [0, 0, 1, 1],
            "batch_norm": [False, False, False, False],
        },
    }
}


# ----------------------------------------------------------------------------
# Deterministic init (matches weight_init: W ~ N(0, 0.02), b = 0)
# ----------------------------------------------------------------------------
def init_params(key, config):
    m = config["model"]
    z_dim, img_c = m["z_dim"], m["img_channels"]
    enc, dec = m["encoder"], m["decoder"]
    params = {"encoder": [], "decoder": []}

    for i in range(enc["num_layers"]):
        cin = img_c if i == 0 else enc["channels"][i - 1]
        cout = enc["channels"][i]
        k = enc["kernel_sizes"][i]
        key, sub = jax.random.split(key)
        w = 0.02 * jax.random.normal(sub, (cout, cin, k, k), jnp.float32)
        params["encoder"].append((w, jnp.zeros((cout,), jnp.float32)))

    for i in range(dec["num_layers"]):
        cin = z_dim if i == 0 else dec["channels"][i - 1]
        cout = img_c if i == dec["num_layers"] - 1 else dec["channels"][i]
        k = dec["kernel_sizes"][i]
        key, sub = jax.random.split(key)
        if i == 0:      # nn.Conv2d -> (Cout, Cin, KH, KW)
            w = 0.02 * jax.random.normal(sub, (cout, cin, k, k), jnp.float32)
        else:           # nn.ConvTranspose2d -> (Cin, Cout, KH, KW)
            w = 0.02 * jax.random.normal(sub, (cin, cout, k, k), jnp.float32)
        params["decoder"].append((w, jnp.zeros((cout,), jnp.float32)))
    return params


# ----------------------------------------------------------------------------
# Plain-JAX reference convs (NCHW, match nn.Conv2d / nn.ConvTranspose2d).
# Used (a) once at prep time to fold each layer into a dense operator and
# (b) for a numerical cross-check of the fused kernel.
# ----------------------------------------------------------------------------
def _conv2d_ref(x, w, bias, stride, padding):
    y = jax.lax.conv_general_dilated(
        x, w, window_strides=(stride, stride),
        padding=[(padding, padding), (padding, padding)],
        dimension_numbers=("NCHW", "OIHW", "NCHW"))
    return y + bias.reshape(1, -1, 1, 1)


def _conv_transpose2d_ref(x, w, bias, stride, padding):
    # ConvTranspose2d == conv of the input dilated by `stride` with the
    # spatially-flipped, (in/out)-swapped kernel and padding (k - 1 - p).
    kh, kw = w.shape[2], w.shape[3]
    w_fwd = jnp.transpose(jnp.flip(w, axis=(2, 3)), (1, 0, 2, 3))  # OIHW
    y = jax.lax.conv_general_dilated(
        x, w_fwd, window_strides=(1, 1),
        padding=[(kh - 1 - padding, kh - 1 - padding),
                 (kw - 1 - padding, kw - 1 - padding)],
        lhs_dilation=(stride, stride),
        dimension_numbers=("NCHW", "OIHW", "NCHW"))
    return y + bias.reshape(1, -1, 1, 1)


def _ref_forward(params, x, eps, config):
    """Pure-JAX f32 reference forward (NCHW), for correctness checking."""
    m = config["model"]
    enc, dec = m["encoder"], m["decoder"]
    z_dim = m["z_dim"]
    h = x
    nL = enc["num_layers"]
    for i in range(nL):
        w, b = params["encoder"][i]
        h = _conv2d_ref(h, w, b, enc["strides"][i], enc["padding"][i])
        if i != nL - 1:
            h = jnp.maximum(h, 0.0)
    mu, logvar = h[:, :z_dim], h[:, z_dim:]
    B = x.shape[0]
    z = mu + jnp.exp(0.5 * logvar) * eps.reshape(B, z_dim, 1, 1)
    d = z
    nLd = dec["num_layers"]
    for i in range(nLd):
        w, b = params["decoder"][i]
        if i == 0:
            d = _conv2d_ref(d, w, b, dec["strides"][i], dec["padding"][i])
        else:
            d = _conv_transpose2d_ref(d, w, b, dec["strides"][i],
                                      dec["padding"][i])
        if i != nLd - 1:
            d = jnp.maximum(d, 0.0)
    return d, mu, logvar, z.reshape(B, z_dim)


# ----------------------------------------------------------------------------
# One-time parameter folding: each conv layer -> dense (Din, Dout) operator on
# the NCHW-flattened activation + bias row.  Built by probing the (affine)
# layer with an identity batch, so stride/padding/transpose-conv semantics are
# exactly those of the reference convs above.  This runs once at setup time,
# not in the per-step hot path.
# ----------------------------------------------------------------------------
def _fold_linear(layer_fn, in_chw):
    C, H, W = in_chw
    din = C * H * W
    basis = jnp.eye(din, dtype=jnp.float32).reshape(din, C, H, W)
    out_basis = layer_fn(basis)                        # (din, Co, Ho, Wo)
    out_zero = layer_fn(jnp.zeros((1, C, H, W), jnp.float32))
    out_chw = tuple(int(d) for d in out_zero.shape[1:])
    A = (out_basis - out_zero).reshape(din, -1)        # (din, dout)
    b_row = out_zero.reshape(1, -1)                    # (1, dout)
    return A, b_row, out_chw


def prepare_fused_params(params, config, input_hw):
    """Fold every conv/conv-transpose into (A_bf16, bias_f32_row)."""
    m = config["model"]
    enc, dec = m["encoder"], m["decoder"]
    z_dim, img_c = m["z_dim"], m["img_channels"]

    A_list, b_list = [], []
    chw = (img_c, int(input_hw[0]), int(input_hw[1]))

    for i in range(enc["num_layers"]):
        w, b = params["encoder"][i]
        fn = functools.partial(_conv2d_ref, w=w, bias=b,
                               stride=enc["strides"][i],
                               padding=enc["padding"][i])
        A, brow, chw = _fold_linear(fn, chw)
        A_list.append(A.astype(jnp.bfloat16))
        b_list.append(brow.astype(jnp.float32))
    assert chw == (2 * z_dim, 1, 1), chw               # encoder must end 1x1

    chw = (z_dim, 1, 1)
    for i in range(dec["num_layers"]):
        w, b = params["decoder"][i]
        if i == 0:
            fn = functools.partial(_conv2d_ref, w=w, bias=b,
                                   stride=dec["strides"][i],
                                   padding=dec["padding"][i])
        else:
            fn = functools.partial(_conv_transpose2d_ref, w=w, bias=b,
                                   stride=dec["strides"][i],
                                   padding=dec["padding"][i])
        A, brow, chw = _fold_linear(fn, chw)
        A_list.append(A.astype(jnp.bfloat16))
        b_list.append(brow.astype(jnp.float32))
    assert chw[0] == img_c, chw

    return A_list, b_list, chw                         # chw = output (C, H, W)


# ----------------------------------------------------------------------------
# The fused Pallas kernel: whole FactorVAE forward in one call.
# ----------------------------------------------------------------------------
def _fused_kernel(*refs, n_enc, n_dec, z_dim):
    n_layers = n_enc + n_dec
    x_ref, eps_ref = refs[0], refs[1]
    ab = refs[2:2 + 2 * n_layers]                      # A0,b0, A1,b1, ...
    xrec_ref, mu_ref, logvar_ref, z_ref = refs[2 + 2 * n_layers:]

    def layer(h_bf16, idx, relu):
        a = ab[2 * idx][...]                           # (Din, Dout) bf16
        b = ab[2 * idx + 1][...]                       # (1, Dout)   f32
        # MXU matmul with f32 accumulation; bias/ReLU epilogue stays f32.
        y = jnp.dot(h_bf16, a, preferred_element_type=jnp.float32) + b
        if relu:
            # Cast back to bf16 once, ready for the next layer's matmul.
            return jnp.maximum(y, 0.0).astype(jnp.bfloat16)
        return y                                       # f32 (layer boundary)

    # ---- encoder ----
    h = x_ref[...].astype(jnp.bfloat16)                # (N, Cin*H*W)
    for i in range(n_enc):
        h = layer(h, i, relu=(i != n_enc - 1))         # ends (N, 2*z_dim) f32

    # ---- reparameterization (fused epilogue; exp -> EUP) ----
    mu = h[:, :z_dim]
    logvar = h[:, z_dim:]
    z = mu + jnp.exp(logvar * 0.5) * eps_ref[...]
    mu_ref[...] = mu
    logvar_ref[...] = logvar
    z_ref[...] = z

    # ---- decoder ----
    d = z.astype(jnp.bfloat16)
    for i in range(n_dec):
        d = layer(d, n_enc + i, relu=(i != n_dec - 1))
    xrec_ref[...] = d                                  # (N, Cout*H*W) lane-dense


def factor_vae_forward(A_list, b_list, x_nchw, eps, config, out_chw,
                       no_decoder=False):
    m = config["model"]
    z_dim = m["z_dim"]
    n_enc = m["encoder"]["num_layers"]
    n_dec = m["decoder"]["num_layers"]

    N = x_nchw.shape[0]
    C, H, W = out_chw
    x_flat = x_nchw.reshape(N, -1).astype(jnp.float32)   # free reshape (NCHW order)

    inputs = [x_flat, eps.astype(jnp.float32)]
    for a, b in zip(A_list, b_list):
        inputs.append(a)
        inputs.append(b)

    kernel = functools.partial(_fused_kernel, n_enc=n_enc, n_dec=n_dec,
                               z_dim=z_dim)
    vmem = pltpu.MemorySpace.VMEM
    xrec_flat, mu, logvar, z = pl.pallas_call(
        kernel,
        out_shape=(
            jax.ShapeDtypeStruct((N, C * H * W), jnp.float32),   # xrecon (flat)
            jax.ShapeDtypeStruct((N, z_dim), jnp.float32),       # mu
            jax.ShapeDtypeStruct((N, z_dim), jnp.float32),       # logvar
            jax.ShapeDtypeStruct((N, z_dim), jnp.float32),       # z
        ),
        in_specs=[pl.BlockSpec(memory_space=vmem)] * len(inputs),
        out_specs=(pl.BlockSpec(memory_space=vmem),) * 4,
    )(*inputs)

    if no_decoder:
        # Matches `return z.squeeze()`.  (The fused kernel still computes the
        # decoder; negligible at these sizes.)
        return z

    xrecon = xrec_flat.reshape(N, C, H, W)             # free reshape (NCHW order)
    return (xrecon,
            mu.reshape(N, z_dim, 1, 1),
            logvar.reshape(N, z_dim, 1, 1),
            z)


# ----------------------------------------------------------------------------
if __name__ == "__main__":
    key = jax.random.PRNGKey(0)
    pkey, xkey, ekey = jax.random.split(key, 3)

    params = init_params(pkey, CONFIG)
    # One-time fold of conv weights into dense per-layer operators (not in the
    # per-step hot path).
    A_list, b_list, out_chw = prepare_fused_params(params, CONFIG,
                                                   input_hw=(16, 16))

    x = jax.random.normal(xkey, (2, 4, 16, 16), jnp.float32)          # NCHW
    eps = jax.random.normal(ekey, (2, CONFIG["model"]["z_dim"]), jnp.float32)

    @jax.jit
    def run(A_list, b_list, x, eps):
        return factor_vae_forward(A_list, b_list, x, eps, CONFIG, out_chw)

    xrecon, mu, logvar, z = jax.block_until_ready(run(A_list, b_list, x, eps))

    # Shape / sanity checks
    assert xrecon.shape == (2, 4, 16, 16)
    assert mu.shape == (2, 8, 1, 1) and logvar.shape == (2, 8, 1, 1)
    assert z.shape == (2, 8)
    assert bool(jnp.all(jnp.isfinite(xrecon)))

    # Numerical cross-check vs. pure-JAX f32 reference (bf16 MXU inputs are a
    # deliberate precision change -> generous relative-to-max tolerance).
    xr_ref, mu_ref, lv_ref, z_ref = _ref_forward(params, x, eps, CONFIG)

    def relerr(a, b):
        return float(jnp.max(jnp.abs(a - b)) / (jnp.max(jnp.abs(b)) + 1e-12))

    assert relerr(xrecon, xr_ref) < 0.1, relerr(xrecon, xr_ref)
    assert relerr(mu.reshape(2, 8), mu_ref.reshape(2, 8)) < 0.1
    assert relerr(logvar.reshape(2, 8), lv_ref.reshape(2, 8)) < 0.1
    assert relerr(z, z_ref) < 0.1

    print("KERNEL_OK")
</pallas_src>

<mosaic_0001>
module attributes {stable_mosaic.version = 11 : i64} {
  func.func @_fused_kernel(%arg0: memref<2x1024xf32, #tpu.memory_space<vmem>>, %arg1: memref<2x8xf32, #tpu.memory_space<vmem>>, %arg2: memref<1024x1024xbf16, #tpu.memory_space<vmem>>, %arg3: memref<1x1024xf32, #tpu.memory_space<vmem>>, %arg4: memref<1024x512xbf16, #tpu.memory_space<vmem>>, %arg5: memref<1x512xf32, #tpu.memory_space<vmem>>, %arg6: memref<512x16xbf16, #tpu.memory_space<vmem>>, %arg7: memref<1x16xf32, #tpu.memory_space<vmem>>, %arg8: memref<8x32xbf16, #tpu.memory_space<vmem>>, %arg9: memref<1x32xf32, #tpu.memory_space<vmem>>, %arg10: memref<32x256xbf16, #tpu.memory_space<vmem>>, %arg11: memref<1x256xf32, #tpu.memory_space<vmem>>, %arg12: memref<256x1024xbf16, #tpu.memory_space<vmem>>, %arg13: memref<1x1024xf32, #tpu.memory_space<vmem>>, %arg14: memref<1024x1024xbf16, #tpu.memory_space<vmem>>, %arg15: memref<1x1024xf32, #tpu.memory_space<vmem>>, %arg16: memref<2x1024xf32, #tpu.memory_space<vmem>>, %arg17: memref<2x8xf32, #tpu.memory_space<vmem>>, %arg18: memref<2x8xf32, #tpu.memory_space<vmem>>, %arg19: memref<2x8xf32, #tpu.memory_space<vmem>>) attributes {dimension_semantics = [], scalar_prefetch = 0 : i64, scratch_operands = 0 : i64, tpu.core_type = #tpu.core_type<tc>} {
    %c0 = arith.constant 0 : index
    %c0_0 = arith.constant 0 : index
    %0 = vector.load %arg0[%c0, %c0_0] : memref<2x1024xf32, #tpu.memory_space<vmem>>, vector<2x1024xf32>
    %1 = arith.truncf %0 : vector<2x1024xf32> to vector<2x1024xbf16>
    %c0_1 = arith.constant 0 : index
    %c0_2 = arith.constant 0 : index
    %2 = vector.load %arg2[%c0_1, %c0_2] : memref<1024x1024xbf16, #tpu.memory_space<vmem>>, vector<1024x1024xbf16>
    %c0_3 = arith.constant 0 : index
    %c0_4 = arith.constant 0 : index
    %3 = vector.load %arg3[%c0_3, %c0_4] : memref<1x1024xf32, #tpu.memory_space<vmem>>, vector<1x1024xf32>
    %cst = arith.constant dense<0.000000e+00> : vector<2x1024xf32>
    %4 = tpu.matmul %1, %2, %cst {dimension_numbers = #tpu.dot_dimension_numbers<[1], [0], [0], [1], [0, 0, 1, 1], [], []>} : vector<2x1024xbf16>, vector<1024x1024xbf16>, vector<2x1024xf32> -> vector<2x1024xf32>
    %5 = vector.broadcast %3 : vector<1x1024xf32> to vector<2x1024xf32>
    %6 = arith.addf %4, %5 : vector<2x1024xf32>
    %cst_5 = arith.constant 0.000000e+00 : f32
    %7 = vector.broadcast %cst_5 : f32 to vector<2x1024xf32>
    %8 = arith.maximumf %6, %7 : vector<2x1024xf32>
    %9 = arith.truncf %8 : vector<2x1024xf32> to vector<2x1024xbf16>
    %c0_6 = arith.constant 0 : index
    %c0_7 = arith.constant 0 : index
    %10 = vector.load %arg4[%c0_6, %c0_7] : memref<1024x512xbf16, #tpu.memory_space<vmem>>, vector<1024x512xbf16>
    %c0_8 = arith.constant 0 : index
    %c0_9 = arith.constant 0 : index
    %11 = vector.load %arg5[%c0_8, %c0_9] : memref<1x512xf32, #tpu.memory_space<vmem>>, vector<1x512xf32>
    %cst_10 = arith.constant dense<0.000000e+00> : vector<2x512xf32>
    %12 = tpu.matmul %9, %10, %cst_10 {dimension_numbers = #tpu.dot_dimension_numbers<[1], [0], [0], [1], [0, 0, 1, 1], [], []>} : vector<2x1024xbf16>, vector<1024x512xbf16>, vector<2x512xf32> -> vector<2x512xf32>
    %13 = vector.broadcast %11 : vector<1x512xf32> to vector<2x512xf32>
    %14 = arith.addf %12, %13 : vector<2x512xf32>
    %cst_11 = arith.constant 0.000000e+00 : f32
    %15 = vector.broadcast %cst_11 : f32 to vector<2x512xf32>
    %16 = arith.maximumf %14, %15 : vector<2x512xf32>
    %17 = arith.truncf %16 : vector<2x512xf32> to vector<2x512xbf16>
    %c0_12 = arith.constant 0 : index
    %c0_13 = arith.constant 0 : index
    %18 = vector.load %arg6[%c0_12, %c0_13] : memref<512x16xbf16, #tpu.memory_space<vmem>>, vector<512x16xbf16>
    %c0_14 = arith.constant 0 : index
    %c0_15 = arith.constant 0 : index
    %19 = vector.load %arg7[%c0_14, %c0_15] : memref<1x16xf32, #tpu.memory_space<vmem>>, vector<1x16xf32>
    %cst_16 = arith.constant dense<0.000000e+00> : vector<2x16xf32>
    %20 = tpu.matmul %17, %18, %cst_16 {dimension_numbers = #tpu.dot_dimension_numbers<[1], [0], [0], [1], [0, 0, 1, 1], [], []>} : vector<2x512xbf16>, vector<512x16xbf16>, vector<2x16xf32> -> vector<2x16xf32>
    %21 = vector.broadcast %19 : vector<1x16xf32> to vector<2x16xf32>
    %22 = arith.addf %20, %21 : vector<2x16xf32>
    %23 = vector.extract_strided_slice %22 {offsets = [0, 0], sizes = [2, 8], strides = [1, 1]} : vector<2x16xf32> to vector<2x8xf32>
    %24 = vector.extract_strided_slice %22 {offsets = [0, 8], sizes = [2, 8], strides = [1, 1]} : vector<2x16xf32> to vector<2x8xf32>
    %cst_17 = arith.constant 5.000000e-01 : f32
    %25 = vector.broadcast %cst_17 : f32 to vector<2x8xf32>
    %26 = arith.mulf %24, %25 : vector<2x8xf32>
    %27 = math.exp %26 : vector<2x8xf32>
    %c0_18 = arith.constant 0 : index
    %c0_19 = arith.constant 0 : index
    %28 = vector.load %arg1[%c0_18, %c0_19] : memref<2x8xf32, #tpu.memory_space<vmem>>, vector<2x8xf32>
    %29 = arith.mulf %27, %28 : vector<2x8xf32>
    %30 = arith.addf %23, %29 : vector<2x8xf32>
    %c0_20 = arith.constant 0 : index
    %c0_21 = arith.constant 0 : index
    %31 = vector.load %arg17[%c0_20, %c0_21] : memref<2x8xf32, #tpu.memory_space<vmem>>, vector<2x8xf32>
    tpu.vector_store %arg17[%c0_20, %c0_21], %23 {strides = array<i32>} : memref<2x8xf32, #tpu.memory_space<vmem>>, vector<2x8xf32>,
    %c0_22 = arith.constant 0 : index
    %c0_23 = arith.constant 0 : index
    %32 = vector.load %arg18[%c0_22, %c0_23] : memref<2x8xf32, #tpu.memory_space<vmem>>, vector<2x8xf32>
    tpu.vector_store %arg18[%c0_22, %c0_23], %24 {strides = array<i32>} : memref<2x8xf32, #tpu.memory_space<vmem>>, vector<2x8xf32>,
    %c0_24 = arith.constant 0 : index
    %c0_25 = arith.constant 0 : index
    %33 = vector.load %arg19[%c0_24, %c0_25] : memref<2x8xf32, #tpu.memory_space<vmem>>, vector<2x8xf32>
    tpu.vector_store %arg19[%c0_24, %c0_25], %30 {strides = array<i32>} : memref<2x8xf32, #tpu.memory_space<vmem>>, vector<2x8xf32>,
    %34 = arith.truncf %30 : vector<2x8xf32> to vector<2x8xbf16>
    %c0_26 = arith.constant 0 : index
    %c0_27 = arith.constant 0 : index
    %35 = vector.load %arg8[%c0_26, %c0_27] : memref<8x32xbf16, #tpu.memory_space<vmem>>, vector<8x32xbf16>
    %c0_28 = arith.constant 0 : index
    %c0_29 = arith.constant 0 : index
    %36 = vector.load %arg9[%c0_28, %c0_29] : memref<1x32xf32, #tpu.memory_space<vmem>>, vector<1x32xf32>
    %cst_30 = arith.constant dense<0.000000e+00> : vector<2x32xf32>
    %37 = tpu.matmul %34, %35, %cst_30 {dimension_numbers = #tpu.dot_dimension_numbers<[1], [0], [0], [1], [0, 0, 1, 1], [], []>} : vector<2x8xbf16>, vector<8x32xbf16>, vector<2x32xf32> -> vector<2x32xf32>
    %38 = vector.broadcast %36 : vector<1x32xf32> to vector<2x32xf32>
    %39 = arith.addf %37, %38 : vector<2x32xf32>
    %cst_31 = arith.constant 0.000000e+00 : f32
    %40 = vector.broadcast %cst_31 : f32 to vector<2x32xf32>
    %41 = arith.maximumf %39, %40 : vector<2x32xf32>
    %42 = arith.truncf %41 : vector<2x32xf32> to vector<2x32xbf16>
    %c0_32 = arith.constant 0 : index
    %c0_33 = arith.constant 0 : index
    %43 = vector.load %arg10[%c0_32, %c0_33] : memref<32x256xbf16, #tpu.memory_space<vmem>>, vector<32x256xbf16>
    %c0_34 = arith.constant 0 : index
    %c0_35 = arith.constant 0 : index
    %44 = vector.load %arg11[%c0_34, %c0_35] : memref<1x256xf32, #tpu.memory_space<vmem>>, vector<1x256xf32>
    %cst_36 = arith.constant dense<0.000000e+00> : vector<2x256xf32>
    %45 = tpu.matmul %42, %43, %cst_36 {dimension_numbers = #tpu.dot_dimension_numbers<[1], [0], [0], [1], [0, 0, 1, 1], [], []>} : vector<2x32xbf16>, vector<32x256xbf16>, vector<2x256xf32> -> vector<2x256xf32>
    %46 = vector.broadcast %44 : vector<1x256xf32> to vector<2x256xf32>
    %47 = arith.addf %45, %46 : vector<2x256xf32>
    %cst_37 = arith.constant 0.000000e+00 : f32
    %48 = vector.broadcast %cst_37 : f32 to vector<2x256xf32>
    %49 = arith.maximumf %47, %48 : vector<2x256xf32>
    %50 = arith.truncf %49 : vector<2x256xf32> to vector<2x256xbf16>
    %c0_38 = arith.constant 0 : index
    %c0_39 = arith.constant 0 : index
    %51 = vector.load %arg12[%c0_38, %c0_39] : memref<256x1024xbf16, #tpu.memory_space<vmem>>, vector<256x1024xbf16>
    %c0_40 = arith.constant 0 : index
    %c0_41 = arith.constant 0 : index
    %52 = vector.load %arg13[%c0_40, %c0_41] : memref<1x1024xf32, #tpu.memory_space<vmem>>, vector<1x1024xf32>
    %cst_42 = arith.constant dense<0.000000e+00> : vector<2x1024xf32>
    %53 = tpu.matmul %50, %51, %cst_42 {dimension_numbers = #tpu.dot_dimension_numbers<[1], [0], [0], [1], [0, 0, 1, 1], [], []>} : vector<2x256xbf16>, vector<256x1024xbf16>, vector<2x1024xf32> -> vector<2x1024xf32>
    %54 = vector.broadcast %52 : vector<1x1024xf32> to vector<2x1024xf32>
    %55 = arith.addf %53, %54 : vector<2x1024xf32>
    %cst_43 = arith.constant 0.000000e+00 : f32
    %56 = vector.broadcast %cst_43 : f32 to vector<2x1024xf32>
    %57 = arith.maximumf %55, %56 : vector<2x1024xf32>
    %58 = arith.truncf %57 : vector<2x1024xf32> to vector<2x1024xbf16>
    %c0_44 = arith.constant 0 : index
    %c0_45 = arith.constant 0 : index
    %59 = vector.load %arg14[%c0_44, %c0_45] : memref<1024x1024xbf16, #tpu.memory_space<vmem>>, vector<1024x1024xbf16>
    %c0_46 = arith.constant 0 : index
    %c0_47 = arith.constant 0 : index
    %60 = vector.load %arg15[%c0_46, %c0_47] : memref<1x1024xf32, #tpu.memory_space<vmem>>, vector<1x1024xf32>
    %cst_48 = arith.constant dense<0.000000e+00> : vector<2x1024xf32>
    %61 = tpu.matmul %58, %59, %cst_48 {dimension_numbers = #tpu.dot_dimension_numbers<[1], [0], [0], [1], [0, 0, 1, 1], [], []>} : vector<2x1024xbf16>, vector<1024x1024xbf16>, vector<2x1024xf32> -> vector<2x1024xf32>
    %62 = vector.broadcast %60 : vector<1x1024xf32> to vector<2x1024xf32>
    %63 = arith.addf %61, %62 : vector<2x1024xf32>
    %c0_49 = arith.constant 0 : index
    %c0_50 = arith.constant 0 : index
    %64 = vector.load %arg16[%c0_49, %c0_50] : memref<2x1024xf32, #tpu.memory_space<vmem>>, vector<2x1024xf32>
    tpu.vector_store %arg16[%c0_49, %c0_50], %63 {strides = array<i32>} : memref<2x1024xf32, #tpu.memory_space<vmem>>, vector<2x1024xf32>,
    return
  }
}

</mosaic_0001>

<bundles_post_ra>
// kernel: run.1
= control target key start
LH: loop header
LB: loop body
LE: loop exit
PB: predicated region body
PF: predicated region fallthrough
CT: control target
= control target key end

     0   :  { %s14569_s0 = inlined_call_operand.vmem [shape: f32[2,1024], index: 0, kind: input, shape index: {}]   ;;  %s14570_s1 = inlined_call_operand.hbm [shape: f32[2,8], index: 1, kind: input, shape index: {}]   ;;  %s14571_s2 = inlined_call_operand.hbm [shape: bf16[1024,1024], index: 2, kind: input, shape index: {}]   ;;  %s14572_s3 = inlined_call_operand.hbm [shape: f32[1,1024], index: 3, kind: input, shape index: {}]   ;;  %s14573_s4 = inlined_call_operand.hbm [shape: bf16[1024,512], index: 4, kind: input, shape index: {}]   ;;  %s14574_s5 = inlined_call_operand.hbm [shape: f32[1,512], index: 5, kind: input, shape index: {}]   ;;  %s14575_s6 = inlined_call_operand.vmem [shape: bf16[512,16], index: 6, kind: input, shape index: {}]   ;;  %s14576_s7 = inlined_call_operand.hbm [shape: f32[1,16], index: 7, kind: input, shape index: {}]   ;;  %s14577_s8 = inlined_call_operand.hbm [shape: bf16[8,32], index: 8, kind: input, shape index: {}]   ;;  %s14578_s9 = inlined_call_operand.hbm [shape: f32[1,32], index: 9, kind: input, shape index: {}]   ;;  %s14579_s10 = inlined_call_operand.hbm [shape: bf16[32,256], index: 10, kind: input, shape index: {}]   ;;  %s14580_s11 = inlined_call_operand.hbm [shape: f32[1,256], index: 11, kind: input, shape index: {}]   ;;  %s14581_s12 = inlined_call_operand.hbm [shape: bf16[256,1024], index: 12, kind: input, shape index: {}]   ;;  %s14582_s13 = inlined_call_operand.hbm [shape: f32[1,1024], index: 13, kind: input, shape index: {}]   ;;  %s14583_s14 = inlined_call_operand.hbm [shape: bf16[1024,1024], index: 14, kind: input, shape index: {}]   ;;  %s14584_s15 = inlined_call_operand.hbm [shape: f32[1,1024], index: 15, kind: input, shape index: {}]   ;;  %s14585_s16 = inlined_call_operand.vmem [shape: f32[2,1024], index: 16, kind: output, shape index: {0}]   ;;  %s14586_s17 = inlined_call_operand.hbm [shape: f32[2,8], index: 17, kind: output, shape index: {1}]   ;;  %s14587_s18 = inlined_call_operand.hbm [shape: f32[2,8], index: 18, kind: output, shape index: {2}]   ;;  %s14588_s19 = inlined_call_operand.hbm [shape: f32[2,8], index: 19, kind: output, shape index: {3}]  }
   0x1   :  { %14598 = sst [smem:[#allocation39_spill]] %s14569_s0 }
   0x2   :  { %14599 = sst [smem:[#allocation40_spill]] %s14570_s1 }
   0x3   :  { %14600 = sst [smem:[#allocation41_spill]] %s14571_s2 }
   0x4   :  { %14601 = sst [smem:[#allocation42_spill]] %s14572_s3 }
   0x5   :  { %14602 = sst [smem:[#allocation43_spill]] %s14588_s19 }
   0x6   :  { %25 = vsyncpa [#allocation3], 0 }
   0x7   :  { %26 = vsyncpa [#allocation6], 0 }
   0x8   :  { %27 = vsyncpa [#allocation9], 0 }
   0x9   :  { %28 = vsyncpa [#allocation12], 0 }
   0xa   :  { %29 = vsyncpa [#allocation15], 0 }
   0xb   :  { %30 = vsyncpa [#allocation18], 0 }
   0xc   :  { %31 = vsyncpa [#allocation21], 0 }
   0xd   :  { %32 = vsyncpa [#allocation24], 0 }
   0xe   :  { %33 = vsyncpa [#allocation4], 0 }
   0xf   :  { %34 = vsyncpa [#allocation27], 0  ;;  %s13824_s0 = smov [#allocation5]   ;;  %s14603_s1 = sld [smem:[#allocation41_spill]] }
  0x10   :  { %s52_s30 = sshll.u32 %s13824_s0, 4  ;;  %s53_s30 = int_to_ptr.vmem [resolvable:$true] %s52_s30 }
  0x15   :  { %s13430_s22 = scalar_lea.hbm %s14603_s1, 65536 }
  0x16   :  { %p13431_p0 = scmp.ne.s32.totalorder %s14603_s1, %s13430_s22  ;;  %p13434_p1 = scmp.lt.u32.totalorder %s13430_s22, %s14603_s1 }
  0x18   :  { %p13436_p2 = pnand %p13434_p1, %p13431_p0 }
  0x1a   :  { %13439 = shalt.err (!%p13436_p2)
}
  0x1b   :  { %s13440_s3 = scalar_lea.vmem %s53_s30, 65536  ;;  %p13445_p4 = scmp.lt.s32.totalorder %s53_s30, %s53_s30 }
  0x1c   :  { %p13441_p3 = scmp.ne.s32.totalorder %s53_s30, %s13440_s3  ;;  %p13446_p5 = scmp.lt.s32.totalorder %s13440_s3, %s13440_s3 }
  0x1e   :  { %p13447_p6 = por %p13446_p5, %p13445_p4 }
  0x20   :  { %p13448_p7 = pnand %p13447_p6, %p13441_p3 }
  0x22   :  { %13451 = shalt.err (!%p13448_p7)
}
  0x23   :  { %s14594_s26 = smov 512   ;;  %s14596_s27 = smov 32  }
  0x24   :  { %58 = dma.hbm_to_vmem [thread:$0]  %s14603_s1, 65536, %s53_s30, [#allocation6], %s14594_s26, %s14594_s26, %s14596_s27  }
  0x25   :  { %s13827_s0 = smov [#allocation8]   ;;  %s13452_s2 = scalar_lea.hbm %s14573_s4, 32768 }
  0x26   :  { %s74_s20 = sshll.u32 %s13827_s0, 4  ;;  %p13453_p8 = scmp.ne.s32.totalorder %s14573_s4, %s13452_s2  ;;  %s75_s20 = int_to_ptr.vmem [resolvable:$true] %s74_s20 }
  0x27   :  { %p13456_p9 = scmp.lt.u32.totalorder %s13452_s2, %s14573_s4 }
  0x29   :  { %p13458_p10 = pnand %p13456_p9, %p13453_p8 }
  0x2b   :  { %13461 = shalt.err (!%p13458_p10)
}
  0x2c   :  { %s13462_s19 = scalar_lea.vmem %s75_s20, 32768  ;;  %p13467_p12 = scmp.lt.s32.totalorder %s75_s20, %s75_s20 }
  0x2d   :  { %p13463_p11 = scmp.ne.s32.totalorder %s75_s20, %s13462_s19  ;;  %p13468_p13 = scmp.lt.s32.totalorder %s13462_s19, %s13462_s19 }
  0x2f   :  { %p13469_p0 = por %p13468_p13, %p13467_p12 }
  0x31   :  { %p13470_p1 = pnand %p13469_p0, %p13463_p11 }
  0x33   :  { %13473 = shalt.err (!%p13470_p1)
}
  0x34   :  { %s13828_s30 = smov 256   ;;  %s13829_s1 = smov 16  }
  0x35   :  { %80 = dma.hbm_to_vmem [thread:$0]  %s14573_s4, 32768, %s75_s20, [#allocation9], %s13828_s30, %s13828_s30, %s13829_s1  }
  0x36   :  { %s13830_s0 = smov [#allocation11]   ;;  %s13831_s22 = smov [#allocation14]  }
  0x37   :  { %s99_s21 = sshll.u32 %s13830_s0, 4  ;;  %s119_s23 = sshll.u32 %s13831_s22, 4  ;;  %s100_s21 = int_to_ptr.vmem [resolvable:$true] %s99_s21  ;;  %s120_s23 = int_to_ptr.vmem [resolvable:$true] %s119_s23 }
  0x38   :  { %s13474_s25 = scalar_lea.hbm %s14576_s7, 16 }
  0x39   :  { %p13475_p2 = scmp.ne.s32.totalorder %s14576_s7, %s13474_s25  ;;  %p13478_p3 = scmp.lt.u32.totalorder %s13474_s25, %s14576_s7 }
  0x3b   :  { %p13480_p4 = pnand %p13478_p3, %p13475_p2 }
  0x3d   :  { %13483 = shalt.err (!%p13480_p4)
}
  0x3e   :  { %s13484_s4 = scalar_lea.vmem %s100_s21, 16  ;;  %s13488_s20 = scalar_lea.vmem %s100_s21, 32 }
  0x3f   :  { %p13485_p5 = scmp.ne.s32.totalorder %s100_s21, %s13484_s4  ;;  %p13489_p6 = scmp.lt.s32.totalorder %s100_s21, %s100_s21 }
  0x40   :  { %p13490_p7 = scmp.lt.s32.totalorder %s13488_s20, %s13484_s4 }
  0x42   :  { %p13491_p8 = por %p13490_p7, %p13489_p6 }
  0x44   :  { %p13492_p9 = pnand %p13491_p8, %p13485_p5 }
  0x46   :  { %13495 = shalt.err (!%p13492_p9)
}
  0x47   :  { %102 = dma.hbm_to_vmem [thread:$0]  %s14576_s7, 16, %s100_s21, [#allocation12]  }
  0x48   :  { %s13496_s0 = scalar_lea.hbm %s14578_s9, 16 }
  0x49   :  { %p13497_p10 = scmp.ne.s32.totalorder %s14578_s9, %s13496_s0  ;;  %p13500_p11 = scmp.lt.u32.totalorder %s13496_s0, %s14578_s9 }
  0x4b   :  { %p13502_p12 = pnand %p13500_p11, %p13497_p10 }
  0x4d   :  { %13505 = shalt.err (!%p13502_p12)
}
  0x4e   :  { %s13506_s24 = scalar_lea.vmem %s120_s23, 16  ;;  %s13510_s25 = scalar_lea.vmem %s120_s23, 32 }
  0x4f   :  { %p13507_p13 = scmp.ne.s32.totalorder %s120_s23, %s13506_s24  ;;  %p13511_p0 = scmp.lt.s32.totalorder %s120_s23, %s120_s23 }
  0x50   :  { %p13512_p1 = scmp.lt.s32.totalorder %s13510_s25, %s13506_s24 }
  0x52   :  { %p13513_p2 = por %p13512_p1, %p13511_p0 }
  0x54   :  { %p13514_p3 = pnand %p13513_p2, %p13507_p13 }
  0x56   :  { %13517 = shalt.err (!%p13514_p3)
}
  0x57   :  { %122 = dma.hbm_to_vmem [thread:$0]  %s14578_s9, 16, %s120_s23, [#allocation15]  }
  0x58   :  { %s13832_s19 = smov [#allocation17]   ;;  %s13833_s4 = smov [#allocation20]  }
  0x59   :  { %s141_s3 = sshll.u32 %s13832_s19, 4  ;;  %s163_s20 = sshll.u32 %s13833_s4, 4  ;;  %s142_s3 = int_to_ptr.vmem [resolvable:$true] %s141_s3  ;;  %s164_s20 = int_to_ptr.vmem [resolvable:$true] %s163_s20 }
  0x5a   :  { %s13518_s28 = scalar_lea.hbm %s14580_s11, 32 }
  0x5b   :  { %p13519_p4 = scmp.ne.s32.totalorder %s14580_s11, %s13518_s28  ;;  %p13522_p5 = scmp.lt.u32.totalorder %s13518_s28, %s14580_s11 }
  0x5d   :  { %p13524_p6 = pnand %p13522_p5, %p13519_p4 }
  0x5f   :  { %13527 = shalt.err (!%p13524_p6)
}
  0x60   :  { %s13528_s9 = scalar_lea.vmem %s142_s3, 32  ;;  %p13533_p8 = scmp.lt.s32.totalorder %s142_s3, %s142_s3 }
  0x61   :  { %p13529_p7 = scmp.ne.s32.totalorder %s142_s3, %s13528_s9  ;;  %p13534_p9 = scmp.lt.s32.totalorder %s13528_s9, %s13528_s9 }
  0x63   :  { %p13535_p10 = por %p13534_p9, %p13533_p8 }
  0x65   :  { %p13536_p11 = pnand %p13535_p10, %p13529_p7 }
  0x67   :  { %13539 = shalt.err (!%p13536_p11)
}
  0x68   :  { %144 = dma.hbm_to_vmem [thread:$0]  %s14580_s11, 32, %s142_s3, [#allocation18]  }
  0x69   :  { %s13540_s25 = scalar_lea.hbm %s14582_s13, 128 }
  0x6a   :  { %p13541_p12 = scmp.ne.s32.totalorder %s14582_s13, %s13540_s25  ;;  %p13544_p13 = scmp.lt.u32.totalorder %s13540_s25, %s14582_s13 }
  0x6c   :  { %p13546_p0 = pnand %p13544_p13, %p13541_p12 }
  0x6e   :  { %13549 = shalt.err (!%p13546_p0)
}
  0x6f   :  { %s13550_s30 = scalar_lea.vmem %s164_s20, 128  ;;  %p13555_p2 = scmp.lt.s32.totalorder %s164_s20, %s164_s20 }
  0x70   :  { %p13551_p1 = scmp.ne.s32.totalorder %s164_s20, %s13550_s30  ;;  %p13556_p3 = scmp.lt.s32.totalorder %s13550_s30, %s13550_s30 }
  0x72   :  { %p13557_p4 = por %p13556_p3, %p13555_p2 }
  0x74   :  { %p13558_p5 = pnand %p13557_p4, %p13551_p1 }
  0x76   :  { %13561 = shalt.err (!%p13558_p5)
}
  0x77   :  { %166 = dma.hbm_to_vmem [thread:$0]  %s14582_s13, 128, %s164_s20, [#allocation21]  }
  0x78   :  { %s13834_s1 = smov [#allocation2]   ;;  %s13835_s29 = smov [#allocation7]  }
  0x79   :  { %s43_s28 = sshll.u32 %s13834_s1, 4  ;;  %s65_s0 = sshll.u32 %s13835_s29, 4  ;;  %s44_s28 = int_to_ptr.vmem [resolvable:$true] %s43_s28  ;;  %s66_s0 = int_to_ptr.vmem [resolvable:$true] %s65_s0 }
  0x7a   :  { %s14604_s9 = sld [smem:[#allocation40_spill]] }
  0x80   :  { %s13562_s23 = scalar_lea.hbm %s14604_s9, 32 }
  0x81   :  { %p13563_p6 = scmp.ne.s32.totalorder %s14604_s9, %s13562_s23  ;;  %p13566_p7 = scmp.lt.u32.totalorder %s13562_s23, %s14604_s9 }
  0x83   :  { %p13568_p8 = pnand %p13566_p7, %p13563_p6 }
  0x85   :  { %13571 = shalt.err (!%p13568_p8)
}
  0x86   :  { %s13572_s13 = scalar_lea.vmem %s44_s28, 32  ;;  %p13577_p10 = scmp.lt.s32.totalorder %s44_s28, %s44_s28 }
  0x87   :  { %p13573_p9 = scmp.ne.s32.totalorder %s44_s28, %s13572_s13  ;;  %p13578_p11 = scmp.lt.s32.totalorder %s13572_s13, %s13572_s13 }
  0x89   :  { %p13579_p12 = por %p13578_p11, %p13577_p10 }
  0x8b   :  { %p13580_p13 = pnand %p13579_p12, %p13573_p9 }
  0x8d   :  { %13583 = shalt.err (!%p13580_p13)
}
  0x8e   :  { %46 = dma.hbm_to_vmem [thread:$0]  %s14604_s9, 32, %s44_s28, [#allocation3]  }
  0x8f   :  { %s14605_s4 = sld [smem:[#allocation42_spill]] }
  0x95   :  { %s13584_s30 = scalar_lea.hbm %s14605_s4, 128 }
  0x96   :  { %p13585_p0 = scmp.ne.s32.totalorder %s14605_s4, %s13584_s30  ;;  %p13588_p1 = scmp.lt.u32.totalorder %s13584_s30, %s14605_s4 }
  0x98   :  { %p13590_p2 = pnand %p13588_p1, %p13585_p0 }
  0x9a   :  { %13593 = shalt.err (!%p13590_p2)
}
  0x9b   :  { %s13594_s26 = scalar_lea.vmem %s66_s0, 128  ;;  %p13599_p4 = scmp.lt.s32.totalorder %s66_s0, %s66_s0 }
  0x9c   :  { %p13595_p3 = scmp.ne.s32.totalorder %s66_s0, %s13594_s26  ;;  %p13600_p5 = scmp.lt.s32.totalorder %s13594_s26, %s13594_s26 }
  0x9e   :  { %p13601_p6 = por %p13600_p5, %p13599_p4 }
  0xa0   :  { %p13602_p7 = pnand %p13601_p6, %p13595_p3 }
  0xa2   :  { %13605 = shalt.err (!%p13602_p7)
}
  0xa3   :  { %68 = dma.hbm_to_vmem [thread:$0]  %s14605_s4, 128, %s66_s0, [#allocation6]  }
  0xa4   :  { %s13836_s9 = smov [#allocation10]   ;;  %s13837_s22 = smov [#allocation13]  }
  0xa5   :  { %s87_s23 = sshll.u32 %s13836_s9, 4  ;;  %s109_s2 = sshll.u32 %s13837_s22, 4  ;;  %s88_s23 = int_to_ptr.vmem [resolvable:$true] %s87_s23  ;;  %s110_s2 = int_to_ptr.vmem [resolvable:$true] %s109_s2 }
  0xa6   :  { %s13606_s13 = scalar_lea.hbm %s14574_s5, 64 }
  0xa7   :  { %p13607_p8 = scmp.ne.s32.totalorder %s14574_s5, %s13606_s13  ;;  %p13610_p9 = scmp.lt.u32.totalorder %s13606_s13, %s14574_s5 }
  0xa9   :  { %p13612_p10 = pnand %p13610_p9, %p13607_p8 }
  0xab   :  { %13615 = shalt.err (!%p13612_p10)
}
  0xac   :  { %s13616_s0 = scalar_lea.vmem %s88_s23, 64  ;;  %p13621_p12 = scmp.lt.s32.totalorder %s88_s23, %s88_s23 }
  0xad   :  { %p13617_p11 = scmp.ne.s32.totalorder %s88_s23, %s13616_s0  ;;  %p13622_p13 = scmp.lt.s32.totalorder %s13616_s0, %s13616_s0 }
  0xaf   :  { %p13623_p0 = por %p13622_p13, %p13621_p12 }
  0xb1   :  { %p13624_p1 = pnand %p13623_p0, %p13617_p11 }
  0xb3   :  { %13627 = shalt.err (!%p13624_p1)
}
  0xb4   :  { %90 = dma.hbm_to_vmem [thread:$0]  %s14574_s5, 64, %s88_s23, [#allocation9]  }
  0xb5   :  { %s13628_s1 = scalar_lea.hbm %s14577_s8, 64 }
  0xb6   :  { %p13629_p2 = scmp.ne.s32.totalorder %s14577_s8, %s13628_s1  ;;  %p13632_p3 = scmp.lt.u32.totalorder %s13628_s1, %s14577_s8 }
  0xb8   :  { %p13634_p4 = pnand %p13632_p3, %p13629_p2 }
  0xba   :  { %13637 = shalt.err (!%p13634_p4)
}
  0xbb   :  { %s13638_s9 = scalar_lea.vmem %s110_s2, 64  ;;  %p13643_p6 = scmp.lt.s32.totalorder %s110_s2, %s110_s2 }
  0xbc   :  { %p13639_p5 = scmp.ne.s32.totalorder %s110_s2, %s13638_s9  ;;  %p13644_p7 = scmp.lt.s32.totalorder %s13638_s9, %s13638_s9 }
  0xbe   :  { %p13645_p8 = por %p13644_p7, %p13643_p6 }
  0xc0   :  { %p13646_p9 = pnand %p13645_p8, %p13639_p5 }
  0xc2   :  { %13649 = shalt.err (!%p13646_p9)
}
  0xc3   :  { %112 = dma.hbm_to_vmem [thread:$0]  %s14577_s8, 64, %s110_s2, [#allocation12]  }
  0xc4   :  { %s13838_s22 = smov [#allocation16]   ;;  %s13650_s20 = scalar_lea.hbm %s14579_s10, 512 }
  0xc5   :  { %s128_s24 = sshll.u32 %s13838_s22, 4  ;;  %p13651_p10 = scmp.ne.s32.totalorder %s14579_s10, %s13650_s20  ;;  %s129_s24 = int_to_ptr.vmem [resolvable:$true] %s128_s24 }
  0xc6   :  { %p13654_p11 = scmp.lt.u32.totalorder %s13650_s20, %s14579_s10 }
  0xc8   :  { %p13656_p12 = pnand %p13654_p11, %p13651_p10 }
  0xca   :  { %13659 = shalt.err (!%p13656_p12)
}
  0xcb   :  { %s13660_s4 = scalar_lea.vmem %s129_s24, 512  ;;  %p13665_p0 = scmp.lt.s32.totalorder %s129_s24, %s129_s24 }
  0xcc   :  { %p13661_p13 = scmp.ne.s32.totalorder %s129_s24, %s13660_s4  ;;  %p13666_p1 = scmp.lt.s32.totalorder %s13660_s4, %s13660_s4 }
  0xce   :  { %p13667_p2 = por %p13666_p1, %p13665_p0 }
  0xd0   :  { %p13668_p3 = pnand %p13667_p2, %p13661_p13 }
  0xd2   :  { %13671 = shalt.err (!%p13668_p3)
}
  0xd3   :  { %s13839_s8 = smov 128   ;;  %s13840_s2 = smov 8  }
  0xd4   :  { %134 = dma.hbm_to_vmem [thread:$0]  %s14579_s10, 512, %s129_s24, [#allocation15], %s13839_s8, %s13839_s8, %s13840_s2  }
  0xd5   :  { %s13841_s3 = smov [#allocation19]   ;;  %s13842_s29 = smov [#allocation22]  }
  0xd6   :  { %s150_s1 = sshll.u32 %s13841_s3, 4  ;;  %s172_s26 = sshll.u32 %s13842_s29, 4  ;;  %s151_s1 = int_to_ptr.vmem [resolvable:$true] %s150_s1  ;;  %s173_s26 = int_to_ptr.vmem [resolvable:$true] %s172_s26 }
  0xd7   :  { %s13672_s9 = scalar_lea.hbm %s14581_s12, 16384 }
  0xd8   :  { %p13673_p4 = scmp.ne.s32.totalorder %s14581_s12, %s13672_s9  ;;  %p13676_p5 = scmp.lt.u32.totalorder %s13672_s9, %s14581_s12 }
  0xda   :  { %p13678_p6 = pnand %p13676_p5, %p13673_p4 }
  0xdc   :  { %13681 = shalt.err (!%p13678_p6)
}
  0xdd   :  { %s13682_s10 = scalar_lea.vmem %s151_s1, 16384  ;;  %p13687_p8 = scmp.lt.s32.totalorder %s151_s1, %s151_s1 }
  0xde   :  { %p13683_p7 = scmp.ne.s32.totalorder %s151_s1, %s13682_s10  ;;  %p13688_p9 = scmp.lt.s32.totalorder %s13682_s10, %s13682_s10 }
  0xe0   :  { %p13689_p10 = por %p13688_p9, %p13687_p8 }
  0xe2   :  { %p13690_p11 = pnand %p13689_p10, %p13683_p7 }
  0xe4   :  { %13693 = shalt.err (!%p13690_p11)
}
  0xe5   :  { %s14606_s24 = smov 32   ;;  %s14607_s13 = smov 512  }
  0xe6   :  { %156 = dma.hbm_to_vmem [thread:$0]  %s14581_s12, 16384, %s151_s1, [#allocation18], %s14607_s13, %s14607_s13, %s14606_s24  }
  0xe7   :  { %s13694_s0 = scalar_lea.hbm %s14583_s14, 65536 }
  0xe8   :  { %p13695_p12 = scmp.ne.s32.totalorder %s14583_s14, %s13694_s0  ;;  %p13698_p13 = scmp.lt.u32.totalorder %s13694_s0, %s14583_s14 }
  0xea   :  { %p13700_p0 = pnand %p13698_p13, %p13695_p12 }
  0xec   :  { %13703 = shalt.err (!%p13700_p0)
}
  0xed   :  { %s13704_s3 = scalar_lea.vmem %s173_s26, 65536  ;;  %p13709_p2 = scmp.lt.s32.totalorder %s173_s26, %s173_s26 }
  0xee   :  { %p13705_p1 = scmp.ne.s32.totalorder %s173_s26, %s13704_s3  ;;  %p13710_p3 = scmp.lt.s32.totalorder %s13704_s3, %s13704_s3 }
  0xf0   :  { %p13711_p4 = por %p13710_p3, %p13709_p2 }
  0xf2   :  { %p13712_p5 = pnand %p13711_p4, %p13705_p1 }
  0xf4   :  { %13715 = shalt.err (!%p13712_p5)
}
  0xf5   :  { %178 = dma.hbm_to_vmem [thread:$0]  %s14583_s14, 65536, %s173_s26, [#allocation21], %s14607_s13, %s14607_s13, %s14606_s24  }
  0xf6   :  { %s13843_s29 = smov [#allocation23]   ;;  %s13716_s5 = scalar_lea.hbm %s14584_s15, 128 }
  0xf7   :  { %s185_s28 = sshll.u32 %s13843_s29, 4  ;;  %p13717_p6 = scmp.ne.s32.totalorder %s14584_s15, %s13716_s5  ;;  %s186_s28 = int_to_ptr.vmem [resolvable:$true] %s185_s28 }
  0xf8   :  { %p13720_p7 = scmp.lt.u32.totalorder %s13716_s5, %s14584_s15 }
  0xfa   :  { %p13722_p8 = pnand %p13720_p7, %p13717_p6 }
  0xfc   :  { %13725 = shalt.err (!%p13722_p8)
}
  0xfd   :  { %s13726_s20 = scalar_lea.vmem %s186_s28, 128  ;;  %p13731_p10 = scmp.lt.s32.totalorder %s186_s28, %s186_s28 }
  0xfe   :  { %p13727_p9 = scmp.ne.s32.totalorder %s186_s28, %s13726_s20  ;;  %p13732_p11 = scmp.lt.s32.totalorder %s13726_s20, %s13726_s20 }
 0x100   :  { %p13733_p12 = por %p13732_p11, %p13731_p10 }
 0x102   :  { %p13734_p13 = pnand %p13733_p12, %p13727_p9 }
 0x104   :  { %13737 = shalt.err (!%p13734_p13)
}
 0x105   :  { %188 = dma.hbm_to_vmem [thread:$0]  %s14584_s15, 128, %s186_s28, [#allocation24]  }
 0x106   :  { %13804 = dma.done.wait [#allocation3], 32  }
 0x107   :  { %13805 = vsyncadd [#allocation3], 4294967264 }
 0x108   :  { %13806 = dma.done.wait [#allocation6], 65664  }
 0x109   :  { %13807 = vsyncadd [#allocation6], 4294901632 }
 0x10a   :  { %13808 = dma.done.wait [#allocation9], 32832  }
 0x10b   :  { %13809 = vsyncadd [#allocation9], 4294934464 }
 0x10c   :  { %13810 = dma.done.wait [#allocation12], 80  }
 0x10d   :  { %13811 = vsyncadd [#allocation12], 4294967216 }
 0x10e   :  { %13812 = dma.done.wait [#allocation15], 528  }
 0x10f   :  { %13813 = vsyncadd [#allocation15], 4294966768 }
 0x110   :  { %13814 = dma.done.wait [#allocation18], 16416  }
 0x111   :  { %13815 = vsyncadd [#allocation18], 4294950880 }
 0x112   :  { %13816 = dma.done.wait [#allocation21], 65664  }
 0x113   :  { %13817 = vsyncadd [#allocation21], 4294901632 }
 0x114   :  { %13818 = dma.done.wait [#allocation24], 128  }
 0x115   :  { %13819 = vsyncadd [#allocation24], 4294967168  ;;  %v286_v0 = vld [vmem:[#allocation5] sm:$0xff]  ;;  %v287_v2 = vld [vmem:[#allocation5 + $0x8] sm:$0xff]  ;;  %v13844_v32 = vmov 1983009808   ;;  %v240_v34 = vlaneseq }
 0x116   :  { %v290_v1 = vld [vmem:[#allocation5 + $0x20] sm:$0xff]  ;;  %v291_v4 = vld [vmem:[#allocation5 + $0x28] sm:$0xff]  ;;  %v238_v33 = vunpack.c.l.s4 %v13844_v32  ;;  %s14608_s13 = sld [smem:[#allocation39_spill]]  ;;  %vm6344_vm0 = vcmask 1043456   ;;  %vm6323_vm1 = vcmask 58368   ;;  %vm13847_vm2 = vmmov 0  }
 0x117   :  { %v11335_v3 = vcombine.high %v286_v0, %v290_v1  ;;  %v11334_v5 = vcombine.low %v286_v0, %v290_v1  ;;  %v294_v6 = vld [vmem:[#allocation5 + $0x40] sm:$0xff]  ;;  %v11337_v8 = vcombine.high %v287_v2, %v291_v4  ;;  %v11336_v9 = vcombine.low %v287_v2, %v291_v4  ;;  %v295_v11 = vld [vmem:[#allocation5 + $0x48] sm:$0xff]  ;;  %s13849_s5 = smov [#allocation26]   ;;  %s13850_s22 = smov [#allocation25]  }
 0x118   :  { %v298_v7 = vld [vmem:[#allocation5 + $0x60] sm:$0xff]  ;;  %v299_v12 = vld [vmem:[#allocation5 + $0x68] sm:$0xff]  ;;  %v239_v43 = vunpack.c.0.s8 %v238_v33  ;;  %v14130_v44 = vshrl.u32 %v240_v34, 7  ;;  %vm6340_vm3 = vcmask 64512   ;;  %vm6426_vm4 = vcmask 261120   ;;  %s11299_s23 = sshll.u32 %s13849_s5, 4  ;;  %s11300_s23 = int_to_ptr.vmem [resolvable:$true] %s11299_s23 }
 0x119   :  { %v11343_v10 = vcombine.high %v294_v6, %v298_v7  ;;  %v302_v13 = vld [vmem:[#allocation5 + $0x80] sm:$0xff]  ;;  %3400 = vmatprep.subr.bf16.mxu0 %v11335_v3  ;;  %v11345_v14 = vcombine.high %v295_v11, %v299_v12  ;;  %v303_v16 = vld [vmem:[#allocation5 + $0x88] sm:$0xff]  ;;  %3564 = vmatprep.subr.bf16.mxu1 %v11337_v8  ;;  %v11342_v18 = vcombine.low %v294_v6, %v298_v7  ;;  %s11289_s25 = sshll.u32 %s13850_s22, 4  ;;  %s13738_s10 = scalar_lea.vmem %s11300_s23, 32  ;;  %s11290_s25 = int_to_ptr.vmem [resolvable:$true] %s11289_s25 }
 0x11a   :  { %v306_v15 = vld [vmem:[#allocation5 + $0xa0] sm:$0xff]  ;;  %v307_v17 = vld [vmem:[#allocation5 + $0xa8] sm:$0xff]  ;;  %3401 = vmatpush1.bf16.msra.mxu0 %v11334_v5  ;;  %3565 = vmatpush1.bf16.msra.mxu1 %v11336_v9  ;;  %v11344_v19 = vcombine.low %v295_v11, %v299_v12  ;;  %v14133_v53 = vsub.s32 %v239_v43, %v14130_v44  ;;  %p13739_p0 = scmp.ne.s32.totalorder %s11300_s23, %s13738_s10  ;;  %p13743_p1 = scmp.lt.s32.totalorder %s11300_s23, %s11300_s23 }
 0x11b   :  { %3402 = vmatprep.subr.bf16.mxu0 %v11343_v10  ;;  %v11351_v20 = vcombine.high %v302_v13, %v306_v15  ;;  %3566 = vmatprep.subr.bf16.mxu1 %v11345_v14  ;;  %v11353_v21 = vcombine.high %v303_v16, %v307_v17  ;;  %v310_v22 = vld [vmem:[#allocation5 + $0xc0] sm:$0xff]  ;;  %v311_v24 = vld [vmem:[#allocation5 + $0xc8] sm:$0xff]  ;;  %v11350_v26 = vcombine.low %v302_v13, %v306_v15  ;;  %p13744_p2 = scmp.lt.s32.totalorder %s13738_s10, %s13738_s10 }
 0x11c   :  { %v314_v23 = vld [vmem:[#allocation5 + $0xe0] sm:$0xff]  ;;  %v315_v25 = vld [vmem:[#allocation5 + $0xe8] sm:$0xff]  ;;  %v11352_v27 = vcombine.low %v303_v16, %v307_v17 }
 0x11d   :  { %v11359_v28 = vcombine.high %v310_v22, %v314_v23  ;;  %v11361_v29 = vcombine.high %v311_v24, %v315_v25  ;;  %v318_v30 = vld [vmem:[#allocation5 + $0x100] sm:$0xff]  ;;  %v319_v35 = vld [vmem:[#allocation5 + $0x108] sm:$0xff]  ;;  %v11358_v37 = vcombine.low %v310_v22, %v314_v23  ;;  %v11360_v38 = vcombine.low %v311_v24, %v315_v25  ;;  %p13745_p3 = por %p13744_p2, %p13743_p1 }
 0x11e   :  { %3403 = vmatpush1.bf16.msra.mxu0 %v11342_v18  ;;  %3567 = vmatpush1.bf16.msra.mxu1 %v11344_v19  ;;  %v322_v31 = vld [vmem:[#allocation5 + $0x120] sm:$0xff]  ;;  %v323_v36 = vld [vmem:[#allocation5 + $0x128] sm:$0xff] }
 0x11f   :  { %3404 = vmatprep.subr.bf16.mxu0 %v11351_v20  ;;  %3568 = vmatprep.subr.bf16.mxu1 %v11353_v21  ;;  %v11367_v39 = vcombine.high %v318_v30, %v322_v31  ;;  %v11369_v40 = vcombine.high %v319_v35, %v323_v36  ;;  %v326_v41 = vld [vmem:[#allocation5 + $0x140] sm:$0xff]  ;;  %v327_v45 = vld [vmem:[#allocation5 + $0x148] sm:$0xff]  ;;  %v11366_v47 = vcombine.low %v318_v30, %v322_v31  ;;  %p13746_p4 = pnand %p13745_p3, %p13739_p0 }
 0x120   :  { %v330_v42 = vld [vmem:[#allocation5 + $0x160] sm:$0xff]  ;;  %v331_v46 = vld [vmem:[#allocation5 + $0x168] sm:$0xff]  ;;  %v11368_v48 = vcombine.low %v319_v35, %v323_v36 }
 0x121   :  { %v11375_v49 = vcombine.high %v326_v41, %v330_v42  ;;  %v11377_v50 = vcombine.high %v327_v45, %v331_v46  ;;  %v334_v51 = vld [vmem:[#allocation5 + $0x180] sm:$0xff]  ;;  %v335_v54 = vld [vmem:[#allocation5 + $0x188] sm:$0xff]  ;;  %v11374_v56 = vcombine.low %v326_v41, %v330_v42  ;;  %v11376_v57 = vcombine.low %v327_v45, %v331_v46 }
 0x122   :  { %3405 = vmatpush1.bf16.msra.mxu0 %v11350_v26  ;;  %3569 = vmatpush1.bf16.msra.mxu1 %v11352_v27  ;;  %v338_v52 = vld [vmem:[#allocation5 + $0x1a0] sm:$0xff]  ;;  %v339_v55 = vld [vmem:[#allocation5 + $0x1a8] sm:$0xff] }
 0x123   :  { %3406 = vmatprep.subr.bf16.mxu0 %v11359_v28  ;;  %3570 = vmatprep.subr.bf16.mxu1 %v11361_v29  ;;  %v11383_v58 = vcombine.high %v334_v51, %v338_v52  ;;  %v14138_v59 = vld [vmem:[%s14608_s13] sm:$0xff]  ;;  %v11385_v60 = vcombine.high %v335_v54, %v339_v55  ;;  %v343_v0 = vld [vmem:[#allocation5 + $0x1c8] sm:$0xff]  ;;  %v11382_v2 = vcombine.low %v334_v51, %v338_v52 }
 0x124   :  { %v342_v61 = vld [vmem:[#allocation5 + $0x1c0] sm:$0xff]  ;;  %v14142_v63 = vrot.slane %v14138_v59, %v14133_v53  ;;  %v347_v1 = vld [vmem:[#allocation5 + $0x1e8] sm:$0xff]  ;;  %v11384_v4 = vcombine.low %v335_v54, %v339_v55 }
 0x125   :  { %v346_v62 = vld [vmem:[#allocation5 + $0x1e0] sm:$0xff]  ;;  %v11393_v6 = vcombine.high %v343_v0, %v347_v1  ;;  %v351_v10 = vld [vmem:[#allocation5 + $0x208] sm:$0xff]  ;;  %v11392_v13 = vcombine.low %v343_v0, %v347_v1 }
 0x126   :  { %3407 = vmatpush1.bf16.msra.mxu0 %v11358_v37  ;;  %3571 = vmatpush1.bf16.msra.mxu1 %v11360_v38  ;;  %v251_v3 = vcombine.high %v14142_v63, %v14142_v63  ;;  %v11391_v5 = vcombine.high %v342_v61, %v346_v62  ;;  %v350_v7 = vld [vmem:[#allocation5 + $0x200] sm:$0xff]  ;;  %v355_v11 = vld [vmem:[#allocation5 + $0x228] sm:$0xff]  ;;  %v11390_v12 = vcombine.low %v342_v61, %v346_v62 }
 0x127   :  { %3408 = vmatprep.subr.bf16.mxu0 %v11367_v39  ;;  %3572 = vmatprep.subr.bf16.mxu1 %v11369_v40  ;;  %v354_v8 = vld [vmem:[#allocation5 + $0x220] sm:$0xff]  ;;  %v11401_v15 = vcombine.high %v351_v10, %v355_v11  ;;  %v359_v18 = vld [vmem:[#allocation5 + $0x248] sm:$0xff]  ;;  %v11400_v21 = vcombine.low %v351_v10, %v355_v11 }
 0x128   :  { %v14146_v9 = vpack.c.bf16 %v251_v3, %v251_v3  ;;  %v11399_v14 = vcombine.high %v350_v7, %v354_v8  ;;  %v358_v16 = vld [vmem:[#allocation5 + $0x240] sm:$0xff]  ;;  %v363_v19 = vld [vmem:[#allocation5 + $0x268] sm:$0xff]  ;;  %v11398_v20 = vcombine.low %v350_v7, %v354_v8 }
 0x129   :  { %v362_v17 = vld [vmem:[#allocation5 + $0x260] sm:$0xff]  ;;  %v11409_v23 = vcombine.high %v359_v18, %v363_v19  ;;  %v367_v26 = vld [vmem:[#allocation5 + $0x288] sm:$0xff]  ;;  %v11408_v29 = vcombine.low %v359_v18, %v363_v19 }
 0x12a   :  { %3409 = vmatpush1.bf16.msra.mxu0 %v11366_v47  ;;  %3573 = vmatpush1.bf16.msra.mxu1 %v11368_v48  ;;  %v11407_v22 = vcombine.high %v358_v16, %v362_v17  ;;  %v366_v24 = vld [vmem:[#allocation5 + $0x280] sm:$0xff]  ;;  %v371_v27 = vld [vmem:[#allocation5 + $0x2a8] sm:$0xff]  ;;  %v11406_v28 = vcombine.low %v358_v16, %v362_v17 }
 0x12b   :  { %3410 = vmatprep.subr.bf16.mxu0 %v11375_v49  ;;  %3574 = vmatprep.subr.bf16.mxu1 %v11377_v50  ;;  %v370_v25 = vld [vmem:[#allocation5 + $0x2a0] sm:$0xff]  ;;  %v11417_v31 = vcombine.high %v367_v26, %v371_v27  ;;  %v375_v34 = vld [vmem:[#allocation5 + $0x2c8] sm:$0xff]  ;;  %v11416_v37 = vcombine.low %v367_v26, %v371_v27 }
 0x12c   :  { %3432 = vmatprep.mubr.bf16.mxu0 %v14146_v9  ;;  %3596 = vmatprep.mubr.bf16.mxu1 %v14146_v9  ;;  %v11415_v30 = vcombine.high %v366_v24, %v370_v25  ;;  %v374_v32 = vld [vmem:[#allocation5 + $0x2c0] sm:$0xff]  ;;  %v379_v35 = vld [vmem:[#allocation5 + $0x2e8] sm:$0xff]  ;;  %v11414_v36 = vcombine.low %v366_v24, %v370_v25  ;;  %v14159_v25 = vpack.c.bf16 %v14142_v63, %v14142_v63 }
 0x12d   :  { %v378_v33 = vld [vmem:[#allocation5 + $0x2e0] sm:$0xff]  ;;  %v11425_v39 = vcombine.high %v375_v34, %v379_v35  ;;  %v383_v42 = vld [vmem:[#allocation5 + $0x308] sm:$0xff]  ;;  %v11424_v46 = vcombine.low %v375_v34, %v379_v35 }
 0x12e   :  { %3411 = vmatpush1.bf16.msra.mxu0 %v11374_v56  ;;  %3575 = vmatpush1.bf16.msra.mxu1 %v11376_v57  ;;  %v11423_v38 = vcombine.high %v374_v32, %v378_v33  ;;  %v382_v40 = vld [vmem:[#allocation5 + $0x300] sm:$0xff]  ;;  %v387_v43 = vld [vmem:[#allocation5 + $0x328] sm:$0xff]  ;;  %v11422_v45 = vcombine.low %v374_v32, %v378_v33 }
 0x12f   :  { %3412 = vmatprep.subr.bf16.mxu0 %v11383_v58  ;;  %3576 = vmatprep.subr.bf16.mxu1 %v11385_v60  ;;  %v386_v41 = vld [vmem:[#allocation5 + $0x320] sm:$0xff]  ;;  %v11433_v48 = vcombine.high %v383_v42, %v387_v43  ;;  %v391_v51 = vld [vmem:[#allocation5 + $0x348] sm:$0xff]  ;;  %v11432_v55 = vcombine.low %v383_v42, %v387_v43 }
 0x130   :  { %v11431_v47 = vcombine.high %v382_v40, %v386_v41  ;;  %v390_v49 = vld [vmem:[#allocation5 + $0x340] sm:$0xff]  ;;  %v395_v52 = vld [vmem:[#allocation5 + $0x368] sm:$0xff]  ;;  %v11430_v54 = vcombine.low %v382_v40, %v386_v41 }
 0x131   :  { %v394_v50 = vld [vmem:[#allocation5 + $0x360] sm:$0xff]  ;;  %v11441_v57 = vcombine.high %v391_v51, %v395_v52  ;;  %v399_v61 = vld [vmem:[#allocation5 + $0x388] sm:$0xff]  ;;  %v11440_v1 = vcombine.low %v391_v51, %v395_v52 }
 0x132   :  { %3413 = vmatpush1.bf16.msra.mxu0 %v11382_v2  ;;  %3577 = vmatpush1.bf16.msra.mxu1 %v11384_v4  ;;  %v11439_v56 = vcombine.high %v390_v49, %v394_v50  ;;  %v398_v58 = vld [vmem:[#allocation5 + $0x380] sm:$0xff]  ;;  %v403_v62 = vld [vmem:[#allocation5 + $0x3a8] sm:$0xff]  ;;  %v11438_v0 = vcombine.low %v390_v49, %v394_v50 }
 0x133   :  { %3414 = vmatprep.subr.bf16.mxu0 %v11391_v5  ;;  %3578 = vmatprep.subr.bf16.mxu1 %v11393_v6  ;;  %v402_v60 = vld [vmem:[#allocation5 + $0x3a0] sm:$0xff]  ;;  %v11449_v3 = vcombine.high %v399_v61, %v403_v62  ;;  %v236_v6 = vcombine.high %v14138_v59, %v14138_v59  ;;  %v407_v7 = vld [vmem:[#allocation5 + $0x3c8] sm:$0xff]  ;;  %v11448_v11 = vcombine.low %v399_v61, %v403_v62 }
 0x134   :  { %v11447_v2 = vcombine.high %v398_v58, %v402_v60  ;;  %v406_v4 = vld [vmem:[#allocation5 + $0x3c0] sm:$0xff]  ;;  %v411_v8 = vld [vmem:[#allocation5 + $0x3e8] sm:$0xff]  ;;  %v11446_v10 = vcombine.low %v398_v58, %v402_v60 }
 0x135   :  { %v410_v5 = vld [vmem:[#allocation5 + $0x3e0] sm:$0xff]  ;;  %v14153_v16 = vrot.slane %v236_v6, %v14133_v53  ;;  %v415_v17 = vld [vmem:[#allocation5 + $0x408] sm:$0xff]  ;;  %v11456_v59 = vcombine.low %v407_v7, %v411_v8 }
 0x136   :  { %3415 = vmatpush1.bf16.msra.mxu0 %v11390_v12  ;;  %3579 = vmatpush1.bf16.msra.mxu1 %v11392_v13  ;;  %v11455_v12 = vcombine.high %v406_v4, %v410_v5  ;;  %v11457_v13 = vcombine.high %v407_v7, %v411_v8  ;;  %v419_v18 = vld [vmem:[#allocation5 + $0x428] sm:$0xff]  ;;  %v11454_v19 = vcombine.low %v406_v4, %v410_v5  ;;  %v434_v32 = vld [vmem:[#allocation5 + $0x4a0] sm:$0xff] }
 0x137   :  { %3416 = vmatprep.subr.bf16.mxu0 %v11399_v14  ;;  %3580 = vmatprep.subr.bf16.mxu1 %v11401_v15  ;;  %v414_v14 = vld [vmem:[#allocation5 + $0x400] sm:$0xff]  ;;  %v252_v24 = vcombine.high %v14153_v16, %v14153_v16  ;;  %v423_v26 = vld [vmem:[#allocation5 + $0x448] sm:$0xff] }
 0x138   :  { %v418_v15 = vld [vmem:[#allocation5 + $0x420] sm:$0xff]  ;;  %v427_v27 = vld [vmem:[#allocation5 + $0x468] sm:$0xff] }
 0x139   :  { %v431_v33 = vld [vmem:[#allocation5 + $0x488] sm:$0xff]  ;;  %v11473_v34 = vcombine.high %v423_v26, %v427_v27  ;;  %v442_v40 = vld [vmem:[#allocation5 + $0x4e0] sm:$0xff] }
 0x13a   :  { %3417 = vmatpush1.bf16.msra.mxu0 %v11398_v20  ;;  %3581 = vmatpush1.bf16.msra.mxu1 %v11400_v21  ;;  %v11463_v20 = vcombine.high %v414_v14, %v418_v15  ;;  %v11465_v21 = vcombine.high %v415_v17, %v419_v18  ;;  %v435_v35 = vld [vmem:[#allocation5 + $0x4a8] sm:$0xff]  ;;  %v450_v49 = vld [vmem:[#allocation5 + $0x520] sm:$0xff] }
 0x13b   :  { %3418 = vmatprep.subr.bf16.mxu0 %v11407_v22  ;;  %3582 = vmatprep.subr.bf16.mxu1 %v11409_v23  ;;  %v422_v22 = vld [vmem:[#allocation5 + $0x440] sm:$0xff]  ;;  %v439_v41 = vld [vmem:[#allocation5 + $0x4c8] sm:$0xff]  ;;  %v11481_v42 = vcombine.high %v431_v33, %v435_v35 }
 0x13c   :  { %v426_v23 = vld [vmem:[#allocation5 + $0x460] sm:$0xff]  ;;  %v443_v43 = vld [vmem:[#allocation5 + $0x4e8] sm:$0xff] }
 0x13d   :  { %v11470_v63 = vcombine.low %v422_v22, %v426_v23  ;;  %v447_v50 = vld [vmem:[#allocation5 + $0x508] sm:$0xff]  ;;  %v11489_v51 = vcombine.high %v439_v41, %v443_v43  ;;  %v458_v58 = vld [vmem:[#allocation5 + $0x560] sm:$0xff] }
 0x13e   :  { %3419 = vmatpush1.bf16.msra.mxu0 %v11406_v28  ;;  %3583 = vmatpush1.bf16.msra.mxu1 %v11408_v29  ;;  %v11462_v28 = vcombine.low %v414_v14, %v418_v15  ;;  %v11464_v29 = vcombine.low %v415_v17, %v419_v18  ;;  %v451_v52 = vld [vmem:[#allocation5 + $0x528] sm:$0xff]  ;;  %v466_v4 = vld [vmem:[#allocation5 + $0x5a0] sm:$0xff] }
 0x13f   :  { %3420 = vmatprep.subr.bf16.mxu0 %v11415_v30  ;;  %3584 = vmatprep.subr.bf16.mxu1 %v11417_v31  ;;  %v11471_v30 = vcombine.high %v422_v22, %v426_v23  ;;  %v430_v31 = vld [vmem:[#allocation5 + $0x480] sm:$0xff]  ;;  %v455_v60 = vld [vmem:[#allocation5 + $0x548] sm:$0xff]  ;;  %v11497_v61 = vcombine.high %v447_v50, %v451_v52 }
 0x140   :  { %v459_v62 = vld [vmem:[#allocation5 + $0x568] sm:$0xff] }
 0x141   :  { %v463_v5 = vld [vmem:[#allocation5 + $0x588] sm:$0xff]  ;;  %v11505_v6 = vcombine.high %v455_v60, %v459_v62 }
 0x142   :  { %3421 = vmatpush1.bf16.msra.mxu0 %v11414_v36  ;;  %3585 = vmatpush1.bf16.msra.mxu1 %v11416_v37  ;;  %v14161_v36 = vpack.c.bf16 %v252_v24, %v252_v24  ;;  %v11472_v37 = vcombine.low %v423_v26, %v427_v27  ;;  %v467_v7 = vld [vmem:[#allocation5 + $0x5a8] sm:$0xff] }
 0x143   :  { %3422 = vmatprep.subr.bf16.mxu0 %v11423_v38  ;;  %3586 = vmatprep.subr.bf16.mxu1 %v11425_v39  ;;  %v11479_v38 = vcombine.high %v430_v31, %v434_v32  ;;  %v438_v39 = vld [vmem:[#allocation5 + $0x4c0] sm:$0xff]  ;;  %v471_v14 = vld [vmem:[#allocation5 + $0x5c8] sm:$0xff]  ;;  %v11513_v15 = vcombine.high %v463_v5, %v467_v7 }
 0x144   :  { %v475_v17 = vld [vmem:[#allocation5 + $0x5e8] sm:$0xff] }
 0x145   :  { %v479_v22 = vld [vmem:[#allocation5 + $0x608] sm:$0xff]  ;;  %v11521_v23 = vcombine.high %v471_v14, %v475_v17  ;;  %v11520_v27 = vcombine.low %v471_v14, %v475_v17  ;;  %v534_v17 = vld [vmem:[#allocation5 + $0x7c0] sm:$0xff] }
 0x146   :  { %3423 = vmatpush1.bf16.msra.mxu0 %v11422_v45  ;;  %3587 = vmatpush1.bf16.msra.mxu1 %v11424_v46  ;;  %v11478_v45 = vcombine.low %v430_v31, %v434_v32  ;;  %v11480_v46 = vcombine.low %v431_v33, %v435_v35  ;;  %v483_v24 = vld [vmem:[#allocation5 + $0x628] sm:$0xff] }
 0x147   :  { %3424 = vmatprep.subr.bf16.mxu0 %v11431_v47  ;;  %3588 = vmatprep.subr.bf16.mxu1 %v11433_v48  ;;  %v11487_v47 = vcombine.high %v438_v39, %v442_v40  ;;  %v446_v48 = vld [vmem:[#allocation5 + $0x500] sm:$0xff]  ;;  %v487_v31 = vld [vmem:[#allocation5 + $0x648] sm:$0xff]  ;;  %v11529_v32 = vcombine.high %v479_v22, %v483_v24  ;;  %v11528_v35 = vcombine.low %v479_v22, %v483_v24 }
 0x148   :  { %v491_v33 = vld [vmem:[#allocation5 + $0x668] sm:$0xff] }
 0x149   :  { %v531_v14 = vld [vmem:[#allocation5 + $0x7a8] sm:$0xff] }
 0x14a   :  { %3425 = vmatpush1.bf16.msra.mxu0 %v11430_v54  ;;  %3589 = vmatpush1.bf16.msra.mxu1 %v11432_v55  ;;  %v11486_v54 = vcombine.low %v438_v39, %v442_v40  ;;  %v11488_v55 = vcombine.low %v439_v41, %v443_v43  ;;  %v495_v39 = vld [vmem:[#allocation5 + $0x688] sm:$0xff]  ;;  %v11537_v40 = vcombine.high %v487_v31, %v491_v33 }
 0x14b   :  { %3426 = vmatprep.subr.bf16.mxu0 %v11439_v56  ;;  %3590 = vmatprep.subr.bf16.mxu1 %v11441_v57  ;;  %v11495_v56 = vcombine.high %v446_v48, %v450_v49  ;;  %v454_v57 = vld [vmem:[#allocation5 + $0x540] sm:$0xff]  ;;  %v499_v41 = vld [vmem:[#allocation5 + $0x6a8] sm:$0xff]  ;;  %v11536_v43 = vcombine.low %v487_v31, %v491_v33 }
 0x14c   :  { %v11502_v8 = vcombine.low %v454_v57, %v458_v58 }
 0x14e   :  { %3427 = vmatpush1.bf16.msra.mxu0 %v11438_v0  ;;  %3591 = vmatpush1.bf16.msra.mxu1 %v11440_v1  ;;  %v11494_v0 = vcombine.low %v446_v48, %v450_v49  ;;  %v11496_v1 = vcombine.low %v447_v50, %v451_v52  ;;  %v503_v48 = vld [vmem:[#allocation5 + $0x6c8] sm:$0xff]  ;;  %v11545_v49 = vcombine.high %v495_v39, %v499_v41 }
 0x14f   :  { %3428 = vmatprep.subr.bf16.mxu0 %v11447_v2  ;;  %3592 = vmatprep.subr.bf16.mxu1 %v11449_v3  ;;  %v11503_v2 = vcombine.high %v454_v57, %v458_v58  ;;  %v462_v3 = vld [vmem:[#allocation5 + $0x580] sm:$0xff]  ;;  %v507_v50 = vld [vmem:[#allocation5 + $0x6e8] sm:$0xff]  ;;  %v11544_v52 = vcombine.low %v495_v39, %v499_v41 }
 0x150   :  { %v11510_v18 = vcombine.low %v462_v3, %v466_v4  ;;  %v511_v57 = vld [vmem:[#allocation5 + $0x708] sm:$0xff]  ;;  %v11553_v58 = vcombine.high %v503_v48, %v507_v50 }
 0x151   :  { %v551_v39 = vld [vmem:[#allocation5 + $0x848] sm:$0xff] }
 0x152   :  { %3429 = vmatpush1.bf16.msra.mxu0 %v11446_v10  ;;  %3593 = vmatpush1.bf16.msra.mxu1 %v11448_v11  ;;  %v11504_v10 = vcombine.low %v455_v60, %v459_v62  ;;  %v11511_v11 = vcombine.high %v462_v3, %v466_v4  ;;  %v515_v60 = vld [vmem:[#allocation5 + $0x728] sm:$0xff]  ;;  %v11552_v62 = vcombine.low %v503_v48, %v507_v50  ;;  %v558_v48 = vld [vmem:[#allocation5 + $0x880] sm:$0xff] }
 0x153   :  { %3430 = vmatprep.subr.bf16.mxu0 %v11455_v12  ;;  %3594 = vmatprep.subr.bf16.mxu1 %v11457_v13  ;;  %v470_v12 = vld [vmem:[#allocation5 + $0x5c0] sm:$0xff]  ;;  %v519_v3 = vld [vmem:[#allocation5 + $0x748] sm:$0xff]  ;;  %v11561_v4 = vcombine.high %v511_v57, %v515_v60 }
 0x154   :  { %v474_v13 = vld [vmem:[#allocation5 + $0x5e0] sm:$0xff]  ;;  %v555_v41 = vld [vmem:[#allocation5 + $0x868] sm:$0xff] }
 0x155   :  { %v11518_v26 = vcombine.low %v470_v12, %v474_v13  ;;  %v559_v50 = vld [vmem:[#allocation5 + $0x888] sm:$0xff] }
 0x156   :  { %3431 = vmatpush1.bf16.msra.mxu0 %v11454_v19  ;;  %3595 = vmatpush1.bf16.msra.mxu1 %v11456_v59  ;;  %v11512_v19 = vcombine.low %v463_v5, %v467_v7  ;;  %v11519_v59 = vcombine.high %v470_v12, %v474_v13  ;;  %v523_v5 = vld [vmem:[#allocation5 + $0x768] sm:$0xff]  ;;  %v11560_v7 = vcombine.low %v511_v57, %v515_v60  ;;  %v566_v57 = vld [vmem:[#allocation5 + $0x8c0] sm:$0xff] }
 0x157   :  { %3441 = vmatprep.subr.bf16.mxu0 %v11463_v20  ;;  %3605 = vmatprep.subr.bf16.mxu1 %v11465_v21  ;;  %v478_v20 = vld [vmem:[#allocation5 + $0x600] sm:$0xff]  ;;  %v527_v12 = vld [vmem:[#allocation5 + $0x788] sm:$0xff]  ;;  %v11569_v13 = vcombine.high %v519_v3, %v523_v5 }
 0x158   :  { %v482_v21 = vld [vmem:[#allocation5 + $0x620] sm:$0xff]  ;;  %v11577_v22 = vcombine.high %v527_v12, %v531_v14  ;;  %v567_v60 = vld [vmem:[#allocation5 + $0x8c8] sm:$0xff] }
 0x159   :  { %3433 = vmatmul.mubr.bf16.vlgmr.msra.gmra.mrb[0].mxu0 %v14159_v25  ;;  %3597 = vmatmul.mubr.bf16.vlgmr.msra.gmra.mrb[0].mxu1 %v14159_v25 }
 0x15a   :  { %3442 = vmatpush1.bf16.msra.mxu0 %v11462_v28  ;;  %3606 = vmatpush1.bf16.msra.mxu1 %v11464_v29  ;;  %v11527_v28 = vcombine.high %v478_v20, %v482_v21  ;;  %v486_v29 = vld [vmem:[#allocation5 + $0x640] sm:$0xff] }
 0x15b   :  { %3443 = vmatprep.subr.bf16.mxu0 %v11471_v30  ;;  %3607 = vmatprep.subr.bf16.mxu1 %v11473_v34  ;;  %v490_v30 = vld [vmem:[#allocation5 + $0x660] sm:$0xff]  ;;  %v11526_v34 = vcombine.low %v478_v20, %v482_v21  ;;  %v535_v20 = vld [vmem:[#allocation5 + $0x7c8] sm:$0xff] }
 0x15c   :  { %3473 = vmatprep.mubr.bf16.mxu0 %v14161_v36  ;;  %3637 = vmatprep.mubr.bf16.mxu1 %v14161_v36  ;;  %v539_v21 = vld [vmem:[#allocation5 + $0x7e8] sm:$0xff] }
 0x15d   :  { %v11585_v31 = vcombine.high %v535_v20, %v539_v21 }
 0x15e   :  { %3444 = vmatpush1.bf16.msra.mxu0 %v11470_v63  ;;  %3608 = vmatpush1.bf16.msra.mxu1 %v11472_v37  ;;  %v11535_v63 = vcombine.high %v486_v29, %v490_v30  ;;  %v494_v37 = vld [vmem:[#allocation5 + $0x680] sm:$0xff] }
 0x15f   :  { %3445 = vmatprep.subr.bf16.mxu0 %v11479_v38  ;;  %3609 = vmatprep.subr.bf16.mxu1 %v11481_v42  ;;  %v498_v38 = vld [vmem:[#allocation5 + $0x6a0] sm:$0xff]  ;;  %v11534_v42 = vcombine.low %v486_v29, %v490_v30  ;;  %v543_v30 = vld [vmem:[#allocation5 + $0x808] sm:$0xff] }
 0x160   :  { %v546_v29 = vld [vmem:[#allocation5 + $0x820] sm:$0xff] }
 0x162   :  { %3446 = vmatpush1.bf16.msra.mxu0 %v11478_v45  ;;  %3610 = vmatpush1.bf16.msra.mxu1 %v11480_v46  ;;  %v11543_v45 = vcombine.high %v494_v37, %v498_v38  ;;  %v502_v46 = vld [vmem:[#allocation5 + $0x6c0] sm:$0xff] }
 0x163   :  { %3447 = vmatprep.subr.bf16.mxu0 %v11487_v47  ;;  %3611 = vmatprep.subr.bf16.mxu1 %v11489_v51  ;;  %v506_v47 = vld [vmem:[#allocation5 + $0x6e0] sm:$0xff]  ;;  %v11542_v51 = vcombine.low %v494_v37, %v498_v38 }
 0x164   :  { %v550_v37 = vld [vmem:[#allocation5 + $0x840] sm:$0xff] }
 0x165   :  { %v554_v38 = vld [vmem:[#allocation5 + $0x860] sm:$0xff] }
 0x166   :  { %3448 = vmatpush1.bf16.msra.mxu0 %v11486_v54  ;;  %3612 = vmatpush1.bf16.msra.mxu1 %v11488_v55  ;;  %v11551_v54 = vcombine.high %v502_v46, %v506_v47  ;;  %v510_v55 = vld [vmem:[#allocation5 + $0x700] sm:$0xff] }
 0x167   :  { %3449 = vmatprep.subr.bf16.mxu0 %v11495_v56  ;;  %3613 = vmatprep.subr.bf16.mxu1 %v11497_v61  ;;  %v514_v56 = vld [vmem:[#allocation5 + $0x720] sm:$0xff]  ;;  %v11550_v61 = vcombine.low %v502_v46, %v506_v47  ;;  %v11599_v47 = vcombine.high %v550_v37, %v554_v38 }
 0x16a   :  { %3450 = vmatpush1.bf16.msra.mxu0 %v11494_v0  ;;  %3614 = vmatpush1.bf16.msra.mxu1 %v11496_v1  ;;  %v11559_v0 = vcombine.high %v510_v55, %v514_v56  ;;  %v518_v1 = vld [vmem:[#allocation5 + $0x740] sm:$0xff] }
 0x16b   :  { %3451 = vmatprep.subr.bf16.mxu0 %v11503_v2  ;;  %3615 = vmatprep.subr.bf16.mxu1 %v11505_v6  ;;  %v522_v2 = vld [vmem:[#allocation5 + $0x760] sm:$0xff]  ;;  %v11558_v6 = vcombine.low %v510_v55, %v514_v56  ;;  %v11600_v55 = vcombine.low %v551_v39, %v555_v41 }
 0x16e   :  { %3452 = vmatpush1.bf16.msra.mxu0 %v11502_v8  ;;  %3616 = vmatpush1.bf16.msra.mxu1 %v11504_v10  ;;  %v11567_v8 = vcombine.high %v518_v1, %v522_v2  ;;  %v526_v10 = vld [vmem:[#allocation5 + $0x780] sm:$0xff] }
 0x16f   :  { %3453 = vmatprep.subr.bf16.mxu0 %v11511_v11  ;;  %3617 = vmatprep.subr.bf16.mxu1 %v11513_v15  ;;  %v530_v11 = vld [vmem:[#allocation5 + $0x7a0] sm:$0xff]  ;;  %v11566_v15 = vcombine.low %v518_v1, %v522_v2 }
 0x170   :  { %v11574_v24 = vcombine.low %v526_v10, %v530_v11 }
 0x172   :  { %3454 = vmatpush1.bf16.msra.mxu0 %v11510_v18  ;;  %3618 = vmatpush1.bf16.msra.mxu1 %v11512_v19  ;;  %v11568_v18 = vcombine.low %v519_v3, %v523_v5  ;;  %v11575_v19 = vcombine.high %v526_v10, %v530_v11  ;;  %v574_v3 = vld [vmem:[#allocation5 + $0x900] sm:$0xff]  ;;  %v575_v5 = vld [vmem:[#allocation5 + $0x908] sm:$0xff] }
 0x173   :  { %3455 = vmatprep.subr.bf16.mxu0 %v11519_v59  ;;  %3619 = vmatprep.subr.bf16.mxu1 %v11521_v23  ;;  %v538_v59 = vld [vmem:[#allocation5 + $0x7e0] sm:$0xff] }
 0x174   :  { %v14170_v23 = vld [vmem:[%s14608_s13 + $0x8] sm:$0xff] }
 0x175   :  { %v14174_v33 = vrot.slane %v14170_v23, %v14133_v53 }
 0x176   :  { %3456 = vmatpush1.bf16.msra.mxu0 %v11518_v26  ;;  %3620 = vmatpush1.bf16.msra.mxu1 %v11520_v27  ;;  %v11576_v26 = vcombine.low %v527_v12, %v531_v14  ;;  %v11583_v27 = vcombine.high %v534_v17, %v538_v59  ;;  %v582_v12 = vld [vmem:[#allocation5 + $0x940] sm:$0xff]  ;;  %v583_v14 = vld [vmem:[#allocation5 + $0x948] sm:$0xff] }
 0x177   :  { %3457 = vmatprep.subr.bf16.mxu0 %v11527_v28  ;;  %3621 = vmatprep.subr.bf16.mxu1 %v11529_v32  ;;  %v542_v28 = vld [vmem:[#allocation5 + $0x800] sm:$0xff]  ;;  %v547_v32 = vld [vmem:[#allocation5 + $0x828] sm:$0xff] }
 0x178   :  { %v11592_v46 = vcombine.low %v543_v30, %v547_v32 }
 0x17a   :  { %3458 = vmatpush1.bf16.msra.mxu0 %v11526_v34  ;;  %3622 = vmatpush1.bf16.msra.mxu1 %v11528_v35  ;;  %v11582_v34 = vcombine.low %v534_v17, %v538_v59  ;;  %v11584_v35 = vcombine.low %v535_v20, %v539_v21  ;;  %v587_v17 = vld [vmem:[#allocation5 + $0x968] sm:$0xff]  ;;  %v590_v20 = vld [vmem:[#allocation5 + $0x980] sm:$0xff] }
 0x17b   :  { %3459 = vmatprep.subr.bf16.mxu0 %v11535_v63  ;;  %3623 = vmatprep.subr.bf16.mxu1 %v11537_v40  ;;  %v11591_v63 = vcombine.high %v542_v28, %v546_v29  ;;  %v11593_v40 = vcombine.high %v543_v30, %v547_v32  ;;  %v594_v21 = vld [vmem:[#allocation5 + $0x9a0] sm:$0xff]  ;;  %v599_v32 = vld [vmem:[#allocation5 + $0x9c8] sm:$0xff] }
 0x17c   :  { %v598_v30 = vld [vmem:[#allocation5 + $0x9c0] sm:$0xff] }
 0x17e   :  { %3460 = vmatpush1.bf16.msra.mxu0 %v11534_v42  ;;  %3624 = vmatpush1.bf16.msra.mxu1 %v11536_v43  ;;  %v268_v42 = vcombine.high %v14174_v33, %v14174_v33  ;;  %v14180_v43 = vpack.c.bf16 %v14153_v16, %v14153_v16  ;;  %v11598_v16 = vcombine.low %v550_v37, %v554_v38 }
 0x17f   :  { %3461 = vmatprep.subr.bf16.mxu0 %v11543_v45  ;;  %3625 = vmatprep.subr.bf16.mxu1 %v11545_v49  ;;  %v11590_v45 = vcombine.low %v542_v28, %v546_v29  ;;  %v562_v49 = vld [vmem:[#allocation5 + $0x8a0] sm:$0xff]  ;;  %v11632_v28 = vcombine.low %v583_v14, %v587_v17  ;;  %v11639_v29 = vcombine.high %v590_v20, %v594_v21 }
 0x180   :  { %v11607_v56 = vcombine.high %v558_v48, %v562_v49 }
 0x182   :  { %3462 = vmatpush1.bf16.msra.mxu0 %v11542_v51  ;;  %3626 = vmatpush1.bf16.msra.mxu1 %v11544_v52  ;;  %v11601_v51 = vcombine.high %v551_v39, %v555_v41  ;;  %v563_v52 = vld [vmem:[#allocation5 + $0x8a8] sm:$0xff]  ;;  %v606_v39 = vld [vmem:[#allocation5 + $0xa00] sm:$0xff] }
 0x183   :  { %3463 = vmatprep.subr.bf16.mxu0 %v11551_v54  ;;  %3627 = vmatprep.subr.bf16.mxu1 %v11553_v58  ;;  %v14182_v54 = vpack.c.bf16 %v268_v42, %v268_v42  ;;  %v570_v58 = vld [vmem:[#allocation5 + $0x8e0] sm:$0xff]  ;;  %v11608_v1 = vcombine.low %v559_v50, %v563_v52  ;;  %v607_v41 = vld [vmem:[#allocation5 + $0xa08] sm:$0xff] }
 0x184   :  { %v11615_v2 = vcombine.high %v566_v57, %v570_v58 }
 0x186   :  { %3464 = vmatpush1.bf16.msra.mxu0 %v11550_v61  ;;  %3628 = vmatpush1.bf16.msra.mxu1 %v11552_v62  ;;  %v11609_v61 = vcombine.high %v559_v50, %v563_v52  ;;  %v571_v62 = vld [vmem:[#allocation5 + $0x8e8] sm:$0xff]  ;;  %v618_v50 = vld [vmem:[#allocation5 + $0xa60] sm:$0xff] }
 0x187   :  { %3465 = vmatprep.subr.bf16.mxu0 %v11559_v0  ;;  %3629 = vmatprep.subr.bf16.mxu1 %v11561_v4  ;;  %v11606_v0 = vcombine.low %v558_v48, %v562_v49  ;;  %v578_v4 = vld [vmem:[#allocation5 + $0x920] sm:$0xff]  ;;  %v11616_v10 = vcombine.low %v567_v60, %v571_v62 }
 0x188   :  { %v11623_v11 = vcombine.high %v574_v3, %v578_v4  ;;  %v614_v49 = vld [vmem:[#allocation5 + $0xa40] sm:$0xff] }
 0x18a   :  { %3466 = vmatpush1.bf16.msra.mxu0 %v11558_v6  ;;  %3630 = vmatpush1.bf16.msra.mxu1 %v11560_v7  ;;  %v11617_v6 = vcombine.high %v567_v60, %v571_v62  ;;  %v579_v7 = vld [vmem:[#allocation5 + $0x928] sm:$0xff]  ;;  %v626_v60 = vld [vmem:[#allocation5 + $0xaa0] sm:$0xff] }
 0x18b   :  { %3467 = vmatprep.subr.bf16.mxu0 %v11567_v8  ;;  %3631 = vmatprep.subr.bf16.mxu1 %v11569_v13  ;;  %v11614_v8 = vcombine.low %v566_v57, %v570_v58  ;;  %v586_v13 = vld [vmem:[#allocation5 + $0x960] sm:$0xff]  ;;  %v11663_v57 = vcombine.high %v614_v49, %v618_v50 }
 0x18c   :  { %v11631_v59 = vcombine.high %v582_v12, %v586_v13  ;;  %v622_v58 = vld [vmem:[#allocation5 + $0xa80] sm:$0xff] }
 0x18e   :  { %3468 = vmatpush1.bf16.msra.mxu0 %v11566_v15  ;;  %3632 = vmatpush1.bf16.msra.mxu1 %v11568_v18  ;;  %v11625_v15 = vcombine.high %v575_v5, %v579_v7  ;;  %v11622_v18 = vcombine.low %v574_v3, %v578_v4  ;;  %v11671_v3 = vcombine.high %v622_v58, %v626_v60  ;;  %v630_v4 = vld [vmem:[#allocation5 + $0xac0] sm:$0xff] }
 0x18f   :  { %3469 = vmatprep.subr.bf16.mxu0 %v11575_v19  ;;  %3633 = vmatprep.subr.bf16.mxu1 %v11577_v22  ;;  %v11624_v19 = vcombine.low %v575_v5, %v579_v7  ;;  %v591_v22 = vld [vmem:[#allocation5 + $0x988] sm:$0xff]  ;;  %v634_v5 = vld [vmem:[#allocation5 + $0xae0] sm:$0xff] }
 0x192   :  { %3470 = vmatpush1.bf16.msra.mxu0 %v11574_v24  ;;  %3634 = vmatpush1.bf16.msra.mxu1 %v11576_v26  ;;  %v11633_v24 = vcombine.high %v583_v14, %v587_v17  ;;  %v595_v26 = vld [vmem:[#allocation5 + $0x9a8] sm:$0xff]  ;;  %v642_v14 = vld [vmem:[#allocation5 + $0xb20] sm:$0xff] }
 0x193   :  { %3471 = vmatprep.subr.bf16.mxu0 %v11583_v27  ;;  %3635 = vmatprep.subr.bf16.mxu1 %v11585_v31  ;;  %v11630_v27 = vcombine.low %v582_v12, %v586_v13  ;;  %v602_v31 = vld [vmem:[#allocation5 + $0x9e0] sm:$0xff]  ;;  %v11640_v37 = vcombine.low %v591_v22, %v595_v26  ;;  %v11679_v12 = vcombine.high %v630_v4, %v634_v5 }
 0x194   :  { %v11647_v38 = vcombine.high %v598_v30, %v602_v31  ;;  %v638_v13 = vld [vmem:[#allocation5 + $0xb00] sm:$0xff] }
 0x196   :  { %3472 = vmatpush1.bf16.msra.mxu0 %v11582_v34  ;;  %3636 = vmatpush1.bf16.msra.mxu1 %v11584_v35  ;;  %v11641_v34 = vcombine.high %v591_v22, %v595_v26  ;;  %v603_v35 = vld [vmem:[#allocation5 + $0x9e8] sm:$0xff]  ;;  %v650_v22 = vld [vmem:[#allocation5 + $0xb60] sm:$0xff] }
 0x197   :  { %3482 = vmatprep.subr.bf16.mxu0 %v11591_v63  ;;  %3646 = vmatprep.subr.bf16.mxu1 %v11593_v40  ;;  %v11638_v63 = vcombine.low %v590_v20, %v594_v21  ;;  %v610_v40 = vld [vmem:[#allocation5 + $0xa20] sm:$0xff]  ;;  %v11649_v42 = vcombine.high %v599_v32, %v603_v35  ;;  %v11687_v20 = vcombine.high %v638_v13, %v642_v14 }
 0x198   :  { %v11655_v48 = vcombine.high %v606_v39, %v610_v40  ;;  %v646_v21 = vld [vmem:[#allocation5 + $0xb40] sm:$0xff] }
 0x199   :  { %3474 = vmatmul.mubr.bf16.vlgmr.msra.gmra.mrb[0].mxu0 %v14180_v43  ;;  %3638 = vmatmul.mubr.bf16.vlgmr.msra.gmra.mrb[0].mxu1 %v14180_v43 }
 0x19a   :  { %3483 = vmatpush1.bf16.msra.mxu0 %v11590_v45  ;;  %3647 = vmatpush1.bf16.msra.mxu1 %v11592_v46  ;;  %v611_v45 = vld [vmem:[#allocation5 + $0xa28] sm:$0xff]  ;;  %v11646_v46 = vcombine.low %v598_v30, %v602_v31  ;;  %v11695_v30 = vcombine.high %v646_v21, %v650_v22  ;;  %v654_v31 = vld [vmem:[#allocation5 + $0xb80] sm:$0xff] }
 0x19b   :  { %3484 = vmatprep.subr.bf16.mxu0 %v11599_v47  ;;  %3648 = vmatprep.subr.bf16.mxu1 %v11601_v51  ;;  %v11648_v47 = vcombine.low %v599_v32, %v603_v35  ;;  %v615_v51 = vld [vmem:[#allocation5 + $0xa48] sm:$0xff]  ;;  %v11657_v52 = vcombine.high %v607_v41, %v611_v45  ;;  %v658_v32 = vld [vmem:[#allocation5 + $0xba0] sm:$0xff] }
 0x19c   :  { %3514 = vmatprep.mubr.bf16.mxu0 %v14182_v54  ;;  %3678 = vmatprep.mubr.bf16.mxu1 %v14182_v54 }
 0x19e   :  { %3485 = vmatpush1.bf16.msra.mxu0 %v11598_v16  ;;  %3649 = vmatpush1.bf16.msra.mxu1 %v11600_v55  ;;  %v619_v16 = vld [vmem:[#allocation5 + $0xa68] sm:$0xff]  ;;  %v11654_v55 = vcombine.low %v606_v39, %v610_v40  ;;  %v11703_v39 = vcombine.high %v654_v31, %v658_v32  ;;  %v662_v40 = vld [vmem:[#allocation5 + $0xbc0] sm:$0xff] }
 0x19f   :  { %3486 = vmatprep.subr.bf16.mxu0 %v11607_v56  ;;  %3650 = vmatprep.subr.bf16.mxu1 %v11609_v61  ;;  %v11656_v56 = vcombine.low %v607_v41, %v611_v45  ;;  %v623_v61 = vld [vmem:[#allocation5 + $0xa88] sm:$0xff]  ;;  %v11665_v62 = vcombine.high %v615_v51, %v619_v16  ;;  %v666_v41 = vld [vmem:[#allocation5 + $0xbe0] sm:$0xff] }
 0x1a2   :  { %3487 = vmatpush1.bf16.msra.mxu0 %v11606_v0  ;;  %3651 = vmatpush1.bf16.msra.mxu1 %v11608_v1  ;;  %v627_v0 = vld [vmem:[#allocation5 + $0xaa8] sm:$0xff]  ;;  %v11662_v1 = vcombine.low %v614_v49, %v618_v50  ;;  %v11711_v50 = vcombine.high %v662_v40, %v666_v41 }
 0x1a3   :  { %3488 = vmatprep.subr.bf16.mxu0 %v11615_v2  ;;  %3652 = vmatprep.subr.bf16.mxu1 %v11617_v6  ;;  %v11664_v2 = vcombine.low %v615_v51, %v619_v16  ;;  %v631_v6 = vld [vmem:[#allocation5 + $0xac8] sm:$0xff]  ;;  %v11673_v7 = vcombine.high %v623_v61, %v627_v0  ;;  %v670_v51 = vld [vmem:[#allocation5 + $0xc00] sm:$0xff] }
 0x1a4   :  { %v671_v16 = vld [vmem:[#allocation5 + $0xc08] sm:$0xff] }
 0x1a6   :  { %3489 = vmatpush1.bf16.msra.mxu0 %v11614_v8  ;;  %3653 = vmatpush1.bf16.msra.mxu1 %v11616_v10  ;;  %v635_v8 = vld [vmem:[#allocation5 + $0xae8] sm:$0xff]  ;;  %v11670_v10 = vcombine.low %v622_v58, %v626_v60  ;;  %v11710_v58 = vcombine.low %v662_v40, %v666_v41 }
 0x1a7   :  { %3490 = vmatprep.subr.bf16.mxu0 %v11623_v11  ;;  %3654 = vmatprep.subr.bf16.mxu1 %v11625_v15  ;;  %v11672_v11 = vcombine.low %v623_v61, %v627_v0  ;;  %v639_v15 = vld [vmem:[#allocation5 + $0xb08] sm:$0xff]  ;;  %v11681_v17 = vcombine.high %v631_v6, %v635_v8  ;;  %v678_v61 = vld [vmem:[#allocation5 + $0xc40] sm:$0xff] }
 0x1a8   :  { %v679_v0 = vld [vmem:[#allocation5 + $0xc48] sm:$0xff] }
 0x1a9   :  { %v715_v40 = vld [vmem:[#allocation5 + $0xd68] sm:$0xff] }
 0x1aa   :  { %3491 = vmatpush1.bf16.msra.mxu0 %v11622_v18  ;;  %3655 = vmatpush1.bf16.msra.mxu1 %v11624_v19  ;;  %v643_v18 = vld [vmem:[#allocation5 + $0xb28] sm:$0xff]  ;;  %v11678_v19 = vcombine.low %v630_v4, %v634_v5  ;;  %v14197_v4 = vpack.c.bf16 %v14174_v33, %v14174_v33 }
 0x1ab   :  { %3492 = vmatprep.subr.bf16.mxu0 %v11631_v59  ;;  %3656 = vmatprep.subr.bf16.mxu1 %v11633_v24  ;;  %v11680_v59 = vcombine.low %v631_v6, %v635_v8  ;;  %v647_v24 = vld [vmem:[#allocation5 + $0xb48] sm:$0xff]  ;;  %v11689_v26 = vcombine.high %v639_v15, %v643_v18  ;;  %v686_v8 = vld [vmem:[#allocation5 + $0xc80] sm:$0xff] }
 0x1ae   :  { %3493 = vmatpush1.bf16.msra.mxu0 %v11630_v27  ;;  %3657 = vmatpush1.bf16.msra.mxu1 %v11632_v28  ;;  %v651_v27 = vld [vmem:[#allocation5 + $0xb68] sm:$0xff]  ;;  %v11686_v28 = vcombine.low %v638_v13, %v642_v14 }
 0x1af   :  { %3494 = vmatprep.subr.bf16.mxu0 %v11639_v29  ;;  %3658 = vmatprep.subr.bf16.mxu1 %v11641_v34  ;;  %v11688_v29 = vcombine.low %v639_v15, %v643_v18  ;;  %v655_v34 = vld [vmem:[#allocation5 + $0xb88] sm:$0xff]  ;;  %v11697_v35 = vcombine.high %v647_v24, %v651_v27  ;;  %v694_v18 = vld [vmem:[#allocation5 + $0xcc0] sm:$0xff] }
 0x1b0   :  { %v691_v13 = vld [vmem:[#allocation5 + $0xca8] sm:$0xff] }
 0x1b2   :  { %3495 = vmatpush1.bf16.msra.mxu0 %v11638_v63  ;;  %3659 = vmatpush1.bf16.msra.mxu1 %v11640_v37  ;;  %v659_v63 = vld [vmem:[#allocation5 + $0xba8] sm:$0xff]  ;;  %v11694_v37 = vcombine.low %v646_v21, %v650_v22 }
 0x1b3   :  { %3496 = vmatprep.subr.bf16.mxu0 %v11647_v38  ;;  %3660 = vmatprep.subr.bf16.mxu1 %v11649_v42  ;;  %v11696_v38 = vcombine.low %v647_v24, %v651_v27  ;;  %v663_v42 = vld [vmem:[#allocation5 + $0xbc8] sm:$0xff]  ;;  %v11705_v45 = vcombine.high %v655_v34, %v659_v63  ;;  %v11704_v49 = vcombine.low %v655_v34, %v659_v63  ;;  %v702_v27 = vld [vmem:[#allocation5 + $0xd00] sm:$0xff] }
 0x1b4   :  { %v699_v21 = vld [vmem:[#allocation5 + $0xce8] sm:$0xff]  ;;  %v710_v63 = vld [vmem:[#allocation5 + $0xd40] sm:$0xff] }
 0x1b6   :  { %3497 = vmatpush1.bf16.msra.mxu0 %v11646_v46  ;;  %3661 = vmatpush1.bf16.msra.mxu1 %v11648_v47  ;;  %v667_v46 = vld [vmem:[#allocation5 + $0xbe8] sm:$0xff]  ;;  %v253_v47 = vcombine.high %v14170_v23, %v14170_v23 }
 0x1b7   :  { %3498 = vmatprep.subr.bf16.mxu0 %v11655_v48  ;;  %3662 = vmatprep.subr.bf16.mxu1 %v11657_v52  ;;  %v11702_v48 = vcombine.low %v654_v31, %v658_v32  ;;  %v674_v52 = vld [vmem:[#allocation5 + $0xc20] sm:$0xff]  ;;  %v11712_v23 = vcombine.low %v663_v42, %v667_v46  ;;  %v707_v31 = vld [vmem:[#allocation5 + $0xd28] sm:$0xff] }
 0x1b8   :  { %v11719_v60 = vcombine.high %v670_v51, %v674_v52  ;;  %v11718_v5 = vcombine.low %v670_v51, %v674_v52 }
 0x1ba   :  { %3499 = vmatpush1.bf16.msra.mxu0 %v11654_v55  ;;  %3663 = vmatpush1.bf16.msra.mxu1 %v11656_v56  ;;  %v11713_v55 = vcombine.high %v663_v42, %v667_v46  ;;  %v675_v56 = vld [vmem:[#allocation5 + $0xc28] sm:$0xff]  ;;  %v718_v46 = vld [vmem:[#allocation5 + $0xd80] sm:$0xff] }
 0x1bb   :  { %3500 = vmatprep.subr.bf16.mxu0 %v11663_v57  ;;  %3664 = vmatprep.subr.bf16.mxu1 %v11665_v62  ;;  %v14191_v57 = vrot.slane %v253_v47, %v14133_v53  ;;  %v682_v62 = vld [vmem:[#allocation5 + $0xc60] sm:$0xff]  ;;  %v11720_v6 = vcombine.low %v671_v16, %v675_v56 }
 0x1bc   :  { %v11726_v33 = vcombine.low %v678_v61, %v682_v62  ;;  %v722_v47 = vld [vmem:[#allocation5 + $0xda0] sm:$0xff] }
 0x1be   :  { %3501 = vmatpush1.bf16.msra.mxu0 %v11662_v1  ;;  %3665 = vmatpush1.bf16.msra.mxu1 %v11664_v2  ;;  %v11721_v1 = vcombine.high %v671_v16, %v675_v56  ;;  %v683_v2 = vld [vmem:[#allocation5 + $0xc68] sm:$0xff]  ;;  %v11767_v16 = vcombine.high %v718_v46, %v722_v47  ;;  %v730_v56 = vld [vmem:[#allocation5 + $0xde0] sm:$0xff] }
 0x1bf   :  { %3502 = vmatprep.subr.bf16.mxu0 %v11671_v3  ;;  %3666 = vmatprep.subr.bf16.mxu1 %v11673_v7  ;;  %v269_v3 = vcombine.high %v14191_v57, %v14191_v57  ;;  %v11727_v7 = vcombine.high %v678_v61, %v682_v62  ;;  %v11728_v15 = vcombine.low %v679_v0, %v683_v2 }
 0x1c0   :  { %v11766_v61 = vcombine.low %v718_v46, %v722_v47 }
 0x1c1   :  { %v14199_v14 = vpack.c.bf16 %v269_v3, %v269_v3  ;;  %v735_v3 = vld [vmem:[#allocation5 + $0xe08] sm:$0xff] }
 0x1c2   :  { %3503 = vmatpush1.bf16.msra.mxu0 %v11670_v10  ;;  %3667 = vmatpush1.bf16.msra.mxu1 %v11672_v11  ;;  %v690_v10 = vld [vmem:[#allocation5 + $0xca0] sm:$0xff]  ;;  %v687_v11 = vld [vmem:[#allocation5 + $0xc88] sm:$0xff] }
 0x1c3   :  { %3504 = vmatprep.subr.bf16.mxu0 %v11679_v12  ;;  %3668 = vmatprep.subr.bf16.mxu1 %v11681_v17  ;;  %v11729_v12 = vcombine.high %v679_v0, %v683_v2  ;;  %v11735_v17 = vcombine.high %v686_v8, %v690_v10  ;;  %v11734_v22 = vcombine.low %v686_v8, %v690_v10  ;;  %v738_v2 = vld [vmem:[#allocation5 + $0xe20] sm:$0xff] }
 0x1c4   :  { %v11736_v24 = vcombine.low %v687_v11, %v691_v13 }
 0x1c6   :  { %3505 = vmatpush1.bf16.msra.mxu0 %v11678_v19  ;;  %3669 = vmatpush1.bf16.msra.mxu1 %v11680_v59  ;;  %v698_v19 = vld [vmem:[#allocation5 + $0xce0] sm:$0xff]  ;;  %v695_v59 = vld [vmem:[#allocation5 + $0xcc8] sm:$0xff] }
 0x1c7   :  { %3506 = vmatprep.subr.bf16.mxu0 %v11687_v20  ;;  %3670 = vmatprep.subr.bf16.mxu1 %v11689_v26  ;;  %v11737_v20 = vcombine.high %v687_v11, %v691_v13  ;;  %v11743_v26 = vcombine.high %v694_v18, %v698_v19  ;;  %v11742_v32 = vcombine.low %v694_v18, %v698_v19  ;;  %v742_v11 = vld [vmem:[#allocation5 + $0xe40] sm:$0xff]  ;;  %v743_v13 = vld [vmem:[#allocation5 + $0xe48] sm:$0xff] }
 0x1c8   :  { %v11744_v34 = vcombine.low %v695_v59, %v699_v21 }
 0x1ca   :  { %3507 = vmatpush1.bf16.msra.mxu0 %v11686_v28  ;;  %3671 = vmatpush1.bf16.msra.mxu1 %v11688_v29  ;;  %v706_v28 = vld [vmem:[#allocation5 + $0xd20] sm:$0xff]  ;;  %v703_v29 = vld [vmem:[#allocation5 + $0xd08] sm:$0xff] }
 0x1cb   :  { %3508 = vmatprep.subr.bf16.mxu0 %v11695_v30  ;;  %3672 = vmatprep.subr.bf16.mxu1 %v11697_v35  ;;  %v11745_v30 = vcombine.high %v695_v59, %v699_v21  ;;  %v11751_v35 = vcombine.high %v702_v27, %v706_v28  ;;  %v11750_v41 = vcombine.low %v702_v27, %v706_v28  ;;  %v750_v59 = vld [vmem:[#allocation5 + $0xe80] sm:$0xff] }
 0x1cc   :  { %v11752_v42 = vcombine.low %v703_v29, %v707_v31  ;;  %v754_v21 = vld [vmem:[#allocation5 + $0xea0] sm:$0xff] }
 0x1cd   :  { %v11799_v28 = vcombine.high %v750_v59, %v754_v21 }
 0x1ce   :  { %3509 = vmatpush1.bf16.msra.mxu0 %v11694_v37  ;;  %3673 = vmatpush1.bf16.msra.mxu1 %v11696_v38  ;;  %v714_v37 = vld [vmem:[#allocation5 + $0xd60] sm:$0xff]  ;;  %v711_v38 = vld [vmem:[#allocation5 + $0xd48] sm:$0xff] }
 0x1cf   :  { %3510 = vmatprep.subr.bf16.mxu0 %v11703_v39  ;;  %3674 = vmatprep.subr.bf16.mxu1 %v11705_v45  ;;  %v11753_v39 = vcombine.high %v703_v29, %v707_v31  ;;  %v11759_v45 = vcombine.high %v710_v63, %v714_v37  ;;  %v11758_v51 = vcombine.low %v710_v63, %v714_v37  ;;  %v762_v31 = vld [vmem:[#allocation5 + $0xee0] sm:$0xff] }
 0x1d0   :  { %v11760_v52 = vcombine.low %v711_v38, %v715_v40 }
 0x1d2   :  { %3511 = vmatpush1.bf16.msra.mxu0 %v11702_v48  ;;  %3675 = vmatpush1.bf16.msra.mxu1 %v11704_v49  ;;  %v719_v48 = vld [vmem:[#allocation5 + $0xd88] sm:$0xff]  ;;  %v11761_v49 = vcombine.high %v711_v38, %v715_v40  ;;  %v770_v40 = vld [vmem:[#allocation5 + $0xf20] sm:$0xff] }
 0x1d3   :  { %3512 = vmatprep.subr.bf16.mxu0 %v11711_v50  ;;  %3676 = vmatprep.subr.bf16.mxu1 %v11713_v55  ;;  %v723_v50 = vld [vmem:[#allocation5 + $0xda8] sm:$0xff]  ;;  %v726_v55 = vld [vmem:[#allocation5 + $0xdc0] sm:$0xff] }
 0x1d4   :  { %v11768_v62 = vcombine.low %v719_v48, %v723_v50  ;;  %v11775_v0 = vcombine.high %v726_v55, %v730_v56 }
 0x1d6   :  { %3513 = vmatpush1.bf16.msra.mxu0 %v11710_v58  ;;  %3677 = vmatpush1.bf16.msra.mxu1 %v11712_v23  ;;  %v727_v58 = vld [vmem:[#allocation5 + $0xdc8] sm:$0xff]  ;;  %v11769_v23 = vcombine.high %v719_v48, %v723_v50  ;;  %v778_v50 = vld [vmem:[#allocation5 + $0xf60] sm:$0xff] }
 0x1d7   :  { %3523 = vmatprep.subr.bf16.mxu0 %v11719_v60  ;;  %3687 = vmatprep.subr.bf16.mxu1 %v11721_v1  ;;  %v731_v60 = vld [vmem:[#allocation5 + $0xde8] sm:$0xff]  ;;  %v734_v1 = vld [vmem:[#allocation5 + $0xe00] sm:$0xff] }
 0x1d8   :  { %v11776_v8 = vcombine.low %v727_v58, %v731_v60  ;;  %v11783_v10 = vcombine.high %v734_v1, %v738_v2 }
 0x1d9   :  { %3515 = vmatmul.mubr.bf16.vlgmr.msra.gmra.mrb[0].mxu0 %v14197_v4  ;;  %3679 = vmatmul.mubr.bf16.vlgmr.msra.gmra.mrb[0].mxu1 %v14197_v4 }
 0x1da   :  { %3524 = vmatpush1.bf16.msra.mxu0 %v11718_v5  ;;  %3688 = vmatpush1.bf16.msra.mxu1 %v11720_v6  ;;  %v11777_v5 = vcombine.high %v727_v58, %v731_v60  ;;  %v739_v6 = vld [vmem:[#allocation5 + $0xe28] sm:$0xff]  ;;  %v786_v60 = vld [vmem:[#allocation5 + $0xfa0] sm:$0xff] }
 0x1db   :  { %3525 = vmatprep.subr.bf16.mxu0 %v11727_v7  ;;  %3689 = vmatprep.subr.bf16.mxu1 %v11729_v12  ;;  %v11774_v7 = vcombine.low %v726_v55, %v730_v56  ;;  %v746_v12 = vld [vmem:[#allocation5 + $0xe60] sm:$0xff]  ;;  %v11784_v18 = vcombine.low %v735_v3, %v739_v6 }
 0x1dc   :  { %3555 = vmatprep.mubr.bf16.mxu0 %v14199_v14  ;;  %3719 = vmatprep.mubr.bf16.mxu1 %v14199_v14  ;;  %v11791_v19 = vcombine.high %v742_v11, %v746_v12 }
 0x1de   :  { %3526 = vmatpush1.bf16.msra.mxu0 %v11726_v33  ;;  %3690 = vmatpush1.bf16.msra.mxu1 %v11728_v15  ;;  %v11785_v33 = vcombine.high %v735_v3, %v739_v6  ;;  %v747_v15 = vld [vmem:[#allocation5 + $0xe68] sm:$0xff]  ;;  %v794_v6 = vld [vmem:[#allocation5 + $0xfe0] sm:$0xff] }
 0x1df   :  { %3527 = vmatprep.subr.bf16.mxu0 %v11735_v17  ;;  %3691 = vmatprep.subr.bf16.mxu1 %v11737_v20  ;;  %v11782_v17 = vcombine.low %v734_v1, %v738_v2  ;;  %v11793_v20 = vcombine.high %v743_v13, %v747_v15  ;;  %v11792_v27 = vcombine.low %v743_v13, %v747_v15  ;;  %v292_v15 = vld [vmem:[#allocation5 + $0x30] sm:$0xff] }
 0x1e2   :  { %3528 = vmatpush1.bf16.msra.mxu0 %v11734_v22  ;;  %3692 = vmatpush1.bf16.msra.mxu1 %v11736_v24  ;;  %v751_v22 = vld [vmem:[#allocation5 + $0xe88] sm:$0xff] }
 0x1e3   :  { %3529 = vmatprep.subr.bf16.mxu0 %v11743_v26  ;;  %3693 = vmatprep.subr.bf16.mxu1 %v11745_v30  ;;  %v755_v24 = vld [vmem:[#allocation5 + $0xea8] sm:$0xff]  ;;  %v11790_v26 = vcombine.low %v742_v11, %v746_v12  ;;  %v758_v30 = vld [vmem:[#allocation5 + $0xec0] sm:$0xff] }
 0x1e4   :  { %v11801_v29 = vcombine.high %v751_v22, %v755_v24  ;;  %v11800_v63 = vcombine.low %v751_v22, %v755_v24  ;;  %v11807_v37 = vcombine.high %v758_v30, %v762_v31  ;;  %v296_v22 = vld [vmem:[#allocation5 + $0x50] sm:$0xff] }
 0x1e5   :  { %v300_v24 = vld [vmem:[#allocation5 + $0x70] sm:$0xff] }
 0x1e6   :  { %3530 = vmatpush1.bf16.msra.mxu0 %v11742_v32  ;;  %3694 = vmatpush1.bf16.msra.mxu1 %v11744_v34  ;;  %v759_v32 = vld [vmem:[#allocation5 + $0xec8] sm:$0xff] }
 0x1e7   :  { %3531 = vmatprep.subr.bf16.mxu0 %v11751_v35  ;;  %3695 = vmatprep.subr.bf16.mxu1 %v11753_v39  ;;  %v763_v34 = vld [vmem:[#allocation5 + $0xee8] sm:$0xff]  ;;  %v11798_v35 = vcombine.low %v750_v59, %v754_v21  ;;  %v766_v39 = vld [vmem:[#allocation5 + $0xf00] sm:$0xff] }
 0x1e8   :  { %v11809_v38 = vcombine.high %v759_v32, %v763_v34  ;;  %v11808_v46 = vcombine.low %v759_v32, %v763_v34  ;;  %v11815_v47 = vcombine.high %v766_v39, %v770_v40  ;;  %v304_v34 = vld [vmem:[#allocation5 + $0x90] sm:$0xff] }
 0x1ea   :  { %3532 = vmatpush1.bf16.msra.mxu0 %v11750_v41  ;;  %3696 = vmatpush1.bf16.msra.mxu1 %v11752_v42  ;;  %v767_v41 = vld [vmem:[#allocation5 + $0xf08] sm:$0xff] }
 0x1eb   :  { %3533 = vmatprep.subr.bf16.mxu0 %v11759_v45  ;;  %3697 = vmatprep.subr.bf16.mxu1 %v11761_v49  ;;  %v771_v42 = vld [vmem:[#allocation5 + $0xf28] sm:$0xff]  ;;  %v11806_v45 = vcombine.low %v758_v30, %v762_v31  ;;  %v774_v49 = vld [vmem:[#allocation5 + $0xf40] sm:$0xff]  ;;  %v11347_v31 = vcombine.high %v296_v22, %v300_v24 }
 0x1ec   :  { %v11817_v48 = vcombine.high %v767_v41, %v771_v42  ;;  %v11816_v55 = vcombine.low %v767_v41, %v771_v42  ;;  %v11823_v56 = vcombine.high %v774_v49, %v778_v50  ;;  %v312_v41 = vld [vmem:[#allocation5 + $0xd0] sm:$0xff] }
 0x1ed   :  { %v316_v42 = vld [vmem:[#allocation5 + $0xf0] sm:$0xff] }
 0x1ee   :  { %3534 = vmatpush1.bf16.msra.mxu0 %v11758_v51  ;;  %3698 = vmatpush1.bf16.msra.mxu1 %v11760_v52  ;;  %v775_v51 = vld [vmem:[#allocation5 + $0xf48] sm:$0xff] }
 0x1ef   :  { %3535 = vmatprep.subr.bf16.mxu0 %v11767_v16  ;;  %3699 = vmatprep.subr.bf16.mxu1 %v11769_v23  ;;  %v779_v52 = vld [vmem:[#allocation5 + $0xf68] sm:$0xff]  ;;  %v11814_v16 = vcombine.low %v766_v39, %v770_v40  ;;  %v782_v23 = vld [vmem:[#allocation5 + $0xf80] sm:$0xff] }
 0x1f0   :  { %v11825_v58 = vcombine.high %v775_v51, %v779_v52  ;;  %v11824_v1 = vcombine.low %v775_v51, %v779_v52  ;;  %v11831_v2 = vcombine.high %v782_v23, %v786_v60  ;;  %v320_v51 = vld [vmem:[#allocation5 + $0x110] sm:$0xff] }
 0x1f1   :  { %v324_v52 = vld [vmem:[#allocation5 + $0x130] sm:$0xff] }
 0x1f2   :  { %3536 = vmatpush1.bf16.msra.mxu0 %v11766_v61  ;;  %3700 = vmatpush1.bf16.msra.mxu1 %v11768_v62  ;;  %v783_v61 = vld [vmem:[#allocation5 + $0xf88] sm:$0xff] }
 0x1f3   :  { %3537 = vmatprep.subr.bf16.mxu0 %v11775_v0  ;;  %3701 = vmatprep.subr.bf16.mxu1 %v11777_v5  ;;  %v787_v62 = vld [vmem:[#allocation5 + $0xfa8] sm:$0xff]  ;;  %v11822_v0 = vcombine.low %v774_v49, %v778_v50  ;;  %v790_v5 = vld [vmem:[#allocation5 + $0xfc0] sm:$0xff]  ;;  %v11363_v49 = vcombine.high %v312_v41, %v316_v42 }
 0x1f4   :  { %v11833_v3 = vcombine.high %v783_v61, %v787_v62  ;;  %v11832_v11 = vcombine.low %v783_v61, %v787_v62  ;;  %v11839_v12 = vcombine.high %v790_v5, %v794_v6  ;;  %v332_v61 = vld [vmem:[#allocation5 + $0x170] sm:$0xff]  ;;  %v329_v62 = vld [vmem:[#allocation5 + $0x158] sm:$0xff] }
 0x1f6   :  { %3538 = vmatpush1.bf16.msra.mxu0 %v11774_v7  ;;  %3702 = vmatpush1.bf16.msra.mxu1 %v11776_v8  ;;  %v791_v7 = vld [vmem:[#allocation5 + $0xfc8] sm:$0xff] }
 0x1f7   :  { %3539 = vmatprep.subr.bf16.mxu0 %v11783_v10  ;;  %3703 = vmatprep.subr.bf16.mxu1 %v11785_v33  ;;  %v795_v8 = vld [vmem:[#allocation5 + $0xfe8] sm:$0xff]  ;;  %v11830_v10 = vcombine.low %v782_v23, %v786_v60  ;;  %v288_v33 = vld [vmem:[#allocation5 + $0x10] sm:$0xff]  ;;  %v11371_v23 = vcombine.high %v320_v51, %v324_v52 }
 0x1f8   :  { %v11841_v13 = vcombine.high %v791_v7, %v795_v8  ;;  %v11840_v59 = vcombine.low %v791_v7, %v795_v8  ;;  %v328_v60 = vld [vmem:[#allocation5 + $0x150] sm:$0xff]  ;;  %v337_v8 = vld [vmem:[#allocation5 + $0x198] sm:$0xff] }
 0x1f9   :  { %v340_v7 = vld [vmem:[#allocation5 + $0x1b0] sm:$0xff] }
 0x1fa   :  { %3540 = vmatpush1.bf16.msra.mxu0 %v11782_v17  ;;  %3704 = vmatpush1.bf16.msra.mxu1 %v11784_v18  ;;  %v289_v17 = vld [vmem:[#allocation5 + $0x18] sm:$0xff] }
 0x1fb   :  { %3541 = vmatprep.subr.bf16.mxu0 %v11791_v19  ;;  %3705 = vmatprep.subr.bf16.mxu1 %v11793_v20  ;;  %v293_v18 = vld [vmem:[#allocation5 + $0x38] sm:$0xff]  ;;  %v11838_v19 = vcombine.low %v790_v5, %v794_v6  ;;  %v11339_v20 = vcombine.high %v288_v33, %v292_v15  ;;  %v336_v6 = vld [vmem:[#allocation5 + $0x190] sm:$0xff] }
 0x1fc   :  { %v11341_v21 = vcombine.high %v289_v17, %v293_v18  ;;  %v11340_v30 = vcombine.low %v289_v17, %v293_v18  ;;  %v348_v17 = vld [vmem:[#allocation5 + $0x1f0] sm:$0xff]  ;;  %v345_v18 = vld [vmem:[#allocation5 + $0x1d8] sm:$0xff] }
 0x1fe   :  { %3542 = vmatpush1.bf16.msra.mxu0 %v11790_v26  ;;  %3706 = vmatpush1.bf16.msra.mxu1 %v11792_v27  ;;  %v14207_v26 = vpack.c.bf16 %v14191_v57, %v14191_v57  ;;  %v297_v27 = vld [vmem:[#allocation5 + $0x58] sm:$0xff]  ;;  %v11346_v57 = vcombine.low %v296_v22, %v300_v24  ;;  %v352_v24 = vld [vmem:[#allocation5 + $0x210] sm:$0xff] }
 0x1ff   :  { %3543 = vmatprep.subr.bf16.mxu0 %v11799_v28  ;;  %3707 = vmatprep.subr.bf16.mxu1 %v11801_v29  ;;  %v301_v28 = vld [vmem:[#allocation5 + $0x78] sm:$0xff]  ;;  %v11338_v29 = vcombine.low %v288_v33, %v292_v15  ;;  %v344_v15 = vld [vmem:[#allocation5 + $0x1d0] sm:$0xff] }
 0x200   :  { %v11349_v32 = vcombine.high %v297_v27, %v301_v28 }
 0x202   :  { %3544 = vmatpush1.bf16.msra.mxu0 %v11798_v35  ;;  %3708 = vmatpush1.bf16.msra.mxu1 %v11800_v63  ;;  %v308_v35 = vld [vmem:[#allocation5 + $0xb0] sm:$0xff]  ;;  %v305_v63 = vld [vmem:[#allocation5 + $0x98] sm:$0xff] }
 0x203   :  { %3545 = vmatprep.subr.bf16.mxu0 %v11807_v37  ;;  %3709 = vmatprep.subr.bf16.mxu1 %v11809_v38  ;;  %v309_v37 = vld [vmem:[#allocation5 + $0xb8] sm:$0xff]  ;;  %v11348_v38 = vcombine.low %v297_v27, %v301_v28  ;;  %v11355_v39 = vcombine.high %v304_v34, %v308_v35  ;;  %v356_v27 = vld [vmem:[#allocation5 + $0x230] sm:$0xff] }
 0x204   :  { %v11357_v40 = vcombine.high %v305_v63, %v309_v37  ;;  %v353_v28 = vld [vmem:[#allocation5 + $0x218] sm:$0xff] }
 0x206   :  { %3546 = vmatpush1.bf16.msra.mxu0 %v11806_v45  ;;  %3710 = vmatpush1.bf16.msra.mxu1 %v11808_v46  ;;  %v313_v45 = vld [vmem:[#allocation5 + $0xd8] sm:$0xff] }
 0x207   :  { %3547 = vmatprep.subr.bf16.mxu0 %v11815_v47  ;;  %3711 = vmatprep.subr.bf16.mxu1 %v11817_v48  ;;  %v317_v46 = vld [vmem:[#allocation5 + $0xf8] sm:$0xff]  ;;  %v11354_v47 = vcombine.low %v304_v34, %v308_v35  ;;  %v11356_v48 = vcombine.low %v305_v63, %v309_v37  ;;  %v360_v35 = vld [vmem:[#allocation5 + $0x250] sm:$0xff] }
 0x208   :  { %v11365_v50 = vcombine.high %v313_v45, %v317_v46  ;;  %v364_v63 = vld [vmem:[#allocation5 + $0x270] sm:$0xff]  ;;  %v361_v37 = vld [vmem:[#allocation5 + $0x258] sm:$0xff] }
 0x20a   :  { %3548 = vmatpush1.bf16.msra.mxu0 %v11814_v16  ;;  %3712 = vmatpush1.bf16.msra.mxu1 %v11816_v55  ;;  %v321_v16 = vld [vmem:[#allocation5 + $0x118] sm:$0xff] }
 0x20b   :  { %3549 = vmatprep.subr.bf16.mxu0 %v11823_v56  ;;  %3713 = vmatprep.subr.bf16.mxu1 %v11825_v58  ;;  %v325_v55 = vld [vmem:[#allocation5 + $0x138] sm:$0xff]  ;;  %v11362_v56 = vcombine.low %v312_v41, %v316_v42  ;;  %v11364_v58 = vcombine.low %v313_v45, %v317_v46  ;;  %v368_v42 = vld [vmem:[#allocation5 + $0x290] sm:$0xff] }
 0x20c   :  { %v372_v45 = vld [vmem:[#allocation5 + $0x2b0] sm:$0xff]  ;;  %v369_v46 = vld [vmem:[#allocation5 + $0x298] sm:$0xff] }
 0x20e   :  { %3550 = vmatpush1.bf16.msra.mxu0 %v11822_v0  ;;  %3714 = vmatpush1.bf16.msra.mxu1 %v11824_v1  ;;  %v333_v0 = vld [vmem:[#allocation5 + $0x178] sm:$0xff]  ;;  %v11370_v1 = vcombine.low %v320_v51, %v324_v52  ;;  %v376_v52 = vld [vmem:[#allocation5 + $0x2d0] sm:$0xff] }
 0x20f   :  { %3551 = vmatprep.subr.bf16.mxu0 %v11831_v2  ;;  %3715 = vmatprep.subr.bf16.mxu1 %v11833_v3  ;;  %v11372_v2 = vcombine.low %v321_v16, %v325_v55  ;;  %v11379_v3 = vcombine.high %v328_v60, %v332_v61  ;;  %v11381_v5 = vcombine.high %v329_v62, %v333_v0 }
 0x212   :  { %3552 = vmatpush1.bf16.msra.mxu0 %v11830_v10  ;;  %3716 = vmatpush1.bf16.msra.mxu1 %v11832_v11  ;;  %v341_v10 = vld [vmem:[#allocation5 + $0x1b8] sm:$0xff]  ;;  %v11378_v11 = vcombine.low %v328_v60, %v332_v61  ;;  %v384_v61 = vld [vmem:[#allocation5 + $0x310] sm:$0xff] }
 0x213   :  { %3553 = vmatprep.subr.bf16.mxu0 %v11839_v12  ;;  %3717 = vmatprep.subr.bf16.mxu1 %v11841_v13  ;;  %v11380_v12 = vcombine.low %v329_v62, %v333_v0  ;;  %v11387_v13 = vcombine.high %v336_v6, %v340_v7  ;;  %v11389_v33 = vcombine.high %v337_v8, %v341_v10  ;;  %v388_v62 = vld [vmem:[#allocation5 + $0x330] sm:$0xff]  ;;  %v385_v0 = vld [vmem:[#allocation5 + $0x318] sm:$0xff] }
 0x216   :  { %3554 = vmatpush1.bf16.msra.mxu0 %v11838_v19  ;;  %3718 = vmatpush1.bf16.msra.mxu1 %v11840_v59  ;;  %v349_v19 = vld [vmem:[#allocation5 + $0x1f8] sm:$0xff]  ;;  %v11386_v59 = vcombine.low %v336_v6, %v340_v7  ;;  %v392_v7 = vld [vmem:[#allocation5 + $0x350] sm:$0xff] }
 0x217   :  { %3728 = vmatprep.subr.bf16.mxu0 %v11339_v20  ;;  %3892 = vmatprep.subr.bf16.mxu1 %v11341_v21  ;;  %v11388_v20 = vcombine.low %v337_v8, %v341_v10  ;;  %v11395_v21 = vcombine.high %v344_v15, %v348_v17  ;;  %v11397_v22 = vcombine.high %v345_v18, %v349_v19  ;;  %v396_v8 = vld [vmem:[#allocation5 + $0x370] sm:$0xff]  ;;  %v393_v10 = vld [vmem:[#allocation5 + $0x358] sm:$0xff] }
 0x219   :  { %3556 = vmatmul.mubr.bf16.vlgmr.msra.gmra.mrb[0].mxu0 %v14207_v26  ;;  %3720 = vmatmul.mubr.bf16.vlgmr.msra.gmra.mrb[0].mxu1 %v14207_v26 }
 0x21a   :  { %3729 = vmatpush1.bf16.msra.mxu0 %v11338_v29  ;;  %3893 = vmatpush1.bf16.msra.mxu1 %v11340_v30  ;;  %v357_v29 = vld [vmem:[#allocation5 + $0x238] sm:$0xff]  ;;  %v11394_v30 = vcombine.low %v344_v15, %v348_v17  ;;  %v400_v17 = vld [vmem:[#allocation5 + $0x390] sm:$0xff] }
 0x21b   :  { %3730 = vmatprep.subr.bf16.mxu0 %v11347_v31  ;;  %3894 = vmatprep.subr.bf16.mxu1 %v11349_v32  ;;  %v11396_v31 = vcombine.low %v345_v18, %v349_v19  ;;  %v11403_v32 = vcombine.high %v352_v24, %v356_v27  ;;  %v11405_v34 = vcombine.high %v353_v28, %v357_v29  ;;  %v404_v18 = vld [vmem:[#allocation5 + $0x3b0] sm:$0xff]  ;;  %v401_v19 = vld [vmem:[#allocation5 + $0x398] sm:$0xff] }
 0x21c   :  { %3760 = vmatprep.mubr.bf16.mxu0 %v14146_v9  ;;  %3924 = vmatprep.mubr.bf16.mxu1 %v14146_v9  ;;  %v11373_v9 = vcombine.high %v321_v16, %v325_v55  ;;  %v380_v16 = vld [vmem:[#allocation5 + $0x2f0] sm:$0xff]  ;;  %v377_v55 = vld [vmem:[#allocation5 + $0x2d8] sm:$0xff] }
 0x21e   :  { %3731 = vmatpush1.bf16.msra.mxu0 %v11346_v57  ;;  %3895 = vmatpush1.bf16.msra.mxu1 %v11348_v38  ;;  %v365_v57 = vld [vmem:[#allocation5 + $0x278] sm:$0xff]  ;;  %v11402_v38 = vcombine.low %v352_v24, %v356_v27  ;;  %v408_v27 = vld [vmem:[#allocation5 + $0x3d0] sm:$0xff] }
 0x21f   :  { %3732 = vmatprep.subr.bf16.mxu0 %v11355_v39  ;;  %3896 = vmatprep.subr.bf16.mxu1 %v11357_v40  ;;  %v11404_v39 = vcombine.low %v353_v28, %v357_v29  ;;  %v11411_v40 = vcombine.high %v360_v35, %v364_v63  ;;  %v11413_v41 = vcombine.high %v361_v37, %v365_v57  ;;  %v412_v28 = vld [vmem:[#allocation5 + $0x3f0] sm:$0xff]  ;;  %v409_v29 = vld [vmem:[#allocation5 + $0x3d8] sm:$0xff] }
 0x222   :  { %3733 = vmatpush1.bf16.msra.mxu0 %v11354_v47  ;;  %3897 = vmatpush1.bf16.msra.mxu1 %v11356_v48  ;;  %v373_v47 = vld [vmem:[#allocation5 + $0x2b8] sm:$0xff]  ;;  %v11410_v48 = vcombine.low %v360_v35, %v364_v63  ;;  %v416_v63 = vld [vmem:[#allocation5 + $0x410] sm:$0xff] }
 0x223   :  { %3734 = vmatprep.subr.bf16.mxu0 %v11363_v49  ;;  %3898 = vmatprep.subr.bf16.mxu1 %v11365_v50  ;;  %v11412_v49 = vcombine.low %v361_v37, %v365_v57  ;;  %v11419_v50 = vcombine.high %v368_v42, %v372_v45  ;;  %v11421_v51 = vcombine.high %v369_v46, %v373_v47  ;;  %v420_v37 = vld [vmem:[#allocation5 + $0x430] sm:$0xff]  ;;  %v417_v57 = vld [vmem:[#allocation5 + $0x418] sm:$0xff] }
 0x226   :  { %3735 = vmatpush1.bf16.msra.mxu0 %v11362_v56  ;;  %3899 = vmatpush1.bf16.msra.mxu1 %v11364_v58  ;;  %v381_v56 = vld [vmem:[#allocation5 + $0x2f8] sm:$0xff]  ;;  %v11418_v58 = vcombine.low %v368_v42, %v372_v45  ;;  %v424_v45 = vld [vmem:[#allocation5 + $0x450] sm:$0xff] }
 0x227   :  { %3736 = vmatprep.subr.bf16.mxu0 %v11371_v23  ;;  %3900 = vmatprep.subr.bf16.mxu1 %v11373_v9  ;;  %v11420_v23 = vcombine.low %v369_v46, %v373_v47  ;;  %v11427_v9 = vcombine.high %v376_v52, %v380_v16  ;;  %v11429_v60 = vcombine.high %v377_v55, %v381_v56  ;;  %v428_v46 = vld [vmem:[#allocation5 + $0x470] sm:$0xff]  ;;  %v425_v47 = vld [vmem:[#allocation5 + $0x458] sm:$0xff] }
 0x22a   :  { %3737 = vmatpush1.bf16.msra.mxu0 %v11370_v1  ;;  %3901 = vmatpush1.bf16.msra.mxu1 %v11372_v2  ;;  %v389_v1 = vld [vmem:[#allocation5 + $0x338] sm:$0xff]  ;;  %v11426_v2 = vcombine.low %v376_v52, %v380_v16  ;;  %v432_v16 = vld [vmem:[#allocation5 + $0x490] sm:$0xff] }
 0x22b   :  { %3738 = vmatprep.subr.bf16.mxu0 %v11379_v3  ;;  %3902 = vmatprep.subr.bf16.mxu1 %v11381_v5  ;;  %v11428_v3 = vcombine.low %v377_v55, %v381_v56  ;;  %v11435_v5 = vcombine.high %v384_v61, %v388_v62  ;;  %v11437_v6 = vcombine.high %v385_v0, %v389_v1  ;;  %v436_v55 = vld [vmem:[#allocation5 + $0x4b0] sm:$0xff]  ;;  %v433_v56 = vld [vmem:[#allocation5 + $0x498] sm:$0xff] }
 0x22e   :  { %3739 = vmatpush1.bf16.msra.mxu0 %v11378_v11  ;;  %3903 = vmatpush1.bf16.msra.mxu1 %v11380_v12  ;;  %v397_v11 = vld [vmem:[#allocation5 + $0x378] sm:$0xff]  ;;  %v11434_v12 = vcombine.low %v384_v61, %v388_v62  ;;  %v440_v62 = vld [vmem:[#allocation5 + $0x4d0] sm:$0xff] }
 0x22f   :  { %3740 = vmatprep.subr.bf16.mxu0 %v11387_v13  ;;  %3904 = vmatprep.subr.bf16.mxu1 %v11389_v33  ;;  %v11436_v13 = vcombine.low %v385_v0, %v389_v1  ;;  %v11443_v33 = vcombine.high %v392_v7, %v396_v8  ;;  %v11445_v15 = vcombine.high %v393_v10, %v397_v11  ;;  %v444_v0 = vld [vmem:[#allocation5 + $0x4f0] sm:$0xff]  ;;  %v441_v1 = vld [vmem:[#allocation5 + $0x4d8] sm:$0xff] }
 0x232   :  { %3741 = vmatpush1.bf16.msra.mxu0 %v11386_v59  ;;  %3905 = vmatpush1.bf16.msra.mxu1 %v11388_v20  ;;  %v405_v59 = vld [vmem:[#allocation5 + $0x3b8] sm:$0xff]  ;;  %v11442_v20 = vcombine.low %v392_v7, %v396_v8  ;;  %v448_v7 = vld [vmem:[#allocation5 + $0x510] sm:$0xff] }
 0x233   :  { %3742 = vmatprep.subr.bf16.mxu0 %v11395_v21  ;;  %3906 = vmatprep.subr.bf16.mxu1 %v11397_v22  ;;  %v11444_v21 = vcombine.low %v393_v10, %v397_v11  ;;  %v11451_v22 = vcombine.high %v400_v17, %v404_v18  ;;  %v11453_v24 = vcombine.high %v401_v19, %v405_v59  ;;  %v452_v8 = vld [vmem:[#allocation5 + $0x530] sm:$0xff]  ;;  %v449_v10 = vld [vmem:[#allocation5 + $0x518] sm:$0xff] }
 0x234   :  { %v453_v11 = vld [vmem:[#allocation5 + $0x538] sm:$0xff] }
 0x236   :  { %3743 = vmatpush1.bf16.msra.mxu0 %v11394_v30  ;;  %3907 = vmatpush1.bf16.msra.mxu1 %v11396_v31  ;;  %v413_v30 = vld [vmem:[#allocation5 + $0x3f8] sm:$0xff]  ;;  %v11450_v31 = vcombine.low %v400_v17, %v404_v18  ;;  %v460_v17 = vld [vmem:[#allocation5 + $0x570] sm:$0xff] }
 0x237   :  { %3744 = vmatprep.subr.bf16.mxu0 %v11403_v32  ;;  %3908 = vmatprep.subr.bf16.mxu1 %v11405_v34  ;;  %v11452_v32 = vcombine.low %v401_v19, %v405_v59  ;;  %v11459_v34 = vcombine.high %v408_v27, %v412_v28  ;;  %v11461_v35 = vcombine.high %v409_v29, %v413_v30  ;;  %v457_v18 = vld [vmem:[#allocation5 + $0x558] sm:$0xff] }
 0x238   :  { %v461_v19 = vld [vmem:[#allocation5 + $0x578] sm:$0xff]  ;;  %v11498_v59 = vcombine.low %v448_v7, %v452_v8 }
 0x23a   :  { %3745 = vmatpush1.bf16.msra.mxu0 %v11402_v38  ;;  %3909 = vmatpush1.bf16.msra.mxu1 %v11404_v39  ;;  %v421_v38 = vld [vmem:[#allocation5 + $0x438] sm:$0xff]  ;;  %v11458_v39 = vcombine.low %v408_v27, %v412_v28  ;;  %v468_v27 = vld [vmem:[#allocation5 + $0x5b0] sm:$0xff] }
 0x23b   :  { %3746 = vmatprep.subr.bf16.mxu0 %v11411_v40  ;;  %3910 = vmatprep.subr.bf16.mxu1 %v11413_v41  ;;  %v11460_v40 = vcombine.low %v409_v29, %v413_v30  ;;  %v11467_v41 = vcombine.high %v416_v63, %v420_v37  ;;  %v11469_v42 = vcombine.high %v417_v57, %v421_v38  ;;  %v465_v28 = vld [vmem:[#allocation5 + $0x598] sm:$0xff] }
 0x23c   :  { %v469_v29 = vld [vmem:[#allocation5 + $0x5b8] sm:$0xff] }
 0x23e   :  { %3747 = vmatpush1.bf16.msra.mxu0 %v11410_v48  ;;  %3911 = vmatpush1.bf16.msra.mxu1 %v11412_v49  ;;  %v429_v48 = vld [vmem:[#allocation5 + $0x478] sm:$0xff]  ;;  %v11466_v49 = vcombine.low %v416_v63, %v420_v37  ;;  %v476_v63 = vld [vmem:[#allocation5 + $0x5f0] sm:$0xff] }
 0x23f   :  { %3748 = vmatprep.subr.bf16.mxu0 %v11419_v50  ;;  %3912 = vmatprep.subr.bf16.mxu1 %v11421_v51  ;;  %v11468_v50 = vcombine.low %v417_v57, %v421_v38  ;;  %v11475_v51 = vcombine.high %v424_v45, %v428_v46  ;;  %v11477_v52 = vcombine.high %v425_v47, %v429_v48  ;;  %v473_v37 = vld [vmem:[#allocation5 + $0x5d8] sm:$0xff] }
 0x240   :  { %v477_v57 = vld [vmem:[#allocation5 + $0x5f8] sm:$0xff] }
 0x242   :  { %3749 = vmatpush1.bf16.msra.mxu0 %v11418_v58  ;;  %3913 = vmatpush1.bf16.msra.mxu1 %v11420_v23  ;;  %v437_v58 = vld [vmem:[#allocation5 + $0x4b8] sm:$0xff]  ;;  %v11474_v23 = vcombine.low %v424_v45, %v428_v46  ;;  %v484_v45 = vld [vmem:[#allocation5 + $0x630] sm:$0xff] }
 0x243   :  { %3750 = vmatprep.subr.bf16.mxu0 %v11427_v9  ;;  %3914 = vmatprep.subr.bf16.mxu1 %v11429_v60  ;;  %v11476_v9 = vcombine.low %v425_v47, %v429_v48  ;;  %v11483_v60 = vcombine.high %v432_v16, %v436_v55  ;;  %v11485_v61 = vcombine.high %v433_v56, %v437_v58  ;;  %v481_v46 = vld [vmem:[#allocation5 + $0x618] sm:$0xff] }
 0x244   :  { %v485_v47 = vld [vmem:[#allocation5 + $0x638] sm:$0xff] }
 0x246   :  { %3751 = vmatpush1.bf16.msra.mxu0 %v11426_v2  ;;  %3915 = vmatpush1.bf16.msra.mxu1 %v11428_v3  ;;  %v445_v2 = vld [vmem:[#allocation5 + $0x4f8] sm:$0xff]  ;;  %v11482_v3 = vcombine.low %v432_v16, %v436_v55  ;;  %v492_v16 = vld [vmem:[#allocation5 + $0x670] sm:$0xff] }
 0x247   :  { %3752 = vmatprep.subr.bf16.mxu0 %v11435_v5  ;;  %3916 = vmatprep.subr.bf16.mxu1 %v11437_v6  ;;  %v11491_v5 = vcombine.high %v440_v62, %v444_v0  ;;  %v11493_v6 = vcombine.high %v441_v1, %v445_v2  ;;  %v489_v55 = vld [vmem:[#allocation5 + $0x658] sm:$0xff] }
 0x24a   :  { %3753 = vmatpush1.bf16.msra.mxu0 %v11434_v12  ;;  %3917 = vmatpush1.bf16.msra.mxu1 %v11436_v13  ;;  %v11490_v12 = vcombine.low %v440_v62, %v444_v0  ;;  %v11492_v13 = vcombine.low %v441_v1, %v445_v2  ;;  %v500_v62 = vld [vmem:[#allocation5 + $0x6b0] sm:$0xff]  ;;  %v497_v0 = vld [vmem:[#allocation5 + $0x698] sm:$0xff] }
 0x24b   :  { %3754 = vmatprep.subr.bf16.mxu0 %v11443_v33  ;;  %3918 = vmatprep.subr.bf16.mxu1 %v11445_v15  ;;  %v11499_v33 = vcombine.high %v448_v7, %v452_v8  ;;  %v456_v15 = vld [vmem:[#allocation5 + $0x550] sm:$0xff]  ;;  %v501_v1 = vld [vmem:[#allocation5 + $0x6b8] sm:$0xff] }
 0x24c   :  { %v11506_v30 = vcombine.low %v456_v15, %v460_v17  ;;  %v508_v7 = vld [vmem:[#allocation5 + $0x6f0] sm:$0xff]  ;;  %v505_v8 = vld [vmem:[#allocation5 + $0x6d8] sm:$0xff] }
 0x24e   :  { %3755 = vmatpush1.bf16.msra.mxu0 %v11442_v20  ;;  %3919 = vmatpush1.bf16.msra.mxu1 %v11444_v21  ;;  %v11500_v20 = vcombine.low %v449_v10, %v453_v11  ;;  %v11507_v21 = vcombine.high %v456_v15, %v460_v17  ;;  %v516_v15 = vld [vmem:[#allocation5 + $0x730] sm:$0xff]  ;;  %v513_v17 = vld [vmem:[#allocation5 + $0x718] sm:$0xff] }
 0x24f   :  { %3756 = vmatprep.subr.bf16.mxu0 %v11451_v22  ;;  %3920 = vmatprep.subr.bf16.mxu1 %v11453_v24  ;;  %v11509_v22 = vcombine.high %v457_v18, %v461_v19  ;;  %v464_v24 = vld [vmem:[#allocation5 + $0x590] sm:$0xff] }
 0x250   :  { %v11514_v38 = vcombine.low %v464_v24, %v468_v27 }
 0x252   :  { %3757 = vmatpush1.bf16.msra.mxu0 %v11450_v31  ;;  %3921 = vmatpush1.bf16.msra.mxu1 %v11452_v32  ;;  %v11508_v31 = vcombine.low %v457_v18, %v461_v19  ;;  %v11515_v32 = vcombine.high %v464_v24, %v468_v27  ;;  %v517_v18 = vld [vmem:[#allocation5 + $0x738] sm:$0xff]  ;;  %v524_v24 = vld [vmem:[#allocation5 + $0x770] sm:$0xff] }
 0x253   :  { %3758 = vmatprep.subr.bf16.mxu0 %v11459_v34  ;;  %3922 = vmatprep.subr.bf16.mxu1 %v11461_v35  ;;  %v11517_v34 = vcombine.high %v465_v28, %v469_v29  ;;  %v472_v35 = vld [vmem:[#allocation5 + $0x5d0] sm:$0xff]  ;;  %v521_v27 = vld [vmem:[#allocation5 + $0x758] sm:$0xff] }
 0x254   :  { %v11522_v48 = vcombine.low %v472_v35, %v476_v63 }
 0x256   :  { %3759 = vmatpush1.bf16.msra.mxu0 %v11458_v39  ;;  %3923 = vmatpush1.bf16.msra.mxu1 %v11460_v40  ;;  %v11516_v39 = vcombine.low %v465_v28, %v469_v29  ;;  %v11523_v40 = vcombine.high %v472_v35, %v476_v63  ;;  %v525_v28 = vld [vmem:[#allocation5 + $0x778] sm:$0xff]  ;;  %v532_v35 = vld [vmem:[#allocation5 + $0x7b0] sm:$0xff] }
 0x257   :  { %3769 = vmatprep.subr.bf16.mxu0 %v11467_v41  ;;  %3933 = vmatprep.subr.bf16.mxu1 %v11469_v42  ;;  %v11525_v41 = vcombine.high %v473_v37, %v477_v57  ;;  %v480_v42 = vld [vmem:[#allocation5 + $0x610] sm:$0xff]  ;;  %v529_v63 = vld [vmem:[#allocation5 + $0x798] sm:$0xff] }
 0x259   :  { %3761 = vmatmul.mubr.bf16.vlgmr.msra.gmra.mrb[4].mxu0 %v14159_v25  ;;  %3925 = vmatmul.mubr.bf16.vlgmr.msra.gmra.mrb[4].mxu1 %v14159_v25  ;;  %v11484_v25 = vcombine.low %v433_v56, %v437_v58  ;;  %v493_v56 = vld [vmem:[#allocation5 + $0x678] sm:$0xff]  ;;  %v11530_v58 = vcombine.low %v480_v42, %v484_v45 }
 0x25a   :  { %3770 = vmatpush1.bf16.msra.mxu0 %v11466_v49  ;;  %3934 = vmatpush1.bf16.msra.mxu1 %v11468_v50  ;;  %v11524_v49 = vcombine.low %v473_v37, %v477_v57  ;;  %v11531_v50 = vcombine.high %v480_v42, %v484_v45  ;;  %v533_v37 = vld [vmem:[#allocation5 + $0x7b8] sm:$0xff]  ;;  %v540_v42 = vld [vmem:[#allocation5 + $0x7f0] sm:$0xff] }
 0x25b   :  { %3771 = vmatprep.subr.bf16.mxu0 %v11475_v51  ;;  %3935 = vmatprep.subr.bf16.mxu1 %v11477_v52  ;;  %v11533_v51 = vcombine.high %v481_v46, %v485_v47  ;;  %v488_v52 = vld [vmem:[#allocation5 + $0x650] sm:$0xff]  ;;  %v537_v45 = vld [vmem:[#allocation5 + $0x7d8] sm:$0xff] }
 0x25c   :  { %3801 = vmatprep.mubr.bf16.mxu0 %v14161_v36  ;;  %3965 = vmatprep.mubr.bf16.mxu1 %v14161_v36  ;;  %v11501_v36 = vcombine.high %v449_v10, %v453_v11  ;;  %v11538_v2 = vcombine.low %v488_v52, %v492_v16  ;;  %v509_v10 = vld [vmem:[#allocation5 + $0x6f8] sm:$0xff] }
 0x25e   :  { %3772 = vmatpush1.bf16.msra.mxu0 %v11474_v23  ;;  %3936 = vmatpush1.bf16.msra.mxu1 %v11476_v9  ;;  %v11532_v23 = vcombine.low %v481_v46, %v485_v47  ;;  %v11539_v9 = vcombine.high %v488_v52, %v492_v16  ;;  %v541_v46 = vld [vmem:[#allocation5 + $0x7f8] sm:$0xff]  ;;  %v548_v52 = vld [vmem:[#allocation5 + $0x830] sm:$0xff] }
 0x25f   :  { %3773 = vmatprep.subr.bf16.mxu0 %v11483_v60  ;;  %3937 = vmatprep.subr.bf16.mxu1 %v11485_v61  ;;  %v11541_v60 = vcombine.high %v489_v55, %v493_v56  ;;  %v496_v61 = vld [vmem:[#allocation5 + $0x690] sm:$0xff]  ;;  %v545_v16 = vld [vmem:[#allocation5 + $0x818] sm:$0xff] }
 0x260   :  { %v11546_v11 = vcombine.low %v496_v61, %v500_v62 }
 0x262   :  { %3774 = vmatpush1.bf16.msra.mxu0 %v11482_v3  ;;  %3938 = vmatpush1.bf16.msra.mxu1 %v11484_v25  ;;  %v11540_v3 = vcombine.low %v489_v55, %v493_v56  ;;  %v11547_v25 = vcombine.high %v496_v61, %v500_v62  ;;  %v549_v55 = vld [vmem:[#allocation5 + $0x838] sm:$0xff]  ;;  %v556_v61 = vld [vmem:[#allocation5 + $0x870] sm:$0xff] }
 0x263   :  { %3775 = vmatprep.subr.bf16.mxu0 %v11491_v5  ;;  %3939 = vmatprep.subr.bf16.mxu1 %v11493_v6  ;;  %v11549_v5 = vcombine.high %v497_v0, %v501_v1  ;;  %v504_v6 = vld [vmem:[#allocation5 + $0x6d0] sm:$0xff]  ;;  %v553_v62 = vld [vmem:[#allocation5 + $0x858] sm:$0xff] }
 0x264   :  { %v11554_v19 = vcombine.low %v504_v6, %v508_v7 }
 0x266   :  { %3776 = vmatpush1.bf16.msra.mxu0 %v11490_v12  ;;  %3940 = vmatpush1.bf16.msra.mxu1 %v11492_v13  ;;  %v11548_v12 = vcombine.low %v497_v0, %v501_v1  ;;  %v11555_v13 = vcombine.high %v504_v6, %v508_v7  ;;  %v557_v0 = vld [vmem:[#allocation5 + $0x878] sm:$0xff]  ;;  %v564_v6 = vld [vmem:[#allocation5 + $0x8b0] sm:$0xff] }
 0x267   :  { %3777 = vmatprep.subr.bf16.mxu0 %v11499_v33  ;;  %3941 = vmatprep.subr.bf16.mxu1 %v11501_v36  ;;  %v11557_v33 = vcombine.high %v505_v8, %v509_v10  ;;  %v512_v36 = vld [vmem:[#allocation5 + $0x710] sm:$0xff]  ;;  %v561_v7 = vld [vmem:[#allocation5 + $0x898] sm:$0xff] }
 0x268   :  { %v11562_v29 = vcombine.low %v512_v36, %v516_v15 }
 0x26a   :  { %3778 = vmatpush1.bf16.msra.mxu0 %v11498_v59  ;;  %3942 = vmatpush1.bf16.msra.mxu1 %v11500_v20  ;;  %v11556_v59 = vcombine.low %v505_v8, %v509_v10  ;;  %v11563_v20 = vcombine.high %v512_v36, %v516_v15  ;;  %v565_v8 = vld [vmem:[#allocation5 + $0x8b8] sm:$0xff]  ;;  %v572_v36 = vld [vmem:[#allocation5 + $0x8f0] sm:$0xff] }
 0x26b   :  { %3779 = vmatprep.subr.bf16.mxu0 %v11507_v21  ;;  %3943 = vmatprep.subr.bf16.mxu1 %v11509_v22  ;;  %v11565_v21 = vcombine.high %v513_v17, %v517_v18  ;;  %v520_v22 = vld [vmem:[#allocation5 + $0x750] sm:$0xff]  ;;  %v569_v15 = vld [vmem:[#allocation5 + $0x8d8] sm:$0xff] }
 0x26c   :  { %v11570_v57 = vcombine.low %v520_v22, %v524_v24 }
 0x26e   :  { %3780 = vmatpush1.bf16.msra.mxu0 %v11506_v30  ;;  %3944 = vmatpush1.bf16.msra.mxu1 %v11508_v31  ;;  %v11564_v30 = vcombine.low %v513_v17, %v517_v18  ;;  %v11571_v31 = vcombine.high %v520_v22, %v524_v24  ;;  %v573_v17 = vld [vmem:[#allocation5 + $0x8f8] sm:$0xff] }
 0x26f   :  { %3781 = vmatprep.subr.bf16.mxu0 %v11515_v32  ;;  %3945 = vmatprep.subr.bf16.mxu1 %v11517_v34  ;;  %v11573_v32 = vcombine.high %v521_v27, %v525_v28  ;;  %v528_v34 = vld [vmem:[#allocation5 + $0x790] sm:$0xff]  ;;  %v577_v22 = vld [vmem:[#allocation5 + $0x918] sm:$0xff] }
 0x270   :  { %v11578_v47 = vcombine.low %v528_v34, %v532_v35  ;;  %v581_v24 = vld [vmem:[#allocation5 + $0x938] sm:$0xff] }
 0x272   :  { %3782 = vmatpush1.bf16.msra.mxu0 %v11514_v38  ;;  %3946 = vmatpush1.bf16.msra.mxu1 %v11516_v39  ;;  %v11572_v38 = vcombine.low %v521_v27, %v525_v28  ;;  %v11579_v39 = vcombine.high %v528_v34, %v532_v35  ;;  %v11620_v28 = vcombine.low %v569_v15, %v573_v17  ;;  %v589_v34 = vld [vmem:[#allocation5 + $0x978] sm:$0xff] }
 0x273   :  { %3783 = vmatprep.subr.bf16.mxu0 %v11523_v40  ;;  %3947 = vmatprep.subr.bf16.mxu1 %v11525_v41  ;;  %v11581_v40 = vcombine.high %v529_v63, %v533_v37  ;;  %v536_v41 = vld [vmem:[#allocation5 + $0x7d0] sm:$0xff] }
 0x274   :  { %v11586_v56 = vcombine.low %v536_v41, %v540_v42 }
 0x276   :  { %3784 = vmatpush1.bf16.msra.mxu0 %v11522_v48  ;;  %3948 = vmatpush1.bf16.msra.mxu1 %v11524_v49  ;;  %v11580_v48 = vcombine.low %v529_v63, %v533_v37  ;;  %v11587_v49 = vcombine.high %v536_v41, %v540_v42  ;;  %v11628_v63 = vcombine.low %v577_v22, %v581_v24  ;;  %v597_v41 = vld [vmem:[#allocation5 + $0x9b8] sm:$0xff] }
 0x277   :  { %3785 = vmatprep.subr.bf16.mxu0 %v11531_v50  ;;  %3949 = vmatprep.subr.bf16.mxu1 %v11533_v51  ;;  %v11589_v50 = vcombine.high %v537_v45, %v541_v46  ;;  %v544_v51 = vld [vmem:[#allocation5 + $0x810] sm:$0xff] }
 0x278   :  { %v11594_v1 = vcombine.low %v544_v51, %v548_v52 }
 0x27a   :  { %3786 = vmatpush1.bf16.msra.mxu0 %v11530_v58  ;;  %3950 = vmatpush1.bf16.msra.mxu1 %v11532_v23  ;;  %v11588_v58 = vcombine.low %v537_v45, %v541_v46  ;;  %v11595_v23 = vcombine.high %v544_v51, %v548_v52  ;;  %v605_v51 = vld [vmem:[#allocation5 + $0x9f8] sm:$0xff] }
 0x27b   :  { %3787 = vmatprep.subr.bf16.mxu0 %v11539_v9  ;;  %3951 = vmatprep.subr.bf16.mxu1 %v11541_v60  ;;  %v11597_v9 = vcombine.high %v545_v16, %v549_v55  ;;  %v552_v60 = vld [vmem:[#allocation5 + $0x850] sm:$0xff] }
 0x27c   :  { %v11602_v10 = vcombine.low %v552_v60, %v556_v61 }
 0x27e   :  { %3788 = vmatpush1.bf16.msra.mxu0 %v11538_v2  ;;  %3952 = vmatpush1.bf16.msra.mxu1 %v11540_v3  ;;  %v11596_v2 = vcombine.low %v545_v16, %v549_v55  ;;  %v11603_v3 = vcombine.high %v552_v60, %v556_v61  ;;  %v613_v60 = vld [vmem:[#allocation5 + $0xa38] sm:$0xff] }
 0x27f   :  { %3789 = vmatprep.subr.bf16.mxu0 %v11547_v25  ;;  %3953 = vmatprep.subr.bf16.mxu1 %v11549_v5  ;;  %v11605_v25 = vcombine.high %v553_v62, %v557_v0  ;;  %v560_v5 = vld [vmem:[#allocation5 + $0x890] sm:$0xff] }
 0x280   :  { %v11610_v18 = vcombine.low %v560_v5, %v564_v6 }
 0x282   :  { %3790 = vmatpush1.bf16.msra.mxu0 %v11546_v11  ;;  %3954 = vmatpush1.bf16.msra.mxu1 %v11548_v12  ;;  %v11604_v11 = vcombine.low %v553_v62, %v557_v0  ;;  %v11611_v12 = vcombine.high %v560_v5, %v564_v6  ;;  %v621_v5 = vld [vmem:[#allocation5 + $0xa78] sm:$0xff] }
 0x283   :  { %3791 = vmatprep.subr.bf16.mxu0 %v11555_v13  ;;  %3955 = vmatprep.subr.bf16.mxu1 %v11557_v33  ;;  %v11613_v13 = vcombine.high %v561_v7, %v565_v8  ;;  %v568_v33 = vld [vmem:[#allocation5 + $0x8d0] sm:$0xff] }
 0x284   :  { %v11618_v27 = vcombine.low %v568_v33, %v572_v36 }
 0x286   :  { %3792 = vmatpush1.bf16.msra.mxu0 %v11554_v19  ;;  %3956 = vmatpush1.bf16.msra.mxu1 %v11556_v59  ;;  %v11619_v19 = vcombine.high %v568_v33, %v572_v36  ;;  %v11621_v59 = vcombine.high %v569_v15, %v573_v17  ;;  %v629_v33 = vld [vmem:[#allocation5 + $0xab8] sm:$0xff] }
 0x287   :  { %3793 = vmatprep.subr.bf16.mxu0 %v11563_v20  ;;  %3957 = vmatprep.subr.bf16.mxu1 %v11565_v21  ;;  %v576_v20 = vld [vmem:[#allocation5 + $0x910] sm:$0xff] }
 0x288   :  { %v580_v21 = vld [vmem:[#allocation5 + $0x930] sm:$0xff] }
 0x289   :  { %v11626_v35 = vcombine.low %v576_v20, %v580_v21 }
 0x28a   :  { %3794 = vmatpush1.bf16.msra.mxu0 %v11562_v29  ;;  %3958 = vmatpush1.bf16.msra.mxu1 %v11564_v30  ;;  %v11627_v29 = vcombine.high %v576_v20, %v580_v21  ;;  %v584_v30 = vld [vmem:[#allocation5 + $0x950] sm:$0xff]  ;;  %v637_v20 = vld [vmem:[#allocation5 + $0xaf8] sm:$0xff] }
 0x28b   :  { %3795 = vmatprep.subr.bf16.mxu0 %v11571_v31  ;;  %3959 = vmatprep.subr.bf16.mxu1 %v11573_v32  ;;  %v588_v31 = vld [vmem:[#allocation5 + $0x970] sm:$0xff]  ;;  %v585_v32 = vld [vmem:[#allocation5 + $0x958] sm:$0xff] }
 0x28c   :  { %v11635_v37 = vcombine.high %v584_v30, %v588_v31  ;;  %v11634_v42 = vcombine.low %v584_v30, %v588_v31  ;;  %v11636_v45 = vcombine.low %v585_v32, %v589_v34  ;;  %v645_v30 = vld [vmem:[#allocation5 + $0xb38] sm:$0xff] }
 0x28e   :  { %3796 = vmatpush1.bf16.msra.mxu0 %v11570_v57  ;;  %3960 = vmatpush1.bf16.msra.mxu1 %v11572_v38  ;;  %v11637_v57 = vcombine.high %v585_v32, %v589_v34  ;;  %v592_v38 = vld [vmem:[#allocation5 + $0x990] sm:$0xff] }
 0x28f   :  { %3797 = vmatprep.subr.bf16.mxu0 %v11579_v39  ;;  %3961 = vmatprep.subr.bf16.mxu1 %v11581_v40  ;;  %v596_v39 = vld [vmem:[#allocation5 + $0x9b0] sm:$0xff]  ;;  %v593_v40 = vld [vmem:[#allocation5 + $0x998] sm:$0xff] }
 0x290   :  { %v11643_v46 = vcombine.high %v592_v38, %v596_v39  ;;  %v11642_v52 = vcombine.low %v592_v38, %v596_v39  ;;  %v11644_v16 = vcombine.low %v593_v40, %v597_v41  ;;  %v653_v38 = vld [vmem:[#allocation5 + $0xb78] sm:$0xff] }
 0x292   :  { %3798 = vmatpush1.bf16.msra.mxu0 %v11578_v47  ;;  %3962 = vmatpush1.bf16.msra.mxu1 %v11580_v48  ;;  %v11645_v47 = vcombine.high %v593_v40, %v597_v41  ;;  %v600_v48 = vld [vmem:[#allocation5 + $0x9d0] sm:$0xff] }
 0x293   :  { %3799 = vmatprep.subr.bf16.mxu0 %v11587_v49  ;;  %3963 = vmatprep.subr.bf16.mxu1 %v11589_v50  ;;  %v604_v49 = vld [vmem:[#allocation5 + $0x9f0] sm:$0xff]  ;;  %v601_v50 = vld [vmem:[#allocation5 + $0x9d8] sm:$0xff] }
 0x294   :  { %v11651_v55 = vcombine.high %v600_v48, %v604_v49  ;;  %v11650_v61 = vcombine.low %v600_v48, %v604_v49  ;;  %v11652_v62 = vcombine.low %v601_v50, %v605_v51  ;;  %v661_v48 = vld [vmem:[#allocation5 + $0xbb8] sm:$0xff] }
 0x296   :  { %3800 = vmatpush1.bf16.msra.mxu0 %v11586_v56  ;;  %3964 = vmatpush1.bf16.msra.mxu1 %v11588_v58  ;;  %v11653_v56 = vcombine.high %v601_v50, %v605_v51  ;;  %v608_v58 = vld [vmem:[#allocation5 + $0xa10] sm:$0xff] }
 0x297   :  { %3810 = vmatprep.subr.bf16.mxu0 %v11595_v23  ;;  %3974 = vmatprep.subr.bf16.mxu1 %v11597_v9  ;;  %v612_v23 = vld [vmem:[#allocation5 + $0xa30] sm:$0xff]  ;;  %v609_v9 = vld [vmem:[#allocation5 + $0xa18] sm:$0xff] }
 0x298   :  { %v11659_v0 = vcombine.high %v608_v58, %v612_v23  ;;  %v11658_v6 = vcombine.low %v608_v58, %v612_v23  ;;  %v669_v58 = vld [vmem:[#allocation5 + $0xbf8] sm:$0xff] }
 0x299   :  { %3802 = vmatmul.mubr.bf16.vlgmr.msra.gmra.mrb[4].mxu0 %v14180_v43  ;;  %3966 = vmatmul.mubr.bf16.vlgmr.msra.gmra.mrb[4].mxu1 %v14180_v43  ;;  %v11612_v43 = vcombine.low %v561_v7, %v565_v8  ;;  %v11660_v7 = vcombine.low %v609_v9, %v613_v60 }
 0x29a   :  { %3811 = vmatpush1.bf16.msra.mxu0 %v11594_v1  ;;  %3975 = vmatpush1.bf16.msra.mxu1 %v11596_v2  ;;  %v11661_v1 = vcombine.high %v609_v9, %v613_v60  ;;  %v616_v2 = vld [vmem:[#allocation5 + $0xa50] sm:$0xff] }
 0x29b   :  { %3812 = vmatprep.subr.bf16.mxu0 %v11603_v3  ;;  %3976 = vmatprep.subr.bf16.mxu1 %v11605_v25  ;;  %v620_v3 = vld [vmem:[#allocation5 + $0xa70] sm:$0xff]  ;;  %v617_v25 = vld [vmem:[#allocation5 + $0xa58] sm:$0xff] }
 0x29c   :  { %3842 = vmatprep.mubr.bf16.mxu0 %v14182_v54  ;;  %4006 = vmatprep.mubr.bf16.mxu1 %v14182_v54  ;;  %v11629_v54 = vcombine.high %v577_v22, %v581_v24  ;;  %v11667_v8 = vcombine.high %v616_v2, %v620_v3  ;;  %v11666_v36 = vcombine.low %v616_v2, %v620_v3  ;;  %v677_v2 = vld [vmem:[#allocation5 + $0xc38] sm:$0xff] }
 0x29d   :  { %v11668_v15 = vcombine.low %v617_v25, %v621_v5 }
 0x29e   :  { %3813 = vmatpush1.bf16.msra.mxu0 %v11602_v10  ;;  %3977 = vmatpush1.bf16.msra.mxu1 %v11604_v11  ;;  %v11669_v10 = vcombine.high %v617_v25, %v621_v5  ;;  %v624_v11 = vld [vmem:[#allocation5 + $0xa90] sm:$0xff] }
 0x29f   :  { %3814 = vmatprep.subr.bf16.mxu0 %v11611_v12  ;;  %3978 = vmatprep.subr.bf16.mxu1 %v11613_v13  ;;  %v628_v12 = vld [vmem:[#allocation5 + $0xab0] sm:$0xff]  ;;  %v625_v13 = vld [vmem:[#allocation5 + $0xa98] sm:$0xff] }
 0x2a0   :  { %v11675_v17 = vcombine.high %v624_v11, %v628_v12  ;;  %v11674_v21 = vcombine.low %v624_v11, %v628_v12  ;;  %v11676_v22 = vcombine.low %v625_v13, %v629_v33  ;;  %v685_v11 = vld [vmem:[#allocation5 + $0xc78] sm:$0xff] }
 0x2a2   :  { %3815 = vmatpush1.bf16.msra.mxu0 %v11610_v18  ;;  %3979 = vmatpush1.bf16.msra.mxu1 %v11612_v43  ;;  %v11677_v18 = vcombine.high %v625_v13, %v629_v33  ;;  %v632_v43 = vld [vmem:[#allocation5 + $0xad0] sm:$0xff] }
 0x2a3   :  { %3816 = vmatprep.subr.bf16.mxu0 %v11619_v19  ;;  %3980 = vmatprep.subr.bf16.mxu1 %v11621_v59  ;;  %v636_v19 = vld [vmem:[#allocation5 + $0xaf0] sm:$0xff]  ;;  %v633_v59 = vld [vmem:[#allocation5 + $0xad8] sm:$0xff] }
 0x2a4   :  { %v11683_v24 = vcombine.high %v632_v43, %v636_v19  ;;  %v11682_v31 = vcombine.low %v632_v43, %v636_v19  ;;  %v11684_v32 = vcombine.low %v633_v59, %v637_v20  ;;  %v693_v43 = vld [vmem:[#allocation5 + $0xcb8] sm:$0xff] }
 0x2a6   :  { %3817 = vmatpush1.bf16.msra.mxu0 %v11618_v27  ;;  %3981 = vmatpush1.bf16.msra.mxu1 %v11620_v28  ;;  %v11685_v27 = vcombine.high %v633_v59, %v637_v20  ;;  %v640_v28 = vld [vmem:[#allocation5 + $0xb10] sm:$0xff] }
 0x2a7   :  { %3818 = vmatprep.subr.bf16.mxu0 %v11627_v29  ;;  %3982 = vmatprep.subr.bf16.mxu1 %v11629_v54  ;;  %v644_v29 = vld [vmem:[#allocation5 + $0xb30] sm:$0xff]  ;;  %v641_v54 = vld [vmem:[#allocation5 + $0xb18] sm:$0xff] }
 0x2a8   :  { %v11691_v34 = vcombine.high %v640_v28, %v644_v29  ;;  %v11690_v39 = vcombine.low %v640_v28, %v644_v29  ;;  %v11692_v40 = vcombine.low %v641_v54, %v645_v30  ;;  %v701_v28 = vld [vmem:[#allocation5 + $0xcf8] sm:$0xff] }
 0x2aa   :  { %3819 = vmatpush1.bf16.msra.mxu0 %v11626_v35  ;;  %3983 = vmatpush1.bf16.msra.mxu1 %v11628_v63  ;;  %v11693_v35 = vcombine.high %v641_v54, %v645_v30  ;;  %v648_v63 = vld [vmem:[#allocation5 + $0xb50] sm:$0xff] }
 0x2ab   :  { %3820 = vmatprep.subr.bf16.mxu0 %v11635_v37  ;;  %3984 = vmatprep.subr.bf16.mxu1 %v11637_v57  ;;  %v652_v37 = vld [vmem:[#allocation5 + $0xb70] sm:$0xff]  ;;  %v649_v57 = vld [vmem:[#allocation5 + $0xb58] sm:$0xff] }
 0x2ac   :  { %v11699_v41 = vcombine.high %v648_v63, %v652_v37  ;;  %v11698_v49 = vcombine.low %v648_v63, %v652_v37  ;;  %v11700_v50 = vcombine.low %v649_v57, %v653_v38 }
 0x2ae   :  { %3821 = vmatpush1.bf16.msra.mxu0 %v11634_v42  ;;  %3985 = vmatpush1.bf16.msra.mxu1 %v11636_v45  ;;  %v11701_v42 = vcombine.high %v649_v57, %v653_v38  ;;  %v656_v45 = vld [vmem:[#allocation5 + $0xb90] sm:$0xff] }
 0x2af   :  { %3822 = vmatprep.subr.bf16.mxu0 %v11643_v46  ;;  %3986 = vmatprep.subr.bf16.mxu1 %v11645_v47  ;;  %v660_v46 = vld [vmem:[#allocation5 + $0xbb0] sm:$0xff]  ;;  %v657_v47 = vld [vmem:[#allocation5 + $0xb98] sm:$0xff] }
 0x2b0   :  { %v11707_v51 = vcombine.high %v656_v45, %v660_v46  ;;  %v11706_v23 = vcombine.low %v656_v45, %v660_v46  ;;  %v11708_v9 = vcombine.low %v657_v47, %v661_v48  ;;  %v712_v38 = vld [vmem:[#allocation5 + $0xd50] sm:$0xff] }
 0x2b2   :  { %3823 = vmatpush1.bf16.msra.mxu0 %v11642_v52  ;;  %3987 = vmatpush1.bf16.msra.mxu1 %v11644_v16  ;;  %v11709_v52 = vcombine.high %v657_v47, %v661_v48  ;;  %v664_v16 = vld [vmem:[#allocation5 + $0xbd0] sm:$0xff] }
 0x2b3   :  { %3824 = vmatprep.subr.bf16.mxu0 %v11651_v55  ;;  %3988 = vmatprep.subr.bf16.mxu1 %v11653_v56  ;;  %v668_v55 = vld [vmem:[#allocation5 + $0xbf0] sm:$0xff]  ;;  %v665_v56 = vld [vmem:[#allocation5 + $0xbd8] sm:$0xff] }
 0x2b4   :  { %v11715_v60 = vcombine.high %v664_v16, %v668_v55  ;;  %v11714_v3 = vcombine.low %v664_v16, %v668_v55  ;;  %v11716_v25 = vcombine.low %v665_v56, %v669_v58  ;;  %v720_v48 = vld [vmem:[#allocation5 + $0xd90] sm:$0xff] }
 0x2b6   :  { %3825 = vmatpush1.bf16.msra.mxu0 %v11650_v61  ;;  %3989 = vmatpush1.bf16.msra.mxu1 %v11652_v62  ;;  %v11717_v61 = vcombine.high %v665_v56, %v669_v58  ;;  %v672_v62 = vld [vmem:[#allocation5 + $0xc10] sm:$0xff] }
 0x2b7   :  { %3826 = vmatprep.subr.bf16.mxu0 %v11659_v0  ;;  %3990 = vmatprep.subr.bf16.mxu1 %v11661_v1  ;;  %v676_v0 = vld [vmem:[#allocation5 + $0xc30] sm:$0xff]  ;;  %v673_v1 = vld [vmem:[#allocation5 + $0xc18] sm:$0xff] }
 0x2b8   :  { %v11723_v5 = vcombine.high %v672_v62, %v676_v0  ;;  %v11722_v12 = vcombine.low %v672_v62, %v676_v0  ;;  %v11724_v13 = vcombine.low %v673_v1, %v677_v2  ;;  %v729_v62 = vld [vmem:[#allocation5 + $0xdd8] sm:$0xff] }
 0x2b9   :  { %v733_v0 = vld [vmem:[#allocation5 + $0xdf8] sm:$0xff] }
 0x2ba   :  { %3827 = vmatpush1.bf16.msra.mxu0 %v11658_v6  ;;  %3991 = vmatpush1.bf16.msra.mxu1 %v11660_v7  ;;  %v11725_v6 = vcombine.high %v673_v1, %v677_v2  ;;  %v680_v7 = vld [vmem:[#allocation5 + $0xc50] sm:$0xff] }
 0x2bb   :  { %3828 = vmatprep.subr.bf16.mxu0 %v11667_v8  ;;  %3992 = vmatprep.subr.bf16.mxu1 %v11669_v10  ;;  %v684_v8 = vld [vmem:[#allocation5 + $0xc70] sm:$0xff]  ;;  %v681_v10 = vld [vmem:[#allocation5 + $0xc58] sm:$0xff] }
 0x2bc   :  { %v11731_v33 = vcombine.high %v680_v7, %v684_v8  ;;  %v11730_v19 = vcombine.low %v680_v7, %v684_v8  ;;  %v11732_v59 = vcombine.low %v681_v10, %v685_v11 }
 0x2be   :  { %3829 = vmatpush1.bf16.msra.mxu0 %v11666_v36  ;;  %3993 = vmatpush1.bf16.msra.mxu1 %v11668_v15  ;;  %v11733_v36 = vcombine.high %v681_v10, %v685_v11  ;;  %v688_v15 = vld [vmem:[#allocation5 + $0xc90] sm:$0xff]  ;;  %v11781_v10 = vcombine.high %v729_v62, %v733_v0 }
 0x2bf   :  { %3830 = vmatprep.subr.bf16.mxu0 %v11675_v17  ;;  %3994 = vmatprep.subr.bf16.mxu1 %v11677_v18  ;;  %v692_v17 = vld [vmem:[#allocation5 + $0xcb0] sm:$0xff]  ;;  %v689_v18 = vld [vmem:[#allocation5 + $0xc98] sm:$0xff] }
 0x2c0   :  { %v11739_v20 = vcombine.high %v688_v15, %v692_v17  ;;  %v11738_v29 = vcombine.low %v688_v15, %v692_v17  ;;  %v736_v11 = vld [vmem:[#allocation5 + $0xe10] sm:$0xff]  ;;  %v11780_v15 = vcombine.low %v729_v62, %v733_v0 }
 0x2c1   :  { %v784_v0 = vld [vmem:[#allocation5 + $0xf90] sm:$0xff] }
 0x2c2   :  { %3831 = vmatpush1.bf16.msra.mxu0 %v11674_v21  ;;  %3995 = vmatpush1.bf16.msra.mxu1 %v11676_v22  ;;  %v11741_v21 = vcombine.high %v689_v18, %v693_v43  ;;  %v696_v22 = vld [vmem:[#allocation5 + $0xcd0] sm:$0xff] }
 0x2c3   :  { %3832 = vmatprep.subr.bf16.mxu0 %v11683_v24  ;;  %3996 = vmatprep.subr.bf16.mxu1 %v11685_v27  ;;  %v700_v24 = vld [vmem:[#allocation5 + $0xcf0] sm:$0xff]  ;;  %v697_v27 = vld [vmem:[#allocation5 + $0xcd8] sm:$0xff] }
 0x2c4   :  { %v11747_v54 = vcombine.high %v696_v22, %v700_v24  ;;  %v11749_v30 = vcombine.high %v697_v27, %v701_v28  ;;  %v11746_v63 = vcombine.low %v696_v22, %v700_v24  ;;  %v11748_v37 = vcombine.low %v697_v27, %v701_v28  ;;  %v752_v28 = vld [vmem:[#allocation5 + $0xe90] sm:$0xff] }
 0x2c6   :  { %3833 = vmatpush1.bf16.msra.mxu0 %v11682_v31  ;;  %3997 = vmatpush1.bf16.msra.mxu1 %v11684_v32  ;;  %v704_v31 = vld [vmem:[#allocation5 + $0xd10] sm:$0xff] }
 0x2c7   :  { %3834 = vmatprep.subr.bf16.mxu0 %v11691_v34  ;;  %3998 = vmatprep.subr.bf16.mxu1 %v11693_v35  ;;  %v708_v32 = vld [vmem:[#allocation5 + $0xd30] sm:$0xff]  ;;  %v705_v34 = vld [vmem:[#allocation5 + $0xd18] sm:$0xff] }
 0x2c8   :  { %v709_v35 = vld [vmem:[#allocation5 + $0xd38] sm:$0xff]  ;;  %v11755_v57 = vcombine.high %v704_v31, %v708_v32 }
 0x2c9   :  { %v11756_v45 = vcombine.low %v705_v34, %v709_v35 }
 0x2ca   :  { %3835 = vmatpush1.bf16.msra.mxu0 %v11690_v39  ;;  %3999 = vmatpush1.bf16.msra.mxu1 %v11692_v40  ;;  %v716_v39 = vld [vmem:[#allocation5 + $0xd70] sm:$0xff]  ;;  %v713_v40 = vld [vmem:[#allocation5 + $0xd58] sm:$0xff] }
 0x2cb   :  { %3836 = vmatprep.subr.bf16.mxu0 %v11699_v41  ;;  %4000 = vmatprep.subr.bf16.mxu1 %v11701_v42  ;;  %v717_v41 = vld [vmem:[#allocation5 + $0xd78] sm:$0xff]  ;;  %v11754_v42 = vcombine.low %v704_v31, %v708_v32  ;;  %v11763_v46 = vcombine.high %v712_v38, %v716_v39 }
 0x2cc   :  { %v11765_v47 = vcombine.high %v713_v40, %v717_v41  ;;  %v11764_v16 = vcombine.low %v713_v40, %v717_v41  ;;  %v768_v41 = vld [vmem:[#allocation5 + $0xf10] sm:$0xff] }
 0x2ce   :  { %3837 = vmatpush1.bf16.msra.mxu0 %v11698_v49  ;;  %4001 = vmatpush1.bf16.msra.mxu1 %v11700_v50  ;;  %v724_v49 = vld [vmem:[#allocation5 + $0xdb0] sm:$0xff]  ;;  %v721_v50 = vld [vmem:[#allocation5 + $0xd98] sm:$0xff] }
 0x2cf   :  { %3838 = vmatprep.subr.bf16.mxu0 %v11707_v51  ;;  %4002 = vmatprep.subr.bf16.mxu1 %v11709_v52  ;;  %v725_v51 = vld [vmem:[#allocation5 + $0xdb8] sm:$0xff]  ;;  %v11762_v52 = vcombine.low %v712_v38, %v716_v39  ;;  %v11771_v55 = vcombine.high %v720_v48, %v724_v49 }
 0x2d0   :  { %v11773_v58 = vcombine.high %v721_v50, %v725_v51 }
 0x2d2   :  { %3839 = vmatpush1.bf16.msra.mxu0 %v11706_v23  ;;  %4003 = vmatpush1.bf16.msra.mxu1 %v11708_v9  ;;  %v728_v23 = vld [vmem:[#allocation5 + $0xdd0] sm:$0xff] }
 0x2d3   :  { %3840 = vmatprep.subr.bf16.mxu0 %v11715_v60  ;;  %4004 = vmatprep.subr.bf16.mxu1 %v11717_v61  ;;  %v732_v9 = vld [vmem:[#allocation5 + $0xdf0] sm:$0xff] }
 0x2d4   :  { %v11779_v7 = vcombine.high %v728_v23, %v732_v9 }
 0x2d6   :  { %3841 = vmatpush1.bf16.msra.mxu0 %v11714_v3  ;;  %4005 = vmatpush1.bf16.msra.mxu1 %v11716_v25  ;;  %v11770_v3 = vcombine.low %v720_v48, %v724_v49 }
 0x2d7   :  { %3851 = vmatprep.subr.bf16.mxu0 %v11723_v5  ;;  %4015 = vmatprep.subr.bf16.mxu1 %v11725_v6  ;;  %v11772_v6 = vcombine.low %v721_v50, %v725_v51  ;;  %v776_v51 = vld [vmem:[#allocation5 + $0xf50] sm:$0xff] }
 0x2d9   :  { %3843 = vmatmul.mubr.bf16.vlgmr.msra.gmra.mrb[4].mxu0 %v14197_v4  ;;  %4007 = vmatmul.mubr.bf16.vlgmr.msra.gmra.mrb[4].mxu1 %v14197_v4  ;;  %v11740_v4 = vcombine.low %v689_v18, %v693_v43  ;;  %v744_v43 = vld [vmem:[#allocation5 + $0xe50] sm:$0xff] }
 0x2da   :  { %3852 = vmatpush1.bf16.msra.mxu0 %v11722_v12  ;;  %4016 = vmatpush1.bf16.msra.mxu1 %v11724_v13  ;;  %v740_v12 = vld [vmem:[#allocation5 + $0xe30] sm:$0xff]  ;;  %v737_v13 = vld [vmem:[#allocation5 + $0xe18] sm:$0xff] }
 0x2db   :  { %3853 = vmatprep.subr.bf16.mxu0 %v11731_v33  ;;  %4017 = vmatprep.subr.bf16.mxu1 %v11733_v36  ;;  %v741_v33 = vld [vmem:[#allocation5 + $0xe38] sm:$0xff]  ;;  %v11778_v36 = vcombine.low %v728_v23, %v732_v9  ;;  %v11787_v17 = vcombine.high %v736_v11, %v740_v12 }
 0x2dc   :  { %3883 = vmatprep.mubr.bf16.mxu0 %v14199_v14  ;;  %4047 = vmatprep.mubr.bf16.mxu1 %v14199_v14  ;;  %v11757_v14 = vcombine.high %v705_v34, %v709_v35  ;;  %v11789_v18 = vcombine.high %v737_v13, %v741_v33  ;;  %v11788_v22 = vcombine.low %v737_v13, %v741_v33  ;;  %v760_v35 = vld [vmem:[#allocation5 + $0xed0] sm:$0xff] }
 0x2dd   :  { %v796_v13 = vld [vmem:[#allocation5 + $0xff0] sm:$0xff] }
 0x2de   :  { %3854 = vmatpush1.bf16.msra.mxu0 %v11730_v19  ;;  %4018 = vmatpush1.bf16.msra.mxu1 %v11732_v59  ;;  %v748_v19 = vld [vmem:[#allocation5 + $0xe70] sm:$0xff]  ;;  %v745_v59 = vld [vmem:[#allocation5 + $0xe58] sm:$0xff] }
 0x2df   :  { %3855 = vmatprep.subr.bf16.mxu0 %v11739_v20  ;;  %4019 = vmatprep.subr.bf16.mxu1 %v11741_v21  ;;  %v749_v20 = vld [vmem:[#allocation5 + $0xe78] sm:$0xff]  ;;  %v11786_v21 = vcombine.low %v736_v11, %v740_v12  ;;  %v11795_v24 = vcombine.high %v744_v43, %v748_v19  ;;  %v792_v12 = vld [vmem:[#allocation5 + $0xfd0] sm:$0xff] }
 0x2e0   :  { %v11797_v27 = vcombine.high %v745_v59, %v749_v20  ;;  %v11796_v31 = vcombine.low %v745_v59, %v749_v20  ;;  %v11842_v20 = vcombine.low %v792_v12, %v796_v13 }
 0x2e2   :  { %3856 = vmatpush1.bf16.msra.mxu0 %v11738_v29  ;;  %4020 = vmatpush1.bf16.msra.mxu1 %v11740_v4  ;;  %v756_v29 = vld [vmem:[#allocation5 + $0xeb0] sm:$0xff]  ;;  %v753_v4 = vld [vmem:[#allocation5 + $0xe98] sm:$0xff] }
 0x2e3   :  { %3857 = vmatprep.subr.bf16.mxu0 %v11747_v54  ;;  %4021 = vmatprep.subr.bf16.mxu1 %v11749_v30  ;;  %v757_v54 = vld [vmem:[#allocation5 + $0xeb8] sm:$0xff]  ;;  %v11794_v30 = vcombine.low %v744_v43, %v748_v19  ;;  %v11803_v32 = vcombine.high %v752_v28, %v756_v29  ;;  %v11843_v43 = vcombine.high %v792_v12, %v796_v13  ;;  %v13067_v12 = vld [vmem:[#allocation8 + $0x148] ss:$16 sps:$4 sm:$0xff]  }
 0x2e4   :  { %v11805_v34 = vcombine.high %v753_v4, %v757_v54  ;;  %v11804_v38 = vcombine.low %v753_v4, %v757_v54  ;;  %v13012_v4 = vld [vmem:[#allocation8 + $0x24] ss:$16 sps:$4 sm:$0xff]  }
 0x2e5   :  { %v13072_v13 = vld [vmem:[#allocation8 + $0x164] ss:$16 sps:$4 sm:$0xff]  }
 0x2e6   :  { %3858 = vmatpush1.bf16.msra.mxu0 %v11746_v63  ;;  %4022 = vmatpush1.bf16.msra.mxu1 %v11748_v37  ;;  %v764_v63 = vld [vmem:[#allocation5 + $0xef0] sm:$0xff]  ;;  %v761_v37 = vld [vmem:[#allocation5 + $0xed8] sm:$0xff] }
 0x2e7   :  { %3859 = vmatprep.subr.bf16.mxu0 %v11755_v57  ;;  %4023 = vmatprep.subr.bf16.mxu1 %v11757_v14  ;;  %v765_v57 = vld [vmem:[#allocation5 + $0xef8] sm:$0xff]  ;;  %v11802_v14 = vcombine.low %v752_v28, %v756_v29  ;;  %v11811_v39 = vcombine.high %v760_v35, %v764_v63  ;;  %v13007_v29 = vld [vmem:[#allocation8 + $0x8] ss:$16 sps:$4 sm:$0xff]  }
 0x2e8   :  { %v11813_v40 = vcombine.high %v761_v37, %v765_v57  ;;  %v11812_v48 = vcombine.low %v761_v37, %v765_v57  ;;  %v13004_v28 = vld [vmem:[#allocation8] ss:$16 sps:$4 sm:$0xff]   ;;  %v13024_v37 = vld [vmem:[#allocation8 + $0x64] ss:$16 sps:$4 sm:$0xff]   ;;  %v13027_v57 = vld [vmem:[#allocation8 + $0x6c] ss:$16 sps:$4 sm:$0xff]  }
 0x2ea   :  { %3860 = vmatpush1.bf16.msra.mxu0 %v11754_v42  ;;  %4024 = vmatpush1.bf16.msra.mxu1 %v11756_v45  ;;  %v772_v42 = vld [vmem:[#allocation5 + $0xf30] sm:$0xff]  ;;  %v769_v45 = vld [vmem:[#allocation5 + $0xf18] sm:$0xff] }
 0x2eb   :  { %3861 = vmatprep.subr.bf16.mxu0 %v11763_v46  ;;  %4025 = vmatprep.subr.bf16.mxu1 %v11765_v47  ;;  %v773_v46 = vld [vmem:[#allocation5 + $0xf38] sm:$0xff]  ;;  %v11810_v47 = vcombine.low %v760_v35, %v764_v63  ;;  %v11819_v49 = vcombine.high %v768_v41, %v772_v42  ;;  %v13019_v63 = vld [vmem:[#allocation8 + $0x48] ss:$16 sps:$4 sm:$0xff]  }
 0x2ec   :  { %v14225_v56 = vpop.f32.mrb[0].mxu0  ;;  %v14227_v60 = vpop.f32.mrb[0].mxu1  ;;  %v11821_v50 = vcombine.high %v769_v45, %v773_v46  ;;  %v11820_v23 = vcombine.low %v769_v45, %v773_v46  ;;  %v13016_v35 = vld [vmem:[#allocation8 + $0x40] ss:$16 sps:$4 sm:$0xff]   ;;  %v13039_v45 = vld [vmem:[#allocation8 + $0xac] ss:$16 sps:$4 sm:$0xff]  }
 0x2ed   :  { %v14229_v61 = vpop.f32.mrb[1].mxu0  ;;  %v14231_v1 = vpop.f32.mrb[1].mxu1  ;;  %v13034_v46 = vld [vmem:[#allocation8 + $0xa0] ss:$16 sps:$4 sm:$0xff]  }
 0x2ee   :  { %v3561_v2 = vpop.f32.mrb[2].mxu0  ;;  %3862 = vmatpush1.bf16.msra.mxu0 %v11762_v52  ;;  %v3725_v25 = vpop.f32.mrb[2].mxu1  ;;  %4026 = vmatpush1.bf16.msra.mxu1 %v11764_v16  ;;  %v780_v52 = vld [vmem:[#allocation5 + $0xf70] sm:$0xff]  ;;  %v777_v16 = vld [vmem:[#allocation5 + $0xf58] sm:$0xff] }
 0x2ef   :  { %v3562_v5 = vpop.f32.mrb[3].mxu0  ;;  %3863 = vmatprep.subr.bf16.mxu0 %v11771_v55  ;;  %v3726_v8 = vpop.f32.mrb[3].mxu1  ;;  %4027 = vmatprep.subr.bf16.mxu1 %v11773_v58  ;;  %v781_v55 = vld [vmem:[#allocation5 + $0xf78] sm:$0xff]  ;;  %v11818_v58 = vcombine.low %v768_v41, %v772_v42  ;;  %v11827_v9 = vcombine.high %v776_v51, %v780_v52  ;;  %v788_v2 = vld [vmem:[#allocation5 + $0xfb0] sm:$0xff] }
 0x2f0   :  { %v11829_v62 = vcombine.high %v777_v16, %v781_v55  ;;  %v785_v25 = vld [vmem:[#allocation5 + $0xf98] sm:$0xff]  ;;  %v11828_v8 = vcombine.low %v777_v16, %v781_v55  ;;  %v13031_v41 = vld [vmem:[#allocation8 + $0x88] ss:$16 sps:$4 sm:$0xff]   ;;  %v13051_v16 = vld [vmem:[#allocation8 + $0xec] ss:$16 sps:$4 sm:$0xff]  }
 0x2f1   :  { %v789_v5 = vld [vmem:[#allocation5 + $0xfb8] sm:$0xff] }
 0x2f2   :  { %3864 = vmatpush1.bf16.msra.mxu0 %v11770_v3  ;;  %4028 = vmatpush1.bf16.msra.mxu1 %v11772_v6  ;;  %v14234_v3 = vsub.s32 1, %v14130_v44  ;;  %v14236_v6 = vld [vmem:[#allocation7] sm:$0xff]  ;;  %v11837_v11 = vcombine.high %v785_v25, %v789_v5  ;;  %v13036_v42 = vld [vmem:[#allocation8 + $0xa4] ss:$16 sps:$4 sm:$0xff]   ;;  %v13046_v55 = vld [vmem:[#allocation8 + $0xe0] ss:$16 sps:$4 sm:$0xff]  }
 0x2f3   :  { %3865 = vmatprep.subr.bf16.mxu0 %v11779_v7  ;;  %4029 = vmatprep.subr.bf16.mxu1 %v11781_v10  ;;  %v11826_v7 = vcombine.low %v776_v51, %v780_v52  ;;  %v11835_v10 = vcombine.high %v784_v0, %v788_v2  ;;  %v13043_v51 = vld [vmem:[#allocation8 + $0xc8] ss:$16 sps:$4 sm:$0xff]   ;;  %v13048_v52 = vld [vmem:[#allocation8 + $0xe4] ss:$16 sps:$4 sm:$0xff]  }
 0x2f4   :  { %v807_v33 = vrot.slane %v14236_v6, %v14234_v3 }
 0x2f6   :  { %3866 = vmatpush1.bf16.msra.mxu0 %v11778_v36  ;;  %4030 = vmatpush1.bf16.msra.mxu1 %v11780_v15  ;;  %v793_v36 = vld [vmem:[#allocation5 + $0xfd8] sm:$0xff]  ;;  %v12835_v59 = vadd.f32 %v14229_v61, %v807_v33  ;;  %v13015_v61 = vld [vmem:[#allocation8 + $0x2c] ss:$16 sps:$4 sm:$0xff]  }
 0x2f7   :  { %3867 = vmatprep.subr.bf16.mxu0 %v11787_v17  ;;  %4031 = vmatprep.subr.bf16.mxu1 %v11789_v18  ;;  %v797_v15 = vld [vmem:[#allocation5 + $0xff8] sm:$0xff]  ;;  %v11834_v17 = vcombine.low %v784_v0, %v788_v2  ;;  %v11836_v18 = vcombine.low %v785_v25, %v789_v5  ;;  %v13055_v0 = vld [vmem:[#allocation8 + $0x108] ss:$16 sps:$4 sm:$0xff]   ;;  %v13063_v25 = vld [vmem:[#allocation8 + $0x12c] ss:$16 sps:$4 sm:$0xff]  }
 0x2f8   :  { %v11845_v19 = vcombine.high %v793_v36, %v797_v15  ;;  %v13060_v2 = vld [vmem:[#allocation8 + $0x124] ss:$16 sps:$4 sm:$0xff]   ;;  %v13058_v5 = vld [vmem:[#allocation8 + $0x120] ss:$16 sps:$4 sm:$0xff]   ;;  %v13075_v33 = vld [vmem:[#allocation8 + $0x16c] ss:$16 sps:$4 sm:$0xff]  }
 0x2fa   :  { %3868 = vmatpush1.bf16.msra.mxu0 %v11786_v21  ;;  %4032 = vmatpush1.bf16.msra.mxu1 %v11788_v22  ;;  %v11844_v21 = vcombine.low %v793_v36, %v797_v15  ;;  %v13006_v22 = vld [vmem:[#allocation8 + $0x4] ss:$16 sps:$4 sm:$0xff]   ;;  %v13070_v36 = vld [vmem:[#allocation8 + $0x160] ss:$16 sps:$4 sm:$0xff]   ;;  %v13073_v15 = vld [vmem:[#allocation8 + $0x168] ss:$16 sps:$4 sm:$0xff]  }
 0x2fb   :  { %3869 = vmatprep.subr.bf16.mxu0 %v11795_v24  ;;  %4033 = vmatprep.subr.bf16.mxu1 %v11797_v27  ;;  %v13009_v24 = vld [vmem:[#allocation8 + $0xc] ss:$16 sps:$4 sm:$0xff]   ;;  %v4057_v27 = vmax.f32 %v12835_v59, 0.0  ;;  %v13079_v59 = vld [vmem:[#allocation8 + $0x188] ss:$16 sps:$4 sm:$0xff]  }
 0x2fd   :  { %v4065_v54 = vpack.c.bf16 %v4057_v27, %v4057_v27 }
 0x2fe   :  { %3870 = vmatpush1.bf16.msra.mxu0 %v11794_v30  ;;  %4034 = vmatpush1.bf16.msra.mxu1 %v11796_v31  ;;  %v13010_v30 = vld [vmem:[#allocation8 + $0x20] ss:$16 sps:$4 sm:$0xff]   ;;  %v13013_v31 = vld [vmem:[#allocation8 + $0x28] ss:$16 sps:$4 sm:$0xff]  }
 0x2ff   :  { %3871 = vmatprep.subr.bf16.mxu0 %v11803_v32  ;;  %4035 = vmatprep.subr.bf16.mxu1 %v11805_v34  ;;  %v13018_v32 = vld [vmem:[#allocation8 + $0x44] ss:$16 sps:$4 sm:$0xff]   ;;  %v13021_v34 = vld [vmem:[#allocation8 + $0x4c] ss:$16 sps:$4 sm:$0xff]  }
 0x302   :  { %3872 = vmatpush1.bf16.msra.mxu0 %v11802_v14  ;;  %4036 = vmatpush1.bf16.msra.mxu1 %v11804_v38  ;;  %v13025_v14 = vld [vmem:[#allocation8 + $0x68] ss:$16 sps:$4 sm:$0xff]   ;;  %v13030_v38 = vld [vmem:[#allocation8 + $0x84] ss:$16 sps:$4 sm:$0xff]  }
 0x303   :  { %3873 = vmatprep.subr.bf16.mxu0 %v11811_v39  ;;  %4037 = vmatprep.subr.bf16.mxu1 %v11813_v40  ;;  %v13033_v39 = vld [vmem:[#allocation8 + $0x8c] ss:$16 sps:$4 sm:$0xff]   ;;  %v13028_v40 = vld [vmem:[#allocation8 + $0x80] ss:$16 sps:$4 sm:$0xff]  }
 0x306   :  { %3874 = vmatpush1.bf16.msra.mxu0 %v11810_v47  ;;  %4038 = vmatpush1.bf16.msra.mxu1 %v11812_v48  ;;  %v13037_v47 = vld [vmem:[#allocation8 + $0xa8] ss:$16 sps:$4 sm:$0xff]   ;;  %v13042_v48 = vld [vmem:[#allocation8 + $0xc4] ss:$16 sps:$4 sm:$0xff]  }
 0x307   :  { %3875 = vmatprep.subr.bf16.mxu0 %v11819_v49  ;;  %4039 = vmatprep.subr.bf16.mxu1 %v11821_v50  ;;  %v13045_v49 = vld [vmem:[#allocation8 + $0xcc] ss:$16 sps:$4 sm:$0xff]   ;;  %v13040_v50 = vld [vmem:[#allocation8 + $0xc0] ss:$16 sps:$4 sm:$0xff]  }
 0x30a   :  { %3876 = vmatpush1.bf16.msra.mxu0 %v11818_v58  ;;  %4040 = vmatpush1.bf16.msra.mxu1 %v11820_v23  ;;  %v13049_v58 = vld [vmem:[#allocation8 + $0xe8] ss:$16 sps:$4 sm:$0xff]   ;;  %v13054_v23 = vld [vmem:[#allocation8 + $0x104] ss:$16 sps:$4 sm:$0xff]  }
 0x30b   :  { %3877 = vmatprep.subr.bf16.mxu0 %v11827_v9  ;;  %4041 = vmatprep.subr.bf16.mxu1 %v11829_v62  ;;  %v13057_v9 = vld [vmem:[#allocation8 + $0x10c] ss:$16 sps:$4 sm:$0xff]   ;;  %v13052_v62 = vld [vmem:[#allocation8 + $0x100] ss:$16 sps:$4 sm:$0xff]  }
 0x30e   :  { %3878 = vmatpush1.bf16.msra.mxu0 %v11826_v7  ;;  %4042 = vmatpush1.bf16.msra.mxu1 %v11828_v8  ;;  %v13061_v7 = vld [vmem:[#allocation8 + $0x128] ss:$16 sps:$4 sm:$0xff]   ;;  %v13066_v8 = vld [vmem:[#allocation8 + $0x144] ss:$16 sps:$4 sm:$0xff]  }
 0x30f   :  { %3879 = vmatprep.subr.bf16.mxu0 %v11835_v10  ;;  %4043 = vmatprep.subr.bf16.mxu1 %v11837_v11  ;;  %v13069_v10 = vld [vmem:[#allocation8 + $0x14c] ss:$16 sps:$4 sm:$0xff]   ;;  %v13064_v11 = vld [vmem:[#allocation8 + $0x140] ss:$16 sps:$4 sm:$0xff]  }
 0x312   :  { %3880 = vmatpush1.bf16.msra.mxu0 %v11834_v17  ;;  %4044 = vmatpush1.bf16.msra.mxu1 %v11836_v18  ;;  %v13078_v17 = vld [vmem:[#allocation8 + $0x184] ss:$16 sps:$4 sm:$0xff]   ;;  %v13081_v18 = vld [vmem:[#allocation8 + $0x18c] ss:$16 sps:$4 sm:$0xff]  }
 0x313   :  { %3881 = vmatprep.subr.bf16.mxu0 %v11843_v43  ;;  %4045 = vmatprep.subr.bf16.mxu1 %v11845_v19  ;;  %v13076_v43 = vld [vmem:[#allocation8 + $0x180] ss:$16 sps:$4 sm:$0xff]   ;;  %v14244_v19 = vsub.s32 0, %v14130_v44 }
 0x315   :  { %v803_v27 = vrot.slane %v14236_v6, %v14244_v19 }
 0x316   :  { %3882 = vmatpush1.bf16.msra.mxu0 %v11842_v20  ;;  %4046 = vmatpush1.bf16.msra.mxu1 %v11844_v21  ;;  %v13084_v20 = vld [vmem:[#allocation8 + $0x1a4] ss:$16 sps:$4 sm:$0xff]   ;;  %v13087_v21 = vld [vmem:[#allocation8 + $0x1ac] ss:$16 sps:$4 sm:$0xff]  }
 0x317   :  { %5630 = vmatprep.subr.bf16.mxu0 %v13006_v22  ;;  %5794 = vmatprep.subr.bf16.mxu1 %v13009_v24  ;;  %v14247_v22 = vsub.s32 3, %v14130_v44  ;;  %v13082_v24 = vld [vmem:[#allocation8 + $0x1a0] ss:$16 sps:$4 sm:$0xff]  }
 0x319   :  { %3884 = vmatmul.mubr.bf16.vlgmr.msra.gmra.mrb[4].mxu0 %v14207_v26  ;;  %4048 = vmatmul.mubr.bf16.vlgmr.msra.gmra.mrb[4].mxu1 %v14207_v26  ;;  %v13022_v26 = vld [vmem:[#allocation8 + $0x60] ss:$16 sps:$4 sm:$0xff]  }
 0x31a   :  { %5631 = vmatpush1.bf16.msra.mxu0 %v13004_v28  ;;  %5662 = vmatprep.mubr.bf16.mxu0 %v4065_v54  ;;  %v13085_v28 = vld [vmem:[#allocation8 + $0x1a8] ss:$16 sps:$4 sm:$0xff]  }
 0x31b   :  { %5795 = vmatpush1.bf16.msra.mxu1 %v13007_v29  ;;  %5826 = vmatprep.mubr.bf16.mxu1 %v4065_v54  ;;  %v13090_v29 = vld [vmem:[#allocation8 + $0x1c4] ss:$16 sps:$4 sm:$0xff]   ;;  %v815_v54 = vrot.slane %v14236_v6, %v14247_v22 }
 0x31c   :  { %5632 = vmatprep.subr.bf16.mxu0 %v13012_v4  ;;  %5796 = vmatprep.subr.bf16.mxu1 %v13015_v61  ;;  %v13093_v4 = vld [vmem:[#allocation8 + $0x1cc] ss:$16 sps:$4 sm:$0xff]   ;;  %v13088_v61 = vld [vmem:[#allocation8 + $0x1c0] ss:$16 sps:$4 sm:$0xff]  }
 0x31e   :  { %5633 = vmatpush1.bf16.msra.mxu0 %v13010_v30  ;;  %v12834_v30 = vadd.f32 %v14225_v56, %v803_v27  ;;  %v13100_v56 = vld [vmem:[#allocation8 + $0x200] ss:$16 sps:$4 sm:$0xff]   ;;  %v13162_v27 = vld [vmem:[#allocation8 + $0x344] ss:$16 sps:$4 sm:$0xff]  }
 0x31f   :  { %5797 = vmatpush1.bf16.msra.mxu1 %v13013_v31  ;;  %5634 = vmatprep.subr.bf16.mxu0 %v13018_v32  ;;  %v13091_v31 = vld [vmem:[#allocation8 + $0x1c8] ss:$16 sps:$4 sm:$0xff]   ;;  %v13096_v32 = vld [vmem:[#allocation8 + $0x1e4] ss:$16 sps:$4 sm:$0xff]  }
 0x320   :  { %5798 = vmatprep.subr.bf16.mxu1 %v13021_v34  ;;  %v13099_v34 = vld [vmem:[#allocation8 + $0x1ec] ss:$16 sps:$4 sm:$0xff]  }
 0x322   :  { %5635 = vmatpush1.bf16.msra.mxu0 %v13016_v35  ;;  %v12837_v35 = vadd.f32 %v14231_v1, %v815_v54  ;;  %v13111_v1 = vld [vmem:[#allocation8 + $0x22c] ss:$16 sps:$4 sm:$0xff]   ;;  %v13168_v54 = vld [vmem:[#allocation8 + $0x364] ss:$16 sps:$4 sm:$0xff]  }
 0x323   :  { %5799 = vmatpush1.bf16.msra.mxu1 %v13019_v63  ;;  %5636 = vmatprep.subr.bf16.mxu0 %v13024_v37  ;;  %v13094_v63 = vld [vmem:[#allocation8 + $0x1e0] ss:$16 sps:$4 sm:$0xff]   ;;  %v4056_v37 = vmax.f32 %v12834_v30, 0.0 }
 0x324   :  { %5800 = vmatprep.subr.bf16.mxu1 %v13027_v57  ;;  %v13097_v57 = vld [vmem:[#allocation8 + $0x1e8] ss:$16 sps:$4 sm:$0xff]   ;;  %v13166_v30 = vld [vmem:[#allocation8 + $0x360] ss:$16 sps:$4 sm:$0xff]  }
 0x326   :  { %5637 = vmatpush1.bf16.msra.mxu0 %v13022_v26  ;;  %v13102_v26 = vld [vmem:[#allocation8 + $0x204] ss:$16 sps:$4 sm:$0xff]  }
 0x327   :  { %5801 = vmatpush1.bf16.msra.mxu1 %v13025_v14  ;;  %5638 = vmatprep.subr.bf16.mxu0 %v13030_v38  ;;  %v13105_v14 = vld [vmem:[#allocation8 + $0x20c] ss:$16 sps:$4 sm:$0xff]   ;;  %v4059_v38 = vmax.f32 %v12837_v35, 0.0  ;;  %v13172_v35 = vld [vmem:[#allocation8 + $0x380] ss:$16 sps:$4 sm:$0xff]  }
 0x328   :  { %5802 = vmatprep.subr.bf16.mxu1 %v13033_v39  ;;  %v4064_v39 = vpack.c.bf16 %v4056_v37, %v4056_v37  ;;  %v13175_v37 = vld [vmem:[#allocation8 + $0x388] ss:$16 sps:$4 sm:$0xff]  }
 0x32a   :  { %5639 = vmatpush1.bf16.msra.mxu0 %v13028_v40  ;;  %v13103_v40 = vld [vmem:[#allocation8 + $0x208] ss:$16 sps:$4 sm:$0xff]  }
 0x32b   :  { %5803 = vmatpush1.bf16.msra.mxu1 %v13031_v41  ;;  %5640 = vmatprep.subr.bf16.mxu0 %v13036_v42  ;;  %v13108_v41 = vld [vmem:[#allocation8 + $0x224] ss:$16 sps:$4 sm:$0xff]   ;;  %v4067_v42 = vpack.c.bf16 %v4059_v38, %v4059_v38 }
 0x32c   :  { %5804 = vmatprep.subr.bf16.mxu1 %v13039_v45  ;;  %v13106_v45 = vld [vmem:[#allocation8 + $0x220] ss:$16 sps:$4 sm:$0xff]  }
 0x32e   :  { %5641 = vmatpush1.bf16.msra.mxu0 %v13034_v46  ;;  %v13109_v46 = vld [vmem:[#allocation8 + $0x228] ss:$16 sps:$4 sm:$0xff]  }
 0x32f   :  { %5805 = vmatpush1.bf16.msra.mxu1 %v13037_v47  ;;  %5642 = vmatprep.subr.bf16.mxu0 %v13042_v48  ;;  %v13114_v47 = vld [vmem:[#allocation8 + $0x244] ss:$16 sps:$4 sm:$0xff]   ;;  %v13117_v48 = vld [vmem:[#allocation8 + $0x24c] ss:$16 sps:$4 sm:$0xff]  }
 0x330   :  { %5806 = vmatprep.subr.bf16.mxu1 %v13045_v49  ;;  %v13112_v49 = vld [vmem:[#allocation8 + $0x240] ss:$16 sps:$4 sm:$0xff]  }
 0x332   :  { %5643 = vmatpush1.bf16.msra.mxu0 %v13040_v50  ;;  %v13115_v50 = vld [vmem:[#allocation8 + $0x248] ss:$16 sps:$4 sm:$0xff]  }
 0x333   :  { %5807 = vmatpush1.bf16.msra.mxu1 %v13043_v51  ;;  %5644 = vmatprep.subr.bf16.mxu0 %v13048_v52  ;;  %v13120_v51 = vld [vmem:[#allocation8 + $0x264] ss:$16 sps:$4 sm:$0xff]   ;;  %v13123_v52 = vld [vmem:[#allocation8 + $0x26c] ss:$16 sps:$4 sm:$0xff]  }
 0x334   :  { %5808 = vmatprep.subr.bf16.mxu1 %v13051_v16  ;;  %v13118_v16 = vld [vmem:[#allocation8 + $0x260] ss:$16 sps:$4 sm:$0xff]  }
 0x336   :  { %5645 = vmatpush1.bf16.msra.mxu0 %v13046_v55  ;;  %v13121_v55 = vld [vmem:[#allocation8 + $0x268] ss:$16 sps:$4 sm:$0xff]  }
 0x337   :  { %5809 = vmatpush1.bf16.msra.mxu1 %v13049_v58  ;;  %5646 = vmatprep.subr.bf16.mxu0 %v13054_v23  ;;  %v13126_v58 = vld [vmem:[#allocation8 + $0x284] ss:$16 sps:$4 sm:$0xff]   ;;  %v13129_v23 = vld [vmem:[#allocation8 + $0x28c] ss:$16 sps:$4 sm:$0xff]  }
 0x338   :  { %5810 = vmatprep.subr.bf16.mxu1 %v13057_v9  ;;  %v13124_v9 = vld [vmem:[#allocation8 + $0x280] ss:$16 sps:$4 sm:$0xff]  }
 0x33a   :  { %5647 = vmatpush1.bf16.msra.mxu0 %v13052_v62  ;;  %v13127_v62 = vld [vmem:[#allocation8 + $0x288] ss:$16 sps:$4 sm:$0xff]  }
 0x33b   :  { %5811 = vmatpush1.bf16.msra.mxu1 %v13055_v0  ;;  %5648 = vmatprep.subr.bf16.mxu0 %v13060_v2  ;;  %v13132_v0 = vld [vmem:[#allocation8 + $0x2a4] ss:$16 sps:$4 sm:$0xff]   ;;  %v13135_v2 = vld [vmem:[#allocation8 + $0x2ac] ss:$16 sps:$4 sm:$0xff]  }
 0x33c   :  { %5812 = vmatprep.subr.bf16.mxu1 %v13063_v25  ;;  %v13130_v25 = vld [vmem:[#allocation8 + $0x2a0] ss:$16 sps:$4 sm:$0xff]  }
 0x33e   :  { %5649 = vmatpush1.bf16.msra.mxu0 %v13058_v5  ;;  %v13133_v5 = vld [vmem:[#allocation8 + $0x2a8] ss:$16 sps:$4 sm:$0xff]  }
 0x33f   :  { %5813 = vmatpush1.bf16.msra.mxu1 %v13061_v7  ;;  %5650 = vmatprep.subr.bf16.mxu0 %v13066_v8  ;;  %v13138_v7 = vld [vmem:[#allocation8 + $0x2c4] ss:$16 sps:$4 sm:$0xff]   ;;  %v13141_v8 = vld [vmem:[#allocation8 + $0x2cc] ss:$16 sps:$4 sm:$0xff]  }
 0x340   :  { %5814 = vmatprep.subr.bf16.mxu1 %v13069_v10  ;;  %v13136_v10 = vld [vmem:[#allocation8 + $0x2c0] ss:$16 sps:$4 sm:$0xff]  }
 0x342   :  { %5651 = vmatpush1.bf16.msra.mxu0 %v13064_v11  ;;  %v13139_v11 = vld [vmem:[#allocation8 + $0x2c8] ss:$16 sps:$4 sm:$0xff]  }
 0x343   :  { %5815 = vmatpush1.bf16.msra.mxu1 %v13067_v12  ;;  %5652 = vmatprep.subr.bf16.mxu0 %v13072_v13  ;;  %v13144_v12 = vld [vmem:[#allocation8 + $0x2e4] ss:$16 sps:$4 sm:$0xff]   ;;  %v13147_v13 = vld [vmem:[#allocation8 + $0x2ec] ss:$16 sps:$4 sm:$0xff]  }
 0x344   :  { %5816 = vmatprep.subr.bf16.mxu1 %v13075_v33  ;;  %v13142_v33 = vld [vmem:[#allocation8 + $0x2e0] ss:$16 sps:$4 sm:$0xff]  }
 0x346   :  { %5653 = vmatpush1.bf16.msra.mxu0 %v13070_v36  ;;  %v13145_v36 = vld [vmem:[#allocation8 + $0x2e8] ss:$16 sps:$4 sm:$0xff]  }
 0x347   :  { %5817 = vmatpush1.bf16.msra.mxu1 %v13073_v15  ;;  %5654 = vmatprep.subr.bf16.mxu0 %v13078_v17  ;;  %v13150_v15 = vld [vmem:[#allocation8 + $0x304] ss:$16 sps:$4 sm:$0xff]   ;;  %v13153_v17 = vld [vmem:[#allocation8 + $0x30c] ss:$16 sps:$4 sm:$0xff]  }
 0x348   :  { %5818 = vmatprep.subr.bf16.mxu1 %v13081_v18  ;;  %v13148_v18 = vld [vmem:[#allocation8 + $0x300] ss:$16 sps:$4 sm:$0xff]  }
 0x34a   :  { %5655 = vmatpush1.bf16.msra.mxu0 %v13076_v43  ;;  %v13151_v43 = vld [vmem:[#allocation8 + $0x308] ss:$16 sps:$4 sm:$0xff]  }
 0x34b   :  { %5819 = vmatpush1.bf16.msra.mxu1 %v13079_v59  ;;  %5656 = vmatprep.subr.bf16.mxu0 %v13084_v20  ;;  %v13156_v59 = vld [vmem:[#allocation8 + $0x324] ss:$16 sps:$4 sm:$0xff]   ;;  %v13159_v20 = vld [vmem:[#allocation8 + $0x32c] ss:$16 sps:$4 sm:$0xff]  }
 0x34c   :  { %5820 = vmatprep.subr.bf16.mxu1 %v13087_v21  ;;  %v13154_v21 = vld [vmem:[#allocation8 + $0x320] ss:$16 sps:$4 sm:$0xff]  }
 0x34e   :  { %5657 = vmatpush1.bf16.msra.mxu0 %v13082_v24  ;;  %v13157_v24 = vld [vmem:[#allocation8 + $0x328] ss:$16 sps:$4 sm:$0xff]  }
 0x34f   :  { %5821 = vmatpush1.bf16.msra.mxu1 %v13085_v28  ;;  %5658 = vmatprep.subr.bf16.mxu0 %v13090_v29  ;;  %v13165_v28 = vld [vmem:[#allocation8 + $0x34c] ss:$16 sps:$4 sm:$0xff]   ;;  %v13160_v29 = vld [vmem:[#allocation8 + $0x340] ss:$16 sps:$4 sm:$0xff]  }
 0x350   :  { %5822 = vmatprep.subr.bf16.mxu1 %v13093_v4  ;;  %v13163_v4 = vld [vmem:[#allocation8 + $0x348] ss:$16 sps:$4 sm:$0xff]  }
 0x352   :  { %5659 = vmatpush1.bf16.msra.mxu0 %v13088_v61  ;;  %v13171_v61 = vld [vmem:[#allocation8 + $0x36c] ss:$16 sps:$4 sm:$0xff]  }
 0x353   :  { %5823 = vmatpush1.bf16.msra.mxu1 %v13091_v31  ;;  %5660 = vmatprep.subr.bf16.mxu0 %v13096_v32  ;;  %v13169_v31 = vld [vmem:[#allocation8 + $0x368] ss:$16 sps:$4 sm:$0xff]   ;;  %v13174_v32 = vld [vmem:[#allocation8 + $0x384] ss:$16 sps:$4 sm:$0xff]  }
 0x354   :  { %5824 = vmatprep.subr.bf16.mxu1 %v13099_v34  ;;  %v13177_v34 = vld [vmem:[#allocation8 + $0x38c] ss:$16 sps:$4 sm:$0xff]  }
 0x356   :  { %5661 = vmatpush1.bf16.msra.mxu0 %v13094_v63  ;;  %v14256_v63 = vsub.s32 2, %v14130_v44 }
 0x357   :  { %5825 = vmatpush1.bf16.msra.mxu1 %v13097_v57  ;;  %5671 = vmatprep.subr.bf16.mxu0 %v13102_v26  ;;  %v13180_v57 = vld [vmem:[#allocation8 + $0x3a4] ss:$16 sps:$4 sm:$0xff]   ;;  %v13183_v26 = vld [vmem:[#allocation8 + $0x3ac] ss:$16 sps:$4 sm:$0xff]  }
 0x358   :  { %5835 = vmatprep.subr.bf16.mxu1 %v13105_v14  ;;  %v13178_v14 = vld [vmem:[#allocation8 + $0x3a0] ss:$16 sps:$4 sm:$0xff]   ;;  %v811_v38 = vrot.slane %v14236_v6, %v14256_v63 }
 0x359   :  { %5663 = vmatmul.mubr.bf16.vlgmr.msra.gmra.mrb[8].mxu0 %v4064_v39 }
 0x35a   :  { %5827 = vmatmul.mubr.bf16.vlgmr.msra.gmra.mrb[8].mxu1 %v4064_v39  ;;  %5672 = vmatpush1.bf16.msra.mxu0 %v13100_v56  ;;  %v13181_v56 = vld [vmem:[#allocation8 + $0x3a8] ss:$16 sps:$4 sm:$0xff]   ;;  %v13186_v39 = vld [vmem:[#allocation8 + $0x3c4] ss:$16 sps:$4 sm:$0xff]  }
 0x35b   :  { %5703 = vmatprep.mubr.bf16.mxu0 %v4067_v42  ;;  %5836 = vmatpush1.bf16.msra.mxu1 %v13103_v40  ;;  %v13189_v40 = vld [vmem:[#allocation8 + $0x3cc] ss:$16 sps:$4 sm:$0xff]  }
 0x35c   :  { %5867 = vmatprep.mubr.bf16.mxu1 %v4067_v42  ;;  %5673 = vmatprep.subr.bf16.mxu0 %v13108_v41  ;;  %v13184_v41 = vld [vmem:[#allocation8 + $0x3c0] ss:$16 sps:$4 sm:$0xff]   ;;  %v12836_v42 = vadd.f32 %v14227_v60, %v811_v38  ;;  %v13199_v60 = vld [vmem:[#allocation8 + $0x408] ss:$16 sps:$4 sm:$0xff]   ;;  %v13264_v38 = vld [vmem:[#allocation8 + $0x564] ss:$16 sps:$4 sm:$0xff]  }
 0x35d   :  { %5837 = vmatprep.subr.bf16.mxu1 %v13111_v1  ;;  %v13187_v1 = vld [vmem:[#allocation8 + $0x3c8] ss:$16 sps:$4 sm:$0xff]  }
 0x35e   :  { %5674 = vmatpush1.bf16.msra.mxu0 %v13106_v45  ;;  %v13192_v45 = vld [vmem:[#allocation8 + $0x3e4] ss:$16 sps:$4 sm:$0xff]  }
 0x35f   :  { %5838 = vmatpush1.bf16.msra.mxu1 %v13109_v46  ;;  %5675 = vmatprep.subr.bf16.mxu0 %v13114_v47  ;;  %v13195_v46 = vld [vmem:[#allocation8 + $0x3ec] ss:$16 sps:$4 sm:$0xff]   ;;  %v13190_v47 = vld [vmem:[#allocation8 + $0x3e0] ss:$16 sps:$4 sm:$0xff]  }
 0x360   :  { %5839 = vmatprep.subr.bf16.mxu1 %v13117_v48  ;;  %v4058_v48 = vmax.f32 %v12836_v42, 0.0  ;;  %v13273_v42 = vld [vmem:[#allocation8 + $0x58c] ss:$16 sps:$4 sm:$0xff]  }
 0x362   :  { %5676 = vmatpush1.bf16.msra.mxu0 %v13112_v49  ;;  %v13193_v49 = vld [vmem:[#allocation8 + $0x3e8] ss:$16 sps:$4 sm:$0xff]  }
 0x363   :  { %5840 = vmatpush1.bf16.msra.mxu1 %v13115_v50  ;;  %5677 = vmatprep.subr.bf16.mxu0 %v13120_v51  ;;  %v13198_v50 = vld [vmem:[#allocation8 + $0x404] ss:$16 sps:$4 sm:$0xff]   ;;  %v13201_v51 = vld [vmem:[#allocation8 + $0x40c] ss:$16 sps:$4 sm:$0xff]  }
 0x364   :  { %5841 = vmatprep.subr.bf16.mxu1 %v13123_v52  ;;  %v13196_v52 = vld [vmem:[#allocation8 + $0x400] ss:$16 sps:$4 sm:$0xff]  }
 0x366   :  { %5678 = vmatpush1.bf16.msra.mxu0 %v13118_v16  ;;  %v4066_v16 = vpack.c.bf16 %v4058_v48, %v4058_v48  ;;  %v13274_v48 = vld [vmem:[#allocation8 + $0x5a0] ss:$16 sps:$4 sm:$0xff]  }
 0x367   :  { %5842 = vmatpush1.bf16.msra.mxu1 %v13121_v55  ;;  %5679 = vmatprep.subr.bf16.mxu0 %v13126_v58  ;;  %v13204_v55 = vld [vmem:[#allocation8 + $0x424] ss:$16 sps:$4 sm:$0xff]   ;;  %v13207_v58 = vld [vmem:[#allocation8 + $0x42c] ss:$16 sps:$4 sm:$0xff]  }
 0x368   :  { %5843 = vmatprep.subr.bf16.mxu1 %v13129_v23  ;;  %v13202_v23 = vld [vmem:[#allocation8 + $0x420] ss:$16 sps:$4 sm:$0xff]  }
 0x36a   :  { %5680 = vmatpush1.bf16.msra.mxu0 %v13124_v9  ;;  %v13205_v9 = vld [vmem:[#allocation8 + $0x428] ss:$16 sps:$4 sm:$0xff]  }
 0x36b   :  { %5844 = vmatpush1.bf16.msra.mxu1 %v13127_v62  ;;  %5681 = vmatprep.subr.bf16.mxu0 %v13132_v0  ;;  %v13210_v62 = vld [vmem:[#allocation8 + $0x444] ss:$16 sps:$4 sm:$0xff]   ;;  %v13213_v0 = vld [vmem:[#allocation8 + $0x44c] ss:$16 sps:$4 sm:$0xff]  }
 0x36c   :  { %5845 = vmatprep.subr.bf16.mxu1 %v13135_v2  ;;  %v13208_v2 = vld [vmem:[#allocation8 + $0x440] ss:$16 sps:$4 sm:$0xff]  }
 0x36e   :  { %5682 = vmatpush1.bf16.msra.mxu0 %v13130_v25  ;;  %v13211_v25 = vld [vmem:[#allocation8 + $0x448] ss:$16 sps:$4 sm:$0xff]  }
 0x36f   :  { %5846 = vmatpush1.bf16.msra.mxu1 %v13133_v5  ;;  %5683 = vmatprep.subr.bf16.mxu0 %v13138_v7  ;;  %v13216_v5 = vld [vmem:[#allocation8 + $0x464] ss:$16 sps:$4 sm:$0xff]   ;;  %v13219_v7 = vld [vmem:[#allocation8 + $0x46c] ss:$16 sps:$4 sm:$0xff]  }
 0x370   :  { %5847 = vmatprep.subr.bf16.mxu1 %v13141_v8  ;;  %v13214_v8 = vld [vmem:[#allocation8 + $0x460] ss:$16 sps:$4 sm:$0xff]  }
 0x372   :  { %5684 = vmatpush1.bf16.msra.mxu0 %v13136_v10  ;;  %v13217_v10 = vld [vmem:[#allocation8 + $0x468] ss:$16 sps:$4 sm:$0xff]  }
 0x373   :  { %5848 = vmatpush1.bf16.msra.mxu1 %v13139_v11  ;;  %5685 = vmatprep.subr.bf16.mxu0 %v13144_v12  ;;  %v13222_v11 = vld [vmem:[#allocation8 + $0x484] ss:$16 sps:$4 sm:$0xff]   ;;  %v13225_v12 = vld [vmem:[#allocation8 + $0x48c] ss:$16 sps:$4 sm:$0xff]  }
 0x374   :  { %5849 = vmatprep.subr.bf16.mxu1 %v13147_v13  ;;  %v13220_v13 = vld [vmem:[#allocation8 + $0x480] ss:$16 sps:$4 sm:$0xff]  }
 0x376   :  { %5686 = vmatpush1.bf16.msra.mxu0 %v13142_v33  ;;  %v13223_v33 = vld [vmem:[#allocation8 + $0x488] ss:$16 sps:$4 sm:$0xff]  }
 0x377   :  { %5850 = vmatpush1.bf16.msra.mxu1 %v13145_v36  ;;  %5687 = vmatprep.subr.bf16.mxu0 %v13150_v15  ;;  %v13228_v36 = vld [vmem:[#allocation8 + $0x4a4] ss:$16 sps:$4 sm:$0xff]   ;;  %v13231_v15 = vld [vmem:[#allocation8 + $0x4ac] ss:$16 sps:$4 sm:$0xff]  }
 0x378   :  { %5851 = vmatprep.subr.bf16.mxu1 %v13153_v17  ;;  %v13226_v17 = vld [vmem:[#allocation8 + $0x4a0] ss:$16 sps:$4 sm:$0xff]  }
 0x37a   :  { %5688 = vmatpush1.bf16.msra.mxu0 %v13148_v18  ;;  %v13229_v18 = vld [vmem:[#allocation8 + $0x4a8] ss:$16 sps:$4 sm:$0xff]  }
 0x37b   :  { %5852 = vmatpush1.bf16.msra.mxu1 %v13151_v43  ;;  %5689 = vmatprep.subr.bf16.mxu0 %v13156_v59  ;;  %v13234_v43 = vld [vmem:[#allocation8 + $0x4c4] ss:$16 sps:$4 sm:$0xff]   ;;  %v13237_v59 = vld [vmem:[#allocation8 + $0x4cc] ss:$16 sps:$4 sm:$0xff]  }
 0x37c   :  { %5853 = vmatprep.subr.bf16.mxu1 %v13159_v20  ;;  %v13232_v20 = vld [vmem:[#allocation8 + $0x4c0] ss:$16 sps:$4 sm:$0xff]  }
 0x37e   :  { %5690 = vmatpush1.bf16.msra.mxu0 %v13154_v21  ;;  %v13235_v21 = vld [vmem:[#allocation8 + $0x4c8] ss:$16 sps:$4 sm:$0xff]  }
 0x37f   :  { %5854 = vmatpush1.bf16.msra.mxu1 %v13157_v24  ;;  %5691 = vmatprep.subr.bf16.mxu0 %v13162_v27  ;;  %v13240_v24 = vld [vmem:[#allocation8 + $0x4e4] ss:$16 sps:$4 sm:$0xff]   ;;  %v13243_v27 = vld [vmem:[#allocation8 + $0x4ec] ss:$16 sps:$4 sm:$0xff]  }
 0x380   :  { %5855 = vmatprep.subr.bf16.mxu1 %v13165_v28  ;;  %v13238_v28 = vld [vmem:[#allocation8 + $0x4e0] ss:$16 sps:$4 sm:$0xff]  }
 0x382   :  { %5692 = vmatpush1.bf16.msra.mxu0 %v13160_v29  ;;  %v13241_v29 = vld [vmem:[#allocation8 + $0x4e8] ss:$16 sps:$4 sm:$0xff]  }
 0x383   :  { %5856 = vmatpush1.bf16.msra.mxu1 %v13163_v4  ;;  %5693 = vmatprep.subr.bf16.mxu0 %v13168_v54  ;;  %v13246_v4 = vld [vmem:[#allocation8 + $0x504] ss:$16 sps:$4 sm:$0xff]   ;;  %v13249_v54 = vld [vmem:[#allocation8 + $0x50c] ss:$16 sps:$4 sm:$0xff]  }
 0x384   :  { %5857 = vmatprep.subr.bf16.mxu1 %v13171_v61  ;;  %v13244_v61 = vld [vmem:[#allocation8 + $0x500] ss:$16 sps:$4 sm:$0xff]  }
 0x386   :  { %5694 = vmatpush1.bf16.msra.mxu0 %v13166_v30  ;;  %v13247_v30 = vld [vmem:[#allocation8 + $0x508] ss:$16 sps:$4 sm:$0xff]  }
 0x387   :  { %5858 = vmatpush1.bf16.msra.mxu1 %v13169_v31  ;;  %5695 = vmatprep.subr.bf16.mxu0 %v13174_v32  ;;  %v13252_v31 = vld [vmem:[#allocation8 + $0x524] ss:$16 sps:$4 sm:$0xff]   ;;  %v13255_v32 = vld [vmem:[#allocation8 + $0x52c] ss:$16 sps:$4 sm:$0xff]  }
 0x388   :  { %5859 = vmatprep.subr.bf16.mxu1 %v13177_v34  ;;  %v13250_v34 = vld [vmem:[#allocation8 + $0x520] ss:$16 sps:$4 sm:$0xff]  }
 0x38a   :  { %5696 = vmatpush1.bf16.msra.mxu0 %v13172_v35  ;;  %v13253_v35 = vld [vmem:[#allocation8 + $0x528] ss:$16 sps:$4 sm:$0xff]  }
 0x38b   :  { %5860 = vmatpush1.bf16.msra.mxu1 %v13175_v37  ;;  %5697 = vmatprep.subr.bf16.mxu0 %v13180_v57  ;;  %v13258_v37 = vld [vmem:[#allocation8 + $0x544] ss:$16 sps:$4 sm:$0xff]   ;;  %v13261_v57 = vld [vmem:[#allocation8 + $0x54c] ss:$16 sps:$4 sm:$0xff]  }
 0x38c   :  { %5861 = vmatprep.subr.bf16.mxu1 %v13183_v26  ;;  %v13256_v26 = vld [vmem:[#allocation8 + $0x540] ss:$16 sps:$4 sm:$0xff]  }
 0x38e   :  { %5698 = vmatpush1.bf16.msra.mxu0 %v13178_v14  ;;  %v13259_v14 = vld [vmem:[#allocation8 + $0x548] ss:$16 sps:$4 sm:$0xff]  }
 0x38f   :  { %5862 = vmatpush1.bf16.msra.mxu1 %v13181_v56  ;;  %5699 = vmatprep.subr.bf16.mxu0 %v13186_v39  ;;  %v13267_v56 = vld [vmem:[#allocation8 + $0x56c] ss:$16 sps:$4 sm:$0xff]   ;;  %v13262_v39 = vld [vmem:[#allocation8 + $0x560] ss:$16 sps:$4 sm:$0xff]  }
 0x390   :  { %5863 = vmatprep.subr.bf16.mxu1 %v13189_v40  ;;  %v13265_v40 = vld [vmem:[#allocation8 + $0x568] ss:$16 sps:$4 sm:$0xff]  }
 0x392   :  { %5700 = vmatpush1.bf16.msra.mxu0 %v13184_v41  ;;  %v13270_v41 = vld [vmem:[#allocation8 + $0x584] ss:$16 sps:$4 sm:$0xff]  }
 0x393   :  { %5864 = vmatpush1.bf16.msra.mxu1 %v13187_v1  ;;  %5701 = vmatprep.subr.bf16.mxu0 %v13192_v45  ;;  %v13268_v1 = vld [vmem:[#allocation8 + $0x580] ss:$16 sps:$4 sm:$0xff]   ;;  %v13271_v45 = vld [vmem:[#allocation8 + $0x588] ss:$16 sps:$4 sm:$0xff]  }
 0x394   :  { %5865 = vmatprep.subr.bf16.mxu1 %v13195_v46  ;;  %v13276_v46 = vld [vmem:[#allocation8 + $0x5a4] ss:$16 sps:$4 sm:$0xff]  }
 0x396   :  { %5702 = vmatpush1.bf16.msra.mxu0 %v13190_v47  ;;  %v13279_v47 = vld [vmem:[#allocation8 + $0x5ac] ss:$16 sps:$4 sm:$0xff]  }
 0x397   :  { %5866 = vmatpush1.bf16.msra.mxu1 %v13193_v49  ;;  %5712 = vmatprep.subr.bf16.mxu0 %v13198_v50  ;;  %v13277_v49 = vld [vmem:[#allocation8 + $0x5a8] ss:$16 sps:$4 sm:$0xff]   ;;  %v13282_v50 = vld [vmem:[#allocation8 + $0x5c4] ss:$16 sps:$4 sm:$0xff]  }
 0x398   :  { %5876 = vmatprep.subr.bf16.mxu1 %v13201_v51  ;;  %v13285_v51 = vld [vmem:[#allocation8 + $0x5cc] ss:$16 sps:$4 sm:$0xff]  }
 0x399   :  { %5704 = vmatmul.mubr.bf16.vlgmr.msra.gmra.mrb[8].mxu0 %v4066_v16 }
 0x39a   :  { %5868 = vmatmul.mubr.bf16.vlgmr.msra.gmra.mrb[8].mxu1 %v4066_v16  ;;  %5713 = vmatpush1.bf16.msra.mxu0 %v13196_v52  ;;  %v13280_v52 = vld [vmem:[#allocation8 + $0x5c0] ss:$16 sps:$4 sm:$0xff]   ;;  %v13283_v16 = vld [vmem:[#allocation8 + $0x5c8] ss:$16 sps:$4 sm:$0xff]  }
 0x39b   :  { %5877 = vmatpush1.bf16.msra.mxu1 %v13199_v60  ;;  %5714 = vmatprep.subr.bf16.mxu0 %v13204_v55  ;;  %v13288_v60 = vld [vmem:[#allocation8 + $0x5e4] ss:$16 sps:$4 sm:$0xff]   ;;  %v13291_v55 = vld [vmem:[#allocation8 + $0x5ec] ss:$16 sps:$4 sm:$0xff]  }
 0x39c   :  { %5878 = vmatprep.subr.bf16.mxu1 %v13207_v58  ;;  %v13286_v58 = vld [vmem:[#allocation8 + $0x5e0] ss:$16 sps:$4 sm:$0xff]  }
 0x39e   :  { %5715 = vmatpush1.bf16.msra.mxu0 %v13202_v23  ;;  %v13289_v23 = vld [vmem:[#allocation8 + $0x5e8] ss:$16 sps:$4 sm:$0xff]  }
 0x39f   :  { %5879 = vmatpush1.bf16.msra.mxu1 %v13205_v9  ;;  %5716 = vmatprep.subr.bf16.mxu0 %v13210_v62  ;;  %v13294_v9 = vld [vmem:[#allocation8 + $0x604] ss:$16 sps:$4 sm:$0xff]   ;;  %v13297_v62 = vld [vmem:[#allocation8 + $0x60c] ss:$16 sps:$4 sm:$0xff]  }
 0x3a0   :  { %5880 = vmatprep.subr.bf16.mxu1 %v13213_v0  ;;  %v14262_v0 = vsub.s32 4, %v14130_v44 }
 0x3a2   :  { %5717 = vmatpush1.bf16.msra.mxu0 %v13208_v2  ;;  %v14265_v2 = vsub.s32 5, %v14130_v44 }
 0x3a3   :  { %5881 = vmatpush1.bf16.msra.mxu1 %v13211_v25  ;;  %5718 = vmatprep.subr.bf16.mxu0 %v13216_v5  ;;  %v14268_v25 = vsub.s32 7, %v14130_v44  ;;  %v819_v5 = vrot.slane %v14236_v6, %v14262_v0 }
 0x3a4   :  { %5882 = vmatprep.subr.bf16.mxu1 %v13219_v7  ;;  %v823_v7 = vrot.slane %v14236_v6, %v14265_v2 }
 0x3a6   :  { %5719 = vmatpush1.bf16.msra.mxu0 %v13214_v8  ;;  %v831_v8 = vrot.slane %v14236_v6, %v14268_v25  ;;  %v13300_v6 = vld [vmem:[#allocation8 + $0x624] ss:$16 sps:$4 sm:$0xff]  }
 0x3a7   :  { %5883 = vmatpush1.bf16.msra.mxu1 %v13217_v10  ;;  %5720 = vmatprep.subr.bf16.mxu0 %v13222_v11 }
 0x3a8   :  { %5884 = vmatprep.subr.bf16.mxu1 %v13225_v12 }
 0x3aa   :  { %5721 = vmatpush1.bf16.msra.mxu0 %v13220_v13 }
 0x3ab   :  { %5885 = vmatpush1.bf16.msra.mxu1 %v13223_v33  ;;  %5722 = vmatprep.subr.bf16.mxu0 %v13228_v36 }
 0x3ac   :  { %5886 = vmatprep.subr.bf16.mxu1 %v13231_v15 }
 0x3ae   :  { %5723 = vmatpush1.bf16.msra.mxu0 %v13226_v17 }
 0x3af   :  { %5887 = vmatpush1.bf16.msra.mxu1 %v13229_v18  ;;  %5724 = vmatprep.subr.bf16.mxu0 %v13234_v43 }
 0x3b0   :  { %5888 = vmatprep.subr.bf16.mxu1 %v13237_v59 }
 0x3b2   :  { %5725 = vmatpush1.bf16.msra.mxu0 %v13232_v20 }
 0x3b3   :  { %5889 = vmatpush1.bf16.msra.mxu1 %v13235_v21  ;;  %5726 = vmatprep.subr.bf16.mxu0 %v13240_v24 }
 0x3b4   :  { %5890 = vmatprep.subr.bf16.mxu1 %v13243_v27 }
 0x3b6   :  { %5727 = vmatpush1.bf16.msra.mxu0 %v13238_v28  ;;  %v13292_v28 = vld [vmem:[#allocation8 + $0x600] ss:$16 sps:$4 sm:$0xff]  }
 0x3b7   :  { %5891 = vmatpush1.bf16.msra.mxu1 %v13241_v29  ;;  %5728 = vmatprep.subr.bf16.mxu0 %v13246_v4  ;;  %v13295_v29 = vld [vmem:[#allocation8 + $0x608] ss:$16 sps:$4 sm:$0xff]  }
 0x3b8   :  { %5892 = vmatprep.subr.bf16.mxu1 %v13249_v54  ;;  %v13303_v54 = vld [vmem:[#allocation8 + $0x62c] ss:$16 sps:$4 sm:$0xff]  }
 0x3ba   :  { %5729 = vmatpush1.bf16.msra.mxu0 %v13244_v61 }
 0x3bb   :  { %5893 = vmatpush1.bf16.msra.mxu1 %v13247_v30  ;;  %5730 = vmatprep.subr.bf16.mxu0 %v13252_v31  ;;  %v13298_v30 = vld [vmem:[#allocation8 + $0x620] ss:$16 sps:$4 sm:$0xff]   ;;  %v13301_v31 = vld [vmem:[#allocation8 + $0x628] ss:$16 sps:$4 sm:$0xff]  }
 0x3bc   :  { %5894 = vmatprep.subr.bf16.mxu1 %v13255_v32  ;;  %v13306_v32 = vld [vmem:[#allocation8 + $0x644] ss:$16 sps:$4 sm:$0xff]  }
 0x3be   :  { %5731 = vmatpush1.bf16.msra.mxu0 %v13250_v34  ;;  %v13309_v34 = vld [vmem:[#allocation8 + $0x64c] ss:$16 sps:$4 sm:$0xff]  }
 0x3bf   :  { %5895 = vmatpush1.bf16.msra.mxu1 %v13253_v35  ;;  %5732 = vmatprep.subr.bf16.mxu0 %v13258_v37  ;;  %v13304_v35 = vld [vmem:[#allocation8 + $0x640] ss:$16 sps:$4 sm:$0xff]   ;;  %v13307_v37 = vld [vmem:[#allocation8 + $0x648] ss:$16 sps:$4 sm:$0xff]  }
 0x3c0   :  { %5896 = vmatprep.subr.bf16.mxu1 %v13261_v57  ;;  %v13312_v57 = vld [vmem:[#allocation8 + $0x664] ss:$16 sps:$4 sm:$0xff]  }
 0x3c2   :  { %5733 = vmatpush1.bf16.msra.mxu0 %v13256_v26  ;;  %v13315_v26 = vld [vmem:[#allocation8 + $0x66c] ss:$16 sps:$4 sm:$0xff]  }
 0x3c3   :  { %5897 = vmatpush1.bf16.msra.mxu1 %v13259_v14  ;;  %5734 = vmatprep.subr.bf16.mxu0 %v13264_v38  ;;  %v13310_v14 = vld [vmem:[#allocation8 + $0x660] ss:$16 sps:$4 sm:$0xff]   ;;  %v13313_v38 = vld [vmem:[#allocation8 + $0x668] ss:$16 sps:$4 sm:$0xff]  }
 0x3c4   :  { %5898 = vmatprep.subr.bf16.mxu1 %v13267_v56  ;;  %v13318_v56 = vld [vmem:[#allocation8 + $0x684] ss:$16 sps:$4 sm:$0xff]  }
 0x3c6   :  { %5735 = vmatpush1.bf16.msra.mxu0 %v13262_v39  ;;  %v13321_v39 = vld [vmem:[#allocation8 + $0x68c] ss:$16 sps:$4 sm:$0xff]  }
 0x3c7   :  { %5899 = vmatpush1.bf16.msra.mxu1 %v13265_v40  ;;  %5736 = vmatprep.subr.bf16.mxu0 %v13270_v41  ;;  %v13316_v40 = vld [vmem:[#allocation8 + $0x680] ss:$16 sps:$4 sm:$0xff]   ;;  %v13319_v41 = vld [vmem:[#allocation8 + $0x688] ss:$16 sps:$4 sm:$0xff]  }
 0x3c8   :  { %5900 = vmatprep.subr.bf16.mxu1 %v13273_v42  ;;  %v13324_v42 = vld [vmem:[#allocation8 + $0x6a4] ss:$16 sps:$4 sm:$0xff]  }
 0x3ca   :  { %5737 = vmatpush1.bf16.msra.mxu0 %v13268_v1  ;;  %v13327_v1 = vld [vmem:[#allocation8 + $0x6ac] ss:$16 sps:$4 sm:$0xff]  }
 0x3cb   :  { %5901 = vmatpush1.bf16.msra.mxu1 %v13271_v45  ;;  %5738 = vmatprep.subr.bf16.mxu0 %v13276_v46  ;;  %v13322_v45 = vld [vmem:[#allocation8 + $0x6a0] ss:$16 sps:$4 sm:$0xff]   ;;  %v13325_v46 = vld [vmem:[#allocation8 + $0x6a8] ss:$16 sps:$4 sm:$0xff]  }
 0x3cc   :  { %5902 = vmatprep.subr.bf16.mxu1 %v13279_v47  ;;  %v13330_v47 = vld [vmem:[#allocation8 + $0x6c4] ss:$16 sps:$4 sm:$0xff]  }
 0x3ce   :  { %5739 = vmatpush1.bf16.msra.mxu0 %v13274_v48  ;;  %v13333_v48 = vld [vmem:[#allocation8 + $0x6cc] ss:$16 sps:$4 sm:$0xff]  }
 0x3cf   :  { %5903 = vmatpush1.bf16.msra.mxu1 %v13277_v49  ;;  %5740 = vmatprep.subr.bf16.mxu0 %v13282_v50  ;;  %v13328_v49 = vld [vmem:[#allocation8 + $0x6c0] ss:$16 sps:$4 sm:$0xff]   ;;  %v13331_v50 = vld [vmem:[#allocation8 + $0x6c8] ss:$16 sps:$4 sm:$0xff]  }
 0x3d0   :  { %5904 = vmatprep.subr.bf16.mxu1 %v13285_v51  ;;  %v13336_v51 = vld [vmem:[#allocation8 + $0x6e4] ss:$16 sps:$4 sm:$0xff]  }
 0x3d2   :  { %5741 = vmatpush1.bf16.msra.mxu0 %v13280_v52  ;;  %v13339_v52 = vld [vmem:[#allocation8 + $0x6ec] ss:$16 sps:$4 sm:$0xff]  }
 0x3d3   :  { %5905 = vmatpush1.bf16.msra.mxu1 %v13283_v16  ;;  %5742 = vmatprep.subr.bf16.mxu0 %v13288_v60  ;;  %v13334_v16 = vld [vmem:[#allocation8 + $0x6e0] ss:$16 sps:$4 sm:$0xff]   ;;  %v13337_v60 = vld [vmem:[#allocation8 + $0x6e8] ss:$16 sps:$4 sm:$0xff]  }
 0x3d4   :  { %5906 = vmatprep.subr.bf16.mxu1 %v13291_v55  ;;  %v13342_v55 = vld [vmem:[#allocation8 + $0x704] ss:$16 sps:$4 sm:$0xff]  }
 0x3d6   :  { %5743 = vmatpush1.bf16.msra.mxu0 %v13286_v58  ;;  %v13345_v58 = vld [vmem:[#allocation8 + $0x70c] ss:$16 sps:$4 sm:$0xff]  }
 0x3d7   :  { %5907 = vmatpush1.bf16.msra.mxu1 %v13289_v23  ;;  %5753 = vmatprep.subr.bf16.mxu0 %v13294_v9  ;;  %v13340_v23 = vld [vmem:[#allocation8 + $0x700] ss:$16 sps:$4 sm:$0xff]   ;;  %v13343_v9 = vld [vmem:[#allocation8 + $0x708] ss:$16 sps:$4 sm:$0xff]  }
 0x3d8   :  { %5917 = vmatprep.subr.bf16.mxu1 %v13297_v62  ;;  %v13348_v62 = vld [vmem:[#allocation8 + $0x724] ss:$16 sps:$4 sm:$0xff]  }
 0x3ec   :  { %v3885_v10 = vpop.f32.mrb[4].mxu0  ;;  %v14276_v12 = vpop.f32.mrb[4].mxu1 }
 0x3ed   :  { %v12838_v11 = vadd.f32 %v3885_v10, %v819_v5  ;;  %v3887_v13 = vpop.f32.mrb[5].mxu0  ;;  %v4051_v36 = vpop.f32.mrb[5].mxu1  ;;  %v13351_v5 = vld [vmem:[#allocation8 + $0x72c] ss:$16 sps:$4 sm:$0xff]   ;;  %v13354_v10 = vld [vmem:[#allocation8 + $0x744] ss:$16 sps:$4 sm:$0xff]  }
 0x3ee   :  { %v12839_v33 = vadd.f32 %v3887_v13, %v823_v7  ;;  %v3889_v15 = vpop.f32.mrb[6].mxu0  ;;  %v12841_v18 = vadd.f32 %v4051_v36, %v831_v8  ;;  %v4053_v43 = vpop.f32.mrb[6].mxu1  ;;  %v13346_v7 = vld [vmem:[#allocation8 + $0x720] ss:$16 sps:$4 sm:$0xff]   ;;  %v13349_v8 = vld [vmem:[#allocation8 + $0x728] ss:$16 sps:$4 sm:$0xff]  }
 0x3ef   :  { %v4060_v17 = vmax.f32 %v12838_v11, 0.0  ;;  %v3890_v59 = vpop.f32.mrb[7].mxu0  ;;  %v4054_v21 = vpop.f32.mrb[7].mxu1  ;;  %v13357_v11 = vld [vmem:[#allocation8 + $0x74c] ss:$16 sps:$4 sm:$0xff]  }
 0x3f0   :  { %v4061_v20 = vmax.f32 %v12839_v33, 0.0  ;;  %v4063_v24 = vmax.f32 %v12841_v18, 0.0  ;;  %v13352_v13 = vld [vmem:[#allocation8 + $0x740] ss:$16 sps:$4 sm:$0xff]   ;;  %v13355_v33 = vld [vmem:[#allocation8 + $0x748] ss:$16 sps:$4 sm:$0xff]  }
 0x3f1   :  { %v4068_v4 = vpack.c.bf16 %v4060_v17, %v4060_v17  ;;  %v13360_v36 = vld [vmem:[#allocation8 + $0x764] ss:$16 sps:$4 sm:$0xff]   ;;  %v13363_v15 = vld [vmem:[#allocation8 + $0x76c] ss:$16 sps:$4 sm:$0xff]   ;;  %v13358_v17 = vld [vmem:[#allocation8 + $0x760] ss:$16 sps:$4 sm:$0xff]  }
 0x3f2   :  { %v4069_v27 = vpack.c.bf16 %v4061_v20, %v4061_v20  ;;  %v4071_v61 = vpack.c.bf16 %v4063_v24, %v4063_v24  ;;  %v13361_v18 = vld [vmem:[#allocation8 + $0x768] ss:$16 sps:$4 sm:$0xff]   ;;  %v13366_v43 = vld [vmem:[#allocation8 + $0x784] ss:$16 sps:$4 sm:$0xff]   ;;  %v13369_v59 = vld [vmem:[#allocation8 + $0x78c] ss:$16 sps:$4 sm:$0xff]  }
 0x3f3   :  { %v13364_v20 = vld [vmem:[#allocation8 + $0x780] ss:$16 sps:$4 sm:$0xff]   ;;  %v13367_v21 = vld [vmem:[#allocation8 + $0x788] ss:$16 sps:$4 sm:$0xff]   ;;  %v14279_v24 = vsub.s32 6, %v14130_v44 }
 0x3f4   :  { %5744 = vmatprep.mubr.bf16.mxu0 %v4069_v27  ;;  %5908 = vmatprep.mubr.bf16.mxu1 %v4069_v27  ;;  %v13372_v27 = vld [vmem:[#allocation8 + $0x7a4] ss:$16 sps:$4 sm:$0xff]   ;;  %v13379_v44 = vld [vmem:[#allocation8 + $0x7c8] ss:$16 sps:$4 sm:$0xff]  }
 0x3f5   :  { %5745 = vmatmul.mubr.bf16.vlgmr.msra.gmra.mrb[8].mxu0 %v4068_v4  ;;  %5909 = vmatmul.mubr.bf16.vlgmr.msra.gmra.mrb[8].mxu1 %v4068_v4  ;;  %v13373_v4 = vld [vmem:[#allocation8 + $0x7a8] ss:$16 sps:$4 sm:$0xff]  }
 0x3f6   :  { %5754 = vmatpush1.bf16.msra.mxu0 %v13292_v28  ;;  %5918 = vmatpush1.bf16.msra.mxu1 %v13295_v29  ;;  %v13375_v28 = vld [vmem:[#allocation8 + $0x7ac] ss:$16 sps:$4 sm:$0xff]   ;;  %v13370_v29 = vld [vmem:[#allocation8 + $0x7a0] ss:$16 sps:$4 sm:$0xff]  }
 0x3f7   :  { %5785 = vmatprep.mubr.bf16.mxu0 %v4071_v61  ;;  %5949 = vmatprep.mubr.bf16.mxu1 %v4071_v61  ;;  %v13378_v61 = vld [vmem:[#allocation8 + $0x7c4] ss:$16 sps:$4 sm:$0xff]  }
 0x3f8   :  { %5755 = vmatprep.subr.bf16.mxu0 %v13300_v6  ;;  %5919 = vmatprep.subr.bf16.mxu1 %v13303_v54  ;;  %v13428_v6 = vld [vmem:[#allocation7] sm:$0xff] }
 0x3f9   :  { %v827_v54 = vrot.slane %v13428_v6, %v14279_v24 }
 0x3fa   :  { %5756 = vmatpush1.bf16.msra.mxu0 %v13298_v30  ;;  %5920 = vmatpush1.bf16.msra.mxu1 %v13301_v31  ;;  %v13381_v30 = vld [vmem:[#allocation8 + $0x7cc] ss:$16 sps:$4 sm:$0xff]   ;;  %v13376_v31 = vld [vmem:[#allocation8 + $0x7c0] ss:$16 sps:$4 sm:$0xff]  }
 0x3fb   :  { %5757 = vmatprep.subr.bf16.mxu0 %v13306_v32  ;;  %5921 = vmatprep.subr.bf16.mxu1 %v13309_v34  ;;  %v12840_v32 = vadd.f32 %v14276_v12, %v827_v54  ;;  %v13384_v34 = vld [vmem:[#allocation8 + $0x7e4] ss:$16 sps:$4 sm:$0xff]  }
 0x3fc   :  { %v13390_v12 = vld [vmem:[%s14575_s6] sm:$0xff]  }
 0x3fe   :  { %5758 = vmatpush1.bf16.msra.mxu0 %v13304_v35  ;;  %5922 = vmatpush1.bf16.msra.mxu1 %v13307_v37  ;;  %v13387_v35 = vld [vmem:[#allocation8 + $0x7ec] ss:$16 sps:$4 sm:$0xff]   ;;  %v13382_v37 = vld [vmem:[#allocation8 + $0x7e0] ss:$16 sps:$4 sm:$0xff]  }
 0x3ff   :  { %5759 = vmatprep.subr.bf16.mxu0 %v13312_v57  ;;  %5923 = vmatprep.subr.bf16.mxu1 %v13315_v26  ;;  %v13385_v57 = vld [vmem:[#allocation8 + $0x7e8] ss:$16 sps:$4 sm:$0xff]   ;;  %v4062_v26 = vmax.f32 %v12840_v32, 0.0 }
 0x402   :  { %5760 = vmatpush1.bf16.msra.mxu0 %v13310_v14  ;;  %5924 = vmatpush1.bf16.msra.mxu1 %v13313_v38  ;;  %v13388_v14 = vld [vmem:[%s14575_s6 + $0x40] sm:$0xff]  }
 0x403   :  { %5761 = vmatprep.subr.bf16.mxu0 %v13318_v56  ;;  %5925 = vmatprep.subr.bf16.mxu1 %v13321_v39  ;;  %v13389_v38 = vld [vmem:[%s14575_s6 + $0xc0] sm:$0xff]   ;;  %v4070_v39 = vpack.c.bf16 %v4062_v26, %v4062_v26 }
 0x404   :  { %v13391_v56 = vld [vmem:[%s14575_s6 + $0x80] sm:$0xff]  }
 0x406   :  { %5762 = vmatpush1.bf16.msra.mxu0 %v13316_v40  ;;  %5926 = vmatpush1.bf16.msra.mxu1 %v13319_v41  ;;  %v13392_v40 = vld [vmem:[%s14575_s6 + $0x48] sm:$0xff]  }
 0x407   :  { %5763 = vmatprep.subr.bf16.mxu0 %v13324_v42  ;;  %5927 = vmatprep.subr.bf16.mxu1 %v13327_v1  ;;  %v13393_v41 = vld [vmem:[%s14575_s6 + $0xc8] sm:$0xff]  }
 0x408   :  { %v13394_v42 = vld [vmem:[%s14575_s6 + $0x8] sm:$0xff]  }
 0x409   :  { %v13395_v1 = vld [vmem:[%s14575_s6 + $0x88] sm:$0xff]  }
 0x40a   :  { %5764 = vmatpush1.bf16.msra.mxu0 %v13322_v45  ;;  %5928 = vmatpush1.bf16.msra.mxu1 %v13325_v46  ;;  %v13396_v45 = vld [vmem:[%s14575_s6 + $0x50] sm:$0xff]  }
 0x40b   :  { %5765 = vmatprep.subr.bf16.mxu0 %v13330_v47  ;;  %5929 = vmatprep.subr.bf16.mxu1 %v13333_v48  ;;  %v13397_v46 = vld [vmem:[%s14575_s6 + $0xd0] sm:$0xff]  }
 0x40c   :  { %v13398_v47 = vld [vmem:[%s14575_s6 + $0x10] sm:$0xff]  }
 0x40d   :  { %v13399_v48 = vld [vmem:[%s14575_s6 + $0x90] sm:$0xff]  }
 0x40e   :  { %5766 = vmatpush1.bf16.msra.mxu0 %v13328_v49  ;;  %5930 = vmatpush1.bf16.msra.mxu1 %v13331_v50  ;;  %v13400_v49 = vld [vmem:[%s14575_s6 + $0x58] sm:$0xff]  }
 0x40f   :  { %5767 = vmatprep.subr.bf16.mxu0 %v13336_v51  ;;  %5931 = vmatprep.subr.bf16.mxu1 %v13339_v52  ;;  %v13401_v50 = vld [vmem:[%s14575_s6 + $0xd8] sm:$0xff]  }
 0x410   :  { %v13402_v51 = vld [vmem:[%s14575_s6 + $0x18] sm:$0xff]  }
 0x411   :  { %v13403_v52 = vld [vmem:[%s14575_s6 + $0x98] sm:$0xff]  }
 0x412   :  { %5768 = vmatpush1.bf16.msra.mxu0 %v13334_v16  ;;  %5932 = vmatpush1.bf16.msra.mxu1 %v13337_v60  ;;  %v13404_v16 = vld [vmem:[%s14575_s6 + $0x60] sm:$0xff]  }
 0x413   :  { %5769 = vmatprep.subr.bf16.mxu0 %v13342_v55  ;;  %5933 = vmatprep.subr.bf16.mxu1 %v13345_v58  ;;  %v13405_v60 = vld [vmem:[%s14575_s6 + $0xe0] sm:$0xff]  }
 0x414   :  { %v13406_v55 = vld [vmem:[%s14575_s6 + $0x20] sm:$0xff]  }
 0x415   :  { %v13407_v58 = vld [vmem:[%s14575_s6 + $0xa0] sm:$0xff]  }
 0x416   :  { %5770 = vmatpush1.bf16.msra.mxu0 %v13340_v23  ;;  %5934 = vmatpush1.bf16.msra.mxu1 %v13343_v9  ;;  %v13408_v23 = vld [vmem:[%s14575_s6 + $0x68] sm:$0xff]  }
 0x417   :  { %5771 = vmatprep.subr.bf16.mxu0 %v13348_v62  ;;  %5935 = vmatprep.subr.bf16.mxu1 %v13351_v5  ;;  %v13409_v9 = vld [vmem:[%s14575_s6 + $0xe8] sm:$0xff]  }
 0x418   :  { %v13410_v62 = vld [vmem:[%s14575_s6 + $0x28] sm:$0xff]  }
 0x419   :  { %v13411_v5 = vld [vmem:[%s14575_s6 + $0xa8] sm:$0xff]  }
 0x41a   :  { %5772 = vmatpush1.bf16.msra.mxu0 %v13346_v7  ;;  %5936 = vmatpush1.bf16.msra.mxu1 %v13349_v8  ;;  %v13412_v7 = vld [vmem:[%s14575_s6 + $0x70] sm:$0xff]  }
 0x41b   :  { %5773 = vmatprep.subr.bf16.mxu0 %v13354_v10  ;;  %5937 = vmatprep.subr.bf16.mxu1 %v13357_v11  ;;  %v13413_v8 = vld [vmem:[%s14575_s6 + $0xf0] sm:$0xff]  }
 0x41c   :  { %v13414_v10 = vld [vmem:[%s14575_s6 + $0x30] sm:$0xff]  }
 0x41d   :  { %v13415_v11 = vld [vmem:[%s14575_s6 + $0xb0] sm:$0xff]  }
 0x41e   :  { %5774 = vmatpush1.bf16.msra.mxu0 %v13352_v13  ;;  %5938 = vmatpush1.bf16.msra.mxu1 %v13355_v33  ;;  %v13416_v13 = vld [vmem:[%s14575_s6 + $0x78] sm:$0xff]  }
 0x41f   :  { %5775 = vmatprep.subr.bf16.mxu0 %v13360_v36  ;;  %5939 = vmatprep.subr.bf16.mxu1 %v13363_v15  ;;  %v13417_v33 = vld [vmem:[%s14575_s6 + $0xf8] sm:$0xff]  }
 0x420   :  { %v13418_v36 = vld [vmem:[%s14575_s6 + $0x38] sm:$0xff]  }
 0x421   :  { %v13419_v15 = vld [vmem:[%s14575_s6 + $0xb8] sm:$0xff]   ;;  %s13846_s6 = smov 120  }
 0x422   :  { %5776 = vmatpush1.bf16.msra.mxu0 %v13358_v17  ;;  %5940 = vmatpush1.bf16.msra.mxu1 %v13361_v18  ;;  %v6312_v17 = vld [vmem:[#allocation2] sm:$0x3]  ;;  %v4328_v18 = vld [vmem:[#allocation10] sm:$0xf] }
 0x423   :  { %5777 = vmatprep.subr.bf16.mxu0 %v13366_v43  ;;  %5941 = vmatprep.subr.bf16.mxu1 %v13369_v59  ;;  %v4333_v43 = vrot.slane %v4328_v18, %v14244_v19  ;;  %v4341_v59 = vrot.slane %v4328_v18, %v14256_v63 }
 0x424   :  { %6314 = vrot.lane.b32.xlu0 %v6312_v17, %s13840_s2  ;;  %v13848_v17 = vmov 0  }
 0x426   :  { %5778 = vmatpush1.bf16.msra.mxu0 %v13364_v20  ;;  %5942 = vmatpush1.bf16.msra.mxu1 %v13367_v21  ;;  %v4337_v20 = vrot.slane %v4328_v18, %v14234_v3  ;;  %v4345_v21 = vrot.slane %v4328_v18, %v14247_v22  ;;  %v6475_v18 = vld [vmem:[#allocation19] sm:$0xff] }
 0x427   :  { %5779 = vmatprep.subr.bf16.mxu0 %v13372_v27  ;;  %5943 = vmatprep.subr.bf16.mxu1 %v13375_v28 }
 0x42a   :  { %5780 = vmatpush1.bf16.msra.mxu0 %v13370_v29  ;;  %5944 = vmatpush1.bf16.msra.mxu1 %v13373_v4 }
 0x42b   :  { %5781 = vmatprep.subr.bf16.mxu0 %v13378_v61  ;;  %5945 = vmatprep.subr.bf16.mxu1 %v13381_v30 }
 0x42e   :  { %5782 = vmatpush1.bf16.msra.mxu0 %v13376_v31  ;;  %5946 = vmatpush1.bf16.msra.mxu1 %v13379_v44 }
 0x42f   :  { %5783 = vmatprep.subr.bf16.mxu0 %v13384_v34  ;;  %5947 = vmatprep.subr.bf16.mxu1 %v13387_v35 }
 0x432   :  { %5784 = vmatpush1.bf16.msra.mxu0 %v13382_v37  ;;  %5948 = vmatpush1.bf16.msra.mxu1 %v13385_v57 }
 0x433   :  { %12782 = vmatprep.subr.bf16.mxu0 %v13388_v14  ;;  %12804 = vmatprep.subr.bf16.mxu1 %v13389_v38 }
 0x435   :  { %5786 = vmatmul.mubr.bf16.vlgmr.msra.gmra.mrb[8].mxu0 %v4070_v39  ;;  %5950 = vmatmul.mubr.bf16.vlgmr.msra.gmra.mrb[8].mxu1 %v4070_v39  ;;  %v6332_v39 = vld [vmem:[#allocation13] sm:$0xf] }
 0x436   :  { %12783 = vmatpush3.bf16.msra.mxu0 %v13390_v12  ;;  %12805 = vmatpush3.bf16.msra.mxu1 %v13391_v56 }
 0x437   :  { %12784 = vmatprep.subr.bf16.mxu0 %v13392_v40  ;;  %12806 = vmatprep.subr.bf16.mxu1 %v13393_v41  ;;  %v13845_v40 = vmov 0.0   ;;  %v6346_v41 = vsel %vm6344_vm0, %v6332_v39, 0  ;;  %v6519_v39 = vld [vmem:[#allocation19 + $0x160] sm:$0xff] }
 0x43a   :  { %12785 = vmatpush3.bf16.msra.mxu0 %v13394_v42  ;;  %12807 = vmatpush3.bf16.msra.mxu1 %v13395_v1 }
 0x43b   :  { %12786 = vmatprep.subr.bf16.mxu0 %v13396_v45  ;;  %12808 = vmatprep.subr.bf16.mxu1 %v13397_v46  ;;  %v12102_v45 = vld [vmem:[#allocation11] ss:$0 sm:$0xff] }
 0x43e   :  { %12787 = vmatpush3.bf16.msra.mxu0 %v13398_v47  ;;  %12809 = vmatpush3.bf16.msra.mxu1 %v13399_v48 }
 0x43f   :  { %12788 = vmatprep.subr.bf16.mxu0 %v13400_v49  ;;  %12810 = vmatprep.subr.bf16.mxu1 %v13401_v50 }
 0x442   :  { %12789 = vmatpush3.bf16.msra.mxu0 %v13402_v51  ;;  %12811 = vmatpush3.bf16.msra.mxu1 %v13403_v52 }
 0x443   :  { %12790 = vmatprep.subr.bf16.mxu0 %v13404_v16  ;;  %12812 = vmatprep.subr.bf16.mxu1 %v13405_v60 }
 0x446   :  { %12791 = vmatpush3.bf16.msra.mxu0 %v13406_v55  ;;  %12813 = vmatpush3.bf16.msra.mxu1 %v13407_v58 }
 0x447   :  { %12792 = vmatprep.subr.bf16.mxu0 %v13408_v23  ;;  %12814 = vmatprep.subr.bf16.mxu1 %v13409_v9  ;;  %v13420_v9 = vld [vmem:[#allocation16] ss:$8 sps:$4 sm:$0xff]  }
 0x44a   :  { %12793 = vmatpush3.bf16.msra.mxu0 %v13410_v62  ;;  %12815 = vmatpush3.bf16.msra.mxu1 %v13411_v5  ;;  %v13422_v62 = vld [vmem:[#allocation16 + $0x4] ss:$8 sps:$4 sm:$0xff]  }
 0x44b   :  { %12794 = vmatprep.subr.bf16.mxu0 %v13412_v7  ;;  %12816 = vmatprep.subr.bf16.mxu1 %v13413_v8 }
 0x44e   :  { %12795 = vmatpush3.bf16.msra.mxu0 %v13414_v10  ;;  %12817 = vmatpush3.bf16.msra.mxu1 %v13415_v11 }
 0x44f   :  { %12796 = vmatprep.subr.bf16.mxu0 %v13416_v13  ;;  %12818 = vmatprep.subr.bf16.mxu1 %v13417_v33 }
 0x452   :  { %12797 = vmatpush3.bf16.msra.mxu0 %v13418_v36  ;;  %12819 = vmatpush3.bf16.msra.mxu1 %v13419_v15  ;;  %v13425_v36 = vld [vmem:[#allocation16 + $0x14] ss:$8 sps:$4 sm:$0xff]   ;;  %v13423_v15 = vld [vmem:[#allocation16 + $0x10] ss:$8 sps:$4 sm:$0xff]  }
 0x453   :  { %12828 = vmatprep.subr.bf16.mxu0 %v13845_v40  ;;  %6430 = vmatprep.subr.bf16.mxu1 %v13422_v62  ;;  %v6555_v62 = vld [vmem:[#allocation19 + $0x280] sm:$0xff] }
 0x496   :  { %v6315_v5 = vpop.permute.xlu0 %6314 }
 0x508   :  { %v5787_v27 = vpop.f32.mrb[8].mxu0  ;;  %v5951_v28 = vpop.f32.mrb[8].mxu1 }
 0x509   :  { %v12842_v29 = vadd.f32 %v5787_v27, %v4333_v43  ;;  %v12844_v4 = vadd.f32 %v5951_v28, %v4341_v59  ;;  %v5789_v6 = vpop.f32.mrb[9].mxu0  ;;  %v5953_v54 = vpop.f32.mrb[9].mxu1  ;;  %v6479_v43 = vld [vmem:[#allocation19 + $0x20] sm:$0xff]  ;;  %v14387_v59 = vld [vmem:[#allocation19 + $0x8] sm:$0xff] }
 0x50a   :  { %v12843_v61 = vadd.f32 %v5789_v6, %v4337_v20  ;;  %v12845_v30 = vadd.f32 %v5953_v54, %v4345_v21  ;;  %v5791_v31 = vpop.f32.mrb[10].mxu0  ;;  %v5955_v44 = vpop.f32.mrb[10].mxu1  ;;  %v12142_v20 = vcombine.low %v6475_v18, %v6479_v43  ;;  %v12143_v21 = vcombine.high %v6475_v18, %v6479_v43  ;;  %v14389_v27 = vld [vmem:[#allocation19 + $0x28] sm:$0xff]  ;;  %v6483_v28 = vld [vmem:[#allocation19 + $0x40] sm:$0xff] }
 0x50b   :  { %v5958_v32 = vmax.f32 %v12842_v29, 0.0  ;;  %v5960_v34 = vmax.f32 %v12844_v4, 0.0  ;;  %v5792_v35 = vpop.f32.mrb[11].mxu0  ;;  %v5956_v37 = vpop.f32.mrb[11].mxu1  ;;  %v6487_v29 = vld [vmem:[#allocation19 + $0x60] sm:$0xff]  ;;  %v12144_v4 = vcombine.low %v14387_v59, %v14389_v27  ;;  %v12145_v6 = vcombine.high %v14387_v59, %v14389_v27 }
 0x50c   :  { %v5959_v57 = vmax.f32 %v12843_v61, 0.0  ;;  %v5961_v26 = vmax.f32 %v12845_v30, 0.0  ;;  %v12151_v54 = vcombine.high %v6483_v28, %v6487_v29  ;;  %v12150_v61 = vcombine.low %v6483_v28, %v6487_v29  ;;  %v6491_v30 = vld [vmem:[#allocation19 + $0x80] sm:$0xff]  ;;  %v12135_v29 = vld [vmem:[#allocation14] ss:$0 sm:$0xff] }
 0x50d   :  { %v5962_v12 = vpack.c.bf16 %v5958_v32, %v5958_v32  ;;  %v5964_v56 = vpack.c.bf16 %v5960_v34, %v5960_v34  ;;  %v6495_v31 = vld [vmem:[#allocation19 + $0xa0] sm:$0xff] }
 0x50e   :  { %v5963_v14 = vpack.c.bf16 %v5959_v57, %v5959_v57  ;;  %v5965_v38 = vpack.c.bf16 %v5961_v26, %v5961_v26  ;;  %v12159_v44 = vcombine.high %v6491_v30, %v6495_v31  ;;  %v12158_v32 = vcombine.low %v6491_v30, %v6495_v31  ;;  %v6499_v34 = vld [vmem:[#allocation19 + $0xc0] sm:$0xff]  ;;  %v6484_v31 = vld [vmem:[#allocation19 + $0x48] sm:$0xff] }
 0x50f   :  { %v6503_v35 = vld [vmem:[#allocation19 + $0xe0] sm:$0xff] }
 0x510   :  { %6261 = vmatprep.mubr.bf16.mxu0 %v5963_v14  ;;  %6301 = vmatprep.mubr.bf16.mxu1 %v5965_v38  ;;  %v12167_v37 = vcombine.high %v6499_v34, %v6503_v35  ;;  %v12166_v57 = vcombine.low %v6499_v34, %v6503_v35  ;;  %v6507_v26 = vld [vmem:[#allocation19 + $0x100] sm:$0xff] }
 0x511   :  { %6262 = vmatmul.mubr.bf16.vlgmr.msra.gmra.mrb[12].mxu0 %v5962_v12  ;;  %6302 = vmatmul.mubr.bf16.vlgmr.msra.gmra.mrb[12].mxu1 %v5964_v56  ;;  %v6511_v14 = vld [vmem:[#allocation19 + $0x120] sm:$0xff] }
 0x512   :  { %12829 = vmatpush3.bf16.msra.mxu0 %v6346_v41  ;;  %12830 = vmatprep.mubr.msk.bf16.mxu0 %vm13847_vm2, %v13845_v40  ;;  %v12175_v38 = vcombine.high %v6507_v26, %v6511_v14  ;;  %v12174_v12 = vcombine.low %v6507_v26, %v6511_v14  ;;  %v6515_v56 = vld [vmem:[#allocation19 + $0x140] sm:$0xff]  ;;  %v6496_v26 = vld [vmem:[#allocation19 + $0xa8] sm:$0xff] }
 0x513   :  { %6431 = vmatpush1.bf16.msra.mxu1 %v13420_v9  ;;  %6462 = vmatprep.mubr.bf16.mxu1 %v13848_v17  ;;  %v12183_v40 = vcombine.high %v6515_v56, %v6519_v39  ;;  %v12182_v41 = vcombine.low %v6515_v56, %v6519_v39  ;;  %v6579_v43 = vld [vmem:[#allocation19 + $0x340] sm:$0xff]  ;;  %v6504_v56 = vld [vmem:[#allocation19 + $0xe8] sm:$0xff] }
 0x514   :  { %6432 = vmatprep.subr.bf16.mxu1 %v13425_v36  ;;  %7285 = vmatprep.subr.bf16.mxu0 %v12143_v21  ;;  %v6571_v36 = vld [vmem:[#allocation19 + $0x300] sm:$0xff] }
 0x517   :  { %6433 = vmatpush1.bf16.msra.mxu1 %v13423_v15  ;;  %v6575_v15 = vld [vmem:[#allocation19 + $0x320] sm:$0xff] }
 0x518   :  { %7326 = vmatprep.subr.bf16.mxu1 %v12145_v6  ;;  %v12239_v17 = vcombine.high %v6571_v36, %v6575_v15  ;;  %v12238_v18 = vcombine.low %v6571_v36, %v6575_v15  ;;  %v6564_v36 = vld [vmem:[#allocation19 + $0x2c8] sm:$0xff] }
 0x519   :  { %v6568_v15 = vld [vmem:[#allocation19 + $0x2e8] sm:$0xff] }
 0x5e4   :  { %v12798_v42 = vpop.f32.mrb[12].mxu0  ;;  %v12820_v1 = vpop.f32.mrb[12].mxu1 }
 0x5e5   :  { %v12799_v46 = vpop.f32.mrb[13].mxu0  ;;  %v12821_v47 = vpop.f32.mrb[13].mxu1 }
 0x5e6   :  { %v12800_v48 = vadd.f32 %v12799_v46, %v12798_v42  ;;  %v12822_v49 = vadd.f32 %v12821_v47, %v12820_v1  ;;  %v12801_v50 = vpop.f32.mrb[14].mxu0  ;;  %v12823_v51 = vpop.f32.mrb[14].mxu1  ;;  %v6523_v42 = vld [vmem:[#allocation19 + $0x180] sm:$0xff] }
 0x5e7   :  { %v12802_v52 = vpop.f32.mrb[15].mxu0  ;;  %v12824_v16 = vpop.f32.mrb[15].mxu1  ;;  %v6527_v1 = vld [vmem:[#allocation19 + $0x1a0] sm:$0xff] }
 0x5e8   :  { %v6264_v60 = vadd.f32 %v12800_v48, %v12102_v45  ;;  %v12191_v45 = vcombine.high %v6523_v42, %v6527_v1  ;;  %v12190_v46 = vcombine.low %v6523_v42, %v6527_v1  ;;  %v6531_v47 = vld [vmem:[#allocation19 + $0x1c0] sm:$0xff]  ;;  %v6512_v42 = vld [vmem:[#allocation19 + $0x128] sm:$0xff] }
 0x5e9   :  { %v6535_v48 = vld [vmem:[#allocation19 + $0x1e0] sm:$0xff] }
 0x5ea   :  { %v6304_v55 = vadd.f32 %v12822_v49, %v6264_v60  ;;  %v12199_v49 = vcombine.high %v6531_v47, %v6535_v48  ;;  %v12198_v50 = vcombine.low %v6531_v47, %v6535_v48  ;;  %v6539_v51 = vld [vmem:[#allocation19 + $0x200] sm:$0xff]  ;;  %v6520_v47 = vld [vmem:[#allocation19 + $0x168] sm:$0xff] }
 0x5eb   :  { %v6543_v52 = vld [vmem:[#allocation19 + $0x220] sm:$0xff]  ;;  %v6528_v48 = vld [vmem:[#allocation19 + $0x1a8] sm:$0xff] }
 0x5ec   :  { %v6309_v58 = vmul.f32 0.5, %v6304_v55  ;;  %6326 = vrot.lane.b32.xlu1 %v6304_v55, %s13846_s6  ;;  %6324 = vst.msk [vmem:[#allocation25] sm:$0x3] %vm6323_vm1, %v6304_v55  ;;  %v12207_v16 = vcombine.high %v6539_v51, %v6543_v52  ;;  %v12206_v60 = vcombine.low %v6539_v51, %v6543_v52  ;;  %v6532_v51 = vld [vmem:[#allocation19 + $0x1c8] sm:$0xff] }
 0x5ed   :  { %v6536_v52 = vld [vmem:[#allocation19 + $0x1e8] sm:$0xff] }
 0x5ee   :  { %v6310_v23 = vmul.f32 1.442695, %v6309_v58  ;;  %v6551_v58 = vld [vmem:[#allocation19 + $0x260] sm:$0xff] }
 0x5f0   :  { %13426 = vpow2.f32 %v6310_v23 }
 0x5fa   :  { %v13427_v7 = vpop.eup %13426 }
 0x5fb   :  { %v6317_v8 = vmul.f32 %v13427_v7, %v6315_v5  ;;  %v6559_v5 = vld [vmem:[#allocation19 + $0x2a0] sm:$0xff] }
 0x5fc   :  { %v12223_v7 = vcombine.high %v6555_v62, %v6559_v5 }
 0x5fd   :  { %6319 = vrot.lane.b32.xlu0 %v6317_v8, %s13846_s6  ;;  %v12222_v8 = vcombine.low %v6555_v62, %v6559_v5  ;;  %v6548_v62 = vld [vmem:[#allocation19 + $0x248] sm:$0xff] }
 0x5fe   :  { %v6552_v5 = vld [vmem:[#allocation19 + $0x268] sm:$0xff] }
 0x65e   :  { %v6327_v10 = vpop.permute.xlu1 %6326 }
 0x65f   :  { %6329 = vst.msk [vmem:[#allocation26] sm:$0x3] %vm6323_vm1, %v6327_v10  ;;  %v6563_v10 = vld [vmem:[#allocation19 + $0x2c0] sm:$0xff] }
 0x66f   :  { %v6320_v11 = vpop.permute.xlu0 %6319 }
 0x670   :  { %v6322_v13 = vadd.f32 %v6320_v11, %v6304_v55  ;;  %v6547_v55 = vld [vmem:[#allocation19 + $0x240] sm:$0xff] }
 0x671   :  { %v12215_v23 = vcombine.high %v6547_v55, %v6551_v58  ;;  %v12214_v9 = vcombine.low %v6547_v55, %v6551_v58  ;;  %v6567_v11 = vld [vmem:[#allocation19 + $0x2e0] sm:$0xff]  ;;  %v6540_v55 = vld [vmem:[#allocation19 + $0x208] sm:$0xff] }
 0x672   :  { %v6331_v33 = vpack.c.bf16 %v6322_v13, %v6322_v13  ;;  %6330 = vst.msk [vmem:[#allocation28] sm:$0x3] %vm6323_vm1, %v6322_v13  ;;  %v12231_v13 = vcombine.high %v6563_v10, %v6567_v11  ;;  %v6544_v58 = vld [vmem:[#allocation19 + $0x228] sm:$0xff] }
 0x674   :  { %12831 = vmatmul.mubr.msk.bf16.vlgmr.msra.gmra.mrb[16].mxu0 %vm6340_vm3, %v6331_v33  ;;  %v12230_v33 = vcombine.low %v6563_v10, %v6567_v11  ;;  %v6556_v10 = vld [vmem:[#allocation19 + $0x288] sm:$0xff] }
 0x675   :  { %7286 = vmatpush1.bf16.msra.mxu0 %v12142_v20  ;;  %v6583_v20 = vld [vmem:[#allocation19 + $0x360] sm:$0xff]  ;;  %v6560_v11 = vld [vmem:[#allocation19 + $0x2a8] sm:$0xff] }
 0x676   :  { %7287 = vmatprep.subr.bf16.mxu0 %v12151_v54  ;;  %v12247_v21 = vcombine.high %v6579_v43, %v6583_v20  ;;  %v12246_v28 = vcombine.low %v6579_v43, %v6583_v20  ;;  %v6572_v43 = vld [vmem:[#allocation19 + $0x308] sm:$0xff] }
 0x677   :  { %v6576_v20 = vld [vmem:[#allocation19 + $0x328] sm:$0xff] }
 0x679   :  { %7288 = vmatpush1.bf16.msra.mxu0 %v12150_v61 }
 0x67a   :  { %7289 = vmatprep.subr.bf16.mxu0 %v12159_v44  ;;  %v6488_v44 = vld [vmem:[#allocation19 + $0x68] sm:$0xff] }
 0x67b   :  { %v12152_v14 = vcombine.low %v6484_v31, %v6488_v44 }
 0x67d   :  { %7290 = vmatpush1.bf16.msra.mxu0 %v12158_v32 }
 0x67e   :  { %7291 = vmatprep.subr.bf16.mxu0 %v12167_v37  ;;  %v12153_v37 = vcombine.high %v6484_v31, %v6488_v44  ;;  %v6587_v31 = vld [vmem:[#allocation19 + $0x380] sm:$0xff] }
 0x67f   :  { %v6591_v44 = vld [vmem:[#allocation19 + $0x3a0] sm:$0xff] }
 0x681   :  { %7292 = vmatpush1.bf16.msra.mxu0 %v12166_v57  ;;  %v6492_v57 = vld [vmem:[#allocation19 + $0x88] sm:$0xff] }
 0x682   :  { %7293 = vmatprep.subr.bf16.mxu0 %v12175_v38  ;;  %v12161_v38 = vcombine.high %v6492_v57, %v6496_v26  ;;  %v12160_v39 = vcombine.low %v6492_v57, %v6496_v26 }
 0x685   :  { %7294 = vmatpush1.bf16.msra.mxu0 %v12174_v12  ;;  %v6500_v12 = vld [vmem:[#allocation19 + $0xc8] sm:$0xff] }
 0x686   :  { %7295 = vmatprep.subr.bf16.mxu0 %v12183_v40  ;;  %v12169_v40 = vcombine.high %v6500_v12, %v6504_v56  ;;  %v12168_v1 = vcombine.low %v6500_v12, %v6504_v56  ;;  %v6596_v12 = vld [vmem:[#allocation19 + $0x3c8] sm:$0xff] }
 0x689   :  { %7296 = vmatpush1.bf16.msra.mxu0 %v12182_v41  ;;  %v6508_v41 = vld [vmem:[#allocation19 + $0x108] sm:$0xff] }
 0x68a   :  { %7297 = vmatprep.subr.bf16.mxu0 %v12191_v45  ;;  %v12177_v45 = vcombine.high %v6508_v41, %v6512_v42  ;;  %v12176_v59 = vcombine.low %v6508_v41, %v6512_v42 }
 0x68d   :  { %7298 = vmatpush1.bf16.msra.mxu0 %v12190_v46  ;;  %v6516_v46 = vld [vmem:[#allocation19 + $0x148] sm:$0xff] }
 0x68e   :  { %7299 = vmatprep.subr.bf16.mxu0 %v12199_v49  ;;  %v12185_v27 = vcombine.high %v6516_v46, %v6520_v47  ;;  %v12184_v49 = vcombine.low %v6516_v46, %v6520_v47  ;;  %v6478_v46 = vld [vmem:[#allocation19 + $0x18] sm:$0xff] }
 0x691   :  { %7300 = vmatpush1.bf16.msra.mxu0 %v12198_v50 }
 0x692   :  { %7301 = vmatprep.subr.bf16.mxu0 %v12207_v16 }
 0x695   :  { %7302 = vmatpush1.bf16.msra.mxu0 %v12206_v60  ;;  %v12201_v60 = vcombine.high %v6532_v51, %v6536_v52 }
 0x696   :  { %7303 = vmatprep.subr.bf16.mxu0 %v12215_v23  ;;  %v12200_v23 = vcombine.low %v6532_v51, %v6536_v52 }
 0x699   :  { %7304 = vmatpush1.bf16.msra.mxu0 %v12214_v9  ;;  %v12209_v9 = vcombine.high %v6540_v55, %v6544_v58 }
 0x69a   :  { %7305 = vmatprep.subr.bf16.mxu0 %v12223_v7  ;;  %v12208_v7 = vcombine.low %v6540_v55, %v6544_v58 }
 0x69d   :  { %7306 = vmatpush1.bf16.msra.mxu0 %v12222_v8  ;;  %v12217_v8 = vcombine.high %v6548_v62, %v6552_v5 }
 0x69e   :  { %7307 = vmatprep.subr.bf16.mxu0 %v12231_v13  ;;  %v12216_v13 = vcombine.low %v6548_v62, %v6552_v5  ;;  %v6485_v5 = vld [vmem:[#allocation19 + $0x50] sm:$0xff] }
 0x6a1   :  { %7308 = vmatpush1.bf16.msra.mxu0 %v12230_v33  ;;  %v12225_v33 = vcombine.high %v6556_v10, %v6560_v11 }
 0x6a2   :  { %7309 = vmatprep.subr.bf16.mxu0 %v12239_v17  ;;  %v12224_v17 = vcombine.low %v6556_v10, %v6560_v11  ;;  %v6490_v10 = vld [vmem:[#allocation19 + $0x78] sm:$0xff] }
 0x6a5   :  { %7310 = vmatpush1.bf16.msra.mxu0 %v12238_v18  ;;  %v12233_v18 = vcombine.high %v6564_v36, %v6568_v15 }
 0x6a6   :  { %7311 = vmatprep.subr.bf16.mxu0 %v12247_v21  ;;  %v12232_v21 = vcombine.low %v6564_v36, %v6568_v15 }
 0x6a9   :  { %7312 = vmatpush1.bf16.msra.mxu0 %v12246_v28  ;;  %v12241_v28 = vcombine.high %v6572_v43, %v6576_v20 }
 0x747   :  { %v6382_v6 = vpop.f32.mrb[16].mxu0 }
 0x748   :  { %v6383_v54 = vadd.f32 %v12135_v29, %v6382_v6  ;;  %v12832_v61 = vpop.f32.mrb[17].mxu0  ;;  %v6580_v29 = vld [vmem:[#allocation19 + $0x348] sm:$0xff] }
 0x749   :  { %v6385_v30 = vpop.f32.mrb[18].mxu0  ;;  %v6584_v6 = vld [vmem:[#allocation19 + $0x368] sm:$0xff] }
 0x74a   :  { %v6388_v32 = vmax.f32 %v6383_v54, 0.0  ;;  %v12833_v34 = vpop.f32.mrb[19].mxu0  ;;  %v12240_v54 = vcombine.low %v6572_v43, %v6576_v20  ;;  %v12249_v61 = vcombine.high %v6580_v29, %v6584_v6  ;;  %v12248_v30 = vcombine.low %v6580_v29, %v6584_v6  ;;  %v6498_v43 = vld [vmem:[#allocation19 + $0xb8] sm:$0xff]  ;;  %v6501_v6 = vld [vmem:[#allocation19 + $0xd0] sm:$0xff] }
 0x74b   :  { %v12255_v34 = vcombine.high %v6587_v31, %v6591_v44 }
 0x74c   :  { %v6389_v35 = vpack.c.bf16 %v6388_v32, %v6388_v32  ;;  %v6588_v32 = vld [vmem:[#allocation19 + $0x388] sm:$0xff] }
 0x74d   :  { %7313 = vmatprep.subr.bf16.mxu0 %v12255_v34 }
 0x74e   :  { %12141 = vmatmul.mubr.msk.bf16.vlgmr.msra.gmra.mrb[16].mxu1 %vm6426_vm4, %v6389_v35  ;;  %v6592_v35 = vld [vmem:[#allocation19 + $0x3a8] sm:$0xff] }
 0x74f   :  { %7327 = vmatpush1.bf16.msra.mxu1 %v12144_v4  ;;  %v6524_v4 = vld [vmem:[#allocation19 + $0x188] sm:$0xff]  ;;  %v12256_v57 = vcombine.low %v6588_v32, %v6592_v35  ;;  %v12257_v26 = vcombine.high %v6588_v32, %v6592_v35  ;;  %v6509_v35 = vld [vmem:[#allocation19 + $0x110] sm:$0xff] }
 0x750   :  { %7328 = vmatprep.subr.bf16.mxu1 %v12153_v37  ;;  %v12193_v50 = vcombine.high %v6524_v4, %v6528_v48  ;;  %v12192_v16 = vcombine.low %v6524_v4, %v6528_v48  ;;  %v12254_v37 = vcombine.low %v6587_v31, %v6591_v44 }
 0x752   :  { %7314 = vmatpush1.bf16.msra.mxu0 %v12254_v37  ;;  %v6513_v37 = vld [vmem:[#allocation19 + $0x130] sm:$0xff] }
 0x753   :  { %7329 = vmatpush1.bf16.msra.mxu1 %v12152_v14  ;;  %v6595_v14 = vld [vmem:[#allocation19 + $0x3c0] sm:$0xff] }
 0x754   :  { %7330 = vmatprep.subr.bf16.mxu1 %v12161_v38  ;;  %v6599_v38 = vld [vmem:[#allocation19 + $0x3e0] sm:$0xff] }
 0x755   :  { %v12263_v56 = vcombine.high %v6595_v14, %v6599_v38 }
 0x757   :  { %7331 = vmatpush1.bf16.msra.mxu1 %v12160_v39  ;;  %v6600_v39 = vld [vmem:[#allocation19 + $0x3e8] sm:$0xff]  ;;  %7315 = vmatprep.subr.bf16.mxu0 %v12263_v56 }
 0x758   :  { %7332 = vmatprep.subr.bf16.mxu1 %v12169_v40  ;;  %v12262_v40 = vcombine.low %v6595_v14, %v6599_v38  ;;  %v12264_v41 = vcombine.low %v6596_v12, %v6600_v39  ;;  %v12265_v42 = vcombine.high %v6596_v12, %v6600_v39  ;;  %v12179_v12 = vcombine.high %v6509_v35, %v6513_v37  ;;  %v6517_v39 = vld [vmem:[#allocation19 + $0x150] sm:$0xff] }
 0x75a   :  { %7316 = vmatpush1.bf16.msra.mxu0 %v12262_v40  ;;  %v6521_v40 = vld [vmem:[#allocation19 + $0x170] sm:$0xff] }
 0x75b   :  { %7333 = vmatpush1.bf16.msra.mxu1 %v12168_v1  ;;  %v6477_v1 = vld [vmem:[#allocation19 + $0x10] sm:$0xff] }
 0x75c   :  { %7334 = vmatprep.subr.bf16.mxu1 %v12177_v45  ;;  %v6481_v45 = vld [vmem:[#allocation19 + $0x30] sm:$0xff] }
 0x75d   :  { %v12147_v47 = vcombine.high %v6477_v1, %v6481_v45 }
 0x75f   :  { %7335 = vmatpush1.bf16.msra.mxu1 %v12176_v59  ;;  %v6482_v59 = vld [vmem:[#allocation19 + $0x38] sm:$0xff]  ;;  %7367 = vmatprep.subr.bf16.mxu0 %v12147_v47 }
 0x760   :  { %7336 = vmatprep.subr.bf16.mxu1 %v12185_v27  ;;  %v12146_v27 = vcombine.low %v6477_v1, %v6481_v45  ;;  %v12148_v4 = vcombine.low %v6478_v46, %v6482_v59  ;;  %v12149_v48 = vcombine.high %v6478_v46, %v6482_v59  ;;  %v12178_v1 = vcombine.low %v6509_v35, %v6513_v37  ;;  %v6525_v59 = vld [vmem:[#allocation19 + $0x190] sm:$0xff] }
 0x761   :  { %v12187_v46 = vcombine.high %v6517_v39, %v6521_v40 }
 0x763   :  { %7337 = vmatpush1.bf16.msra.mxu1 %v12184_v49  ;;  %v6394_v49 = vld [vmem:[#allocation17] sm:$0x3] }
 0x764   :  { %7338 = vmatprep.subr.bf16.mxu1 %v12193_v50  ;;  %v6399_v50 = vrot.slane %v6394_v49, %v14244_v19  ;;  %v6403_v51 = vrot.slane %v6394_v49, %v14234_v3  ;;  %v12186_v49 = vcombine.low %v6517_v39, %v6521_v40 }
 0x767   :  { %7339 = vmatpush1.bf16.msra.mxu1 %v12192_v16 }
 0x768   :  { %7340 = vmatprep.subr.bf16.mxu1 %v12201_v60 }
 0x76b   :  { %7341 = vmatpush1.bf16.msra.mxu1 %v12200_v23 }
 0x76c   :  { %7342 = vmatprep.subr.bf16.mxu1 %v12209_v9 }
 0x76f   :  { %7343 = vmatpush1.bf16.msra.mxu1 %v12208_v7  ;;  %v6489_v7 = vld [vmem:[#allocation19 + $0x70] sm:$0xff] }
 0x770   :  { %7344 = vmatprep.subr.bf16.mxu1 %v12217_v8  ;;  %v6486_v8 = vld [vmem:[#allocation19 + $0x58] sm:$0xff]  ;;  %v12155_v36 = vcombine.high %v6485_v5, %v6489_v7  ;;  %v12154_v20 = vcombine.low %v6485_v5, %v6489_v7  ;;  %v6541_v7 = vld [vmem:[#allocation19 + $0x210] sm:$0xff] }
 0x771   :  { %v12157_v15 = vcombine.high %v6486_v8, %v6490_v10 }
 0x773   :  { %7345 = vmatpush1.bf16.msra.mxu1 %v12216_v13 }
 0x774   :  { %7346 = vmatprep.subr.bf16.mxu1 %v12225_v33  ;;  %v6493_v33 = vld [vmem:[#allocation19 + $0x90] sm:$0xff] }
 0x777   :  { %7347 = vmatpush1.bf16.msra.mxu1 %v12224_v17  ;;  %v6497_v17 = vld [vmem:[#allocation19 + $0xb0] sm:$0xff] }
 0x778   :  { %7348 = vmatprep.subr.bf16.mxu1 %v12233_v18  ;;  %v6494_v18 = vld [vmem:[#allocation19 + $0x98] sm:$0xff]  ;;  %v12162_v31 = vcombine.low %v6493_v33, %v6497_v17 }
 0x779   :  { %v12165_v29 = vcombine.high %v6494_v18, %v6498_v43  ;;  %v12164_v44 = vcombine.low %v6494_v18, %v6498_v43  ;;  %v6549_v18 = vld [vmem:[#allocation19 + $0x250] sm:$0xff] }
 0x77a   :  { %v6553_v43 = vld [vmem:[#allocation19 + $0x270] sm:$0xff] }
 0x77b   :  { %7349 = vmatpush1.bf16.msra.mxu1 %v12232_v21  ;;  %v12156_v21 = vcombine.low %v6486_v8, %v6490_v10  ;;  %v6545_v8 = vld [vmem:[#allocation19 + $0x230] sm:$0xff]  ;;  %v6542_v10 = vld [vmem:[#allocation19 + $0x218] sm:$0xff] }
 0x77c   :  { %7350 = vmatprep.subr.bf16.mxu1 %v12241_v28  ;;  %v12163_v28 = vcombine.high %v6493_v33, %v6497_v17 }
 0x77f   :  { %7351 = vmatpush1.bf16.msra.mxu1 %v12240_v54  ;;  %v6505_v54 = vld [vmem:[#allocation19 + $0xf0] sm:$0xff] }
 0x780   :  { %7352 = vmatprep.subr.bf16.mxu1 %v12249_v61  ;;  %v6502_v61 = vld [vmem:[#allocation19 + $0xd8] sm:$0xff]  ;;  %v12171_v32 = vcombine.high %v6501_v6, %v6505_v54  ;;  %v12170_v14 = vcombine.low %v6501_v6, %v6505_v54  ;;  %v12219_v6 = vcombine.high %v6549_v18, %v6553_v43 }
 0x783   :  { %7353 = vmatpush1.bf16.msra.mxu1 %v12248_v30  ;;  %v6506_v30 = vld [vmem:[#allocation19 + $0xf8] sm:$0xff] }
 0x784   :  { %7354 = vmatprep.subr.bf16.mxu1 %v12257_v26  ;;  %v12173_v34 = vcombine.high %v6502_v61, %v6506_v30  ;;  %v6514_v26 = vld [vmem:[#allocation19 + $0x138] sm:$0xff]  ;;  %v12172_v38 = vcombine.low %v6502_v61, %v6506_v30  ;;  %v6557_v61 = vld [vmem:[#allocation19 + $0x290] sm:$0xff] }
 0x785   :  { %v6561_v30 = vld [vmem:[#allocation19 + $0x2b0] sm:$0xff] }
 0x786   :  { %v12227_v35 = vcombine.high %v6557_v61, %v6561_v30 }
 0x787   :  { %7355 = vmatpush1.bf16.msra.mxu1 %v12256_v57  ;;  %v6510_v57 = vld [vmem:[#allocation19 + $0x118] sm:$0xff] }
 0x788   :  { %7356 = vmatprep.subr.bf16.mxu1 %v12265_v42  ;;  %v12181_v56 = vcombine.high %v6510_v57, %v6514_v26  ;;  %v6522_v42 = vld [vmem:[#allocation19 + $0x178] sm:$0xff]  ;;  %v12180_v45 = vcombine.low %v6510_v57, %v6514_v26  ;;  %v6565_v57 = vld [vmem:[#allocation19 + $0x2d0] sm:$0xff] }
 0x789   :  { %v6569_v26 = vld [vmem:[#allocation19 + $0x2f0] sm:$0xff] }
 0x78a   :  { %v12235_v39 = vcombine.high %v6565_v57, %v6569_v26 }
 0x78b   :  { %7357 = vmatpush1.bf16.msra.mxu1 %v12264_v41  ;;  %v6518_v41 = vld [vmem:[#allocation19 + $0x158] sm:$0xff] }
 0x78c   :  { %7408 = vmatprep.subr.bf16.mxu1 %v12149_v48  ;;  %v12189_v47 = vcombine.high %v6518_v41, %v6522_v42  ;;  %v6530_v48 = vld [vmem:[#allocation19 + $0x1b8] sm:$0xff] }
 0x821   :  { %v6464_v52 = vpop.f32.mrb[16].mxu1 }
 0x822   :  { %v6465_v16 = vadd.f32 %v6464_v52, %v6399_v50  ;;  %v6466_v60 = vpop.f32.mrb[17].mxu1  ;;  %v12188_v50 = vcombine.low %v6518_v41, %v6522_v42  ;;  %v6573_v41 = vld [vmem:[#allocation19 + $0x310] sm:$0xff] }
 0x823   :  { %v6467_v55 = vadd.f32 %v6466_v60, %v6403_v51  ;;  %v6468_v58 = vpop.f32.mrb[18].mxu1  ;;  %v6537_v60 = vld [vmem:[#allocation19 + $0x1f0] sm:$0xff] }
 0x824   :  { %v6471_v23 = vmax.f32 %v6465_v16, 0.0  ;;  %v6469_v9 = vpop.f32.mrb[19].mxu1  ;;  %v6533_v16 = vld [vmem:[#allocation19 + $0x1d0] sm:$0xff]  ;;  %v6538_v58 = vld [vmem:[#allocation19 + $0x1f8] sm:$0xff] }
 0x825   :  { %v6472_v62 = vmax.f32 %v6467_v55, 0.0  ;;  %v6534_v55 = vld [vmem:[#allocation19 + $0x1d8] sm:$0xff]  ;;  %v12202_v33 = vcombine.low %v6533_v16, %v6537_v60  ;;  %v6577_v42 = vld [vmem:[#allocation19 + $0x330] sm:$0xff] }
 0x826   :  { %v14400_v13 = vpack.c.bf16 %v6471_v23, %v6471_v23  ;;  %v12205_v5 = vcombine.high %v6534_v55, %v6538_v58 }
 0x827   :  { %v6474_v11 = vpack.c.bf16 %v6472_v62, %v6472_v62  ;;  %v12203_v62 = vcombine.high %v6533_v16, %v6537_v60 }
 0x829   :  { %7317 = vmatprep.mubr.bf16.mxu0 %v6474_v11  ;;  %7358 = vmatprep.mubr.bf16.mxu1 %v6474_v11 }
 0x82a   :  { %7318 = vmatmul.mubr.bf16.vlgmr.msra.gmra.mrb[20].mxu0 %v14400_v13  ;;  %7359 = vmatmul.mubr.bf16.vlgmr.msra.gmra.mrb[20].mxu1 %v14400_v13 }
 0x82b   :  { %7368 = vmatpush1.bf16.msra.mxu0 %v12146_v27  ;;  %7409 = vmatpush1.bf16.msra.mxu1 %v12148_v4  ;;  %v6529_v27 = vld [vmem:[#allocation19 + $0x1b0] sm:$0xff]  ;;  %v6526_v4 = vld [vmem:[#allocation19 + $0x198] sm:$0xff] }
 0x82c   :  { %7399 = vmatprep.mubr.bf16.mxu0 %v6474_v11  ;;  %7440 = vmatprep.mubr.bf16.mxu1 %v6474_v11  ;;  %v12195_v51 = vcombine.high %v6525_v59, %v6529_v27  ;;  %v12197_v52 = vcombine.high %v6526_v4, %v6530_v48  ;;  %v12194_v23 = vcombine.low %v6525_v59, %v6529_v27  ;;  %v6546_v11 = vld [vmem:[#allocation19 + $0x238] sm:$0xff] }
 0x82d   :  { %7369 = vmatprep.subr.bf16.mxu0 %v12155_v36  ;;  %7410 = vmatprep.subr.bf16.mxu1 %v12157_v15  ;;  %v12196_v9 = vcombine.low %v6526_v4, %v6530_v48  ;;  %v12204_v36 = vcombine.low %v6534_v55, %v6538_v58  ;;  %v12211_v15 = vcombine.high %v6541_v7, %v6545_v8  ;;  %v6581_v4 = vld [vmem:[#allocation19 + $0x350] sm:$0xff] }
 0x82e   :  { %v12213_v17 = vcombine.high %v6542_v10, %v6546_v11  ;;  %v12243_v59 = vcombine.high %v6573_v41, %v6577_v42  ;;  %v6585_v48 = vld [vmem:[#allocation19 + $0x370] sm:$0xff] }
 0x82f   :  { %7370 = vmatpush1.bf16.msra.mxu0 %v12154_v20  ;;  %7411 = vmatpush1.bf16.msra.mxu1 %v12156_v21  ;;  %v6550_v20 = vld [vmem:[#allocation19 + $0x258] sm:$0xff]  ;;  %v12251_v16 = vcombine.high %v6581_v4, %v6585_v48  ;;  %v6589_v55 = vld [vmem:[#allocation19 + $0x390] sm:$0xff] }
 0x830   :  { %7371 = vmatprep.subr.bf16.mxu0 %v12163_v28  ;;  %7412 = vmatprep.subr.bf16.mxu1 %v12165_v29  ;;  %v6554_v21 = vld [vmem:[#allocation19 + $0x278] sm:$0xff]  ;;  %v12210_v28 = vcombine.low %v6541_v7, %v6545_v8  ;;  %v12212_v29 = vcombine.low %v6542_v10, %v6546_v11  ;;  %v6593_v58 = vld [vmem:[#allocation19 + $0x3b0] sm:$0xff] }
 0x831   :  { %v12221_v54 = vcombine.high %v6550_v20, %v6554_v21  ;;  %v12259_v7 = vcombine.high %v6589_v55, %v6593_v58  ;;  %v6597_v10 = vld [vmem:[#allocation19 + $0x3d0] sm:$0xff] }
 0x832   :  { %v6601_v11 = vld [vmem:[#allocation19 + $0x3f0] sm:$0xff] }
 0x833   :  { %7372 = vmatpush1.bf16.msra.mxu0 %v12162_v31  ;;  %7413 = vmatpush1.bf16.msra.mxu1 %v12164_v44  ;;  %v6558_v31 = vld [vmem:[#allocation19 + $0x298] sm:$0xff] }
 0x834   :  { %7373 = vmatprep.subr.bf16.mxu0 %v12171_v32  ;;  %7414 = vmatprep.subr.bf16.mxu1 %v12173_v34  ;;  %v6562_v44 = vld [vmem:[#allocation19 + $0x2b8] sm:$0xff]  ;;  %v12218_v32 = vcombine.low %v6549_v18, %v6553_v43  ;;  %v12220_v34 = vcombine.low %v6550_v20, %v6554_v21  ;;  %v12267_v18 = vcombine.high %v6597_v10, %v6601_v11  ;;  %v7465_v20 = vld [vmem:[#allocation22] sm:$0xff] }
 0x835   :  { %v12229_v37 = vcombine.high %v6558_v31, %v6562_v44  ;;  %v7469_v21 = vld [vmem:[#allocation22 + $0x20] sm:$0xff] }
 0x837   :  { %7374 = vmatpush1.bf16.msra.mxu0 %v12170_v14  ;;  %7415 = vmatpush1.bf16.msra.mxu1 %v12172_v38  ;;  %v6566_v14 = vld [vmem:[#allocation19 + $0x2d8] sm:$0xff] }
 0x838   :  { %7375 = vmatprep.subr.bf16.mxu0 %v12179_v12  ;;  %7416 = vmatprep.subr.bf16.mxu1 %v12181_v56  ;;  %v6570_v38 = vld [vmem:[#allocation19 + $0x2f8] sm:$0xff]  ;;  %v12226_v12 = vcombine.low %v6557_v61, %v6561_v30  ;;  %v12228_v56 = vcombine.low %v6558_v31, %v6562_v44  ;;  %v12271_v61 = vcombine.high %v7465_v20, %v7469_v21  ;;  %v7473_v31 = vld [vmem:[#allocation22 + $0x40] sm:$0xff] }
 0x839   :  { %v12237_v40 = vcombine.high %v6566_v14, %v6570_v38  ;;  %v7477_v44 = vld [vmem:[#allocation22 + $0x60] sm:$0xff] }
 0x83b   :  { %7376 = vmatpush1.bf16.msra.mxu0 %v12178_v1  ;;  %7417 = vmatpush1.bf16.msra.mxu1 %v12180_v45  ;;  %v6574_v1 = vld [vmem:[#allocation19 + $0x318] sm:$0xff] }
 0x83c   :  { %7377 = vmatprep.subr.bf16.mxu0 %v12187_v46  ;;  %7418 = vmatprep.subr.bf16.mxu1 %v12189_v47  ;;  %v6578_v45 = vld [vmem:[#allocation19 + $0x338] sm:$0xff]  ;;  %v12234_v46 = vcombine.low %v6565_v57, %v6569_v26  ;;  %v12236_v47 = vcombine.low %v6566_v14, %v6570_v38  ;;  %v12279_v57 = vcombine.high %v7473_v31, %v7477_v44  ;;  %v7481_v14 = vld [vmem:[#allocation22 + $0x80] sm:$0xff] }
 0x83d   :  { %v12245_v27 = vcombine.high %v6574_v1, %v6578_v45  ;;  %v7485_v38 = vld [vmem:[#allocation22 + $0xa0] sm:$0xff] }
 0x83f   :  { %7378 = vmatpush1.bf16.msra.mxu0 %v12186_v49  ;;  %7419 = vmatpush1.bf16.msra.mxu1 %v12188_v50  ;;  %v6582_v49 = vld [vmem:[#allocation19 + $0x358] sm:$0xff] }
 0x840   :  { %7379 = vmatprep.subr.bf16.mxu0 %v12195_v51  ;;  %7420 = vmatprep.subr.bf16.mxu1 %v12197_v52  ;;  %v6586_v50 = vld [vmem:[#allocation19 + $0x378] sm:$0xff]  ;;  %v12242_v51 = vcombine.low %v6573_v41, %v6577_v42  ;;  %v12244_v52 = vcombine.low %v6574_v1, %v6578_v45  ;;  %v12287_v41 = vcombine.high %v7481_v14, %v7485_v38  ;;  %v7489_v1 = vld [vmem:[#allocation22 + $0xc0] sm:$0xff] }
 0x841   :  { %v12253_v60 = vcombine.high %v6582_v49, %v6586_v50  ;;  %v7493_v45 = vld [vmem:[#allocation22 + $0xe0] sm:$0xff] }
 0x843   :  { %7380 = vmatpush1.bf16.msra.mxu0 %v12194_v23  ;;  %7421 = vmatpush1.bf16.msra.mxu1 %v12196_v9  ;;  %v6590_v23 = vld [vmem:[#allocation19 + $0x398] sm:$0xff] }
 0x844   :  { %7381 = vmatprep.subr.bf16.mxu0 %v12203_v62  ;;  %7422 = vmatprep.subr.bf16.mxu1 %v12205_v5  ;;  %v6594_v9 = vld [vmem:[#allocation19 + $0x3b8] sm:$0xff]  ;;  %v12250_v62 = vcombine.low %v6581_v4, %v6585_v48  ;;  %v12252_v5 = vcombine.low %v6582_v49, %v6586_v50  ;;  %v12295_v4 = vcombine.high %v7489_v1, %v7493_v45  ;;  %v7497_v48 = vld [vmem:[#allocation22 + $0x100] sm:$0xff]  ;;  %v7498_v50 = vld [vmem:[#allocation22 + $0x108] sm:$0xff] }
 0x845   :  { %v12261_v8 = vcombine.high %v6590_v23, %v6594_v9  ;;  %v7501_v49 = vld [vmem:[#allocation22 + $0x120] sm:$0xff] }
 0x847   :  { %7382 = vmatpush1.bf16.msra.mxu0 %v12202_v33  ;;  %7423 = vmatpush1.bf16.msra.mxu1 %v12204_v36  ;;  %v6598_v33 = vld [vmem:[#allocation19 + $0x3d8] sm:$0xff] }
 0x848   :  { %7383 = vmatprep.subr.bf16.mxu0 %v12211_v15  ;;  %7424 = vmatprep.subr.bf16.mxu1 %v12213_v17  ;;  %v6602_v36 = vld [vmem:[#allocation19 + $0x3f8] sm:$0xff]  ;;  %v12258_v15 = vcombine.low %v6589_v55, %v6593_v58  ;;  %v12260_v17 = vcombine.low %v6590_v23, %v6594_v9  ;;  %v7505_v58 = vld [vmem:[#allocation22 + $0x140] sm:$0xff]  ;;  %v7506_v9 = vld [vmem:[#allocation22 + $0x148] sm:$0xff] }
 0x849   :  { %v12269_v43 = vcombine.high %v6598_v33, %v6602_v36  ;;  %v7509_v23 = vld [vmem:[#allocation22 + $0x160] sm:$0xff] }
 0x84b   :  { %7384 = vmatpush1.bf16.msra.mxu0 %v12210_v28  ;;  %7425 = vmatpush1.bf16.msra.mxu1 %v12212_v29  ;;  %v7466_v28 = vld [vmem:[#allocation22 + $0x8] sm:$0xff] }
 0x84c   :  { %7385 = vmatprep.subr.bf16.mxu0 %v12219_v6  ;;  %7426 = vmatprep.subr.bf16.mxu1 %v12221_v54  ;;  %v7470_v29 = vld [vmem:[#allocation22 + $0x28] sm:$0xff]  ;;  %v12266_v6 = vcombine.low %v6597_v10, %v6601_v11  ;;  %v12268_v54 = vcombine.low %v6598_v33, %v6602_v36  ;;  %v7513_v11 = vld [vmem:[#allocation22 + $0x180] sm:$0xff] }
 0x84d   :  { %v12273_v30 = vcombine.high %v7466_v28, %v7470_v29  ;;  %v7517_v33 = vld [vmem:[#allocation22 + $0x1a0] sm:$0xff]  ;;  %v7514_v36 = vld [vmem:[#allocation22 + $0x188] sm:$0xff] }
 0x84f   :  { %7386 = vmatpush1.bf16.msra.mxu0 %v12218_v32  ;;  %7427 = vmatpush1.bf16.msra.mxu1 %v12220_v34  ;;  %v7474_v32 = vld [vmem:[#allocation22 + $0x48] sm:$0xff] }
 0x850   :  { %7387 = vmatprep.subr.bf16.mxu0 %v12227_v35  ;;  %7428 = vmatprep.subr.bf16.mxu1 %v12229_v37  ;;  %v7478_v34 = vld [vmem:[#allocation22 + $0x68] sm:$0xff]  ;;  %v12270_v35 = vcombine.low %v7465_v20, %v7469_v21  ;;  %v12272_v37 = vcombine.low %v7466_v28, %v7470_v29  ;;  %v7521_v21 = vld [vmem:[#allocation22 + $0x1c0] sm:$0xff] }
 0x851   :  { %v12281_v26 = vcombine.high %v7474_v32, %v7478_v34  ;;  %v7525_v28 = vld [vmem:[#allocation22 + $0x1e0] sm:$0xff]  ;;  %v7522_v29 = vld [vmem:[#allocation22 + $0x1c8] sm:$0xff] }
 0x853   :  { %7388 = vmatpush1.bf16.msra.mxu0 %v12226_v12  ;;  %7429 = vmatpush1.bf16.msra.mxu1 %v12228_v56  ;;  %v7482_v12 = vld [vmem:[#allocation22 + $0x88] sm:$0xff] }
 0x854   :  { %7389 = vmatprep.subr.bf16.mxu0 %v12235_v39  ;;  %7430 = vmatprep.subr.bf16.mxu1 %v12237_v40  ;;  %v7486_v56 = vld [vmem:[#allocation22 + $0xa8] sm:$0xff]  ;;  %v12278_v39 = vcombine.low %v7473_v31, %v7477_v44  ;;  %v12280_v40 = vcombine.low %v7474_v32, %v7478_v34  ;;  %v7529_v44 = vld [vmem:[#allocation22 + $0x200] sm:$0xff] }
 0x855   :  { %v12289_v42 = vcombine.high %v7482_v12, %v7486_v56  ;;  %v7533_v32 = vld [vmem:[#allocation22 + $0x220] sm:$0xff]  ;;  %v7530_v34 = vld [vmem:[#allocation22 + $0x208] sm:$0xff] }
 0x857   :  { %7390 = vmatpush1.bf16.msra.mxu0 %v12234_v46  ;;  %7431 = vmatpush1.bf16.msra.mxu1 %v12236_v47  ;;  %v7490_v46 = vld [vmem:[#allocation22 + $0xc8] sm:$0xff] }
 0x858   :  { %7391 = vmatprep.subr.bf16.mxu0 %v12243_v59  ;;  %7432 = vmatprep.subr.bf16.mxu1 %v12245_v27  ;;  %v7494_v47 = vld [vmem:[#allocation22 + $0xe8] sm:$0xff]  ;;  %v12286_v59 = vcombine.low %v7481_v14, %v7485_v38  ;;  %v12288_v27 = vcombine.low %v7482_v12, %v7486_v56  ;;  %v14408_v14 = vld [vmem:[#allocation22 + $0x420] sm:$0xff]  ;;  %v12335_v12 = vcombine.high %v7529_v44, %v7533_v32 }
 0x859   :  { %v14410_v38 = vld [vmem:[#allocation22 + $0x408] sm:$0xff] }
 0x85b   :  { %7392 = vmatpush1.bf16.msra.mxu0 %v12242_v51  ;;  %7433 = vmatpush1.bf16.msra.mxu1 %v12244_v52  ;;  %v7502_v51 = vld [vmem:[#allocation22 + $0x128] sm:$0xff]  ;;  %v12294_v52 = vcombine.low %v7489_v1, %v7493_v45 }
 0x85c   :  { %7393 = vmatprep.subr.bf16.mxu0 %v12251_v16  ;;  %7434 = vmatprep.subr.bf16.mxu1 %v12253_v60  ;;  %v12296_v16 = vcombine.low %v7490_v46, %v7494_v47  ;;  %v12303_v60 = vcombine.high %v7497_v48, %v7501_v49  ;;  %v12305_v55 = vcombine.high %v7498_v50, %v7502_v51  ;;  %v7542_v1 = vld [vmem:[#allocation22 + $0x268] sm:$0xff] }
 0x85f   :  { %7394 = vmatpush1.bf16.msra.mxu0 %v12250_v62  ;;  %7435 = vmatpush1.bf16.msra.mxu1 %v12252_v5  ;;  %v7510_v62 = vld [vmem:[#allocation22 + $0x168] sm:$0xff]  ;;  %v12302_v5 = vcombine.low %v7497_v48, %v7501_v49  ;;  %v7549_v48 = vld [vmem:[#allocation22 + $0x2a0] sm:$0xff] }
 0x860   :  { %7395 = vmatprep.subr.bf16.mxu0 %v12259_v7  ;;  %7436 = vmatprep.subr.bf16.mxu1 %v12261_v8  ;;  %v12304_v7 = vcombine.low %v7498_v50, %v7502_v51  ;;  %v12311_v8 = vcombine.high %v7505_v58, %v7509_v23  ;;  %v12313_v10 = vcombine.high %v7506_v9, %v7510_v62  ;;  %v7546_v49 = vld [vmem:[#allocation22 + $0x288] sm:$0xff] }
 0x861   :  { %v7550_v50 = vld [vmem:[#allocation22 + $0x2a8] sm:$0xff] }
 0x863   :  { %7396 = vmatpush1.bf16.msra.mxu0 %v12258_v15  ;;  %7437 = vmatpush1.bf16.msra.mxu1 %v12260_v17  ;;  %v7518_v15 = vld [vmem:[#allocation22 + $0x1a8] sm:$0xff]  ;;  %v12310_v17 = vcombine.low %v7505_v58, %v7509_v23  ;;  %v7557_v58 = vld [vmem:[#allocation22 + $0x2e0] sm:$0xff] }
 0x864   :  { %7397 = vmatprep.subr.bf16.mxu0 %v12267_v18  ;;  %7438 = vmatprep.subr.bf16.mxu1 %v12269_v43  ;;  %v12312_v18 = vcombine.low %v7506_v9, %v7510_v62  ;;  %v12319_v43 = vcombine.high %v7513_v11, %v7517_v33  ;;  %v12321_v20 = vcombine.high %v7514_v36, %v7518_v15  ;;  %v7554_v23 = vld [vmem:[#allocation22 + $0x2c8] sm:$0xff] }
 0x865   :  { %v7558_v9 = vld [vmem:[#allocation22 + $0x2e8] sm:$0xff] }
 0x867   :  { %7398 = vmatpush1.bf16.msra.mxu0 %v12266_v6  ;;  %7439 = vmatpush1.bf16.msra.mxu1 %v12268_v54  ;;  %v7526_v6 = vld [vmem:[#allocation22 + $0x1e8] sm:$0xff]  ;;  %v12318_v54 = vcombine.low %v7513_v11, %v7517_v33  ;;  %v7565_v11 = vld [vmem:[#allocation22 + $0x320] sm:$0xff] }
 0x868   :  { %10579 = vmatprep.subr.bf16.mxu0 %v12271_v61  ;;  %10743 = vmatprep.subr.bf16.mxu1 %v12273_v30  ;;  %v12320_v61 = vcombine.low %v7514_v36, %v7518_v15  ;;  %v12327_v30 = vcombine.high %v7521_v21, %v7525_v28  ;;  %v12329_v31 = vcombine.high %v7522_v29, %v7526_v6  ;;  %v7562_v33 = vld [vmem:[#allocation22 + $0x308] sm:$0xff] }
 0x869   :  { %v7566_v36 = vld [vmem:[#allocation22 + $0x328] sm:$0xff] }
 0x86a   :  { %7400 = vmatmul.mubr.bf16.vlgmr.msra.gmra.mrb[24].mxu0 %v14400_v13  ;;  %7441 = vmatmul.mubr.bf16.vlgmr.msra.gmra.mrb[24].mxu1 %v14400_v13  ;;  %v12297_v13 = vcombine.high %v7490_v46, %v7494_v47  ;;  %v12334_v47 = vcombine.low %v7529_v44, %v7533_v32  ;;  %v7581_v44 = vld [vmem:[#allocation22 + $0x3a0] sm:$0xff]  ;;  %v7578_v32 = vld [vmem:[#allocation22 + $0x388] sm:$0xff] }
 0x86b   :  { %10580 = vmatpush1.bf16.msra.mxu0 %v12270_v35  ;;  %10744 = vmatpush1.bf16.msra.mxu1 %v12272_v37  ;;  %v7534_v35 = vld [vmem:[#allocation22 + $0x228] sm:$0xff]  ;;  %v12326_v37 = vcombine.low %v7521_v21, %v7525_v28  ;;  %v7573_v21 = vld [vmem:[#allocation22 + $0x360] sm:$0xff] }
 0x86c   :  { %10581 = vmatprep.subr.bf16.mxu0 %v12279_v57  ;;  %10745 = vmatprep.subr.bf16.mxu1 %v12281_v26  ;;  %v12328_v57 = vcombine.low %v7522_v29, %v7526_v6  ;;  %v14406_v26 = vld [vmem:[#allocation22 + $0x400] sm:$0xff]  ;;  %v12337_v56 = vcombine.high %v7530_v34, %v7534_v35  ;;  %v7570_v28 = vld [vmem:[#allocation22 + $0x348] sm:$0xff] }
 0x86d   :  { %v12398_v45 = vcombine.low %v14406_v26, %v14408_v14  ;;  %v7574_v29 = vld [vmem:[#allocation22 + $0x368] sm:$0xff] }
 0x86f   :  { %10582 = vmatpush1.bf16.msra.mxu0 %v12278_v39  ;;  %10746 = vmatpush1.bf16.msra.mxu1 %v12280_v40  ;;  %v7537_v39 = vld [vmem:[#allocation22 + $0x240] sm:$0xff]  ;;  %v14412_v40 = vld [vmem:[#allocation22 + $0x428] sm:$0xff] }
 0x870   :  { %10583 = vmatprep.subr.bf16.mxu0 %v12287_v41  ;;  %10747 = vmatprep.subr.bf16.mxu1 %v12289_v42  ;;  %v7541_v41 = vld [vmem:[#allocation22 + $0x260] sm:$0xff]  ;;  %v7538_v42 = vld [vmem:[#allocation22 + $0x248] sm:$0xff]  ;;  %v12400_v46 = vcombine.low %v14410_v38, %v14412_v40 }
 0x871   :  { %v12342_v51 = vcombine.low %v7537_v39, %v7541_v41 }
 0x873   :  { %10584 = vmatpush1.bf16.msra.mxu0 %v12286_v59  ;;  %10748 = vmatpush1.bf16.msra.mxu1 %v12288_v27  ;;  %v12336_v59 = vcombine.low %v7530_v34, %v7534_v35  ;;  %v12343_v27 = vcombine.high %v7537_v39, %v7541_v41  ;;  %v7582_v34 = vld [vmem:[#allocation22 + $0x3a8] sm:$0xff]  ;;  %v7589_v39 = vld [vmem:[#allocation22 + $0x3e0] sm:$0xff] }
 0x874   :  { %10585 = vmatprep.subr.bf16.mxu0 %v12295_v4  ;;  %10749 = vmatprep.subr.bf16.mxu1 %v12297_v13  ;;  %v12345_v4 = vcombine.high %v7538_v42, %v7542_v1  ;;  %v7545_v13 = vld [vmem:[#allocation22 + $0x280] sm:$0xff]  ;;  %v7586_v41 = vld [vmem:[#allocation22 + $0x3c8] sm:$0xff] }
 0x875   :  { %v12350_v62 = vcombine.low %v7545_v13, %v7549_v48 }
 0x877   :  { %10586 = vmatpush1.bf16.msra.mxu0 %v12294_v52  ;;  %10750 = vmatpush1.bf16.msra.mxu1 %v12296_v16  ;;  %v12344_v52 = vcombine.low %v7538_v42, %v7542_v1  ;;  %v12351_v16 = vcombine.high %v7545_v13, %v7549_v48  ;;  %v7590_v42 = vld [vmem:[#allocation22 + $0x3e8] sm:$0xff]  ;;  %v12399_v48 = vcombine.high %v14406_v26, %v14408_v14 }
 0x878   :  { %10587 = vmatprep.subr.bf16.mxu0 %v12303_v60  ;;  %10751 = vmatprep.subr.bf16.mxu1 %v12305_v55  ;;  %v12353_v60 = vcombine.high %v7546_v49, %v7550_v50  ;;  %v7553_v55 = vld [vmem:[#allocation22 + $0x2c0] sm:$0xff]  ;;  %v12392_v13 = vcombine.low %v7586_v41, %v7590_v42 }
 0x879   :  { %v12358_v15 = vcombine.low %v7553_v55, %v7557_v58 }
 0x87b   :  { %10588 = vmatpush1.bf16.msra.mxu0 %v12302_v5  ;;  %10752 = vmatpush1.bf16.msra.mxu1 %v12304_v7  ;;  %v12352_v5 = vcombine.low %v7546_v49, %v7550_v50  ;;  %v12359_v7 = vcombine.high %v7553_v55, %v7557_v58  ;;  %v12401_v49 = vcombine.high %v14410_v38, %v14412_v40  ;;  %v14422_v50 = vld [vmem:[#allocation20] sm:$0xff] }
 0x87c   :  { %10589 = vmatprep.subr.bf16.mxu0 %v12311_v8  ;;  %10753 = vmatprep.subr.bf16.mxu1 %v12313_v10  ;;  %v12361_v8 = vcombine.high %v7554_v23, %v7558_v9  ;;  %v7561_v10 = vld [vmem:[#allocation22 + $0x300] sm:$0xff] }
 0x87d   :  { %v12366_v6 = vcombine.low %v7561_v10, %v7565_v11 }
 0x87f   :  { %10590 = vmatpush1.bf16.msra.mxu0 %v12310_v17  ;;  %10754 = vmatpush1.bf16.msra.mxu1 %v12312_v18  ;;  %v12360_v17 = vcombine.low %v7554_v23, %v7558_v9  ;;  %v12367_v18 = vcombine.high %v7561_v10, %v7565_v11 }
 0x880   :  { %10591 = vmatprep.subr.bf16.mxu0 %v12319_v43  ;;  %10755 = vmatprep.subr.bf16.mxu1 %v12321_v20  ;;  %v12369_v43 = vcombine.high %v7562_v33, %v7566_v36  ;;  %v7569_v20 = vld [vmem:[#allocation22 + $0x340] sm:$0xff] }
 0x881   :  { %v12374_v35 = vcombine.low %v7569_v20, %v7573_v21 }
 0x883   :  { %10592 = vmatpush1.bf16.msra.mxu0 %v12318_v54  ;;  %10756 = vmatpush1.bf16.msra.mxu1 %v12320_v61  ;;  %v12368_v54 = vcombine.low %v7562_v33, %v7566_v36  ;;  %v12375_v61 = vcombine.high %v7569_v20, %v7573_v21  ;;  %v7606_v20 = vld [vmem:[#allocation22 + $0x468] sm:$0xff] }
 0x884   :  { %10593 = vmatprep.subr.bf16.mxu0 %v12327_v30  ;;  %10757 = vmatprep.subr.bf16.mxu1 %v12329_v31  ;;  %v12377_v30 = vcombine.high %v7570_v28, %v7574_v29  ;;  %v7577_v31 = vld [vmem:[#allocation22 + $0x380] sm:$0xff] }
 0x885   :  { %v12382_v1 = vcombine.low %v7577_v31, %v7581_v44 }
 0x887   :  { %10594 = vmatpush1.bf16.msra.mxu0 %v12326_v37  ;;  %10758 = vmatpush1.bf16.msra.mxu1 %v12328_v57  ;;  %v12376_v37 = vcombine.low %v7570_v28, %v7574_v29  ;;  %v12383_v57 = vcombine.high %v7577_v31, %v7581_v44  ;;  %v7609_v29 = vld [vmem:[#allocation22 + $0x480] sm:$0xff]  ;;  %v7614_v31 = vld [vmem:[#allocation22 + $0x4a8] sm:$0xff] }
 0x888   :  { %10595 = vmatprep.subr.bf16.mxu0 %v12335_v12  ;;  %10759 = vmatprep.subr.bf16.mxu1 %v12337_v56  ;;  %v12385_v12 = vcombine.high %v7578_v32, %v7582_v34  ;;  %v7585_v56 = vld [vmem:[#allocation22 + $0x3c0] sm:$0xff] }
 0x88b   :  { %10596 = vmatpush1.bf16.msra.mxu0 %v12334_v47  ;;  %10760 = vmatpush1.bf16.msra.mxu1 %v12336_v59  ;;  %v12384_v47 = vcombine.low %v7578_v32, %v7582_v34  ;;  %v12391_v59 = vcombine.high %v7585_v56, %v7589_v39 }
 0x88c   :  { %10597 = vmatprep.subr.bf16.mxu0 %v12343_v27  ;;  %10761 = vmatprep.subr.bf16.mxu1 %v12345_v4  ;;  %v12393_v27 = vcombine.high %v7586_v41, %v7590_v42  ;;  %v12390_v4 = vcombine.low %v7585_v56, %v7589_v39  ;;  %v7618_v56 = vld [vmem:[#allocation22 + $0x4c8] sm:$0xff] }
 0x88d   :  { %v7622_v39 = vld [vmem:[#allocation22 + $0x4e8] sm:$0xff] }
 0x88e   :  { %v12425_v40 = vcombine.high %v7618_v56, %v7622_v39  ;;  %v7626_v41 = vld [vmem:[#allocation22 + $0x508] sm:$0xff] }
 0x88f   :  { %10598 = vmatpush1.bf16.msra.mxu0 %v12342_v51  ;;  %10762 = vmatpush1.bf16.msra.mxu1 %v12344_v52  ;;  %v6608_v51 = vrot.slane %v14422_v50, %v14244_v19  ;;  %v6612_v52 = vrot.slane %v14422_v50, %v14234_v3  ;;  %v7630_v42 = vld [vmem:[#allocation22 + $0x528] sm:$0xff] }
 0x890   :  { %10599 = vmatprep.subr.bf16.mxu0 %v12351_v16  ;;  %10763 = vmatprep.subr.bf16.mxu1 %v12353_v60  ;;  %v6620_v16 = vrot.slane %v14422_v50, %v14247_v22 }
 0x893   :  { %10600 = vmatpush1.bf16.msra.mxu0 %v12350_v62  ;;  %10764 = vmatpush1.bf16.msra.mxu1 %v12352_v5 }
 0x894   :  { %10601 = vmatprep.subr.bf16.mxu0 %v12359_v7  ;;  %10765 = vmatprep.subr.bf16.mxu1 %v12361_v8 }
 0x897   :  { %10602 = vmatpush1.bf16.msra.mxu0 %v12358_v15  ;;  %10766 = vmatpush1.bf16.msra.mxu1 %v12360_v17  ;;  %v7601_v15 = vld [vmem:[#allocation22 + $0x440] sm:$0xff] }
 0x898   :  { %10603 = vmatprep.subr.bf16.mxu0 %v12367_v18  ;;  %10767 = vmatprep.subr.bf16.mxu1 %v12369_v43  ;;  %v7605_v18 = vld [vmem:[#allocation22 + $0x460] sm:$0xff]  ;;  %v7602_v43 = vld [vmem:[#allocation22 + $0x448] sm:$0xff] }
 0x899   :  { %v12406_v32 = vcombine.low %v7601_v15, %v7605_v18  ;;  %v12408_v34 = vcombine.low %v7602_v43, %v7606_v20 }
 0x89b   :  { %10604 = vmatpush1.bf16.msra.mxu0 %v12366_v6  ;;  %10768 = vmatpush1.bf16.msra.mxu1 %v12368_v54  ;;  %v12407_v6 = vcombine.high %v7601_v15, %v7605_v18  ;;  %v12409_v54 = vcombine.high %v7602_v43, %v7606_v20  ;;  %v7654_v15 = vld [vmem:[#allocation22 + $0x5e8] sm:$0xff] }
 0x89c   :  { %10605 = vmatprep.subr.bf16.mxu0 %v12375_v61  ;;  %10769 = vmatprep.subr.bf16.mxu1 %v12377_v30  ;;  %v7613_v61 = vld [vmem:[#allocation22 + $0x4a0] sm:$0xff]  ;;  %v7610_v30 = vld [vmem:[#allocation22 + $0x488] sm:$0xff] }
 0x89d   :  { %v12414_v26 = vcombine.low %v7609_v29, %v7613_v61  ;;  %v12416_v14 = vcombine.low %v7610_v30, %v7614_v31 }
 0x89f   :  { %10606 = vmatpush1.bf16.msra.mxu0 %v12374_v35  ;;  %10770 = vmatpush1.bf16.msra.mxu1 %v12376_v37  ;;  %v12415_v35 = vcombine.high %v7609_v29, %v7613_v61  ;;  %v12417_v37 = vcombine.high %v7610_v30, %v7614_v31  ;;  %v7657_v29 = vld [vmem:[#allocation22 + $0x600] sm:$0xff]  ;;  %v7662_v61 = vld [vmem:[#allocation22 + $0x628] sm:$0xff] }
 0x8a0   :  { %10607 = vmatprep.subr.bf16.mxu0 %v12383_v57  ;;  %10771 = vmatprep.subr.bf16.mxu1 %v12385_v12  ;;  %v7617_v57 = vld [vmem:[#allocation22 + $0x4c0] sm:$0xff] }
 0x8a1   :  { %v7621_v12 = vld [vmem:[#allocation22 + $0x4e0] sm:$0xff] }
 0x8a2   :  { %v12423_v38 = vcombine.high %v7617_v57, %v7621_v12 }
 0x8a3   :  { %10608 = vmatpush1.bf16.msra.mxu0 %v12382_v1  ;;  %10772 = vmatpush1.bf16.msra.mxu1 %v12384_v47  ;;  %v12422_v1 = vcombine.low %v7617_v57, %v7621_v12  ;;  %v12424_v47 = vcombine.low %v7618_v56, %v7622_v39  ;;  %v7666_v57 = vld [vmem:[#allocation22 + $0x648] sm:$0xff] }
 0x8a4   :  { %10609 = vmatprep.subr.bf16.mxu0 %v12391_v59  ;;  %10773 = vmatprep.subr.bf16.mxu1 %v12393_v27  ;;  %v12433_v27 = vcombine.high %v7626_v41, %v7630_v42  ;;  %v7670_v12 = vld [vmem:[#allocation22 + $0x668] sm:$0xff] }
 0x8a7   :  { %10610 = vmatpush1.bf16.msra.mxu0 %v12390_v4  ;;  %10774 = vmatpush1.bf16.msra.mxu1 %v12392_v13  ;;  %v7633_v4 = vld [vmem:[#allocation22 + $0x540] sm:$0xff] }
 0x8a8   :  { %10620 = vmatprep.subr.bf16.mxu0 %v12399_v48  ;;  %10784 = vmatprep.subr.bf16.mxu1 %v12401_v49  ;;  %v7637_v13 = vld [vmem:[#allocation22 + $0x560] sm:$0xff]  ;;  %v7634_v48 = vld [vmem:[#allocation22 + $0x548] sm:$0xff] }
 0x8a9   :  { %v7638_v49 = vld [vmem:[#allocation22 + $0x568] sm:$0xff] }
 0x8fd   :  { %v7319_v60 = vpop.f32.mrb[20].mxu0  ;;  %v14430_v55 = vpop.f32.mrb[20].mxu1 }
 0x8fe   :  { %v7320_v58 = vadd.f32 %v7319_v60, %v6608_v51  ;;  %v7321_v23 = vpop.f32.mrb[21].mxu0  ;;  %v7362_v9 = vpop.f32.mrb[21].mxu1  ;;  %v12441_v60 = vcombine.high %v7634_v48, %v7638_v49 }
 0x8ff   :  { %v7322_v62 = vadd.f32 %v7321_v23, %v6612_v52  ;;  %v7363_v5 = vadd.f32 %v7362_v9, %v6620_v16  ;;  %v7323_v7 = vpop.f32.mrb[22].mxu0  ;;  %v7364_v8 = vpop.f32.mrb[22].mxu1  ;;  %v12432_v52 = vcombine.low %v7626_v41, %v7630_v42  ;;  %v12439_v16 = vcombine.high %v7633_v4, %v7637_v13  ;;  %v7645_v23 = vld [vmem:[#allocation22 + $0x5a0] sm:$0xff]  ;;  %v7642_v9 = vld [vmem:[#allocation22 + $0x588] sm:$0xff] }
 0x900   :  { %v7449_v10 = vmax.f32 %v7320_v58, 0.0  ;;  %v7324_v11 = vpop.f32.mrb[23].mxu0  ;;  %v7365_v33 = vpop.f32.mrb[23].mxu1  ;;  %v7641_v58 = vld [vmem:[#allocation22 + $0x580] sm:$0xff]  ;;  %v12440_v7 = vcombine.low %v7634_v48, %v7638_v49  ;;  %v12472_v42 = vcombine.low %v7666_v57, %v7670_v12 }
 0x901   :  { %v7450_v36 = vmax.f32 %v7322_v62, 0.0  ;;  %v7452_v17 = vmax.f32 %v7363_v5, 0.0  ;;  %v7646_v62 = vld [vmem:[#allocation22 + $0x5a8] sm:$0xff]  ;;  %v12438_v5 = vcombine.low %v7633_v4, %v7637_v13  ;;  %v12447_v8 = vcombine.high %v7641_v58, %v7645_v23  ;;  %v7649_v11 = vld [vmem:[#allocation22 + $0x5c0] sm:$0xff] }
 0x902   :  { %v14434_v28 = vpack.c.bf16 %v7449_v10, %v7449_v10  ;;  %v12449_v10 = vcombine.high %v7642_v9, %v7646_v62  ;;  %v7653_v33 = vld [vmem:[#allocation22 + $0x5e0] sm:$0xff]  ;;  %v12448_v18 = vcombine.low %v7642_v9, %v7646_v62  ;;  %v7682_v4 = vld [vmem:[#allocation22 + $0x6c8] sm:$0xff] }
 0x903   :  { %v14432_v21 = vpack.c.bf16 %v7450_v36, %v7450_v36  ;;  %v14438_v44 = vpack.c.bf16 %v7452_v17, %v7452_v17  ;;  %v7650_v36 = vld [vmem:[#allocation22 + $0x5c8] sm:$0xff]  ;;  %v12446_v17 = vcombine.low %v7641_v58, %v7645_v23  ;;  %v12455_v43 = vcombine.high %v7649_v11, %v7653_v33 }
 0x904   :  { %v12457_v20 = vcombine.high %v7650_v36, %v7654_v15  ;;  %v12454_v30 = vcombine.low %v7649_v11, %v7653_v33  ;;  %v12456_v31 = vcombine.low %v7650_v36, %v7654_v15  ;;  %v7686_v13 = vld [vmem:[#allocation22 + $0x6e8] sm:$0xff] }
 0x905   :  { %10611 = vmatprep.mubr.bf16.mxu0 %v14432_v21  ;;  %10775 = vmatprep.mubr.bf16.mxu1 %v14432_v21  ;;  %v7690_v58 = vld [vmem:[#allocation22 + $0x708] sm:$0xff]  ;;  %v12488_v62 = vcombine.low %v7682_v4, %v7686_v13 }
 0x906   :  { %10612 = vmatmul.mubr.bf16.vlgmr.msra.gmra.mrb[28].mxu0 %v14434_v28  ;;  %10776 = vmatmul.mubr.bf16.vlgmr.msra.gmra.mrb[28].mxu1 %v14434_v28  ;;  %v7694_v23 = vld [vmem:[#allocation22 + $0x728] sm:$0xff] }
 0x907   :  { %10621 = vmatpush1.bf16.msra.mxu0 %v12398_v45  ;;  %10785 = vmatpush1.bf16.msra.mxu1 %v12400_v46  ;;  %v7625_v45 = vld [vmem:[#allocation22 + $0x500] sm:$0xff]  ;;  %v7698_v11 = vld [vmem:[#allocation22 + $0x748] sm:$0xff]  ;;  %v12496_v15 = vcombine.low %v7690_v58, %v7694_v23 }
 0x908   :  { %10652 = vmatprep.mubr.bf16.mxu0 %v14438_v44  ;;  %10816 = vmatprep.mubr.bf16.mxu1 %v14438_v44  ;;  %v7629_v46 = vld [vmem:[#allocation22 + $0x520] sm:$0xff]  ;;  %v7702_v33 = vld [vmem:[#allocation22 + $0x768] sm:$0xff] }
 0x909   :  { %10622 = vmatprep.subr.bf16.mxu0 %v12407_v6  ;;  %10786 = vmatprep.subr.bf16.mxu1 %v12409_v54  ;;  %v12431_v59 = vcombine.high %v7625_v45, %v7629_v46  ;;  %v12430_v51 = vcombine.low %v7625_v45, %v7629_v46  ;;  %v7661_v6 = vld [vmem:[#allocation22 + $0x620] sm:$0xff]  ;;  %v7658_v54 = vld [vmem:[#allocation22 + $0x608] sm:$0xff] }
 0x90a   :  { %v12462_v56 = vcombine.low %v7657_v29, %v7661_v6  ;;  %v12464_v39 = vcombine.low %v7658_v54, %v7662_v61  ;;  %v7674_v45 = vld [vmem:[#allocation22 + $0x688] sm:$0xff] }
 0x90b   :  { %10623 = vmatpush1.bf16.msra.mxu0 %v12406_v32  ;;  %10787 = vmatpush1.bf16.msra.mxu1 %v12408_v34  ;;  %v12463_v32 = vcombine.high %v7657_v29, %v7661_v6  ;;  %v12465_v34 = vcombine.high %v7658_v54, %v7662_v61  ;;  %v7678_v46 = vld [vmem:[#allocation22 + $0x6a8] sm:$0xff]  ;;  %v12504_v61 = vcombine.low %v7698_v11, %v7702_v33 }
 0x90c   :  { %10624 = vmatprep.subr.bf16.mxu0 %v12415_v35  ;;  %10788 = vmatprep.subr.bf16.mxu1 %v12417_v37  ;;  %v7665_v35 = vld [vmem:[#allocation22 + $0x640] sm:$0xff]  ;;  %v12480_v49 = vcombine.low %v7674_v45, %v7678_v46  ;;  %v7706_v29 = vld [vmem:[#allocation22 + $0x788] sm:$0xff] }
 0x90d   :  { %v7669_v37 = vld [vmem:[#allocation22 + $0x660] sm:$0xff]  ;;  %v7710_v6 = vld [vmem:[#allocation22 + $0x7a8] sm:$0xff] }
 0x90e   :  { %v12470_v41 = vcombine.low %v7665_v35, %v7669_v37 }
 0x90f   :  { %10625 = vmatpush1.bf16.msra.mxu0 %v12414_v26  ;;  %10789 = vmatpush1.bf16.msra.mxu1 %v12416_v14  ;;  %v12471_v26 = vcombine.high %v7665_v35, %v7669_v37  ;;  %v12473_v14 = vcombine.high %v7666_v57, %v7670_v12  ;;  %v7717_v35 = vld [vmem:[#allocation22 + $0x7e0] sm:$0xff]  ;;  %v7714_v37 = vld [vmem:[#allocation22 + $0x7c8] sm:$0xff]  ;;  %v6628_v12 = vrot.slane %v14422_v50, %v14265_v2 }
 0x910   :  { %10626 = vmatprep.subr.bf16.mxu0 %v12423_v38  ;;  %10790 = vmatprep.subr.bf16.mxu1 %v12425_v40  ;;  %v7673_v38 = vld [vmem:[#allocation22 + $0x680] sm:$0xff]  ;;  %v7718_v57 = vld [vmem:[#allocation22 + $0x7e8] sm:$0xff] }
 0x911   :  { %v7677_v40 = vld [vmem:[#allocation22 + $0x6a0] sm:$0xff] }
 0x912   :  { %v12478_v48 = vcombine.low %v7673_v38, %v7677_v40 }
 0x913   :  { %10627 = vmatpush1.bf16.msra.mxu0 %v12422_v1  ;;  %10791 = vmatpush1.bf16.msra.mxu1 %v12424_v47  ;;  %v12479_v1 = vcombine.high %v7673_v38, %v7677_v40  ;;  %v12481_v47 = vcombine.high %v7674_v45, %v7678_v46  ;;  %v12521_v38 = vcombine.high %v7714_v37, %v7718_v57  ;;  %v7721_v40 = vld [vmem:[#allocation22 + $0x800] sm:$0xff] }
 0x914   :  { %10628 = vmatprep.subr.bf16.mxu0 %v12431_v59  ;;  %10792 = vmatprep.subr.bf16.mxu1 %v12433_v27  ;;  %v7681_v59 = vld [vmem:[#allocation22 + $0x6c0] sm:$0xff] }
 0x915   :  { %v7685_v27 = vld [vmem:[#allocation22 + $0x6e0] sm:$0xff] }
 0x916   :  { %v12486_v9 = vcombine.low %v7681_v59, %v7685_v27 }
 0x917   :  { %10629 = vmatpush1.bf16.msra.mxu0 %v12430_v51  ;;  %10793 = vmatpush1.bf16.msra.mxu1 %v12432_v52  ;;  %v12487_v51 = vcombine.high %v7681_v59, %v7685_v27  ;;  %v12489_v52 = vcombine.high %v7682_v4, %v7686_v13 }
 0x918   :  { %10630 = vmatprep.subr.bf16.mxu0 %v12439_v16  ;;  %10794 = vmatprep.subr.bf16.mxu1 %v12441_v60  ;;  %v7689_v16 = vld [vmem:[#allocation22 + $0x700] sm:$0xff] }
 0x919   :  { %v7693_v60 = vld [vmem:[#allocation22 + $0x720] sm:$0xff] }
 0x91a   :  { %v12494_v36 = vcombine.low %v7689_v16, %v7693_v60 }
 0x91b   :  { %10631 = vmatpush1.bf16.msra.mxu0 %v12438_v5  ;;  %10795 = vmatpush1.bf16.msra.mxu1 %v12440_v7  ;;  %v12495_v5 = vcombine.high %v7689_v16, %v7693_v60  ;;  %v12497_v7 = vcombine.high %v7690_v58, %v7694_v23  ;;  %v7729_v23 = vld [vmem:[#allocation22 + $0x840] sm:$0xff] }
 0x91c   :  { %10632 = vmatprep.subr.bf16.mxu0 %v12447_v8  ;;  %10796 = vmatprep.subr.bf16.mxu1 %v12449_v10  ;;  %v7697_v8 = vld [vmem:[#allocation22 + $0x740] sm:$0xff] }
 0x91d   :  { %v7701_v10 = vld [vmem:[#allocation22 + $0x760] sm:$0xff] }
 0x91e   :  { %v12502_v54 = vcombine.low %v7697_v8, %v7701_v10 }
 0x91f   :  { %10633 = vmatpush1.bf16.msra.mxu0 %v12446_v17  ;;  %10797 = vmatpush1.bf16.msra.mxu1 %v12448_v18  ;;  %v12503_v17 = vcombine.high %v7697_v8, %v7701_v10  ;;  %v12505_v18 = vcombine.high %v7698_v11, %v7702_v33 }
 0x920   :  { %10634 = vmatprep.subr.bf16.mxu0 %v12455_v43  ;;  %10798 = vmatprep.subr.bf16.mxu1 %v12457_v20  ;;  %v7705_v43 = vld [vmem:[#allocation22 + $0x780] sm:$0xff] }
 0x921   :  { %v7709_v20 = vld [vmem:[#allocation22 + $0x7a0] sm:$0xff] }
 0x923   :  { %10635 = vmatpush1.bf16.msra.mxu0 %v12454_v30  ;;  %10799 = vmatpush1.bf16.msra.mxu1 %v12456_v31  ;;  %v6616_v30 = vrot.slane %v14422_v50, %v14256_v63  ;;  %v12511_v31 = vcombine.high %v7705_v43, %v7709_v20 }
 0x924   :  { %10636 = vmatprep.subr.bf16.mxu0 %v12463_v32  ;;  %10800 = vmatprep.subr.bf16.mxu1 %v12465_v34  ;;  %v12513_v32 = vcombine.high %v7706_v29, %v7710_v6  ;;  %v7713_v34 = vld [vmem:[#allocation22 + $0x7c0] sm:$0xff] }
 0x927   :  { %10637 = vmatpush1.bf16.msra.mxu0 %v12462_v56  ;;  %10801 = vmatpush1.bf16.msra.mxu1 %v12464_v39  ;;  %v12510_v56 = vcombine.low %v7705_v43, %v7709_v20  ;;  %v12512_v39 = vcombine.low %v7706_v29, %v7710_v6  ;;  %v7742_v43 = vld [vmem:[#allocation22 + $0x8a8] sm:$0xff] }
 0x928   :  { %10638 = vmatprep.subr.bf16.mxu0 %v12471_v26  ;;  %10802 = vmatprep.subr.bf16.mxu1 %v12473_v14  ;;  %v7361_v26 = vadd.f32 %v14430_v55, %v6616_v30  ;;  %v12519_v14 = vcombine.high %v7713_v34, %v7717_v35  ;;  %v12518_v55 = vcombine.low %v7713_v34, %v7717_v35  ;;  %v7749_v30 = vld [vmem:[#allocation22 + $0x8e0] sm:$0xff] }
 0x92b   :  { %10639 = vmatpush1.bf16.msra.mxu0 %v12470_v41  ;;  %10803 = vmatpush1.bf16.msra.mxu1 %v12472_v42  ;;  %v7725_v41 = vld [vmem:[#allocation22 + $0x820] sm:$0xff]  ;;  %v7722_v42 = vld [vmem:[#allocation22 + $0x808] sm:$0xff] }
 0x92c   :  { %10640 = vmatprep.subr.bf16.mxu0 %v12479_v1  ;;  %10804 = vmatprep.subr.bf16.mxu1 %v12481_v47  ;;  %v7726_v1 = vld [vmem:[#allocation22 + $0x828] sm:$0xff]  ;;  %v12527_v16 = vcombine.high %v7721_v40, %v7725_v41 }
 0x92d   :  { %v12529_v60 = vcombine.high %v7722_v42, %v7726_v1  ;;  %v12528_v10 = vcombine.low %v7722_v42, %v7726_v1  ;;  %v7761_v42 = vld [vmem:[#allocation22 + $0x940] sm:$0xff] }
 0x92e   :  { %v7765_v1 = vld [vmem:[#allocation22 + $0x960] sm:$0xff] }
 0x92f   :  { %10641 = vmatpush1.bf16.msra.mxu0 %v12478_v48  ;;  %10805 = vmatpush1.bf16.msra.mxu1 %v12480_v49  ;;  %v12520_v48 = vcombine.low %v7714_v37, %v7718_v57  ;;  %v7451_v49 = vmax.f32 %v7361_v26, 0.0  ;;  %v7758_v26 = vld [vmem:[#allocation22 + $0x928] sm:$0xff] }
 0x930   :  { %10642 = vmatprep.subr.bf16.mxu0 %v12487_v51  ;;  %10806 = vmatprep.subr.bf16.mxu1 %v12489_v52 }
 0x931   :  { %v14461_v8 = vpack.c.bf16 %v7451_v49, %v7451_v49  ;;  %v7769_v49 = vld [vmem:[#allocation22 + $0x980] sm:$0xff] }
 0x933   :  { %10643 = vmatpush1.bf16.msra.mxu0 %v12486_v9  ;;  %10807 = vmatpush1.bf16.msra.mxu1 %v12488_v62  ;;  %v7733_v9 = vld [vmem:[#allocation22 + $0x860] sm:$0xff]  ;;  %v7730_v62 = vld [vmem:[#allocation22 + $0x848] sm:$0xff] }
 0x934   :  { %10644 = vmatprep.subr.bf16.mxu0 %v12495_v5  ;;  %10808 = vmatprep.subr.bf16.mxu1 %v12497_v7  ;;  %v7734_v5 = vld [vmem:[#allocation22 + $0x868] sm:$0xff]  ;;  %v12526_v7 = vcombine.low %v7721_v40, %v7725_v41  ;;  %v12535_v33 = vcombine.high %v7729_v23, %v7733_v9  ;;  %v12534_v20 = vcombine.low %v7729_v23, %v7733_v9 }
 0x935   :  { %v12536_v29 = vcombine.low %v7730_v62, %v7734_v5 }
 0x937   :  { %10645 = vmatpush1.bf16.msra.mxu0 %v12494_v36  ;;  %10809 = vmatpush1.bf16.msra.mxu1 %v12496_v15  ;;  %v12537_v36 = vcombine.high %v7730_v62, %v7734_v5  ;;  %v7737_v15 = vld [vmem:[#allocation22 + $0x880] sm:$0xff] }
 0x938   :  { %10646 = vmatprep.subr.bf16.mxu0 %v12503_v17  ;;  %10810 = vmatprep.subr.bf16.mxu1 %v12505_v18  ;;  %v7741_v17 = vld [vmem:[#allocation22 + $0x8a0] sm:$0xff]  ;;  %v7738_v18 = vld [vmem:[#allocation22 + $0x888] sm:$0xff] }
 0x939   :  { %v12543_v6 = vcombine.high %v7737_v15, %v7741_v17  ;;  %v12542_v34 = vcombine.low %v7737_v15, %v7741_v17  ;;  %v12544_v35 = vcombine.low %v7738_v18, %v7742_v43  ;;  %v7777_v62 = vld [vmem:[#allocation22 + $0x9c0] sm:$0xff] }
 0x93a   :  { %v7781_v5 = vld [vmem:[#allocation22 + $0x9e0] sm:$0xff] }
 0x93b   :  { %10647 = vmatpush1.bf16.msra.mxu0 %v12502_v54  ;;  %10811 = vmatpush1.bf16.msra.mxu1 %v12504_v61  ;;  %v12545_v54 = vcombine.high %v7738_v18, %v7742_v43  ;;  %v7745_v61 = vld [vmem:[#allocation22 + $0x8c0] sm:$0xff]  ;;  %v12583_v15 = vcombine.high %v7777_v62, %v7781_v5 }
 0x93c   :  { %10648 = vmatprep.subr.bf16.mxu0 %v12511_v31  ;;  %10812 = vmatprep.subr.bf16.mxu1 %v12513_v32  ;;  %v7746_v31 = vld [vmem:[#allocation22 + $0x8c8] sm:$0xff]  ;;  %v12551_v37 = vcombine.high %v7745_v61, %v7749_v30  ;;  %v7785_v18 = vld [vmem:[#allocation22 + $0xa00] sm:$0xff] }
 0x93d   :  { %v14455_v45 = vpop.f32.mrb[24].mxu0  ;;  %v14457_v46 = vpop.f32.mrb[24].mxu1  ;;  %v7750_v32 = vld [vmem:[#allocation22 + $0x8e8] sm:$0xff]  ;;  %v7789_v43 = vld [vmem:[#allocation22 + $0xa20] sm:$0xff] }
 0x93e   :  { %v7403_v47 = vpop.f32.mrb[25].mxu0  ;;  %v14459_v59 = vpop.f32.mrb[25].mxu1  ;;  %v12553_v57 = vcombine.high %v7746_v31, %v7750_v32 }
 0x93f   :  { %v7404_v27 = vadd.f32 %v7403_v47, %v6628_v12  ;;  %v7405_v4 = vpop.f32.mrb[26].mxu0  ;;  %v7446_v13 = vpop.f32.mrb[26].mxu1  ;;  %10649 = vmatpush1.bf16.msra.mxu0 %v12510_v56  ;;  %10813 = vmatpush1.bf16.msra.mxu1 %v12512_v39  ;;  %v7753_v12 = vld [vmem:[#allocation22 + $0x900] sm:$0xff]  ;;  %v7754_v39 = vld [vmem:[#allocation22 + $0x908] sm:$0xff] }
 0x940   :  { %v7406_v51 = vpop.f32.mrb[27].mxu0  ;;  %v7447_v52 = vpop.f32.mrb[27].mxu1  ;;  %10650 = vmatprep.subr.bf16.mxu0 %v12519_v14  ;;  %10814 = vmatprep.subr.bf16.mxu1 %v12521_v38  ;;  %v7757_v56 = vld [vmem:[#allocation22 + $0x920] sm:$0xff]  ;;  %v12550_v14 = vcombine.low %v7745_v61, %v7749_v30  ;;  %v12552_v38 = vcombine.low %v7746_v31, %v7750_v32  ;;  %v12561_v41 = vcombine.high %v7754_v39, %v7758_v26  ;;  %v7762_v47 = vld [vmem:[#allocation22 + $0x948] sm:$0xff] }
 0x941   :  { %v7454_v58 = vmax.f32 %v7404_v27, 0.0  ;;  %v12559_v40 = vcombine.high %v7753_v12, %v7757_v56  ;;  %v7766_v27 = vld [vmem:[#allocation22 + $0x968] sm:$0xff]  ;;  %v12558_v4 = vcombine.low %v7753_v12, %v7757_v56  ;;  %v12560_v13 = vcombine.low %v7754_v39, %v7758_v26  ;;  %v7773_v51 = vld [vmem:[#allocation22 + $0x9a0] sm:$0xff] }
 0x942   :  { %v7770_v52 = vld [vmem:[#allocation22 + $0x988] sm:$0xff]  ;;  %v12575_v23 = vcombine.high %v7769_v49, %v7773_v51  ;;  %v12591_v61 = vcombine.high %v7785_v18, %v7789_v43  ;;  %v7793_v31 = vld [vmem:[#allocation22 + $0xa40] sm:$0xff] }
 0x943   :  { %10651 = vmatpush1.bf16.msra.mxu0 %v12518_v55  ;;  %10815 = vmatpush1.bf16.msra.mxu1 %v12520_v48  ;;  %v14463_v11 = vpack.c.bf16 %v7454_v58, %v7454_v58  ;;  %v12567_v55 = vcombine.high %v7761_v42, %v7765_v1  ;;  %v12569_v48 = vcombine.high %v7762_v47, %v7766_v27  ;;  %v7797_v32 = vld [vmem:[#allocation22 + $0xa60] sm:$0xff] }
 0x944   :  { %10661 = vmatprep.subr.bf16.mxu0 %v12527_v16  ;;  %10825 = vmatprep.subr.bf16.mxu1 %v12529_v60  ;;  %v7774_v16 = vld [vmem:[#allocation22 + $0x9a8] sm:$0xff]  ;;  %v12566_v60 = vcombine.low %v7761_v42, %v7765_v1  ;;  %v12568_v58 = vcombine.low %v7762_v47, %v7766_v27  ;;  %v12599_v12 = vcombine.high %v7793_v31, %v7797_v32  ;;  %v7801_v39 = vld [vmem:[#allocation22 + $0xa80] sm:$0xff] }
 0x945   :  { %v12577_v9 = vcombine.high %v7770_v52, %v7774_v16  ;;  %v7805_v26 = vld [vmem:[#allocation22 + $0xaa0] sm:$0xff] }
 0x946   :  { %10653 = vmatmul.mubr.bf16.vlgmr.msra.gmra.mrb[28].mxu0 %v14461_v8  ;;  %10817 = vmatmul.mubr.bf16.vlgmr.msra.gmra.mrb[28].mxu1 %v14461_v8  ;;  %v12607_v42 = vcombine.high %v7801_v39, %v7805_v26  ;;  %v7809_v47 = vld [vmem:[#allocation22 + $0xac0] sm:$0xff] }
 0x947   :  { %10662 = vmatpush1.bf16.msra.mxu0 %v12526_v7  ;;  %10693 = vmatprep.mubr.bf16.mxu0 %v14463_v11  ;;  %v7778_v7 = vld [vmem:[#allocation22 + $0x9c8] sm:$0xff]  ;;  %v7813_v27 = vld [vmem:[#allocation22 + $0xae0] sm:$0xff] }
 0x948   :  { %10826 = vmatpush1.bf16.msra.mxu1 %v12528_v10  ;;  %10857 = vmatprep.mubr.bf16.mxu1 %v14463_v11  ;;  %v7782_v10 = vld [vmem:[#allocation22 + $0x9e8] sm:$0xff] }
 0x949   :  { %10663 = vmatprep.subr.bf16.mxu0 %v12535_v33  ;;  %10827 = vmatprep.subr.bf16.mxu1 %v12537_v36  ;;  %v12574_v33 = vcombine.low %v7769_v49, %v7773_v51  ;;  %v12576_v36 = vcombine.low %v7770_v52, %v7774_v16  ;;  %v12585_v17 = vcombine.high %v7778_v7, %v7782_v10  ;;  %v7817_v52 = vld [vmem:[#allocation22 + $0xb00] sm:$0xff] }
 0x94a   :  { %v12615_v49 = vcombine.high %v7809_v47, %v7813_v27  ;;  %v7821_v16 = vld [vmem:[#allocation22 + $0xb20] sm:$0xff] }
 0x94b   :  { %10664 = vmatpush1.bf16.msra.mxu0 %v12534_v20  ;;  %v7786_v20 = vld [vmem:[#allocation22 + $0xa08] sm:$0xff] }
 0x94c   :  { %10828 = vmatpush1.bf16.msra.mxu1 %v12536_v29  ;;  %10665 = vmatprep.subr.bf16.mxu0 %v12543_v6  ;;  %v7790_v29 = vld [vmem:[#allocation22 + $0xa28] sm:$0xff]  ;;  %v12582_v6 = vcombine.low %v7777_v62, %v7781_v5  ;;  %v12623_v62 = vcombine.high %v7817_v52, %v7821_v16 }
 0x94d   :  { %10829 = vmatprep.subr.bf16.mxu1 %v12545_v54  ;;  %v12584_v54 = vcombine.low %v7778_v7, %v7782_v10  ;;  %v12593_v30 = vcombine.high %v7786_v20, %v7790_v29  ;;  %v7825_v7 = vld [vmem:[#allocation22 + $0xb40] sm:$0xff] }
 0x94e   :  { %v7829_v10 = vld [vmem:[#allocation22 + $0xb60] sm:$0xff] }
 0x94f   :  { %10666 = vmatpush1.bf16.msra.mxu0 %v12542_v34  ;;  %v7794_v34 = vld [vmem:[#allocation22 + $0xa48] sm:$0xff] }
 0x950   :  { %10830 = vmatpush1.bf16.msra.mxu1 %v12544_v35  ;;  %10667 = vmatprep.subr.bf16.mxu0 %v12551_v37  ;;  %v7798_v35 = vld [vmem:[#allocation22 + $0xa68] sm:$0xff]  ;;  %v12590_v37 = vcombine.low %v7785_v18, %v7789_v43  ;;  %v12631_v18 = vcombine.high %v7825_v7, %v7829_v10 }
 0x951   :  { %10831 = vmatprep.subr.bf16.mxu1 %v12553_v57  ;;  %v12592_v57 = vcombine.low %v7786_v20, %v7790_v29  ;;  %v12601_v56 = vcombine.high %v7794_v34, %v7798_v35  ;;  %v7833_v20 = vld [vmem:[#allocation22 + $0xb80] sm:$0xff] }
 0x952   :  { %v7837_v29 = vld [vmem:[#allocation22 + $0xba0] sm:$0xff] }
 0x953   :  { %10668 = vmatpush1.bf16.msra.mxu0 %v12550_v14  ;;  %v7802_v14 = vld [vmem:[#allocation22 + $0xa88] sm:$0xff] }
 0x954   :  { %10832 = vmatpush1.bf16.msra.mxu1 %v12552_v38  ;;  %10669 = vmatprep.subr.bf16.mxu0 %v12559_v40  ;;  %v7806_v38 = vld [vmem:[#allocation22 + $0xaa8] sm:$0xff]  ;;  %v12598_v40 = vcombine.low %v7793_v31, %v7797_v32  ;;  %v12639_v32 = vcombine.high %v7833_v20, %v7837_v29 }
 0x955   :  { %10833 = vmatprep.subr.bf16.mxu1 %v12561_v41  ;;  %v12600_v41 = vcombine.low %v7794_v34, %v7798_v35  ;;  %v12609_v1 = vcombine.high %v7802_v14, %v7806_v38  ;;  %v7841_v35 = vld [vmem:[#allocation22 + $0xbc0] sm:$0xff] }
 0x957   :  { %10670 = vmatpush1.bf16.msra.mxu0 %v12558_v4  ;;  %v7810_v4 = vld [vmem:[#allocation22 + $0xac8] sm:$0xff] }
 0x958   :  { %10834 = vmatpush1.bf16.msra.mxu1 %v12560_v13  ;;  %10671 = vmatprep.subr.bf16.mxu0 %v12567_v55  ;;  %v7814_v13 = vld [vmem:[#allocation22 + $0xae8] sm:$0xff]  ;;  %v12606_v55 = vcombine.low %v7801_v39, %v7805_v26  ;;  %v12638_v39 = vcombine.low %v7833_v20, %v7837_v29  ;;  %v7877_v20 = vld [vmem:[#allocation22 + $0xce0] sm:$0xff] }
 0x959   :  { %10835 = vmatprep.subr.bf16.mxu1 %v12569_v48  ;;  %v12608_v48 = vcombine.low %v7802_v14, %v7806_v38  ;;  %v12617_v51 = vcombine.high %v7810_v4, %v7814_v13  ;;  %v7874_v29 = vld [vmem:[#allocation22 + $0xcc8] sm:$0xff] }
 0x95b   :  { %10672 = vmatpush1.bf16.msra.mxu0 %v12566_v60  ;;  %v7818_v60 = vld [vmem:[#allocation22 + $0xb08] sm:$0xff] }
 0x95c   :  { %10836 = vmatpush1.bf16.msra.mxu1 %v12568_v58  ;;  %10673 = vmatprep.subr.bf16.mxu0 %v12575_v23  ;;  %v7822_v58 = vld [vmem:[#allocation22 + $0xb28] sm:$0xff]  ;;  %v12614_v23 = vcombine.low %v7809_v47, %v7813_v27 }
 0x95d   :  { %10837 = vmatprep.subr.bf16.mxu1 %v12577_v9  ;;  %v12616_v9 = vcombine.low %v7810_v4, %v7814_v13  ;;  %v12625_v5 = vcombine.high %v7818_v60, %v7822_v58  ;;  %v7850_v47 = vld [vmem:[#allocation22 + $0xc08] sm:$0xff] }
 0x95e   :  { %v7854_v27 = vld [vmem:[#allocation22 + $0xc28] sm:$0xff] }
 0x95f   :  { %10674 = vmatpush1.bf16.msra.mxu0 %v12574_v33  ;;  %v7826_v33 = vld [vmem:[#allocation22 + $0xb48] sm:$0xff] }
 0x960   :  { %10838 = vmatpush1.bf16.msra.mxu1 %v12576_v36  ;;  %10675 = vmatprep.subr.bf16.mxu0 %v12583_v15  ;;  %v7830_v36 = vld [vmem:[#allocation22 + $0xb68] sm:$0xff]  ;;  %v12622_v15 = vcombine.low %v7817_v52, %v7821_v16 }
 0x961   :  { %10839 = vmatprep.subr.bf16.mxu1 %v12585_v17  ;;  %v12624_v17 = vcombine.low %v7818_v60, %v7822_v58  ;;  %v12633_v43 = vcombine.high %v7826_v33, %v7830_v36  ;;  %v12632_v31 = vcombine.low %v7826_v33, %v7830_v36  ;;  %v7858_v16 = vld [vmem:[#allocation22 + $0xc48] sm:$0xff] }
 0x962   :  { %v7862_v60 = vld [vmem:[#allocation22 + $0xc68] sm:$0xff] }
 0x963   :  { %10676 = vmatpush1.bf16.msra.mxu0 %v12582_v6  ;;  %v7834_v6 = vld [vmem:[#allocation22 + $0xb88] sm:$0xff] }
 0x964   :  { %10840 = vmatpush1.bf16.msra.mxu1 %v12584_v54  ;;  %10677 = vmatprep.subr.bf16.mxu0 %v12591_v61  ;;  %v7838_v54 = vld [vmem:[#allocation22 + $0xba8] sm:$0xff]  ;;  %v12630_v61 = vcombine.low %v7825_v7, %v7829_v10  ;;  %v12665_v7 = vcombine.high %v7858_v16, %v7862_v60 }
 0x965   :  { %10841 = vmatprep.subr.bf16.mxu1 %v12593_v30  ;;  %v6624_v30 = vrot.slane %v14422_v50, %v14262_v0  ;;  %v12641_v34 = vcombine.high %v7834_v6, %v7838_v54  ;;  %v12640_v14 = vcombine.low %v7834_v6, %v7838_v54  ;;  %v7866_v10 = vld [vmem:[#allocation22 + $0xc88] sm:$0xff] }
 0x966   :  { %v7870_v33 = vld [vmem:[#allocation22 + $0xca8] sm:$0xff] }
 0x967   :  { %10678 = vmatpush1.bf16.msra.mxu0 %v12590_v37  ;;  %v7845_v37 = vld [vmem:[#allocation22 + $0xbe0] sm:$0xff]  ;;  %v7402_v26 = vadd.f32 %v14455_v45, %v6624_v30  ;;  %v12657_v45 = vcombine.high %v7850_v47, %v7854_v27  ;;  %v7878_v6 = vld [vmem:[#allocation22 + $0xce8] sm:$0xff] }
 0x968   :  { %10842 = vmatpush1.bf16.msra.mxu1 %v12592_v57  ;;  %10679 = vmatprep.subr.bf16.mxu0 %v12599_v12  ;;  %v6636_v57 = vrot.slane %v14422_v50, %v14268_v25  ;;  %v7842_v12 = vld [vmem:[#allocation22 + $0xbc8] sm:$0xff]  ;;  %v12647_v38 = vcombine.high %v7841_v35, %v7845_v37  ;;  %v12646_v50 = vcombine.low %v7841_v35, %v7845_v37 }
 0x969   :  { %10843 = vmatprep.subr.bf16.mxu1 %v12601_v56  ;;  %v7846_v56 = vld [vmem:[#allocation22 + $0xbe8] sm:$0xff]  ;;  %v7453_v4 = vmax.f32 %v7402_v26, 0.0  ;;  %v7889_v26 = vld [vmem:[#allocation22 + $0xd40] sm:$0xff] }
 0x96a   :  { %v12648_v13 = vcombine.low %v7842_v12, %v7846_v56  ;;  %v7882_v35 = vld [vmem:[#allocation22 + $0xd08] sm:$0xff] }
 0x96b   :  { %10680 = vmatpush1.bf16.msra.mxu0 %v12598_v40  ;;  %v12649_v40 = vcombine.high %v7842_v12, %v7846_v56  ;;  %v14475_v58 = vpack.c.bf16 %v7453_v4, %v7453_v4  ;;  %v7886_v37 = vld [vmem:[#allocation22 + $0xd28] sm:$0xff]  ;;  %v12680_v12 = vcombine.low %v7874_v29, %v7878_v6 }
 0x96c   :  { %10844 = vmatpush1.bf16.msra.mxu1 %v12600_v41  ;;  %10681 = vmatprep.subr.bf16.mxu0 %v12607_v42  ;;  %v7849_v41 = vld [vmem:[#allocation22 + $0xc00] sm:$0xff]  ;;  %v7898_v4 = vld [vmem:[#allocation22 + $0xd88] sm:$0xff] }
 0x96d   :  { %10845 = vmatprep.subr.bf16.mxu1 %v12609_v1  ;;  %v7853_v42 = vld [vmem:[#allocation22 + $0xc20] sm:$0xff]  ;;  %v7445_v1 = vadd.f32 %v14459_v59, %v6636_v57  ;;  %v12656_v59 = vcombine.low %v7850_v47, %v7854_v27 }
 0x96e   :  { %v12654_v52 = vcombine.low %v7849_v41, %v7853_v42  ;;  %v7897_v27 = vld [vmem:[#allocation22 + $0xd80] sm:$0xff] }
 0x96f   :  { %10682 = vmatpush1.bf16.msra.mxu0 %v12606_v55  ;;  %v12655_v55 = vcombine.high %v7849_v41, %v7853_v42  ;;  %v12688_v42 = vcombine.low %v7882_v35, %v7886_v37 }
 0x970   :  { %10846 = vmatpush1.bf16.msra.mxu1 %v12608_v48  ;;  %10683 = vmatprep.subr.bf16.mxu0 %v12615_v49  ;;  %v7456_v48 = vmax.f32 %v7445_v1, 0.0  ;;  %v7857_v49 = vld [vmem:[#allocation22 + $0xc40] sm:$0xff] }
 0x971   :  { %10847 = vmatprep.subr.bf16.mxu1 %v12617_v51  ;;  %v7861_v51 = vld [vmem:[#allocation22 + $0xc60] sm:$0xff] }
 0x972   :  { %v12662_v36 = vcombine.low %v7857_v49, %v7861_v51 }
 0x973   :  { %10684 = vmatpush1.bf16.msra.mxu0 %v12614_v23  ;;  %v12663_v23 = vcombine.high %v7857_v49, %v7861_v51  ;;  %v7905_v51 = vld [vmem:[#allocation22 + $0xdc0] sm:$0xff] }
 0x974   :  { %10848 = vmatpush1.bf16.msra.mxu1 %v12616_v9  ;;  %10685 = vmatprep.subr.bf16.mxu0 %v12623_v62  ;;  %v7865_v9 = vld [vmem:[#allocation22 + $0xc80] sm:$0xff] }
 0x975   :  { %10849 = vmatprep.subr.bf16.mxu1 %v12625_v5  ;;  %v7869_v62 = vld [vmem:[#allocation22 + $0xca0] sm:$0xff]  ;;  %v14477_v5 = vpack.c.bf16 %v7456_v48, %v7456_v48 }
 0x976   :  { %v12670_v54 = vcombine.low %v7865_v9, %v7869_v62 }
 0x977   :  { %10686 = vmatpush1.bf16.msra.mxu0 %v12622_v15  ;;  %v12664_v15 = vcombine.low %v7858_v16, %v7862_v60  ;;  %v7906_v16 = vld [vmem:[#allocation22 + $0xdc8] sm:$0xff] }
 0x978   :  { %10850 = vmatpush1.bf16.msra.mxu1 %v12624_v17  ;;  %10687 = vmatprep.subr.bf16.mxu0 %v12631_v18  ;;  %v12671_v17 = vcombine.high %v7865_v9, %v7869_v62  ;;  %v12673_v18 = vcombine.high %v7866_v10, %v7870_v33  ;;  %v7910_v60 = vld [vmem:[#allocation22 + $0xde8] sm:$0xff] }
 0x979   :  { %10851 = vmatprep.subr.bf16.mxu1 %v12633_v43  ;;  %v7873_v43 = vld [vmem:[#allocation22 + $0xcc0] sm:$0xff]  ;;  %v12713_v62 = vcombine.high %v7906_v16, %v7910_v60 }
 0x97a   :  { %v12679_v30 = vcombine.high %v7873_v43, %v7877_v20  ;;  %v12678_v57 = vcombine.low %v7873_v43, %v7877_v20  ;;  %v7921_v20 = vld [vmem:[#allocation22 + $0xe40] sm:$0xff] }
 0x97b   :  { %10688 = vmatpush1.bf16.msra.mxu0 %v12630_v61  ;;  %v12672_v61 = vcombine.low %v7866_v10, %v7870_v33  ;;  %v7917_v10 = vld [vmem:[#allocation22 + $0xe20] sm:$0xff]  ;;  %v7914_v33 = vld [vmem:[#allocation22 + $0xe08] sm:$0xff] }
 0x97c   :  { %10852 = vmatpush1.bf16.msra.mxu1 %v12632_v31  ;;  %10689 = vmatprep.subr.bf16.mxu0 %v12639_v32  ;;  %v12681_v31 = vcombine.high %v7874_v29, %v7878_v6  ;;  %v7881_v32 = vld [vmem:[#allocation22 + $0xd00] sm:$0xff]  ;;  %v7922_v6 = vld [vmem:[#allocation22 + $0xe48] sm:$0xff] }
 0x97d   :  { %10853 = vmatprep.subr.bf16.mxu1 %v12641_v34  ;;  %v7885_v34 = vld [vmem:[#allocation22 + $0xd20] sm:$0xff] }
 0x97e   :  { %v12687_v56 = vcombine.high %v7881_v32, %v7885_v34  ;;  %v12686_v41 = vcombine.low %v7881_v32, %v7885_v34  ;;  %v7925_v29 = vld [vmem:[#allocation22 + $0xe60] sm:$0xff] }
 0x97f   :  { %10690 = vmatpush1.bf16.msra.mxu0 %v12638_v39  ;;  %v12689_v39 = vcombine.high %v7882_v35, %v7886_v37  ;;  %v7929_v34 = vld [vmem:[#allocation22 + $0xe80] sm:$0xff]  ;;  %v7930_v37 = vld [vmem:[#allocation22 + $0xe88] sm:$0xff] }
 0x980   :  { %10854 = vmatpush1.bf16.msra.mxu1 %v12640_v14  ;;  %10691 = vmatprep.subr.bf16.mxu0 %v12647_v38  ;;  %v7893_v14 = vld [vmem:[#allocation22 + $0xd60] sm:$0xff]  ;;  %v7890_v38 = vld [vmem:[#allocation22 + $0xd48] sm:$0xff] }
 0x981   :  { %10855 = vmatprep.subr.bf16.mxu1 %v12649_v40  ;;  %v7894_v40 = vld [vmem:[#allocation22 + $0xd68] sm:$0xff]  ;;  %v12695_v1 = vcombine.high %v7889_v26, %v7893_v14  ;;  %v7933_v35 = vld [vmem:[#allocation22 + $0xea0] sm:$0xff] }
 0x982   :  { %v12697_v47 = vcombine.high %v7890_v38, %v7894_v40 }
 0x983   :  { %10692 = vmatpush1.bf16.msra.mxu0 %v12646_v50  ;;  %v7901_v50 = vld [vmem:[#allocation22 + $0xda0] sm:$0xff] }
 0x984   :  { %10856 = vmatpush1.bf16.msra.mxu1 %v12648_v13  ;;  %10702 = vmatprep.subr.bf16.mxu0 %v12655_v55  ;;  %v7902_v13 = vld [vmem:[#allocation22 + $0xda8] sm:$0xff]  ;;  %v12694_v55 = vcombine.low %v7889_v26, %v7893_v14  ;;  %v12703_v48 = vcombine.high %v7897_v27, %v7901_v50  ;;  %v7937_v14 = vld [vmem:[#allocation22 + $0xec0] sm:$0xff] }
 0x985   :  { %10866 = vmatprep.subr.bf16.mxu1 %v12657_v45  ;;  %v12696_v45 = vcombine.low %v7890_v38, %v7894_v40  ;;  %v12705_v49 = vcombine.high %v7898_v4, %v7902_v13  ;;  %v7941_v38 = vld [vmem:[#allocation22 + $0xee0] sm:$0xff]  ;;  %v7938_v40 = vld [vmem:[#allocation22 + $0xec8] sm:$0xff] }
 0x986   :  { %10694 = vmatmul.mubr.bf16.vlgmr.msra.gmra.mrb[28].mxu0 %v14475_v58 }
 0x987   :  { %10858 = vmatmul.mubr.bf16.vlgmr.msra.gmra.mrb[28].mxu1 %v14475_v58  ;;  %10703 = vmatpush1.bf16.msra.mxu0 %v12654_v52  ;;  %v7909_v52 = vld [vmem:[#allocation22 + $0xde0] sm:$0xff] }
 0x988   :  { %10734 = vmatprep.mubr.bf16.mxu0 %v14477_v5  ;;  %10867 = vmatpush1.bf16.msra.mxu1 %v12656_v59  ;;  %v12702_v59 = vcombine.low %v7897_v27, %v7901_v50  ;;  %v12711_v9 = vcombine.high %v7905_v51, %v7909_v52  ;;  %v7945_v50 = vld [vmem:[#allocation22 + $0xf00] sm:$0xff] }
 0x989   :  { %10898 = vmatprep.mubr.bf16.mxu1 %v14477_v5  ;;  %10704 = vmatprep.subr.bf16.mxu0 %v12663_v23  ;;  %v12704_v23 = vcombine.low %v7898_v4, %v7902_v13  ;;  %v7949_v4 = vld [vmem:[#allocation22 + $0xf20] sm:$0xff]  ;;  %v7946_v13 = vld [vmem:[#allocation22 + $0xf08] sm:$0xff] }
 0x98a   :  { %10868 = vmatprep.subr.bf16.mxu1 %v12665_v7  ;;  %v7913_v7 = vld [vmem:[#allocation22 + $0xe00] sm:$0xff] }
 0x98b   :  { %10705 = vmatpush1.bf16.msra.mxu0 %v12662_v36  ;;  %v7918_v36 = vld [vmem:[#allocation22 + $0xe28] sm:$0xff] }
 0x98c   :  { %10869 = vmatpush1.bf16.msra.mxu1 %v12664_v15  ;;  %10706 = vmatprep.subr.bf16.mxu0 %v12671_v17  ;;  %v12710_v15 = vcombine.low %v7905_v51, %v7909_v52  ;;  %v12712_v17 = vcombine.low %v7906_v16, %v7910_v60  ;;  %v12721_v43 = vcombine.high %v7914_v33, %v7918_v36  ;;  %v7953_v52 = vld [vmem:[#allocation22 + $0xf40] sm:$0xff]  ;;  %v7954_v60 = vld [vmem:[#allocation22 + $0xf48] sm:$0xff] }
 0x98d   :  { %10870 = vmatprep.subr.bf16.mxu1 %v12673_v18  ;;  %v12719_v18 = vcombine.high %v7913_v7, %v7917_v10  ;;  %v7957_v16 = vld [vmem:[#allocation22 + $0xf60] sm:$0xff] }
 0x98f   :  { %10707 = vmatpush1.bf16.msra.mxu0 %v12670_v54  ;;  %v7926_v54 = vld [vmem:[#allocation22 + $0xe68] sm:$0xff] }
 0x990   :  { %10871 = vmatpush1.bf16.msra.mxu1 %v12672_v61  ;;  %10708 = vmatprep.subr.bf16.mxu0 %v12679_v30  ;;  %v12718_v61 = vcombine.low %v7913_v7, %v7917_v10  ;;  %v12720_v30 = vcombine.low %v7914_v33, %v7918_v36  ;;  %v12729_v32 = vcombine.high %v7922_v6, %v7926_v54  ;;  %v7961_v10 = vld [vmem:[#allocation22 + $0xf80] sm:$0xff]  ;;  %v7962_v36 = vld [vmem:[#allocation22 + $0xf88] sm:$0xff] }
 0x991   :  { %10872 = vmatprep.subr.bf16.mxu1 %v12681_v31  ;;  %v12727_v31 = vcombine.high %v7921_v20, %v7925_v29  ;;  %v7965_v33 = vld [vmem:[#allocation22 + $0xfa0] sm:$0xff] }
 0x993   :  { %10709 = vmatpush1.bf16.msra.mxu0 %v12678_v57  ;;  %v7934_v57 = vld [vmem:[#allocation22 + $0xea8] sm:$0xff] }
 0x994   :  { %10873 = vmatpush1.bf16.msra.mxu1 %v12680_v12  ;;  %10710 = vmatprep.subr.bf16.mxu0 %v12687_v56  ;;  %v12726_v12 = vcombine.low %v7921_v20, %v7925_v29  ;;  %v12728_v56 = vcombine.low %v7922_v6, %v7926_v54  ;;  %v12737_v26 = vcombine.high %v7930_v37, %v7934_v57  ;;  %v7969_v54 = vld [vmem:[#allocation22 + $0xfc0] sm:$0xff] }
 0x995   :  { %10874 = vmatprep.subr.bf16.mxu1 %v12689_v39  ;;  %v12735_v39 = vcombine.high %v7929_v34, %v7933_v35  ;;  %v12767_v29 = vcombine.high %v7961_v10, %v7965_v33 }
 0x997   :  { %10711 = vmatpush1.bf16.msra.mxu0 %v12686_v41  ;;  %v7942_v41 = vld [vmem:[#allocation22 + $0xee8] sm:$0xff] }
 0x998   :  { %10875 = vmatpush1.bf16.msra.mxu1 %v12688_v42  ;;  %10712 = vmatprep.subr.bf16.mxu0 %v12695_v1  ;;  %v12734_v42 = vcombine.low %v7929_v34, %v7933_v35  ;;  %v12736_v1 = vcombine.low %v7930_v37, %v7934_v57  ;;  %v12745_v27 = vcombine.high %v7938_v40, %v7942_v41 }
 0x999   :  { %10876 = vmatprep.subr.bf16.mxu1 %v12697_v47  ;;  %v12743_v47 = vcombine.high %v7937_v14, %v7941_v38 }
 0x99b   :  { %10713 = vmatpush1.bf16.msra.mxu0 %v12694_v55  ;;  %v7950_v55 = vld [vmem:[#allocation22 + $0xf28] sm:$0xff] }
 0x99c   :  { %10877 = vmatpush1.bf16.msra.mxu1 %v12696_v45  ;;  %10714 = vmatprep.subr.bf16.mxu0 %v12703_v48  ;;  %v12742_v45 = vcombine.low %v7937_v14, %v7941_v38  ;;  %v12744_v48 = vcombine.low %v7938_v40, %v7942_v41  ;;  %v12753_v51 = vcombine.high %v7946_v13, %v7950_v55 }
 0x99d   :  { %10878 = vmatprep.subr.bf16.mxu1 %v12705_v49  ;;  %v12751_v49 = vcombine.high %v7945_v50, %v7949_v4 }
 0x99f   :  { %10715 = vmatpush1.bf16.msra.mxu0 %v12702_v59  ;;  %v7958_v59 = vld [vmem:[#allocation22 + $0xf68] sm:$0xff] }
 0x9a0   :  { %10879 = vmatpush1.bf16.msra.mxu1 %v12704_v23  ;;  %10716 = vmatprep.subr.bf16.mxu0 %v12711_v9  ;;  %v12750_v23 = vcombine.low %v7945_v50, %v7949_v4  ;;  %v12752_v9 = vcombine.low %v7946_v13, %v7950_v55  ;;  %v12761_v7 = vcombine.high %v7954_v60, %v7958_v59  ;;  %v7480_v50 = vld [vmem:[#allocation22 + $0x78] sm:$0xff] }
 0x9a1   :  { %10880 = vmatprep.subr.bf16.mxu1 %v12713_v62  ;;  %v12759_v62 = vcombine.high %v7953_v52, %v7957_v16  ;;  %v12760_v20 = vcombine.low %v7954_v60, %v7958_v59 }
 0x9a3   :  { %10717 = vmatpush1.bf16.msra.mxu0 %v12710_v15  ;;  %v7966_v15 = vld [vmem:[#allocation22 + $0xfa8] sm:$0xff] }
 0x9a4   :  { %10881 = vmatpush1.bf16.msra.mxu1 %v12712_v17  ;;  %10718 = vmatprep.subr.bf16.mxu0 %v12719_v18  ;;  %v12758_v17 = vcombine.low %v7953_v52, %v7957_v16  ;;  %v13429_v18 = vld [vmem:[#allocation20] sm:$0xff]  ;;  %v12769_v6 = vcombine.high %v7962_v36, %v7966_v15  ;;  %v12768_v35 = vcombine.low %v7962_v36, %v7966_v15 }
 0x9a5   :  { %10882 = vmatprep.subr.bf16.mxu1 %v12721_v43  ;;  %v6632_v43 = vrot.slane %v13429_v18, %v14279_v24  ;;  %v7488_v52 = vld [vmem:[#allocation22 + $0xb8] sm:$0xff]  ;;  %v7499_v18 = vld [vmem:[#allocation22 + $0x110] sm:$0xff] }
 0x9a7   :  { %10719 = vmatpush1.bf16.msra.mxu0 %v12718_v61  ;;  %v7973_v61 = vld [vmem:[#allocation22 + $0xfe0] sm:$0xff]  ;;  %v7443_v34 = vadd.f32 %v14457_v46, %v6632_v43  ;;  %v7475_v46 = vld [vmem:[#allocation22 + $0x50] sm:$0xff] }
 0x9a8   :  { %10883 = vmatpush1.bf16.msra.mxu1 %v12720_v30  ;;  %10720 = vmatprep.subr.bf16.mxu0 %v12727_v31  ;;  %v7970_v30 = vld [vmem:[#allocation22 + $0xfc8] sm:$0xff]  ;;  %v12775_v37 = vcombine.high %v7969_v54, %v7973_v61  ;;  %v12774_v14 = vcombine.low %v7969_v54, %v7973_v61  ;;  %v7503_v43 = vld [vmem:[#allocation22 + $0x130] sm:$0xff] }
 0x9a9   :  { %10884 = vmatprep.subr.bf16.mxu1 %v12729_v32  ;;  %v7974_v31 = vld [vmem:[#allocation22 + $0xfe8] sm:$0xff]  ;;  %v12766_v32 = vcombine.low %v7961_v10, %v7965_v33  ;;  %v7455_v38 = vmax.f32 %v7443_v34, 0.0  ;;  %v7496_v10 = vld [vmem:[#allocation22 + $0xf8] sm:$0xff]  ;;  %v12307_v54 = vcombine.high %v7499_v18, %v7503_v43 }
 0x9aa   :  { %v12777_v57 = vcombine.high %v7970_v30, %v7974_v31  ;;  %v12776_v40 = vcombine.low %v7970_v30, %v7974_v31  ;;  %v7507_v30 = vld [vmem:[#allocation22 + $0x150] sm:$0xff]  ;;  %v7512_v34 = vld [vmem:[#allocation22 + $0x178] sm:$0xff] }
 0x9ab   :  { %10721 = vmatpush1.bf16.msra.mxu0 %v12726_v12  ;;  %v7467_v12 = vld [vmem:[#allocation22 + $0x10] sm:$0xff]  ;;  %v14485_v4 = vpack.c.bf16 %v7455_v38, %v7455_v38 }
 0x9ac   :  { %10885 = vmatpush1.bf16.msra.mxu1 %v12728_v56  ;;  %10722 = vmatprep.subr.bf16.mxu0 %v12735_v39  ;;  %v7471_v56 = vld [vmem:[#allocation22 + $0x30] sm:$0xff]  ;;  %v7468_v39 = vld [vmem:[#allocation22 + $0x18] sm:$0xff] }
 0x9ad   :  { %10886 = vmatprep.subr.bf16.mxu1 %v12737_v26  ;;  %v7472_v26 = vld [vmem:[#allocation22 + $0x38] sm:$0xff]  ;;  %v12275_v41 = vcombine.high %v7467_v12, %v7471_v56  ;;  %v7511_v31 = vld [vmem:[#allocation22 + $0x170] sm:$0xff] }
 0x9ae   :  { %v12276_v13 = vcombine.low %v7468_v39, %v7472_v26  ;;  %v12314_v38 = vcombine.low %v7507_v30, %v7511_v31 }
 0x9af   :  { %10723 = vmatpush1.bf16.msra.mxu0 %v12734_v42  ;;  %v12277_v42 = vcombine.high %v7468_v39, %v7472_v26  ;;  %v7519_v39 = vld [vmem:[#allocation22 + $0x1b0] sm:$0xff]  ;;  %v7516_v26 = vld [vmem:[#allocation22 + $0x198] sm:$0xff] }
 0x9b0   :  { %10887 = vmatpush1.bf16.msra.mxu1 %v12736_v1  ;;  %10724 = vmatprep.subr.bf16.mxu0 %v12743_v47  ;;  %v7479_v1 = vld [vmem:[#allocation22 + $0x70] sm:$0xff]  ;;  %v12274_v47 = vcombine.low %v7467_v12, %v7471_v56 }
 0x9b1   :  { %10888 = vmatprep.subr.bf16.mxu1 %v12745_v27  ;;  %v7476_v27 = vld [vmem:[#allocation22 + $0x58] sm:$0xff]  ;;  %v12283_v55 = vcombine.high %v7475_v46, %v7479_v1  ;;  %v12282_v16 = vcombine.low %v7475_v46, %v7479_v1  ;;  %v7515_v56 = vld [vmem:[#allocation22 + $0x190] sm:$0xff] }
 0x9b2   :  { %v12284_v60 = vcombine.low %v7476_v27, %v7480_v50  ;;  %v7523_v46 = vld [vmem:[#allocation22 + $0x1d0] sm:$0xff] }
 0x9b3   :  { %10725 = vmatpush1.bf16.msra.mxu0 %v12742_v45  ;;  %v7483_v45 = vld [vmem:[#allocation22 + $0x90] sm:$0xff] }
 0x9b4   :  { %10889 = vmatpush1.bf16.msra.mxu1 %v12744_v48  ;;  %10726 = vmatprep.subr.bf16.mxu0 %v12751_v49  ;;  %v7487_v48 = vld [vmem:[#allocation22 + $0xb0] sm:$0xff]  ;;  %v12285_v49 = vcombine.high %v7476_v27, %v7480_v50  ;;  %v7528_v27 = vld [vmem:[#allocation22 + $0x1f8] sm:$0xff]  ;;  %v12322_v50 = vcombine.low %v7515_v56, %v7519_v39 }
 0x9b5   :  { %10890 = vmatprep.subr.bf16.mxu1 %v12753_v51  ;;  %v7484_v51 = vld [vmem:[#allocation22 + $0x98] sm:$0xff]  ;;  %v12291_v59 = vcombine.high %v7483_v45, %v7487_v48  ;;  %v12290_v33 = vcombine.low %v7483_v45, %v7487_v48  ;;  %v7527_v1 = vld [vmem:[#allocation22 + $0x1f0] sm:$0xff] }
 0x9b6   :  { %v12292_v36 = vcombine.low %v7484_v51, %v7488_v52  ;;  %v7531_v48 = vld [vmem:[#allocation22 + $0x210] sm:$0xff] }
 0x9b7   :  { %10727 = vmatpush1.bf16.msra.mxu0 %v12750_v23  ;;  %v12293_v23 = vcombine.high %v7484_v51, %v7488_v52  ;;  %v7532_v51 = vld [vmem:[#allocation22 + $0x218] sm:$0xff] }
 0x9b8   :  { %10891 = vmatpush1.bf16.msra.mxu1 %v12752_v9  ;;  %10728 = vmatprep.subr.bf16.mxu0 %v12759_v62  ;;  %v7491_v9 = vld [vmem:[#allocation22 + $0xd0] sm:$0xff]  ;;  %v7536_v52 = vld [vmem:[#allocation22 + $0x238] sm:$0xff] }
 0x9b9   :  { %10892 = vmatprep.subr.bf16.mxu1 %v12761_v7  ;;  %v7495_v62 = vld [vmem:[#allocation22 + $0xf0] sm:$0xff]  ;;  %v7492_v7 = vld [vmem:[#allocation22 + $0xd8] sm:$0xff] }
 0x9ba   :  { %v12299_v15 = vcombine.high %v7491_v9, %v7495_v62 }
 0x9bb   :  { %10729 = vmatpush1.bf16.msra.mxu0 %v12758_v17  ;;  %v12301_v17 = vcombine.high %v7492_v7, %v7496_v10 }
 0x9bc   :  { %10893 = vmatpush1.bf16.msra.mxu1 %v12760_v20  ;;  %10730 = vmatprep.subr.bf16.mxu0 %v12767_v29  ;;  %v7500_v20 = vld [vmem:[#allocation22 + $0x118] sm:$0xff] }
 0x9bd   :  { %10894 = vmatprep.subr.bf16.mxu1 %v12769_v6  ;;  %v7504_v29 = vld [vmem:[#allocation22 + $0x138] sm:$0xff]  ;;  %v12300_v6 = vcombine.low %v7492_v7, %v7496_v10 }
 0x9be   :  { %v12309_v61 = vcombine.high %v7500_v20, %v7504_v29  ;;  %v7540_v7 = vld [vmem:[#allocation22 + $0x258] sm:$0xff] }
 0x9bf   :  { %10731 = vmatpush1.bf16.msra.mxu0 %v12766_v32  ;;  %v7508_v32 = vld [vmem:[#allocation22 + $0x158] sm:$0xff] }
 0x9c0   :  { %10895 = vmatpush1.bf16.msra.mxu1 %v12768_v35  ;;  %10732 = vmatprep.subr.bf16.mxu0 %v12775_v37  ;;  %v12306_v35 = vcombine.low %v7499_v18, %v7503_v43  ;;  %v12308_v37 = vcombine.low %v7500_v20, %v7504_v29  ;;  %v12317_v12 = vcombine.high %v7508_v32, %v7512_v34  ;;  %v7544_v10 = vld [vmem:[#allocation22 + $0x278] sm:$0xff]  ;;  %v7547_v18 = vld [vmem:[#allocation22 + $0x290] sm:$0xff] }
 0x9c1   :  { %10896 = vmatprep.subr.bf16.mxu1 %v12777_v57  ;;  %v12315_v57 = vcombine.high %v7507_v30, %v7511_v31  ;;  %v7551_v43 = vld [vmem:[#allocation22 + $0x2b0] sm:$0xff]  ;;  %v7548_v20 = vld [vmem:[#allocation22 + $0x298] sm:$0xff] }
 0x9c2   :  { %v7552_v29 = vld [vmem:[#allocation22 + $0x2b8] sm:$0xff]  ;;  %v7555_v30 = vld [vmem:[#allocation22 + $0x2d0] sm:$0xff] }
 0x9c3   :  { %10733 = vmatpush1.bf16.msra.mxu0 %v12774_v14  ;;  %v7520_v14 = vld [vmem:[#allocation22 + $0x1b8] sm:$0xff]  ;;  %v7559_v31 = vld [vmem:[#allocation22 + $0x2f0] sm:$0xff] }
 0x9c4   :  { %10897 = vmatpush1.bf16.msra.mxu1 %v12776_v40  ;;  %10907 = vmatprep.subr.bf16.mxu0 %v12275_v41  ;;  %v12316_v40 = vcombine.low %v7508_v32, %v7512_v34  ;;  %v12323_v41 = vcombine.high %v7515_v56, %v7519_v39  ;;  %v7556_v32 = vld [vmem:[#allocation22 + $0x2d8] sm:$0xff]  ;;  %v7563_v56 = vld [vmem:[#allocation22 + $0x310] sm:$0xff] }
 0x9c5   :  { %11071 = vmatprep.subr.bf16.mxu1 %v12277_v42  ;;  %v12325_v42 = vcombine.high %v7516_v26, %v7520_v14  ;;  %v7560_v34 = vld [vmem:[#allocation22 + $0x2f8] sm:$0xff]  ;;  %v7567_v39 = vld [vmem:[#allocation22 + $0x330] sm:$0xff] }
 0x9c6   :  { %10735 = vmatmul.mubr.bf16.vlgmr.msra.gmra.mrb[28].mxu0 %v14485_v4 }
 0x9c7   :  { %10899 = vmatmul.mubr.bf16.vlgmr.msra.gmra.mrb[28].mxu1 %v14485_v4  ;;  %10908 = vmatpush1.bf16.msra.mxu0 %v12274_v47  ;;  %v7524_v47 = vld [vmem:[#allocation22 + $0x1d8] sm:$0xff] }
 0x9c8   :  { %10939 = vmatprep.mubr.bf16.mxu0 %v14432_v21  ;;  %11072 = vmatpush1.bf16.msra.mxu1 %v12276_v13  ;;  %v12324_v13 = vcombine.low %v7516_v26, %v7520_v14  ;;  %v12333_v45 = vcombine.high %v7524_v47, %v7528_v27  ;;  %v7564_v26 = vld [vmem:[#allocation22 + $0x318] sm:$0xff] }
 0x9c9   :  { %11103 = vmatprep.mubr.bf16.mxu1 %v14432_v21  ;;  %10909 = vmatprep.subr.bf16.mxu0 %v12283_v55  ;;  %v12298_v21 = vcombine.low %v7491_v9, %v7495_v62  ;;  %v12331_v55 = vcombine.high %v7523_v46, %v7527_v1  ;;  %v7539_v9 = vld [vmem:[#allocation22 + $0x250] sm:$0xff]  ;;  %v7568_v14 = vld [vmem:[#allocation22 + $0x338] sm:$0xff] }
 0x9ca   :  { %11073 = vmatprep.subr.bf16.mxu1 %v12285_v49  ;;  %v7535_v49 = vld [vmem:[#allocation22 + $0x230] sm:$0xff] }
 0x9cb   :  { %10910 = vmatpush1.bf16.msra.mxu0 %v12282_v16  ;;  %v12330_v16 = vcombine.low %v7523_v46, %v7527_v1  ;;  %v7543_v62 = vld [vmem:[#allocation22 + $0x270] sm:$0xff] }
 0x9cc   :  { %11074 = vmatpush1.bf16.msra.mxu1 %v12284_v60  ;;  %10911 = vmatprep.subr.bf16.mxu0 %v12291_v59  ;;  %v12332_v60 = vcombine.low %v7524_v47, %v7528_v27  ;;  %v12339_v59 = vcombine.high %v7531_v48, %v7535_v49  ;;  %v7571_v46 = vld [vmem:[#allocation22 + $0x350] sm:$0xff]  ;;  %v7572_v47 = vld [vmem:[#allocation22 + $0x358] sm:$0xff] }
 0x9cd   :  { %11075 = vmatprep.subr.bf16.mxu1 %v12293_v23  ;;  %v12341_v23 = vcombine.high %v7532_v51, %v7536_v52  ;;  %v7575_v1 = vld [vmem:[#allocation22 + $0x370] sm:$0xff]  ;;  %v7576_v27 = vld [vmem:[#allocation22 + $0x378] sm:$0xff] }
 0x9cf   :  { %10912 = vmatpush1.bf16.msra.mxu0 %v12290_v33  ;;  %v12338_v33 = vcombine.low %v7531_v48, %v7535_v49  ;;  %v7579_v48 = vld [vmem:[#allocation22 + $0x390] sm:$0xff] }
 0x9d0   :  { %11076 = vmatpush1.bf16.msra.mxu1 %v12292_v36  ;;  %10913 = vmatprep.subr.bf16.mxu0 %v12299_v15  ;;  %v12340_v36 = vcombine.low %v7532_v51, %v7536_v52  ;;  %v12347_v15 = vcombine.high %v7539_v9, %v7543_v62  ;;  %v7583_v49 = vld [vmem:[#allocation22 + $0x3b0] sm:$0xff]  ;;  %v7580_v51 = vld [vmem:[#allocation22 + $0x398] sm:$0xff] }
 0x9d1   :  { %11077 = vmatprep.subr.bf16.mxu1 %v12301_v17  ;;  %v12349_v17 = vcombine.high %v7540_v7, %v7544_v10  ;;  %v7584_v52 = vld [vmem:[#allocation22 + $0x3b8] sm:$0xff] }
 0x9d3   :  { %10914 = vmatpush1.bf16.msra.mxu0 %v12298_v21  ;;  %v12346_v21 = vcombine.low %v7539_v9, %v7543_v62  ;;  %v7587_v9 = vld [vmem:[#allocation22 + $0x3d0] sm:$0xff] }
 0x9d4   :  { %11078 = vmatpush1.bf16.msra.mxu1 %v12300_v6  ;;  %10915 = vmatprep.subr.bf16.mxu0 %v12307_v54  ;;  %v12348_v6 = vcombine.low %v7540_v7, %v7544_v10  ;;  %v12355_v54 = vcombine.high %v7547_v18, %v7551_v43  ;;  %v7591_v62 = vld [vmem:[#allocation22 + $0x3f0] sm:$0xff]  ;;  %v7588_v7 = vld [vmem:[#allocation22 + $0x3d8] sm:$0xff] }
 0x9d5   :  { %11079 = vmatprep.subr.bf16.mxu1 %v12309_v61  ;;  %v12357_v61 = vcombine.high %v7548_v20, %v7552_v29  ;;  %v7592_v10 = vld [vmem:[#allocation22 + $0x3f8] sm:$0xff] }
 0x9d7   :  { %10916 = vmatpush1.bf16.msra.mxu0 %v12306_v35  ;;  %v12354_v35 = vcombine.low %v7547_v18, %v7551_v43  ;;  %v7595_v18 = vld [vmem:[#allocation22 + $0x410] sm:$0xff] }
 0x9d8   :  { %11080 = vmatpush1.bf16.msra.mxu1 %v12308_v37  ;;  %10917 = vmatprep.subr.bf16.mxu0 %v12315_v57  ;;  %v12356_v37 = vcombine.low %v7548_v20, %v7552_v29  ;;  %v12363_v57 = vcombine.high %v7555_v30, %v7559_v31  ;;  %v7599_v43 = vld [vmem:[#allocation22 + $0x430] sm:$0xff]  ;;  %v7596_v20 = vld [vmem:[#allocation22 + $0x418] sm:$0xff] }
 0x9d9   :  { %11081 = vmatprep.subr.bf16.mxu1 %v12317_v12  ;;  %v12365_v12 = vcombine.high %v7556_v32, %v7560_v34  ;;  %v7600_v29 = vld [vmem:[#allocation22 + $0x438] sm:$0xff] }
 0x9db   :  { %10918 = vmatpush1.bf16.msra.mxu0 %v12314_v38  ;;  %v12362_v38 = vcombine.low %v7555_v30, %v7559_v31  ;;  %v7603_v30 = vld [vmem:[#allocation22 + $0x450] sm:$0xff] }
 0x9dc   :  { %11082 = vmatpush1.bf16.msra.mxu1 %v12316_v40  ;;  %10919 = vmatprep.subr.bf16.mxu0 %v12323_v41  ;;  %v12364_v40 = vcombine.low %v7556_v32, %v7560_v34  ;;  %v12371_v41 = vcombine.high %v7563_v56, %v7567_v39  ;;  %v7607_v31 = vld [vmem:[#allocation22 + $0x470] sm:$0xff]  ;;  %v12402_v32 = vcombine.low %v7595_v18, %v7599_v43  ;;  %v7604_v34 = vld [vmem:[#allocation22 + $0x458] sm:$0xff] }
 0x9dd   :  { %11083 = vmatprep.subr.bf16.mxu1 %v12325_v42  ;;  %v12373_v42 = vcombine.high %v7564_v26, %v7568_v14 }
 0x9df   :  { %10920 = vmatpush1.bf16.msra.mxu0 %v12322_v50  ;;  %v12370_v50 = vcombine.low %v7563_v56, %v7567_v39  ;;  %v7615_v56 = vld [vmem:[#allocation22 + $0x4b0] sm:$0xff] }
 0x9e0   :  { %11084 = vmatpush1.bf16.msra.mxu1 %v12324_v13  ;;  %10921 = vmatprep.subr.bf16.mxu0 %v12331_v55  ;;  %v12372_v13 = vcombine.low %v7564_v26, %v7568_v14  ;;  %v12379_v55 = vcombine.high %v7571_v46, %v7575_v1  ;;  %v7612_v26 = vld [vmem:[#allocation22 + $0x498] sm:$0xff] }
 0x9e1   :  { %11085 = vmatprep.subr.bf16.mxu1 %v12333_v45  ;;  %v12381_v45 = vcombine.high %v7572_v47, %v7576_v27  ;;  %v7616_v14 = vld [vmem:[#allocation22 + $0x4b8] sm:$0xff] }
 0x9e3   :  { %10922 = vmatpush1.bf16.msra.mxu0 %v12330_v16  ;;  %v12378_v16 = vcombine.low %v7571_v46, %v7575_v1  ;;  %v7619_v46 = vld [vmem:[#allocation22 + $0x4d0] sm:$0xff] }
 0x9e4   :  { %11086 = vmatpush1.bf16.msra.mxu1 %v12332_v60  ;;  %10923 = vmatprep.subr.bf16.mxu0 %v12339_v59  ;;  %v12380_v60 = vcombine.low %v7572_v47, %v7576_v27  ;;  %v12387_v59 = vcombine.high %v7579_v48, %v7583_v49  ;;  %v7623_v1 = vld [vmem:[#allocation22 + $0x4f0] sm:$0xff]  ;;  %v7620_v47 = vld [vmem:[#allocation22 + $0x4d8] sm:$0xff] }
 0x9e5   :  { %11087 = vmatprep.subr.bf16.mxu1 %v12341_v23  ;;  %v12389_v23 = vcombine.high %v7580_v51, %v7584_v52  ;;  %v7624_v27 = vld [vmem:[#allocation22 + $0x4f8] sm:$0xff] }
 0x9e7   :  { %10924 = vmatpush1.bf16.msra.mxu0 %v12338_v33  ;;  %v12386_v33 = vcombine.low %v7579_v48, %v7583_v49  ;;  %v7631_v48 = vld [vmem:[#allocation22 + $0x530] sm:$0xff]  ;;  %v7628_v49 = vld [vmem:[#allocation22 + $0x518] sm:$0xff] }
 0x9e8   :  { %11088 = vmatpush1.bf16.msra.mxu1 %v12340_v36  ;;  %10925 = vmatprep.subr.bf16.mxu0 %v12347_v15  ;;  %v12388_v36 = vcombine.low %v7580_v51, %v7584_v52  ;;  %v12395_v15 = vcombine.high %v7587_v9, %v7591_v62  ;;  %v7632_v51 = vld [vmem:[#allocation22 + $0x538] sm:$0xff]  ;;  %v12428_v52 = vcombine.low %v7620_v47, %v7624_v27 }
 0x9e9   :  { %11089 = vmatprep.subr.bf16.mxu1 %v12349_v17  ;;  %v12397_v17 = vcombine.high %v7588_v7, %v7592_v10 }
 0x9eb   :  { %10926 = vmatpush1.bf16.msra.mxu0 %v12346_v21  ;;  %v12394_v21 = vcombine.low %v7587_v9, %v7591_v62  ;;  %v7636_v9 = vld [vmem:[#allocation22 + $0x558] sm:$0xff] }
 0x9ec   :  { %11090 = vmatpush1.bf16.msra.mxu1 %v12348_v6  ;;  %10927 = vmatprep.subr.bf16.mxu0 %v12355_v54  ;;  %v12396_v6 = vcombine.low %v7588_v7, %v7592_v10  ;;  %v12403_v54 = vcombine.high %v7595_v18, %v7599_v43  ;;  %v7640_v62 = vld [vmem:[#allocation22 + $0x578] sm:$0xff]  ;;  %v12436_v10 = vcombine.low %v7628_v49, %v7632_v51 }
 0x9ed   :  { %11091 = vmatprep.subr.bf16.mxu1 %v12357_v61  ;;  %v12405_v61 = vcombine.high %v7596_v20, %v7600_v29  ;;  %v7644_v18 = vld [vmem:[#allocation22 + $0x598] sm:$0xff] }
 0x9ee   :  { %v7648_v43 = vld [vmem:[#allocation22 + $0x5b8] sm:$0xff] }
 0x9ef   :  { %10928 = vmatpush1.bf16.msra.mxu0 %v12354_v35  ;;  %v7608_v35 = vld [vmem:[#allocation22 + $0x478] sm:$0xff] }
 0x9f0   :  { %11092 = vmatpush1.bf16.msra.mxu1 %v12356_v37  ;;  %10929 = vmatprep.subr.bf16.mxu0 %v12363_v57  ;;  %v12404_v37 = vcombine.low %v7596_v20, %v7600_v29  ;;  %v12411_v57 = vcombine.high %v7603_v30, %v7607_v31  ;;  %v12413_v39 = vcombine.high %v7604_v34, %v7608_v35 }
 0x9f1   :  { %11093 = vmatprep.subr.bf16.mxu1 %v12365_v12  ;;  %v7611_v12 = vld [vmem:[#allocation22 + $0x490] sm:$0xff]  ;;  %v12444_v29 = vcombine.low %v7636_v9, %v7640_v62 }
 0x9f3   :  { %10930 = vmatpush1.bf16.msra.mxu0 %v12362_v38  ;;  %v12410_v38 = vcombine.low %v7603_v30, %v7607_v31  ;;  %v7652_v30 = vld [vmem:[#allocation22 + $0x5d8] sm:$0xff] }
 0x9f4   :  { %11094 = vmatpush1.bf16.msra.mxu1 %v12364_v40  ;;  %10931 = vmatprep.subr.bf16.mxu0 %v12371_v41  ;;  %v12412_v40 = vcombine.low %v7604_v34, %v7608_v35  ;;  %v12419_v41 = vcombine.high %v7611_v12, %v7615_v56  ;;  %v7656_v31 = vld [vmem:[#allocation22 + $0x5f8] sm:$0xff]  ;;  %v12452_v34 = vcombine.low %v7644_v18, %v7648_v43 }
 0x9f5   :  { %11095 = vmatprep.subr.bf16.mxu1 %v12373_v42  ;;  %v12421_v42 = vcombine.high %v7612_v26, %v7616_v14 }
 0x9f7   :  { %10932 = vmatpush1.bf16.msra.mxu0 %v12370_v50  ;;  %v12418_v50 = vcombine.low %v7611_v12, %v7615_v56  ;;  %v7663_v12 = vld [vmem:[#allocation22 + $0x630] sm:$0xff]  ;;  %v7660_v56 = vld [vmem:[#allocation22 + $0x618] sm:$0xff] }
 0x9f8   :  { %11096 = vmatpush1.bf16.msra.mxu1 %v12372_v13  ;;  %10933 = vmatprep.subr.bf16.mxu0 %v12379_v55  ;;  %v12427_v13 = vcombine.high %v7619_v46, %v7623_v1  ;;  %v12429_v55 = vcombine.high %v7620_v47, %v7624_v27 }
 0x9f9   :  { %11097 = vmatprep.subr.bf16.mxu1 %v12381_v45  ;;  %v7627_v45 = vld [vmem:[#allocation22 + $0x510] sm:$0xff] }
 0x9fa   :  { %v12434_v7 = vcombine.low %v7627_v45, %v7631_v48 }
 0x9fb   :  { %10934 = vmatpush1.bf16.msra.mxu0 %v12378_v16  ;;  %v12435_v16 = vcombine.high %v7627_v45, %v7631_v48  ;;  %v7676_v45 = vld [vmem:[#allocation22 + $0x698] sm:$0xff] }
 0x9fc   :  { %11098 = vmatpush1.bf16.msra.mxu1 %v12380_v60  ;;  %10935 = vmatprep.subr.bf16.mxu0 %v12387_v59  ;;  %v12437_v60 = vcombine.high %v7628_v49, %v7632_v51  ;;  %v7635_v59 = vld [vmem:[#allocation22 + $0x550] sm:$0xff]  ;;  %v7680_v48 = vld [vmem:[#allocation22 + $0x6b8] sm:$0xff] }
 0x9fd   :  { %11099 = vmatprep.subr.bf16.mxu1 %v12389_v23  ;;  %v7639_v23 = vld [vmem:[#allocation22 + $0x570] sm:$0xff] }
 0x9fe   :  { %v12442_v20 = vcombine.low %v7635_v59, %v7639_v23 }
 0x9ff   :  { %10936 = vmatpush1.bf16.msra.mxu0 %v12386_v33  ;;  %v12443_v33 = vcombine.high %v7635_v59, %v7639_v23  ;;  %v7684_v59 = vld [vmem:[#allocation22 + $0x6d8] sm:$0xff] }
 0xa00   :  { %11100 = vmatpush1.bf16.msra.mxu1 %v12388_v36  ;;  %10937 = vmatprep.subr.bf16.mxu0 %v12395_v15  ;;  %v12445_v36 = vcombine.high %v7636_v9, %v7640_v62  ;;  %v7643_v15 = vld [vmem:[#allocation22 + $0x590] sm:$0xff]  ;;  %v7688_v23 = vld [vmem:[#allocation22 + $0x6f8] sm:$0xff]  ;;  %v12484_v62 = vcombine.low %v7676_v45, %v7680_v48 }
 0xa01   :  { %11101 = vmatprep.subr.bf16.mxu1 %v12397_v17  ;;  %v7647_v17 = vld [vmem:[#allocation22 + $0x5b0] sm:$0xff] }
 0xa03   :  { %10938 = vmatpush1.bf16.msra.mxu0 %v12394_v21  ;;  %v12451_v21 = vcombine.high %v7643_v15, %v7647_v17 }
 0xa04   :  { %11102 = vmatpush1.bf16.msra.mxu1 %v12396_v6  ;;  %10948 = vmatprep.subr.bf16.mxu0 %v12403_v54  ;;  %v12453_v6 = vcombine.high %v7644_v18, %v7648_v43  ;;  %v7651_v54 = vld [vmem:[#allocation22 + $0x5d0] sm:$0xff]  ;;  %v12492_v43 = vcombine.low %v7684_v59, %v7688_v23 }
 0xa05   :  { %11112 = vmatprep.subr.bf16.mxu1 %v12405_v61  ;;  %v7655_v61 = vld [vmem:[#allocation22 + $0x5f0] sm:$0xff] }
 0xa06   :  { %10940 = vmatmul.mubr.bf16.vlgmr.msra.gmra.mrb[32].mxu0 %v14434_v28  ;;  %v12459_v35 = vcombine.high %v7651_v54, %v7655_v61 }
 0xa07   :  { %11104 = vmatmul.mubr.bf16.vlgmr.msra.gmra.mrb[32].mxu1 %v14434_v28  ;;  %10949 = vmatpush1.bf16.msra.mxu0 %v12402_v32  ;;  %v12420_v28 = vcombine.low %v7612_v26, %v7616_v14  ;;  %v12450_v32 = vcombine.low %v7643_v15, %v7647_v17  ;;  %v12458_v26 = vcombine.low %v7651_v54, %v7655_v61  ;;  %v7692_v15 = vld [vmem:[#allocation22 + $0x718] sm:$0xff] }
 0xa08   :  { %10980 = vmatprep.mubr.bf16.mxu0 %v14438_v44  ;;  %11113 = vmatpush1.bf16.msra.mxu1 %v12404_v37  ;;  %v12461_v37 = vcombine.high %v7652_v30, %v7656_v31  ;;  %v12460_v14 = vcombine.low %v7652_v30, %v7656_v31  ;;  %v7696_v17 = vld [vmem:[#allocation22 + $0x738] sm:$0xff] }
 0xa09   :  { %11144 = vmatprep.mubr.bf16.mxu1 %v14438_v44  ;;  %10950 = vmatprep.subr.bf16.mxu0 %v12411_v57  ;;  %v12426_v44 = vcombine.low %v7619_v46, %v7623_v1  ;;  %v7659_v57 = vld [vmem:[#allocation22 + $0x610] sm:$0xff]  ;;  %v7668_v46 = vld [vmem:[#allocation22 + $0x658] sm:$0xff]  ;;  %v12500_v31 = vcombine.low %v7692_v15, %v7696_v17 }
 0xa0a   :  { %11114 = vmatprep.subr.bf16.mxu1 %v12413_v39  ;;  %v7664_v39 = vld [vmem:[#allocation22 + $0x638] sm:$0xff]  ;;  %v12466_v47 = vcombine.low %v7659_v57, %v7663_v12 }
 0xa0b   :  { %10951 = vmatpush1.bf16.msra.mxu0 %v12410_v38  ;;  %v12467_v38 = vcombine.high %v7659_v57, %v7663_v12  ;;  %v7672_v1 = vld [vmem:[#allocation22 + $0x678] sm:$0xff]  ;;  %v12468_v27 = vcombine.low %v7660_v56, %v7664_v39 }
 0xa0c   :  { %11115 = vmatpush1.bf16.msra.mxu1 %v12412_v40  ;;  %10952 = vmatprep.subr.bf16.mxu0 %v12419_v41  ;;  %v12469_v40 = vcombine.high %v7660_v56, %v7664_v39  ;;  %v7667_v41 = vld [vmem:[#allocation22 + $0x650] sm:$0xff]  ;;  %v12476_v51 = vcombine.low %v7668_v46, %v7672_v1  ;;  %v7700_v54 = vld [vmem:[#allocation22 + $0x758] sm:$0xff] }
 0xa0d   :  { %11116 = vmatprep.subr.bf16.mxu1 %v12421_v42  ;;  %v7671_v42 = vld [vmem:[#allocation22 + $0x670] sm:$0xff]  ;;  %v7704_v61 = vld [vmem:[#allocation22 + $0x778] sm:$0xff] }
 0xa0e   :  { %v12474_v49 = vcombine.low %v7667_v41, %v7671_v42  ;;  %v7708_v57 = vld [vmem:[#allocation22 + $0x798] sm:$0xff]  ;;  %v12508_v39 = vcombine.low %v7700_v54, %v7704_v61 }
 0xa0f   :  { %10953 = vmatpush1.bf16.msra.mxu0 %v12418_v50  ;;  %v12475_v50 = vcombine.high %v7667_v41, %v7671_v42  ;;  %v7712_v12 = vld [vmem:[#allocation22 + $0x7b8] sm:$0xff] }
 0xa10   :  { %11117 = vmatpush1.bf16.msra.mxu1 %v12420_v28  ;;  %10954 = vmatprep.subr.bf16.mxu0 %v12427_v13  ;;  %v12477_v28 = vcombine.high %v7668_v46, %v7672_v1  ;;  %v7675_v13 = vld [vmem:[#allocation22 + $0x690] sm:$0xff]  ;;  %v7716_v41 = vld [vmem:[#allocation22 + $0x7d8] sm:$0xff]  ;;  %v12516_v1 = vcombine.low %v7708_v57, %v7712_v12 }
 0xa11   :  { %11118 = vmatprep.subr.bf16.mxu1 %v12429_v55  ;;  %v7679_v55 = vld [vmem:[#allocation22 + $0x6b0] sm:$0xff]  ;;  %v7720_v42 = vld [vmem:[#allocation22 + $0x7f8] sm:$0xff] }
 0xa12   :  { %v12482_v9 = vcombine.low %v7675_v13, %v7679_v55 }
 0xa13   :  { %10955 = vmatpush1.bf16.msra.mxu0 %v12426_v44  ;;  %v12483_v44 = vcombine.high %v7675_v13, %v7679_v55  ;;  %v7724_v13 = vld [vmem:[#allocation22 + $0x818] sm:$0xff] }
 0xa14   :  { %11119 = vmatpush1.bf16.msra.mxu1 %v12428_v52  ;;  %10956 = vmatprep.subr.bf16.mxu0 %v12435_v16  ;;  %v12485_v52 = vcombine.high %v7676_v45, %v7680_v48  ;;  %v7683_v16 = vld [vmem:[#allocation22 + $0x6d0] sm:$0xff]  ;;  %v7728_v55 = vld [vmem:[#allocation22 + $0x838] sm:$0xff]  ;;  %v12524_v48 = vcombine.low %v7716_v41, %v7720_v42 }
 0xa15   :  { %11120 = vmatprep.subr.bf16.mxu1 %v12437_v60  ;;  %v7687_v60 = vld [vmem:[#allocation22 + $0x6f0] sm:$0xff] }
 0xa16   :  { %v12490_v18 = vcombine.low %v7683_v16, %v7687_v60 }
 0xa17   :  { %10957 = vmatpush1.bf16.msra.mxu0 %v12434_v7  ;;  %v12491_v7 = vcombine.high %v7683_v16, %v7687_v60  ;;  %v7732_v60 = vld [vmem:[#allocation22 + $0x858] sm:$0xff] }
 0xa18   :  { %11121 = vmatpush1.bf16.msra.mxu1 %v12436_v10  ;;  %10958 = vmatprep.subr.bf16.mxu0 %v12443_v33  ;;  %v12493_v10 = vcombine.high %v7684_v59, %v7688_v23  ;;  %v7691_v33 = vld [vmem:[#allocation22 + $0x710] sm:$0xff]  ;;  %v7736_v59 = vld [vmem:[#allocation22 + $0x878] sm:$0xff]  ;;  %v12532_v23 = vcombine.low %v7724_v13, %v7728_v55 }
 0xa19   :  { %11122 = vmatprep.subr.bf16.mxu1 %v12445_v36  ;;  %v7695_v36 = vld [vmem:[#allocation22 + $0x730] sm:$0xff] }
 0xa1a   :  { %v12498_v30 = vcombine.low %v7691_v33, %v7695_v36 }
 0xa1b   :  { %10959 = vmatpush1.bf16.msra.mxu0 %v12442_v20  ;;  %v12499_v20 = vcombine.high %v7691_v33, %v7695_v36  ;;  %v7740_v33 = vld [vmem:[#allocation22 + $0x898] sm:$0xff] }
 0xa1c   :  { %11123 = vmatpush1.bf16.msra.mxu1 %v12444_v29  ;;  %10960 = vmatprep.subr.bf16.mxu0 %v12451_v21  ;;  %v12501_v29 = vcombine.high %v7692_v15, %v7696_v17  ;;  %v7699_v21 = vld [vmem:[#allocation22 + $0x750] sm:$0xff]  ;;  %v7744_v36 = vld [vmem:[#allocation22 + $0x8b8] sm:$0xff]  ;;  %v12540_v17 = vcombine.low %v7732_v60, %v7736_v59 }
 0xa1d   :  { %11124 = vmatprep.subr.bf16.mxu1 %v12453_v6  ;;  %v7703_v6 = vld [vmem:[#allocation22 + $0x770] sm:$0xff] }
 0xa1e   :  { %v12506_v56 = vcombine.low %v7699_v21, %v7703_v6 }
 0xa1f   :  { %10961 = vmatpush1.bf16.msra.mxu0 %v12450_v32  ;;  %v12507_v32 = vcombine.high %v7699_v21, %v7703_v6  ;;  %v7748_v21 = vld [vmem:[#allocation22 + $0x8d8] sm:$0xff] }
 0xa20   :  { %11125 = vmatpush1.bf16.msra.mxu1 %v12452_v34  ;;  %10962 = vmatprep.subr.bf16.mxu0 %v12459_v35  ;;  %v12509_v34 = vcombine.high %v7700_v54, %v7704_v61  ;;  %v7707_v35 = vld [vmem:[#allocation22 + $0x790] sm:$0xff]  ;;  %v7752_v6 = vld [vmem:[#allocation22 + $0x8f8] sm:$0xff] }
 0xa21   :  { %11126 = vmatprep.subr.bf16.mxu1 %v12461_v37  ;;  %v7711_v37 = vld [vmem:[#allocation22 + $0x7b0] sm:$0xff] }
 0xa22   :  { %v12514_v46 = vcombine.low %v7707_v35, %v7711_v37 }
 0xa23   :  { %10963 = vmatpush1.bf16.msra.mxu0 %v12458_v26  ;;  %v12515_v26 = vcombine.high %v7707_v35, %v7711_v37  ;;  %v7760_v35 = vld [vmem:[#allocation22 + $0x938] sm:$0xff]  ;;  %v12556_v37 = vcombine.low %v7748_v21, %v7752_v6 }
 0xa24   :  { %11127 = vmatpush1.bf16.msra.mxu1 %v12460_v14  ;;  %10964 = vmatprep.subr.bf16.mxu0 %v12467_v38  ;;  %v12517_v14 = vcombine.high %v7708_v57, %v7712_v12  ;;  %v7715_v38 = vld [vmem:[#allocation22 + $0x7d0] sm:$0xff] }
 0xa25   :  { %11128 = vmatprep.subr.bf16.mxu1 %v12469_v40  ;;  %v7719_v40 = vld [vmem:[#allocation22 + $0x7f0] sm:$0xff] }
 0xa26   :  { %v12522_v45 = vcombine.low %v7715_v38, %v7719_v40 }
 0xa27   :  { %10965 = vmatpush1.bf16.msra.mxu0 %v12466_v47  ;;  %v12523_v47 = vcombine.high %v7715_v38, %v7719_v40 }
 0xa28   :  { %11129 = vmatpush1.bf16.msra.mxu1 %v12468_v27  ;;  %10966 = vmatprep.subr.bf16.mxu0 %v12475_v50  ;;  %v12525_v27 = vcombine.high %v7716_v41, %v7720_v42  ;;  %v7723_v50 = vld [vmem:[#allocation22 + $0x810] sm:$0xff] }
 0xa29   :  { %11130 = vmatprep.subr.bf16.mxu1 %v12477_v28  ;;  %v7727_v28 = vld [vmem:[#allocation22 + $0x830] sm:$0xff] }
 0xa2a   :  { %v12530_v16 = vcombine.low %v7723_v50, %v7727_v28 }
 0xa2b   :  { %10967 = vmatpush1.bf16.msra.mxu0 %v12474_v49  ;;  %v12531_v49 = vcombine.high %v7723_v50, %v7727_v28 }
 0xa2c   :  { %11131 = vmatpush1.bf16.msra.mxu1 %v12476_v51  ;;  %10968 = vmatprep.subr.bf16.mxu0 %v12483_v44  ;;  %v12533_v51 = vcombine.high %v7724_v13, %v7728_v55  ;;  %v7731_v44 = vld [vmem:[#allocation22 + $0x850] sm:$0xff] }
 0xa2d   :  { %11132 = vmatprep.subr.bf16.mxu1 %v12485_v52  ;;  %v7735_v52 = vld [vmem:[#allocation22 + $0x870] sm:$0xff] }
 0xa2e   :  { %v12538_v15 = vcombine.low %v7731_v44, %v7735_v52 }
 0xa2f   :  { %10969 = vmatpush1.bf16.msra.mxu0 %v12482_v9  ;;  %v12539_v9 = vcombine.high %v7731_v44, %v7735_v52 }
 0xa30   :  { %11133 = vmatpush1.bf16.msra.mxu1 %v12484_v62  ;;  %10970 = vmatprep.subr.bf16.mxu0 %v12491_v7  ;;  %v7739_v62 = vld [vmem:[#allocation22 + $0x890] sm:$0xff] }
 0xa31   :  { %11134 = vmatprep.subr.bf16.mxu1 %v12493_v10  ;;  %v7743_v7 = vld [vmem:[#allocation22 + $0x8b0] sm:$0xff]  ;;  %v12541_v10 = vcombine.high %v7732_v60, %v7736_v59 }
 0xa32   :  { %v12546_v54 = vcombine.low %v7739_v62, %v7743_v7  ;;  %v7787_v59 = vld [vmem:[#allocation22 + $0xa10] sm:$0xff] }
 0xa33   :  { %10971 = vmatpush1.bf16.msra.mxu0 %v12490_v18  ;;  %v12547_v18 = vcombine.high %v7739_v62, %v7743_v7  ;;  %v7792_v62 = vld [vmem:[#allocation22 + $0xa38] sm:$0xff] }
 0xa34   :  { %11135 = vmatpush1.bf16.msra.mxu1 %v12492_v43  ;;  %10972 = vmatprep.subr.bf16.mxu0 %v12499_v20  ;;  %v12549_v43 = vcombine.high %v7740_v33, %v7744_v36  ;;  %v7747_v20 = vld [vmem:[#allocation22 + $0x8d0] sm:$0xff] }
 0xa35   :  { %11136 = vmatprep.subr.bf16.mxu1 %v12501_v29  ;;  %v7751_v29 = vld [vmem:[#allocation22 + $0x8f0] sm:$0xff] }
 0xa36   :  { %v12555_v61 = vcombine.high %v7747_v20, %v7751_v29 }
 0xa37   :  { %10973 = vmatpush1.bf16.msra.mxu0 %v12498_v30  ;;  %v12557_v30 = vcombine.high %v7748_v21, %v7752_v6 }
 0xa38   :  { %11137 = vmatpush1.bf16.msra.mxu1 %v12500_v31  ;;  %10974 = vmatprep.subr.bf16.mxu0 %v12507_v32  ;;  %v7755_v31 = vld [vmem:[#allocation22 + $0x910] sm:$0xff] }
 0xa39   :  { %11138 = vmatprep.subr.bf16.mxu1 %v12509_v34  ;;  %v7759_v32 = vld [vmem:[#allocation22 + $0x930] sm:$0xff]  ;;  %v7756_v34 = vld [vmem:[#allocation22 + $0x918] sm:$0xff] }
 0xa3a   :  { %v12563_v57 = vcombine.high %v7755_v31, %v7759_v32  ;;  %v12565_v12 = vcombine.high %v7756_v34, %v7760_v35  ;;  %v12562_v38 = vcombine.low %v7755_v31, %v7759_v32  ;;  %v12564_v40 = vcombine.low %v7756_v34, %v7760_v35 }
 0xa3b   :  { %10975 = vmatpush1.bf16.msra.mxu0 %v12506_v56  ;;  %v7763_v56 = vld [vmem:[#allocation22 + $0x950] sm:$0xff] }
 0xa3c   :  { %11139 = vmatpush1.bf16.msra.mxu1 %v12508_v39  ;;  %10976 = vmatprep.subr.bf16.mxu0 %v12515_v26  ;;  %v7767_v39 = vld [vmem:[#allocation22 + $0x970] sm:$0xff]  ;;  %v7764_v26 = vld [vmem:[#allocation22 + $0x958] sm:$0xff] }
 0xa3d   :  { %11140 = vmatprep.subr.bf16.mxu1 %v12517_v14  ;;  %v7768_v14 = vld [vmem:[#allocation22 + $0x978] sm:$0xff]  ;;  %v12571_v41 = vcombine.high %v7763_v56, %v7767_v39  ;;  %v12570_v50 = vcombine.low %v7763_v56, %v7767_v39 }
 0xa3e   :  { %v12573_v42 = vcombine.high %v7764_v26, %v7768_v14  ;;  %v12572_v28 = vcombine.low %v7764_v26, %v7768_v14 }
 0xa3f   :  { %10977 = vmatpush1.bf16.msra.mxu0 %v12514_v46  ;;  %v7771_v46 = vld [vmem:[#allocation22 + $0x990] sm:$0xff] }
 0xa40   :  { %11141 = vmatpush1.bf16.msra.mxu1 %v12516_v1  ;;  %10978 = vmatprep.subr.bf16.mxu0 %v12523_v47  ;;  %v7775_v1 = vld [vmem:[#allocation22 + $0x9b0] sm:$0xff]  ;;  %v7772_v47 = vld [vmem:[#allocation22 + $0x998] sm:$0xff] }
 0xa41   :  { %11142 = vmatprep.subr.bf16.mxu1 %v12525_v27  ;;  %v7776_v27 = vld [vmem:[#allocation22 + $0x9b8] sm:$0xff]  ;;  %v12579_v13 = vcombine.high %v7771_v46, %v7775_v1  ;;  %v12578_v44 = vcombine.low %v7771_v46, %v7775_v1 }
 0xa42   :  { %v12581_v55 = vcombine.high %v7772_v47, %v7776_v27  ;;  %v12580_v52 = vcombine.low %v7772_v47, %v7776_v27 }
 0xa43   :  { %10979 = vmatpush1.bf16.msra.mxu0 %v12522_v45  ;;  %v7779_v45 = vld [vmem:[#allocation22 + $0x9d0] sm:$0xff] }
 0xa44   :  { %11143 = vmatpush1.bf16.msra.mxu1 %v12524_v48  ;;  %10989 = vmatprep.subr.bf16.mxu0 %v12531_v49  ;;  %v7783_v48 = vld [vmem:[#allocation22 + $0x9f0] sm:$0xff]  ;;  %v7780_v49 = vld [vmem:[#allocation22 + $0x9d8] sm:$0xff] }
 0xa45   :  { %11153 = vmatprep.subr.bf16.mxu1 %v12533_v51  ;;  %v7784_v51 = vld [vmem:[#allocation22 + $0x9f8] sm:$0xff]  ;;  %v12586_v7 = vcombine.low %v7779_v45, %v7783_v48 }
 0xa46   :  { %10981 = vmatmul.mubr.bf16.vlgmr.msra.gmra.mrb[32].mxu0 %v14461_v8  ;;  %v12589_v60 = vcombine.high %v7780_v49, %v7784_v51 }
 0xa47   :  { %11145 = vmatmul.mubr.bf16.vlgmr.msra.gmra.mrb[32].mxu1 %v14461_v8  ;;  %10990 = vmatpush1.bf16.msra.mxu0 %v12530_v16  ;;  %v12548_v8 = vcombine.low %v7740_v33, %v7744_v36  ;;  %v12587_v16 = vcombine.high %v7779_v45, %v7783_v48 }
 0xa48   :  { %11021 = vmatprep.mubr.bf16.mxu0 %v14463_v11  ;;  %11154 = vmatpush1.bf16.msra.mxu1 %v12532_v23  ;;  %v7791_v23 = vld [vmem:[#allocation22 + $0xa30] sm:$0xff] }
 0xa49   :  { %11185 = vmatprep.mubr.bf16.mxu1 %v14463_v11  ;;  %10991 = vmatprep.subr.bf16.mxu0 %v12539_v9  ;;  %v12554_v11 = vcombine.low %v7747_v20, %v7751_v29  ;;  %v7788_v9 = vld [vmem:[#allocation22 + $0xa18] sm:$0xff]  ;;  %v12595_v33 = vcombine.high %v7787_v59, %v7791_v23  ;;  %v12594_v20 = vcombine.low %v7787_v59, %v7791_v23 }
 0xa4a   :  { %11155 = vmatprep.subr.bf16.mxu1 %v12541_v10  ;;  %v12588_v10 = vcombine.low %v7780_v49, %v7784_v51  ;;  %v12597_v36 = vcombine.high %v7788_v9, %v7792_v62  ;;  %v12596_v29 = vcombine.low %v7788_v9, %v7792_v62 }
 0xa4b   :  { %10992 = vmatpush1.bf16.msra.mxu0 %v12538_v15  ;;  %v7795_v15 = vld [vmem:[#allocation22 + $0xa50] sm:$0xff] }
 0xa4c   :  { %11156 = vmatpush1.bf16.msra.mxu1 %v12540_v17  ;;  %10993 = vmatprep.subr.bf16.mxu0 %v12547_v18  ;;  %v7799_v17 = vld [vmem:[#allocation22 + $0xa70] sm:$0xff]  ;;  %v7796_v18 = vld [vmem:[#allocation22 + $0xa58] sm:$0xff] }
 0xa4d   :  { %11157 = vmatprep.subr.bf16.mxu1 %v12549_v43  ;;  %v7800_v43 = vld [vmem:[#allocation22 + $0xa78] sm:$0xff]  ;;  %v12603_v21 = vcombine.high %v7795_v15, %v7799_v17  ;;  %v12602_v31 = vcombine.low %v7795_v15, %v7799_v17 }
 0xa4e   :  { %v12605_v6 = vcombine.high %v7796_v18, %v7800_v43  ;;  %v12604_v32 = vcombine.low %v7796_v18, %v7800_v43 }
 0xa4f   :  { %10994 = vmatpush1.bf16.msra.mxu0 %v12546_v54  ;;  %v7803_v54 = vld [vmem:[#allocation22 + $0xa90] sm:$0xff] }
 0xa50   :  { %11158 = vmatpush1.bf16.msra.mxu1 %v12548_v8  ;;  %10995 = vmatprep.subr.bf16.mxu0 %v12555_v61  ;;  %v7807_v8 = vld [vmem:[#allocation22 + $0xab0] sm:$0xff]  ;;  %v7804_v61 = vld [vmem:[#allocation22 + $0xa98] sm:$0xff] }
 0xa51   :  { %11159 = vmatprep.subr.bf16.mxu1 %v12557_v30  ;;  %v7808_v30 = vld [vmem:[#allocation22 + $0xab8] sm:$0xff]  ;;  %v12611_v34 = vcombine.high %v7803_v54, %v7807_v8  ;;  %v12610_v56 = vcombine.low %v7803_v54, %v7807_v8 }
 0xa52   :  { %v12613_v35 = vcombine.high %v7804_v61, %v7808_v30  ;;  %v12612_v39 = vcombine.low %v7804_v61, %v7808_v30 }
 0xa53   :  { %10996 = vmatpush1.bf16.msra.mxu0 %v12554_v11  ;;  %v7811_v11 = vld [vmem:[#allocation22 + $0xad0] sm:$0xff] }
 0xa54   :  { %11160 = vmatpush1.bf16.msra.mxu1 %v12556_v37  ;;  %10997 = vmatprep.subr.bf16.mxu0 %v12563_v57  ;;  %v7815_v37 = vld [vmem:[#allocation22 + $0xaf0] sm:$0xff]  ;;  %v7812_v57 = vld [vmem:[#allocation22 + $0xad8] sm:$0xff] }
 0xa55   :  { %11161 = vmatprep.subr.bf16.mxu1 %v12565_v12  ;;  %v7816_v12 = vld [vmem:[#allocation22 + $0xaf8] sm:$0xff]  ;;  %v12619_v26 = vcombine.high %v7811_v11, %v7815_v37  ;;  %v12618_v46 = vcombine.low %v7811_v11, %v7815_v37 }
 0xa56   :  { %v12621_v14 = vcombine.high %v7812_v57, %v7816_v12  ;;  %v12620_v1 = vcombine.low %v7812_v57, %v7816_v12  ;;  %v7864_v11 = vld [vmem:[#allocation22 + $0xc78] sm:$0xff]  ;;  %v7867_v12 = vld [vmem:[#allocation22 + $0xc90] sm:$0xff] }
 0xa57   :  { %10998 = vmatpush1.bf16.msra.mxu0 %v12562_v38  ;;  %v7819_v38 = vld [vmem:[#allocation22 + $0xb10] sm:$0xff] }
 0xa58   :  { %11162 = vmatpush1.bf16.msra.mxu1 %v12564_v40  ;;  %10999 = vmatprep.subr.bf16.mxu0 %v12571_v41  ;;  %v7823_v40 = vld [vmem:[#allocation22 + $0xb30] sm:$0xff]  ;;  %v7820_v41 = vld [vmem:[#allocation22 + $0xb18] sm:$0xff] }
 0xa59   :  { %11163 = vmatprep.subr.bf16.mxu1 %v12573_v42  ;;  %v7824_v42 = vld [vmem:[#allocation22 + $0xb38] sm:$0xff]  ;;  %v12627_v47 = vcombine.high %v7819_v38, %v7823_v40  ;;  %v12626_v45 = vcombine.low %v7819_v38, %v7823_v40 }
 0xa5a   :  { %v12629_v27 = vcombine.high %v7820_v41, %v7824_v42  ;;  %v12628_v48 = vcombine.low %v7820_v41, %v7824_v42 }
 0xa5b   :  { %11000 = vmatpush1.bf16.msra.mxu0 %v12570_v50  ;;  %v7827_v50 = vld [vmem:[#allocation22 + $0xb50] sm:$0xff] }
 0xa5c   :  { %11164 = vmatpush1.bf16.msra.mxu1 %v12572_v28  ;;  %11001 = vmatprep.subr.bf16.mxu0 %v12579_v13  ;;  %v7831_v28 = vld [vmem:[#allocation22 + $0xb70] sm:$0xff]  ;;  %v7828_v13 = vld [vmem:[#allocation22 + $0xb58] sm:$0xff] }
 0xa5d   :  { %11165 = vmatprep.subr.bf16.mxu1 %v12581_v55  ;;  %v7832_v55 = vld [vmem:[#allocation22 + $0xb78] sm:$0xff]  ;;  %v12635_v49 = vcombine.high %v7827_v50, %v7831_v28  ;;  %v12634_v59 = vcombine.low %v7827_v50, %v7831_v28 }
 0xa5e   :  { %v12637_v51 = vcombine.high %v7828_v13, %v7832_v55  ;;  %v12636_v23 = vcombine.low %v7828_v13, %v7832_v55  ;;  %v7883_v55 = vld [vmem:[#allocation22 + $0xd10] sm:$0xff] }
 0xa5f   :  { %11002 = vmatpush1.bf16.msra.mxu0 %v12578_v44  ;;  %v7835_v44 = vld [vmem:[#allocation22 + $0xb90] sm:$0xff] }
 0xa60   :  { %11166 = vmatpush1.bf16.msra.mxu1 %v12580_v52  ;;  %11003 = vmatprep.subr.bf16.mxu0 %v12587_v16  ;;  %v7839_v52 = vld [vmem:[#allocation22 + $0xbb0] sm:$0xff]  ;;  %v7836_v16 = vld [vmem:[#allocation22 + $0xb98] sm:$0xff] }
 0xa61   :  { %11167 = vmatprep.subr.bf16.mxu1 %v12589_v60  ;;  %v7840_v60 = vld [vmem:[#allocation22 + $0xbb8] sm:$0xff]  ;;  %v12643_v9 = vcombine.high %v7835_v44, %v7839_v52  ;;  %v12642_v15 = vcombine.low %v7835_v44, %v7839_v52 }
 0xa62   :  { %v12645_v62 = vcombine.high %v7836_v16, %v7840_v60  ;;  %v12644_v17 = vcombine.low %v7836_v16, %v7840_v60  ;;  %v7891_v16 = vld [vmem:[#allocation22 + $0xd50] sm:$0xff] }
 0xa63   :  { %11004 = vmatpush1.bf16.msra.mxu0 %v12586_v7  ;;  %v7843_v7 = vld [vmem:[#allocation22 + $0xbd0] sm:$0xff] }
 0xa64   :  { %11168 = vmatpush1.bf16.msra.mxu1 %v12588_v10  ;;  %11005 = vmatprep.subr.bf16.mxu0 %v12595_v33  ;;  %v7847_v10 = vld [vmem:[#allocation22 + $0xbf0] sm:$0xff]  ;;  %v7844_v33 = vld [vmem:[#allocation22 + $0xbd8] sm:$0xff] }
 0xa65   :  { %11169 = vmatprep.subr.bf16.mxu1 %v12597_v36  ;;  %v7848_v36 = vld [vmem:[#allocation22 + $0xbf8] sm:$0xff]  ;;  %v12651_v18 = vcombine.high %v7843_v7, %v7847_v10  ;;  %v12650_v54 = vcombine.low %v7843_v7, %v7847_v10  ;;  %v7895_v60 = vld [vmem:[#allocation22 + $0xd70] sm:$0xff] }
 0xa66   :  { %v12653_v43 = vcombine.high %v7844_v33, %v7848_v36  ;;  %v12652_v8 = vcombine.low %v7844_v33, %v7848_v36  ;;  %v12699_v10 = vcombine.high %v7891_v16, %v7895_v60  ;;  %v7899_v36 = vld [vmem:[#allocation22 + $0xd90] sm:$0xff] }
 0xa67   :  { %11006 = vmatpush1.bf16.msra.mxu0 %v12594_v20  ;;  %v7851_v20 = vld [vmem:[#allocation22 + $0xc10] sm:$0xff] }
 0xa68   :  { %11170 = vmatpush1.bf16.msra.mxu1 %v12596_v29  ;;  %11007 = vmatprep.subr.bf16.mxu0 %v12603_v21  ;;  %v7855_v29 = vld [vmem:[#allocation22 + $0xc30] sm:$0xff]  ;;  %v7852_v21 = vld [vmem:[#allocation22 + $0xc18] sm:$0xff] }
 0xa69   :  { %11171 = vmatprep.subr.bf16.mxu1 %v12605_v6  ;;  %v7856_v6 = vld [vmem:[#allocation22 + $0xc38] sm:$0xff]  ;;  %v12659_v61 = vcombine.high %v7851_v20, %v7855_v29 }
 0xa6a   :  { %v12661_v30 = vcombine.high %v7852_v21, %v7856_v6  ;;  %v12660_v37 = vcombine.low %v7852_v21, %v7856_v6  ;;  %v12698_v21 = vcombine.low %v7891_v16, %v7895_v60 }
 0xa6b   :  { %11008 = vmatpush1.bf16.msra.mxu0 %v12602_v31  ;;  %v7859_v31 = vld [vmem:[#allocation22 + $0xc50] sm:$0xff] }
 0xa6c   :  { %11172 = vmatpush1.bf16.msra.mxu1 %v12604_v32  ;;  %11009 = vmatprep.subr.bf16.mxu0 %v12611_v34  ;;  %v7863_v32 = vld [vmem:[#allocation22 + $0xc70] sm:$0xff]  ;;  %v12658_v34 = vcombine.low %v7851_v20, %v7855_v29 }
 0xa6d   :  { %11173 = vmatprep.subr.bf16.mxu1 %v12613_v35  ;;  %v7860_v35 = vld [vmem:[#allocation22 + $0xc58] sm:$0xff]  ;;  %v12667_v57 = vcombine.high %v7859_v31, %v7863_v32  ;;  %v12666_v38 = vcombine.low %v7859_v31, %v7863_v32  ;;  %v7911_v31 = vld [vmem:[#allocation22 + $0xdf0] sm:$0xff] }
 0xa6e   :  { %v12668_v40 = vcombine.low %v7860_v35, %v7864_v11 }
 0xa6f   :  { %11010 = vmatpush1.bf16.msra.mxu0 %v12610_v56  ;;  %v7871_v56 = vld [vmem:[#allocation22 + $0xcb0] sm:$0xff] }
 0xa70   :  { %11174 = vmatpush1.bf16.msra.mxu1 %v12612_v39  ;;  %11011 = vmatprep.subr.bf16.mxu0 %v12619_v26  ;;  %v12669_v39 = vcombine.high %v7860_v35, %v7864_v11  ;;  %v7868_v26 = vld [vmem:[#allocation22 + $0xc98] sm:$0xff]  ;;  %v12675_v41 = vcombine.high %v7867_v12, %v7871_v56  ;;  %v12674_v50 = vcombine.low %v7867_v12, %v7871_v56 }
 0xa71   :  { %11175 = vmatprep.subr.bf16.mxu1 %v12621_v14  ;;  %v7872_v14 = vld [vmem:[#allocation22 + $0xcb8] sm:$0xff] }
 0xa72   :  { %v12677_v42 = vcombine.high %v7868_v26, %v7872_v14  ;;  %v7912_v11 = vld [vmem:[#allocation22 + $0xdf8] sm:$0xff] }
 0xa73   :  { %11012 = vmatpush1.bf16.msra.mxu0 %v12618_v46  ;;  %v7875_v46 = vld [vmem:[#allocation22 + $0xcd0] sm:$0xff] }
 0xa74   :  { %11176 = vmatpush1.bf16.msra.mxu1 %v12620_v1  ;;  %11013 = vmatprep.subr.bf16.mxu0 %v12627_v47  ;;  %v7879_v1 = vld [vmem:[#allocation22 + $0xcf0] sm:$0xff]  ;;  %v7876_v47 = vld [vmem:[#allocation22 + $0xcd8] sm:$0xff] }
 0xa75   :  { %11177 = vmatprep.subr.bf16.mxu1 %v12629_v27  ;;  %v7880_v27 = vld [vmem:[#allocation22 + $0xcf8] sm:$0xff]  ;;  %v12683_v28 = vcombine.high %v7875_v46, %v7879_v1 }
 0xa76   :  { %v12685_v13 = vcombine.high %v7876_v47, %v7880_v27 }
 0xa77   :  { %11014 = vmatpush1.bf16.msra.mxu0 %v12626_v45  ;;  %v7887_v45 = vld [vmem:[#allocation22 + $0xd30] sm:$0xff] }
 0xa78   :  { %11178 = vmatpush1.bf16.msra.mxu1 %v12628_v48  ;;  %11015 = vmatprep.subr.bf16.mxu0 %v12635_v49  ;;  %v7884_v48 = vld [vmem:[#allocation22 + $0xd18] sm:$0xff]  ;;  %v12691_v44 = vcombine.high %v7883_v55, %v7887_v45 }
 0xa79   :  { %11179 = vmatprep.subr.bf16.mxu1 %v12637_v51  ;;  %v7888_v49 = vld [vmem:[#allocation22 + $0xd38] sm:$0xff]  ;;  %v12684_v51 = vcombine.low %v7876_v47, %v7880_v27 }
 0xa7a   :  { %v12693_v52 = vcombine.high %v7884_v48, %v7888_v49  ;;  %v12692_v7 = vcombine.low %v7884_v48, %v7888_v49  ;;  %v7916_v27 = vld [vmem:[#allocation22 + $0xe18] sm:$0xff]  ;;  %v7923_v49 = vld [vmem:[#allocation22 + $0xe50] sm:$0xff] }
 0xa7b   :  { %11016 = vmatpush1.bf16.msra.mxu0 %v12634_v59  ;;  %v7892_v59 = vld [vmem:[#allocation22 + $0xd58] sm:$0xff] }
 0xa7c   :  { %11180 = vmatpush1.bf16.msra.mxu1 %v12636_v23  ;;  %11017 = vmatprep.subr.bf16.mxu0 %v12643_v9  ;;  %v7896_v23 = vld [vmem:[#allocation22 + $0xd78] sm:$0xff]  ;;  %v12690_v9 = vcombine.low %v7883_v55, %v7887_v45 }
 0xa7d   :  { %11181 = vmatprep.subr.bf16.mxu1 %v12645_v62  ;;  %v14503_v62 = vld [vmem:[#allocation23] sm:$0xff]  ;;  %v12701_v33 = vcombine.high %v7892_v59, %v7896_v23 }
 0xa7e   :  { %v7990_v20 = vrot.slane %v14503_v62, %v14256_v63  ;;  %v7986_v29 = vrot.slane %v14503_v62, %v14234_v3  ;;  %v7994_v6 = vrot.slane %v14503_v62, %v14247_v22  ;;  %v7908_v63 = vld [vmem:[#allocation22 + $0xdd8] sm:$0xff] }
 0xa7f   :  { %11018 = vmatpush1.bf16.msra.mxu0 %v12642_v15  ;;  %v7903_v15 = vld [vmem:[#allocation22 + $0xdb0] sm:$0xff]  ;;  %v12716_v55 = vcombine.low %v7908_v63, %v7912_v11 }
 0xa80   :  { %11182 = vmatpush1.bf16.msra.mxu1 %v12644_v17  ;;  %11019 = vmatprep.subr.bf16.mxu0 %v12651_v18  ;;  %v7982_v17 = vrot.slane %v14503_v62, %v14244_v19  ;;  %v7900_v18 = vld [vmem:[#allocation22 + $0xd98] sm:$0xff]  ;;  %v12706_v56 = vcombine.low %v7899_v36, %v7903_v15 }
 0xa81   :  { %11183 = vmatprep.subr.bf16.mxu1 %v12653_v43  ;;  %v7904_v43 = vld [vmem:[#allocation22 + $0xdb8] sm:$0xff] }
 0xa82   :  { %v12709_v19 = vcombine.high %v7900_v18, %v7904_v43 }
 0xa83   :  { %11020 = vmatpush1.bf16.msra.mxu0 %v12650_v54  ;;  %v12700_v54 = vcombine.low %v7892_v59, %v7896_v23 }
 0xa84   :  { %11184 = vmatpush1.bf16.msra.mxu1 %v12652_v8  ;;  %11030 = vmatprep.subr.bf16.mxu0 %v12659_v61  ;;  %v12707_v8 = vcombine.high %v7899_v36, %v7903_v15 }
 0xa85   :  { %11194 = vmatprep.subr.bf16.mxu1 %v12661_v30  ;;  %v7907_v30 = vld [vmem:[#allocation22 + $0xdd0] sm:$0xff] }
 0xa86   :  { %11022 = vmatmul.mubr.bf16.vlgmr.msra.gmra.mrb[32].mxu0 %v14475_v58 }
 0xa87   :  { %11186 = vmatmul.mubr.bf16.vlgmr.msra.gmra.mrb[32].mxu1 %v14475_v58  ;;  %11031 = vmatpush1.bf16.msra.mxu0 %v12658_v34  ;;  %v12676_v58 = vcombine.low %v7868_v26, %v7872_v14  ;;  %v12708_v14 = vcombine.low %v7900_v18, %v7904_v43  ;;  %v7939_v43 = vld [vmem:[#allocation22 + $0xed0] sm:$0xff] }
 0xa88   :  { %11062 = vmatprep.mubr.bf16.mxu0 %v14477_v5  ;;  %11195 = vmatpush1.bf16.msra.mxu1 %v12660_v37 }
 0xa89   :  { %11226 = vmatprep.mubr.bf16.mxu1 %v14477_v5  ;;  %11032 = vmatprep.subr.bf16.mxu0 %v12667_v57  ;;  %v12682_v5 = vcombine.low %v7875_v46, %v7879_v1  ;;  %v7915_v46 = vld [vmem:[#allocation22 + $0xe10] sm:$0xff] }
 0xa8a   :  { %11196 = vmatprep.subr.bf16.mxu1 %v12669_v39  ;;  %v7919_v1 = vld [vmem:[#allocation22 + $0xe30] sm:$0xff] }
 0xa8b   :  { %11033 = vmatpush1.bf16.msra.mxu0 %v12666_v38  ;;  %v12715_v38 = vcombine.high %v7907_v30, %v7911_v31  ;;  %v12723_v45 = vcombine.high %v7915_v46, %v7919_v1  ;;  %v12722_v16 = vcombine.low %v7915_v46, %v7919_v1 }
 0xa8c   :  { %11197 = vmatpush1.bf16.msra.mxu1 %v12668_v40  ;;  %11034 = vmatprep.subr.bf16.mxu0 %v12675_v41 }
 0xa8d   :  { %11198 = vmatprep.subr.bf16.mxu1 %v12677_v42  ;;  %v12717_v42 = vcombine.high %v7908_v63, %v7912_v11 }
 0xa8f   :  { %11035 = vmatpush1.bf16.msra.mxu0 %v12674_v50  ;;  %v7920_v50 = vld [vmem:[#allocation22 + $0xe38] sm:$0xff] }
 0xa90   :  { %11199 = vmatpush1.bf16.msra.mxu1 %v12676_v58  ;;  %11036 = vmatprep.subr.bf16.mxu0 %v12683_v28  ;;  %v12714_v28 = vcombine.low %v7907_v30, %v7911_v31  ;;  %v12725_v48 = vcombine.high %v7916_v27, %v7920_v50  ;;  %v12724_v60 = vcombine.low %v7916_v27, %v7920_v50  ;;  %v7951_v30 = vld [vmem:[#allocation22 + $0xf30] sm:$0xff]  ;;  %v7948_v31 = vld [vmem:[#allocation22 + $0xf18] sm:$0xff] }
 0xa91   :  { %11200 = vmatprep.subr.bf16.mxu1 %v12685_v13  ;;  %v7971_v27 = vld [vmem:[#allocation22 + $0xfd0] sm:$0xff] }
 0xa92   :  { %v7975_v50 = vld [vmem:[#allocation22 + $0xff0] sm:$0xff] }
 0xa93   :  { %11037 = vmatpush1.bf16.msra.mxu0 %v12682_v5  ;;  %v7927_v5 = vld [vmem:[#allocation22 + $0xe70] sm:$0xff] }
 0xa94   :  { %11201 = vmatpush1.bf16.msra.mxu1 %v12684_v51  ;;  %11038 = vmatprep.subr.bf16.mxu0 %v12691_v44  ;;  %v7924_v44 = vld [vmem:[#allocation22 + $0xe58] sm:$0xff]  ;;  %v12731_v59 = vcombine.high %v7923_v49, %v7927_v5  ;;  %v12730_v36 = vcombine.low %v7923_v49, %v7927_v5  ;;  %v12778_v49 = vcombine.low %v7971_v27, %v7975_v50 }
 0xa95   :  { %11202 = vmatprep.subr.bf16.mxu1 %v12693_v52  ;;  %v7928_v52 = vld [vmem:[#allocation22 + $0xe78] sm:$0xff] }
 0xa96   :  { %v12733_v23 = vcombine.high %v7924_v44, %v7928_v52  ;;  %v12732_v15 = vcombine.low %v7924_v44, %v7928_v52 }
 0xa97   :  { %11039 = vmatpush1.bf16.msra.mxu0 %v12690_v9  ;;  %v7931_v9 = vld [vmem:[#allocation22 + $0xe90] sm:$0xff] }
 0xa98   :  { %11203 = vmatpush1.bf16.msra.mxu1 %v12692_v7  ;;  %11040 = vmatprep.subr.bf16.mxu0 %v12699_v10  ;;  %v7935_v7 = vld [vmem:[#allocation22 + $0xeb0] sm:$0xff]  ;;  %v7932_v10 = vld [vmem:[#allocation22 + $0xe98] sm:$0xff] }
 0xa99   :  { %v10736_v61 = vpop.f32.mrb[28].mxu0  ;;  %11204 = vmatprep.subr.bf16.mxu1 %v12701_v33  ;;  %v7936_v33 = vld [vmem:[#allocation22 + $0xeb8] sm:$0xff] }
 0xa9a   :  { %v12846_v32 = vadd.f32 %v10736_v61, %v7982_v17  ;;  %v10900_v34 = vpop.f32.mrb[28].mxu1  ;;  %v10738_v35 = vpop.f32.mrb[29].mxu0  ;;  %v12739_v17 = vcombine.high %v7931_v9, %v7935_v7  ;;  %v12741_v18 = vcombine.high %v7932_v10, %v7936_v33 }
 0xa9b   :  { %v12848_v37 = vadd.f32 %v10900_v34, %v7990_v20  ;;  %v12847_v3 = vadd.f32 %v10738_v35, %v7986_v29  ;;  %v10902_v57 = vpop.f32.mrb[29].mxu1  ;;  %v10740_v12 = vpop.f32.mrb[30].mxu0  ;;  %11041 = vmatpush1.bf16.msra.mxu0 %v12698_v21  ;;  %v7943_v20 = vld [vmem:[#allocation22 + $0xef0] sm:$0xff]  ;;  %v7940_v29 = vld [vmem:[#allocation22 + $0xed8] sm:$0xff] }
 0xa9c   :  { %v12849_v22 = vadd.f32 %v10902_v57, %v7994_v6  ;;  %v10904_v39 = vpop.f32.mrb[30].mxu1  ;;  %11205 = vmatpush1.bf16.msra.mxu1 %v12700_v54  ;;  %v10741_v26 = vpop.f32.mrb[31].mxu0  ;;  %11042 = vmatprep.subr.bf16.mxu0 %v12707_v8  ;;  %v7944_v21 = vld [vmem:[#allocation22 + $0xef8] sm:$0xff]  ;;  %v12738_v6 = vcombine.low %v7931_v9, %v7935_v7  ;;  %v12740_v54 = vcombine.low %v7932_v10, %v7936_v33 }
 0xa9d   :  { %v11243_v40 = vcombine.low %v12846_v32, %v12847_v3  ;;  %v10905_v41 = vpop.f32.mrb[31].mxu1  ;;  %11206 = vmatprep.subr.bf16.mxu1 %v12709_v19  ;;  %v12747_v8 = vcombine.high %v7939_v43, %v7943_v20  ;;  %v12749_v61 = vcombine.high %v7940_v29, %v7944_v21  ;;  %v7947_v19 = vld [vmem:[#allocation22 + $0xf10] sm:$0xff]  ;;  %v7952_v32 = vld [vmem:[#allocation22 + $0xf38] sm:$0xff]  ;;  %v12746_v34 = vcombine.low %v7939_v43, %v7943_v20 }
 0xa9e   :  { %v11244_v47 = vcombine.low %v12848_v37, %v12849_v22  ;;  %v12748_v35 = vcombine.low %v7940_v29, %v7944_v21  ;;  %v12755_v63 = vcombine.high %v7947_v19, %v7951_v30  ;;  %v12757_v11 = vcombine.high %v7948_v31, %v7952_v32  ;;  %v7955_v37 = vld [vmem:[#allocation22 + $0xf50] sm:$0xff]  ;;  %v7956_v57 = vld [vmem:[#allocation22 + $0xf58] sm:$0xff] }
 0xa9f   :  { %v11251_v58 = vrot.slane %v11243_v40, %v14133_v53  ;;  %11043 = vmatpush1.bf16.msra.mxu0 %v12706_v56  ;;  %v7959_v3 = vld [vmem:[#allocation22 + $0xf70] sm:$0xff]  ;;  %v7960_v12 = vld [vmem:[#allocation22 + $0xf78] sm:$0xff]  ;;  %v12754_v56 = vcombine.low %v7947_v19, %v7951_v30  ;;  %v12756_v22 = vcombine.low %v7948_v31, %v7952_v32 }
 0xaa0   :  { %v11258_v13 = vrot.slane %v11244_v47, %v14133_v53  ;;  %11207 = vmatpush1.bf16.msra.mxu1 %v12708_v14  ;;  %11044 = vmatprep.subr.bf16.mxu0 %v12715_v38  ;;  %v12763_v39 = vcombine.high %v7955_v37, %v7959_v3  ;;  %v12765_v26 = vcombine.high %v7956_v57, %v7960_v12  ;;  %v7963_v14 = vld [vmem:[#allocation22 + $0xf90] sm:$0xff]  ;;  %v7964_v40 = vld [vmem:[#allocation22 + $0xf98] sm:$0xff] }
 0xaa1   :  { %11208 = vmatprep.subr.bf16.mxu1 %v12717_v42  ;;  %v7967_v38 = vld [vmem:[#allocation22 + $0xfb0] sm:$0xff]  ;;  %v7968_v41 = vld [vmem:[#allocation22 + $0xfb8] sm:$0xff]  ;;  %v12762_v42 = vcombine.low %v7955_v37, %v7959_v3  ;;  %v12764_v46 = vcombine.low %v7956_v57, %v7960_v12 }
 0xaa2   :  { %v11259_v51 = vcombine.low %v11251_v58, %v11258_v13  ;;  %v12771_v1 = vcombine.high %v7963_v14, %v7967_v38  ;;  %v12773_v47 = vcombine.high %v7964_v40, %v7968_v41  ;;  %v7972_v58 = vld [vmem:[#allocation22 + $0xfd8] sm:$0xff]  ;;  %v12770_v13 = vcombine.low %v7963_v14, %v7967_v38 }
 0xaa3   :  { %11045 = vmatpush1.bf16.msra.mxu0 %v12714_v28  ;;  %v7976_v28 = vld [vmem:[#allocation22 + $0xff8] sm:$0xff] }
 0xaa4   :  { %11279 = vst [vmem:[%s14585_s16] sm:$0xff] %v11259_v51  ;;  %11209 = vmatpush1.bf16.msra.mxu1 %v12716_v55  ;;  %11046 = vmatprep.subr.bf16.mxu0 %v12723_v45  ;;  %v12772_v55 = vcombine.low %v7964_v40, %v7968_v41  ;;  %v12779_v45 = vcombine.high %v7971_v27, %v7975_v50 }
 0xaa5   :  { %11210 = vmatprep.subr.bf16.mxu1 %v12725_v48  ;;  %v12781_v48 = vcombine.high %v7972_v58, %v7976_v28  ;;  %v12780_v5 = vcombine.low %v7972_v58, %v7976_v28 }
 0xaa7   :  { %11047 = vmatpush1.bf16.msra.mxu0 %v12722_v16 }
 0xaa8   :  { %11211 = vmatpush1.bf16.msra.mxu1 %v12724_v60  ;;  %11048 = vmatprep.subr.bf16.mxu0 %v12731_v59 }
 0xaa9   :  { %11212 = vmatprep.subr.bf16.mxu1 %v12733_v23 }
 0xaab   :  { %11049 = vmatpush1.bf16.msra.mxu0 %v12730_v36 }
 0xaac   :  { %11213 = vmatpush1.bf16.msra.mxu1 %v12732_v15  ;;  %11050 = vmatprep.subr.bf16.mxu0 %v12739_v17 }
 0xaad   :  { %11214 = vmatprep.subr.bf16.mxu1 %v12741_v18 }
 0xaaf   :  { %11051 = vmatpush1.bf16.msra.mxu0 %v12738_v6 }
 0xab0   :  { %11215 = vmatpush1.bf16.msra.mxu1 %v12740_v54  ;;  %11052 = vmatprep.subr.bf16.mxu0 %v12747_v8 }
 0xab1   :  { %11216 = vmatprep.subr.bf16.mxu1 %v12749_v61 }
 0xab3   :  { %11053 = vmatpush1.bf16.msra.mxu0 %v12746_v34 }
 0xab4   :  { %11217 = vmatpush1.bf16.msra.mxu1 %v12748_v35  ;;  %11054 = vmatprep.subr.bf16.mxu0 %v12755_v63 }
 0xab5   :  { %11218 = vmatprep.subr.bf16.mxu1 %v12757_v11 }
 0xab7   :  { %11055 = vmatpush1.bf16.msra.mxu0 %v12754_v56 }
 0xab8   :  { %11219 = vmatpush1.bf16.msra.mxu1 %v12756_v22  ;;  %11056 = vmatprep.subr.bf16.mxu0 %v12763_v39 }
 0xab9   :  { %11220 = vmatprep.subr.bf16.mxu1 %v12765_v26 }
 0xabb   :  { %11057 = vmatpush1.bf16.msra.mxu0 %v12762_v42 }
 0xabc   :  { %11221 = vmatpush1.bf16.msra.mxu1 %v12764_v46  ;;  %11058 = vmatprep.subr.bf16.mxu0 %v12771_v1 }
 0xabd   :  { %11222 = vmatprep.subr.bf16.mxu1 %v12773_v47 }
 0xabf   :  { %11059 = vmatpush1.bf16.msra.mxu0 %v12770_v13 }
 0xac0   :  { %11223 = vmatpush1.bf16.msra.mxu1 %v12772_v55  ;;  %11060 = vmatprep.subr.bf16.mxu0 %v12779_v45 }
 0xac1   :  { %11224 = vmatprep.subr.bf16.mxu1 %v12781_v48 }
 0xac3   :  { %11061 = vmatpush1.bf16.msra.mxu0 %v12778_v49 }
 0xac4   :  { %11225 = vmatpush1.bf16.msra.mxu1 %v12780_v5 }
 0xac6   :  { %11063 = vmatmul.mubr.bf16.vlgmr.msra.gmra.mrb[32].mxu0 %v14485_v4 }
 0xac7   :  { %11227 = vmatmul.mubr.bf16.vlgmr.msra.gmra.mrb[32].mxu1 %v14485_v4 }
 0xac8   :  { %13749 = shalt.err (!%p13746_p4)
}
 0xac9   :  { %s13750_s26 = scalar_lea.hbm %s14587_s18, 32 }
 0xaca   :  { %p13751_p5 = scmp.ne.s32.totalorder %s14587_s18, %s13750_s26  ;;  %p13754_p6 = scmp.lt.u32.totalorder %s13750_s26, %s14587_s18 }
 0xacc   :  { %p13756_p7 = pnand %p13754_p6, %p13751_p5 }
 0xace   :  { %13759 = shalt.err (!%p13756_p7)
}
 0xacf   :  { %11302 = dma.vmem_to_hbm [thread:$0]  %s11300_s23, 32, %s14587_s18, [#allocation27]  }
 0xad0   :  { %s13760_s0 = scalar_lea.vmem %s11290_s25, 32  ;;  %p13765_p9 = scmp.lt.s32.totalorder %s11290_s25, %s11290_s25 }
 0xad1   :  { %p13761_p8 = scmp.ne.s32.totalorder %s11290_s25, %s13760_s0  ;;  %p13766_p10 = scmp.lt.s32.totalorder %s13760_s0, %s13760_s0 }
 0xad3   :  { %p13767_p11 = por %p13766_p10, %p13765_p9 }
 0xad5   :  { %p13768_p12 = pnand %p13767_p11, %p13761_p8 }
 0xad7   :  { %13771 = shalt.err (!%p13768_p12)
}
 0xad8   :  { %s13772_s30 = scalar_lea.hbm %s14586_s17, 32 }
 0xad9   :  { %p13773_p13 = scmp.ne.s32.totalorder %s14586_s17, %s13772_s30  ;;  %p13776_p0 = scmp.lt.u32.totalorder %s13772_s30, %s14586_s17 }
 0xadb   :  { %p13778_p1 = pnand %p13776_p0, %p13773_p13 }
 0xadd   :  { %13781 = shalt.err (!%p13778_p1)
}
 0xade   :  { %11292 = dma.vmem_to_hbm [thread:$0]  %s11290_s25, 32, %s14586_s17, [#allocation4]  }
 0xadf   :  { %s13851_s28 = smov [#allocation28]  }
 0xae0   :  { %s11309_s27 = sshll.u32 %s13851_s28, 4  ;;  %s11310_s27 = int_to_ptr.vmem [resolvable:$true] %s11309_s27 }
 0xae1   :  { %s13782_s6 = scalar_lea.vmem %s11310_s27, 32  ;;  %p13787_p3 = scmp.lt.s32.totalorder %s11310_s27, %s11310_s27 }
 0xae2   :  { %p13783_p2 = scmp.ne.s32.totalorder %s11310_s27, %s13782_s6  ;;  %p13788_p4 = scmp.lt.s32.totalorder %s13782_s6, %s13782_s6 }
 0xae4   :  { %p13789_p5 = por %p13788_p4, %p13787_p3 }
 0xae6   :  { %p13790_p6 = pnand %p13789_p5, %p13783_p2 }
 0xae8   :  { %13793 = shalt.err (!%p13790_p6)
}
 0xae9   :  { %s14609_s5 = sld [smem:[#allocation43_spill]] }
 0xaef   :  { %s13794_s23 = scalar_lea.hbm %s14609_s5, 32 }
 0xaf0   :  { %p13795_p7 = scmp.ne.s32.totalorder %s14609_s5, %s13794_s23  ;;  %p13798_p8 = scmp.lt.u32.totalorder %s13794_s23, %s14609_s5 }
 0xaf2   :  { %p13800_p9 = pnand %p13798_p8, %p13795_p7 }
 0xaf4   :  { %13803 = shalt.err (!%p13800_p9)
}
 0xaf5   :  { %11312 = dma.vmem_to_hbm [thread:$0]  %s11310_s27, 32, %s14609_s5, [#allocation27]   ;;  %v7998_v4 = vrot.slane %v14503_v62, %v14262_v0  ;;  %v8006_v51 = vrot.slane %v14503_v62, %v14279_v24  ;;  %v8002_v44 = vrot.slane %v14503_v62, %v14265_v2  ;;  %v8010_v52 = vrot.slane %v14503_v62, %v14268_v25 }
 0xb99   :  { %v11064_v16 = vpop.f32.mrb[32].mxu0 }
 0xb9a   :  { %v12850_v60 = vadd.f32 %v11064_v16, %v7998_v4  ;;  %v11228_v59 = vpop.f32.mrb[32].mxu1  ;;  %v11066_v23 = vpop.f32.mrb[33].mxu0 }
 0xb9b   :  { %v12852_v9 = vadd.f32 %v11228_v59, %v8006_v51  ;;  %v12851_v7 = vadd.f32 %v11066_v23, %v8002_v44  ;;  %v11230_v10 = vpop.f32.mrb[33].mxu1  ;;  %v11068_v33 = vpop.f32.mrb[34].mxu0 }
 0xb9c   :  { %v12853_v36 = vadd.f32 %v11230_v10, %v8010_v52  ;;  %v11232_v15 = vpop.f32.mrb[34].mxu1  ;;  %v11069_v0 = vpop.f32.mrb[35].mxu0 }
 0xb9d   :  { %v11260_v17 = vcombine.low %v12850_v60, %v12851_v7  ;;  %v11233_v18 = vpop.f32.mrb[35].mxu1 }
 0xb9e   :  { %v11261_v24 = vcombine.low %v12852_v9, %v12853_v36 }
 0xb9f   :  { %v11268_v43 = vrot.slane %v11260_v17, %v14133_v53 }
 0xba0   :  { %v11275_v2 = vrot.slane %v11261_v24, %v14133_v53 }
 0xba2   :  { %v11276_v20 = vcombine.low %v11268_v43, %v11275_v2 }
 0xba4   :  { %11280 = vst [vmem:[%s14585_s16 + $0x8] sm:$0xff] %v11276_v20 }
 0xba5   :  { %13820 = dma.done.wait [#allocation4], 32  }
 0xba6   :  { %13821 = vsyncadd [#allocation4], 4294967264 }
 0xba7   :  { %13822 = dma.done.wait [#allocation27], 64  }
 0xba8   :  { %13823 = vsyncadd [#allocation27], 4294967232 }
 0xba9   :  { %11324 = vsyncpa [#allocation3], 1 }
 0xbaa   :  { %11325 = vsyncpa [#allocation6], 1 }
 0xbab   :  { %11326 = vsyncpa [#allocation9], 1 }
 0xbac   :  { %11327 = vsyncpa [#allocation12], 1 }
 0xbad   :  { %11328 = vsyncpa [#allocation15], 1 }
 0xbae   :  { %11329 = vsyncpa [#allocation18], 1 }
 0xbaf   :  { %11330 = vsyncpa [#allocation21], 1 }
 0xbb0   :  { %11331 = vsyncpa [#allocation24], 1 }
 0xbb1   :  { %11332 = vsyncpa [#allocation4], 1 }
 0xbb2   :  { %11333 = vsyncpa [#allocation27], 1 }

</bundles_post_ra>
